<compile_context>
chip_gen: v5e
topology: v5e:2x2
jax: 0.10.0
libtpu: 0.0.40
codegen_flags: <defaults>
</compile_context>

<pallas_src>
import math
import functools

import jax
import jax.numpy as jnp
from jax.experimental import pallas as pl
from jax.experimental.pallas import tpu as pltpu  # noqa: F401  (TPU backend)


# ----------------------------------------------------------------------------
# In-kernel math helpers (only Mosaic-safe primitives: exp, mul, add, div, where)
# ----------------------------------------------------------------------------
_SQRT_HALF = 0.7071067811865476
_LN_EPS = 1e-5


def _erf(x):
    # Abramowitz & Stegun 7.1.26 rational approximation, |abs err| < 1.5e-7.
    a1, a2, a3, a4, a5 = (0.254829592, -0.284496736, 1.421413741,
                          -1.453152027, 1.061405429)
    p = 0.3275911
    ax = jnp.abs(x)
    t = 1.0 / (1.0 + p * ax)
    poly = ((((a5 * t + a4) * t + a3) * t + a2) * t + a1) * t
    y = 1.0 - poly * jnp.exp(-ax * ax)
    return jnp.where(x >= 0.0, y, -y)


def _gelu(x):
    # Exact-erf GELU (matches torch.nn.GELU default up to ~1e-7).
    return 0.5 * x * (1.0 + _erf(x * _SQRT_HALF))


def _sigmoid(x):
    return 1.0 / (1.0 + jnp.exp(-x))


def _mm(x, w):
    """MXU matmul: bf16 operands, f32 accumulation."""
    return jnp.dot(x.astype(jnp.bfloat16), w.astype(jnp.bfloat16),
                   preferred_element_type=jnp.float32)


def _layernorm(x, g, b, eps=_LN_EPS):
    mu = jnp.mean(x, axis=-1, keepdims=True)
    xc = x - mu
    var = jnp.mean(xc * xc, axis=-1, keepdims=True)
    return xc * jax.lax.rsqrt(var + eps) * g + b


# ----------------------------------------------------------------------------
# Pallas kernels (all single-invocation, whole arrays resident in VMEM)
# ----------------------------------------------------------------------------
def _dense_kernel(x_ref, w_ref, b_ref, o_ref, *, act):
    y = _mm(x_ref[...], w_ref[...]) + b_ref[...]
    if act == "gelu":
        y = _gelu(y)
    o_ref[...] = y


def pallas_dense(x, w, b, act="none"):
    """x: (M, K), w: (K, N), b: (N,) -> (M, N) f32 (optional fused GELU)."""
    M, _ = x.shape
    N = w.shape[1]
    return pl.pallas_call(
        functools.partial(_dense_kernel, act=act),
        out_shape=jax.ShapeDtypeStruct((M, N), jnp.float32),
    )(x, w, b.reshape(1, N))


def _attn_kernel(q_ref, k_ref, v_ref, o_ref, *, scale):
    """Batched multi-group attention; q,k,v: (G, Sq/Sk, D). No probs output."""
    s = jnp.einsum("gqd,gkd->gqk",
                   q_ref[...].astype(jnp.bfloat16),
                   k_ref[...].astype(jnp.bfloat16),
                   preferred_element_type=jnp.float32) * scale
    s = s - jnp.max(s, axis=-1, keepdims=True)
    e = jnp.exp(s)
    p = e * pl.reciprocal(jnp.sum(e, axis=-1, keepdims=True), approx=True)
    o_ref[...] = jnp.einsum("gqk,gkd->gqd",
                            p.astype(jnp.bfloat16),
                            v_ref[...].astype(jnp.bfloat16),
                            preferred_element_type=jnp.float32)


def pallas_self_attention(q, k, v):
    G, Sq, D = q.shape
    return pl.pallas_call(
        functools.partial(_attn_kernel, scale=1.0 / math.sqrt(D)),
        out_shape=jax.ShapeDtypeStruct((G, Sq, D), jnp.float32),
    )(q, k, v)


def _sq1_attn_kernel(q_ref, k_ref, v_ref, o_ref, *, scale):
    """Single-query grouped attention (Sq == 1 per group) done with VPU ops."""
    q = q_ref[...]                                         # (G, D)
    k = k_ref[...]                                         # (G, Sk, D)
    v = v_ref[...]                                         # (G, Sk, D)
    s = jnp.sum(q[:, None, :] * k, axis=-1) * scale        # (G, Sk)
    s = s - jnp.max(s, axis=-1, keepdims=True)
    e = jnp.exp(s)
    p = e * pl.reciprocal(jnp.sum(e, axis=-1, keepdims=True), approx=True)
    o_ref[...] = jnp.sum(p[:, :, None] * v, axis=1)        # (G, D)


def _pattern_attn_kernel(q_ref, k_ref, v_ref, o_ref, pw_ref, *, scale):
    """q: (H, N, D); shared K/V per head: (H, M, D). Emits head-averaged weights."""
    s = jnp.einsum("hbd,hmd->hbm",
                   q_ref[...].astype(jnp.bfloat16),
                   k_ref[...].astype(jnp.bfloat16),
                   preferred_element_type=jnp.float32) * scale
    s = s - jnp.max(s, axis=-1, keepdims=True)
    e = jnp.exp(s)
    p = e * pl.reciprocal(jnp.sum(e, axis=-1, keepdims=True), approx=True)
    o_ref[...] = jnp.einsum("hbm,hmd->hbd",
                            p.astype(jnp.bfloat16),
                            v_ref[...].astype(jnp.bfloat16),
                            preferred_element_type=jnp.float32)
    pw_ref[...] = jnp.mean(p, axis=0)                      # average over heads


def _proj_add_ln_kernel(a_ref, w_ref, b_ref, r_ref, g_ref, bb_ref, o_ref, *, eps):
    """out = LayerNorm(residual + a @ w + b)."""
    y = _mm(a_ref[...], w_ref[...]) + b_ref[...] + r_ref[...]
    o_ref[...] = _layernorm(y, g_ref[...], bb_ref[...], eps)


def _ffn_add_ln_kernel(x_ref, w1_ref, b1_ref, w2_ref, b2_ref, g_ref, b_ref,
                       o_ref, *, eps):
    """out = LayerNorm(x + GELU(x @ w1 + b1) @ w2 + b2)."""
    x = x_ref[...]
    h = _gelu(_mm(x, w1_ref[...]) + b1_ref[...])
    y = _mm(h, w2_ref[...]) + b2_ref[...]
    o_ref[...] = _layernorm(x + y, g_ref[...], b_ref[...], eps)


def _final_heads_kernel(c_ref, p_ref, g_ref, b_ref,
                        ew1, eb1, ew2, eb2, ew3, eb3,
                        cw1, cb1, cw2, cb2,
                        logits_ref, conf_ref, *, eps):
    """Fused: final LayerNorm + expert-predictor MLP + confidence-predictor MLP."""
    f = _layernorm(c_ref[...] + p_ref[...], g_ref[...], b_ref[...], eps)
    h = _gelu(_mm(f, ew1[...]) + eb1[...])
    h = _gelu(_mm(h, ew2[...]) + eb2[...])
    logits_ref[...] = _mm(h, ew3[...]) + eb3[...]
    c = _gelu(_mm(f, cw1[...]) + cb1[...])
    conf_ref[...] = _sigmoid(_mm(c, cw2[...]) + cb2[...])


# ----------------------------------------------------------------------------
# Model building blocks (glue in JAX, compute in Pallas)
# ----------------------------------------------------------------------------
def self_encoder_layer(x, p, num_heads):
    """PyTorch nn.TransformerEncoderLayer (post-norm, exact gelu, eval mode)."""
    B, L, E = x.shape
    Dh = E // num_heads
    x2 = x.reshape(B * L, E)

    # Packed QKV projection (one kernel)
    qkv = pallas_dense(x2, p["wqkv"], p["bqkv"])                       # (B*L, 3E)
    qkv = qkv.reshape(B, L, 3, num_heads, Dh).transpose(2, 0, 3, 1, 4)  # (3,B,H,L,Dh)
    q = qkv[0].reshape(B * num_heads, L, Dh)
    k = qkv[1].reshape(B * num_heads, L, Dh)
    v = qkv[2].reshape(B * num_heads, L, Dh)

    # All (batch*head) groups in a single attention kernel, probs discarded
    o = pallas_self_attention(q, k, v)                                  # (B*H,L,Dh)
    o = o.reshape(B, num_heads, L, Dh).transpose(0, 2, 1, 3).reshape(B * L, E)

    # out-proj + residual + LayerNorm1 fused
    x2 = pl.pallas_call(
        functools.partial(_proj_add_ln_kernel, eps=_LN_EPS),
        out_shape=jax.ShapeDtypeStruct((B * L, E), jnp.float32),
    )(o, p["wo"], p["bo"].reshape(1, E), x2,
      p["ln1_g"].reshape(1, E), p["ln1_b"].reshape(1, E))

    # FFN + residual + LayerNorm2 fused
    x2 = pl.pallas_call(
        functools.partial(_ffn_add_ln_kernel, eps=_LN_EPS),
        out_shape=jax.ShapeDtypeStruct((B * L, E), jnp.float32),
    )(x2, p["w1"], p["b1"].reshape(1, -1), p["w2"], p["b2"].reshape(1, E),
      p["ln2_g"].reshape(1, E), p["ln2_b"].reshape(1, E))
    return x2.reshape(B, L, E)


def cross_attention(queries, keys, p, num_heads):
    """nn.MultiheadAttention with a single query per group. queries: (N, E),
    keys=values: (N, Sk, E). Returns (N, E); attention weights are not needed."""
    N, E = queries.shape
    Sk = keys.shape[1]
    Dh = E // num_heads

    q = pallas_dense(queries, p["wq"], p["bq"])                         # (N, E)
    kv = pallas_dense(keys.reshape(N * Sk, E), p["wkv"], p["bkv"])      # (N*Sk, 2E)

    q = q.reshape(N * num_heads, Dh)
    kv = kv.reshape(N, Sk, 2, num_heads, Dh).transpose(2, 0, 3, 1, 4)   # (2,N,H,Sk,Dh)
    k = kv[0].reshape(N * num_heads, Sk, Dh)
    v = kv[1].reshape(N * num_heads, Sk, Dh)

    o = pl.pallas_call(
        functools.partial(_sq1_attn_kernel, scale=1.0 / math.sqrt(Dh)),
        out_shape=jax.ShapeDtypeStruct((N * num_heads, Dh), jnp.float32),
    )(q, k, v)
    o = o.reshape(N, E)
    return pallas_dense(o, p["wo"], p["bo"])


def pattern_attention(queries, pattern_memory, p, num_heads):
    """nn.MultiheadAttention against the 64 shared pattern-memory slots.
    K/V projection of the memory is done ONCE (hoisted out of the per-token path).
    Returns (out (N, E), weights averaged over heads (N, Mslots))."""
    N, E = queries.shape
    M = pattern_memory.shape[0]
    Dh = E // num_heads

    q = pallas_dense(queries, p["wq"], p["bq"]).reshape(N, num_heads, Dh)
    q = q.transpose(1, 0, 2)                                            # (H, N, Dh)

    kv = pallas_dense(pattern_memory, p["wkv"], p["bkv"])               # (M, 2E)
    kv = kv.reshape(M, 2, num_heads, Dh).transpose(1, 2, 0, 3)          # (2,H,M,Dh)
    k, v = kv[0], kv[1]

    o, pw = pl.pallas_call(
        functools.partial(_pattern_attn_kernel, scale=1.0 / math.sqrt(Dh)),
        out_shape=(jax.ShapeDtypeStruct((num_heads, N, Dh), jnp.float32),
                   jax.ShapeDtypeStruct((N, M), jnp.float32)),
    )(q, k, v)
    o = o.transpose(1, 0, 2).reshape(N, E)
    out = pallas_dense(o, p["wo"], p["bo"])
    return out, pw


def forward(params, expert_sequence, layer_ids, attention_mask=None, *, num_heads):
    """Mirrors InterLayerSpeculationModel.forward (eval mode, attention_mask=None)."""
    del layer_ids  # unused in the reference forward as well
    B, S, NL = expert_sequence.shape
    E = params["expert_embedding"].shape[1]

    # Embedding gather + positional encodings (JAX glue)
    emb = jnp.take(params["expert_embedding"], expert_sequence, axis=0)  # (B,S,NL,E)
    emb = emb + params["layer_pos_embedding"][:NL][None, None]
    L = S * NL
    hidden = emb.reshape(B, L, E) + params["token_pos"][:L][None]

    for lp in params["attn_layers"]:
        hidden = self_encoder_layer(hidden, lp, num_heads)

    layer_hidden = hidden.reshape(B, S, NL, E)
    layer_context = layer_hidden.mean(axis=2)                           # (B,S,E)

    cross = cross_attention(layer_context.reshape(B * S, E),
                            layer_hidden.reshape(B * S, NL, E),
                            params["cross_attn"], num_heads)            # (B*S, E)

    pattern_out, pattern_w = pattern_attention(cross, params["pattern_memory"],
                                               params["pattern_attn"], num_heads)

    Mslots = params["pattern_memory"].shape[0]
    num_experts = params["ep_w3"].shape[1]

    # final LayerNorm + expert/confidence heads, one fused kernel, two outputs.
    # (self.dropout is identity in eval mode)
    logits, conf = pl.pallas_call(
        functools.partial(_final_heads_kernel, eps=_LN_EPS),
        out_shape=(jax.ShapeDtypeStruct((B * S, num_experts), jnp.float32),
                   jax.ShapeDtypeStruct((B * S, 1), jnp.float32)),
    )(cross, pattern_out,
      params["final_ln_g"].reshape(1, E), params["final_ln_b"].reshape(1, E),
      params["ep_w1"], params["ep_b1"].reshape(1, -1),
      params["ep_w2"], params["ep_b2"].reshape(1, -1),
      params["ep_w3"], params["ep_b3"].reshape(1, -1),
      params["cp_w1"], params["cp_b1"].reshape(1, -1),
      params["cp_w2"], params["cp_b2"].reshape(1, -1))

    return (logits.reshape(B, S, num_experts),
            conf.reshape(B, S, 1),
            pattern_w.reshape(B, S, Mslots))


# ----------------------------------------------------------------------------
# Deterministic parameter initialization (synthetic; matches module shapes)
# ----------------------------------------------------------------------------
def xavier_uniform(key, shape):
    fan_in, fan_out = shape
    limit = math.sqrt(6.0 / (fan_in + fan_out))
    return jax.random.uniform(key, shape, jnp.float32, -limit, limit)


def init_self_mha(key, E):
    ks = jax.random.split(key, 4)
    z = lambda n: jnp.zeros((n,), jnp.float32)
    wq = xavier_uniform(ks[0], (E, E))
    wk = xavier_uniform(ks[1], (E, E))
    wv = xavier_uniform(ks[2], (E, E))
    return dict(wqkv=jnp.concatenate([wq, wk, wv], axis=1), bqkv=z(3 * E),
                wo=xavier_uniform(ks[3], (E, E)), bo=z(E))


def init_cross_mha(key, E):
    ks = jax.random.split(key, 4)
    z = lambda n: jnp.zeros((n,), jnp.float32)
    return dict(wq=xavier_uniform(ks[0], (E, E)), bq=z(E),
                wkv=jnp.concatenate([xavier_uniform(ks[1], (E, E)),
                                     xavier_uniform(ks[2], (E, E))], axis=1),
                bkv=z(2 * E),
                wo=xavier_uniform(ks[3], (E, E)), bo=z(E))


def init_encoder_layer(key, E, ff):
    ks = jax.random.split(key, 3)
    z = lambda n: jnp.zeros((n,), jnp.float32)
    o = lambda n: jnp.ones((n,), jnp.float32)
    layer = dict(init_self_mha(ks[0], E))
    layer.update(w1=xavier_uniform(ks[1], (E, ff)), b1=z(ff),
                 w2=xavier_uniform(ks[2], (ff, E)), b2=z(E),
                 ln1_g=o(E), ln1_b=z(E), ln2_g=o(E), ln2_b=z(E))
    return layer


def sinusoidal_encoding(max_len, d):
    pos = jnp.arange(max_len, dtype=jnp.float32)[:, None]
    div = jnp.exp(jnp.arange(0, d, 2, dtype=jnp.float32) * (-math.log(10000.0) / d))
    pe = jnp.zeros((max_len, d), jnp.float32)
    pe = pe.at[:, 0::2].set(jnp.sin(pos * div))
    pe = pe.at[:, 1::2].set(jnp.cos(pos * div))
    return pe


def init_params(key, *, num_experts, model_dim, num_layers, num_heads, ff_dim,
                num_attention_layers, pattern_slots, max_positions):
    E = model_dim
    keys = jax.random.split(key, 16)
    z = lambda n: jnp.zeros((n,), jnp.float32)
    o = lambda n: jnp.ones((n,), jnp.float32)
    layer_keys = jax.random.split(keys[2], num_attention_layers)
    return dict(
        expert_embedding=0.02 * jax.random.normal(keys[0], (num_experts, E), jnp.float32),
        layer_pos_embedding=0.02 * jax.random.normal(keys[1], (num_layers, E), jnp.float32),
        token_pos=sinusoidal_encoding(max_positions, E),
        attn_layers=[init_encoder_layer(k, E, ff_dim) for k in layer_keys],
        cross_attn=init_cross_mha(keys[3], E),
        pattern_memory=jax.random.normal(keys[4], (pattern_slots, E), jnp.float32),
        pattern_attn=init_cross_mha(keys[5], E),
        final_ln_g=o(E), final_ln_b=z(E),
        ep_w1=xavier_uniform(keys[6], (E, ff_dim)), ep_b1=z(ff_dim),
        ep_w2=xavier_uniform(keys[7], (ff_dim, ff_dim // 2)), ep_b2=z(ff_dim // 2),
        ep_w3=xavier_uniform(keys[8], (ff_dim // 2, num_experts)), ep_b3=z(num_experts),
        cp_w1=xavier_uniform(keys[9], (E, E // 2)), cp_b1=z(E // 2),
        cp_w2=xavier_uniform(keys[10], (E // 2, 1)), cp_b2=z(1),
    )


# ----------------------------------------------------------------------------
if __name__ == "__main__":
    # Small hyper-parameters consistent with the module
    NUM_EXPERTS = 64
    MODEL_DIM = 128
    NUM_HEADS = 4
    FF_DIM = 256
    NUM_ATTN_LAYERS = 2
    NUM_LAYERS = 4          # size of layer_pos_encoding table
    PATTERN_SLOTS = 64
    MAX_POSITIONS = 64
    B, S, NL = 2, 4, 4      # batch, seq_len, num_input_layers (seq_len*NL = 16 tokens)

    root = jax.random.PRNGKey(0)
    k_params, k_seq, k_lid = jax.random.split(root, 3)

    params = init_params(k_params, num_experts=NUM_EXPERTS, model_dim=MODEL_DIM,
                         num_layers=NUM_LAYERS, num_heads=NUM_HEADS, ff_dim=FF_DIM,
                         num_attention_layers=NUM_ATTN_LAYERS,
                         pattern_slots=PATTERN_SLOTS, max_positions=MAX_POSITIONS)

    expert_sequence = jax.random.randint(k_seq, (B, S, NL), 0, NUM_EXPERTS, dtype=jnp.int32)
    layer_ids = jax.random.randint(k_lid, (B, S), 0, NUM_LAYERS, dtype=jnp.int32)

    fwd = jax.jit(functools.partial(forward, num_heads=NUM_HEADS))
    expert_logits, confidence, pattern_weights = fwd(params, expert_sequence, layer_ids)
    jax.block_until_ready((expert_logits, confidence, pattern_weights))

    assert expert_logits.shape == (B, S, NUM_EXPERTS)
    assert confidence.shape == (B, S, 1)
    assert pattern_weights.shape == (B, S, PATTERN_SLOTS)
    assert bool(jnp.all(jnp.isfinite(expert_logits)))
    assert bool(jnp.all(jnp.isfinite(pattern_weights)))
    assert bool(jnp.all((confidence >= 0.0) & (confidence <= 1.0)))

    print("KERNEL_OK")
</pallas_src>

<mosaic_0001>
module attributes {stable_mosaic.version = 11 : i64} {
  func.func @_dense_kernel(%arg0: memref<32x128xf32, #tpu.memory_space<vmem>>, %arg1: memref<128x384xf32, #tpu.memory_space<vmem>>, %arg2: memref<1x384xf32, #tpu.memory_space<vmem>>, %arg3: memref<32x384xf32, #tpu.memory_space<vmem>>) attributes {dimension_semantics = [], scalar_prefetch = 0 : i64, scratch_operands = 0 : i64, tpu.core_type = #tpu.core_type<tc>} {
    %c0 = arith.constant 0 : index
    %c0_0 = arith.constant 0 : index
    %0 = vector.load %arg0[%c0, %c0_0] : memref<32x128xf32, #tpu.memory_space<vmem>>, vector<32x128xf32>
    %c0_1 = arith.constant 0 : index
    %c0_2 = arith.constant 0 : index
    %1 = vector.load %arg1[%c0_1, %c0_2] : memref<128x384xf32, #tpu.memory_space<vmem>>, vector<128x384xf32>
    %2 = arith.truncf %0 : vector<32x128xf32> to vector<32x128xbf16>
    %3 = arith.truncf %1 : vector<128x384xf32> to vector<128x384xbf16>
    %cst = arith.constant dense<0.000000e+00> : vector<32x384xf32>
    %4 = tpu.matmul %2, %3, %cst {dimension_numbers = #tpu.dot_dimension_numbers<[1], [0], [0], [1], [0, 0, 1, 1], [], []>} : vector<32x128xbf16>, vector<128x384xbf16>, vector<32x384xf32> -> vector<32x384xf32>
    %c0_3 = arith.constant 0 : index
    %c0_4 = arith.constant 0 : index
    %5 = vector.load %arg2[%c0_3, %c0_4] : memref<1x384xf32, #tpu.memory_space<vmem>>, vector<1x384xf32>
    %6 = vector.broadcast %5 : vector<1x384xf32> to vector<32x384xf32>
    %7 = arith.addf %4, %6 : vector<32x384xf32>
    %c0_5 = arith.constant 0 : index
    %c0_6 = arith.constant 0 : index
    %8 = vector.load %arg3[%c0_5, %c0_6] : memref<32x384xf32, #tpu.memory_space<vmem>>, vector<32x384xf32>
    tpu.vector_store %arg3[%c0_5, %c0_6], %7 {strides = array<i32>} : memref<32x384xf32, #tpu.memory_space<vmem>>, vector<32x384xf32>,
    return
  }
}

module attributes {stable_mosaic.version = 11 : i64} {
  func.func @_attn_kernel(%arg0: memref<8x16x32xf32, #tpu.memory_space<vmem>>, %arg1: memref<8x16x32xf32, #tpu.memory_space<vmem>>, %arg2: memref<8x16x32xf32, #tpu.memory_space<vmem>>, %arg3: memref<8x16x32xf32, #tpu.memory_space<vmem>>) attributes {dimension_semantics = [], scalar_prefetch = 0 : i64, scratch_operands = 0 : i64, tpu.core_type = #tpu.core_type<tc>} {
    %c0 = arith.constant 0 : index
    %c0_0 = arith.constant 0 : index
    %c0_1 = arith.constant 0 : index
    %0 = vector.load %arg0[%c0, %c0_0, %c0_1] : memref<8x16x32xf32, #tpu.memory_space<vmem>>, vector<8x16x32xf32>
    %1 = arith.truncf %0 : vector<8x16x32xf32> to vector<8x16x32xbf16>
    %c0_2 = arith.constant 0 : index
    %c0_3 = arith.constant 0 : index
    %c0_4 = arith.constant 0 : index
    %2 = vector.load %arg1[%c0_2, %c0_3, %c0_4] : memref<8x16x32xf32, #tpu.memory_space<vmem>>, vector<8x16x32xf32>
    %3 = arith.truncf %2 : vector<8x16x32xf32> to vector<8x16x32xbf16>
    "tpu.trace_start"() <{level = 10 : i32, message = "gqd,gkd->gqk"}> : () -> ()
    %cst = arith.constant dense<0.000000e+00> : vector<8x16x16xf32>
    %4 = tpu.matmul %1, %3, %cst {dimension_numbers = #tpu.dot_dimension_numbers<[2], [2], [1], [1], [0, 0, 0, 1, 1, 1], [0], [0]>} : vector<8x16x32xbf16>, vector<8x16x32xbf16>, vector<8x16x16xf32> -> vector<8x16x16xf32>
    "tpu.trace_stop"() : () -> ()
    %cst_5 = arith.constant 0.176776692 : f32
    %5 = vector.broadcast %cst_5 : f32 to vector<8x16x16xf32>
    %6 = arith.mulf %4, %5 : vector<8x16x16xf32>
    %cst_6 = arith.constant dense<0xFF800000> : vector<8x16xf32>
    %7 = vector.multi_reduction <maximumf>, %6, %cst_6 [2] : vector<8x16x16xf32> to vector<8x16xf32>
    %8 = vector.shape_cast %7 : vector<8x16xf32> to vector<8x16x1xf32>
    %9 = vector.broadcast %8 : vector<8x16x1xf32> to vector<8x16x16xf32>
    %10 = arith.subf %6, %9 : vector<8x16x16xf32>
    %11 = math.exp %10 : vector<8x16x16xf32>
    %cst_7 = arith.constant dense<0.000000e+00> : vector<8x16xf32>
    %12 = vector.multi_reduction <add>, %11, %cst_7 [2] : vector<8x16x16xf32> to vector<8x16xf32>
    %13 = vector.shape_cast %12 : vector<8x16xf32> to vector<8x16x1xf32>
    %14 = tpu.reciprocal %13 {approx = true} : vector<8x16x1xf32> -> vector<8x16x1xf32>
    %15 = vector.broadcast %14 : vector<8x16x1xf32> to vector<8x16x16xf32>
    %16 = arith.mulf %11, %15 : vector<8x16x16xf32>
    %17 = arith.truncf %16 : vector<8x16x16xf32> to vector<8x16x16xbf16>
    %c0_8 = arith.constant 0 : index
    %c0_9 = arith.constant 0 : index
    %c0_10 = arith.constant 0 : index
    %18 = vector.load %arg2[%c0_8, %c0_9, %c0_10] : memref<8x16x32xf32, #tpu.memory_space<vmem>>, vector<8x16x32xf32>
    %19 = arith.truncf %18 : vector<8x16x32xf32> to vector<8x16x32xbf16>
    "tpu.trace_start"() <{level = 10 : i32, message = "gqk,gkd->gqd"}> : () -> ()
    %cst_11 = arith.constant dense<0.000000e+00> : vector<8x16x32xf32>
    %20 = tpu.matmul %17, %19, %cst_11 {dimension_numbers = #tpu.dot_dimension_numbers<[2], [1], [1], [2], [0, 0, 0, 1, 1, 2], [0], [0]>} : vector<8x16x16xbf16>, vector<8x16x32xbf16>, vector<8x16x32xf32> -> vector<8x16x32xf32>
    "tpu.trace_stop"() : () -> ()
    %c0_12 = arith.constant 0 : index
    %c0_13 = arith.constant 0 : index
    %c0_14 = arith.constant 0 : index
    %21 = vector.load %arg3[%c0_12, %c0_13, %c0_14] : memref<8x16x32xf32, #tpu.memory_space<vmem>>, vector<8x16x32xf32>
    tpu.vector_store %arg3[%c0_12, %c0_13, %c0_14], %20 {strides = array<i32>} : memref<8x16x32xf32, #tpu.memory_space<vmem>>, vector<8x16x32xf32>,
    return
  }
}

module attributes {stable_mosaic.version = 11 : i64} {
  func.func @_proj_add_ln_kernel(%arg0: memref<32x128xf32, #tpu.memory_space<vmem>>, %arg1: memref<128x128xf32, #tpu.memory_space<vmem>>, %arg2: memref<1x128xf32, #tpu.memory_space<vmem>>, %arg3: memref<32x128xf32, #tpu.memory_space<vmem>>, %arg4: memref<1x128xf32, #tpu.memory_space<vmem>>, %arg5: memref<1x128xf32, #tpu.memory_space<vmem>>, %arg6: memref<32x128xf32, #tpu.memory_space<vmem>>) attributes {dimension_semantics = [], scalar_prefetch = 0 : i64, scratch_operands = 0 : i64, tpu.core_type = #tpu.core_type<tc>} {
    %c0 = arith.constant 0 : index
    %c0_0 = arith.constant 0 : index
    %0 = vector.load %arg0[%c0, %c0_0] : memref<32x128xf32, #tpu.memory_space<vmem>>, vector<32x128xf32>
    %c0_1 = arith.constant 0 : index
    %c0_2 = arith.constant 0 : index
    %1 = vector.load %arg1[%c0_1, %c0_2] : memref<128x128xf32, #tpu.memory_space<vmem>>, vector<128x128xf32>
    %2 = arith.truncf %0 : vector<32x128xf32> to vector<32x128xbf16>
    %3 = arith.truncf %1 : vector<128x128xf32> to vector<128x128xbf16>
    %cst = arith.constant dense<0.000000e+00> : vector<32x128xf32>
    %4 = tpu.matmul %2, %3, %cst {dimension_numbers = #tpu.dot_dimension_numbers<[1], [0], [0], [1], [0, 0, 1, 1], [], []>} : vector<32x128xbf16>, vector<128x128xbf16>, vector<32x128xf32> -> vector<32x128xf32>
    %c0_3 = arith.constant 0 : index
    %c0_4 = arith.constant 0 : index
    %5 = vector.load %arg2[%c0_3, %c0_4] : memref<1x128xf32, #tpu.memory_space<vmem>>, vector<1x128xf32>
    %6 = vector.broadcast %5 : vector<1x128xf32> to vector<32x128xf32>
    %7 = arith.addf %4, %6 : vector<32x128xf32>
    %c0_5 = arith.constant 0 : index
    %c0_6 = arith.constant 0 : index
    %8 = vector.load %arg3[%c0_5, %c0_6] : memref<32x128xf32, #tpu.memory_space<vmem>>, vector<32x128xf32>
    %9 = arith.addf %7, %8 : vector<32x128xf32>
    %c0_7 = arith.constant 0 : index
    %c0_8 = arith.constant 0 : index
    %10 = vector.load %arg4[%c0_7, %c0_8] : memref<1x128xf32, #tpu.memory_space<vmem>>, vector<1x128xf32>
    %c0_9 = arith.constant 0 : index
    %c0_10 = arith.constant 0 : index
    %11 = vector.load %arg5[%c0_9, %c0_10] : memref<1x128xf32, #tpu.memory_space<vmem>>, vector<1x128xf32>
    %cst_11 = arith.constant dense<0.000000e+00> : vector<32xf32>
    %12 = vector.multi_reduction <add>, %9, %cst_11 [1] : vector<32x128xf32> to vector<32xf32>
    %13 = vector.shape_cast %12 : vector<32xf32> to vector<32x1xf32>
    %cst_12 = arith.constant 1.280000e+02 : f32
    %14 = vector.broadcast %cst_12 : f32 to vector<32x1xf32>
    %15 = arith.divf %13, %14 : vector<32x1xf32>
    %16 = vector.broadcast %15 : vector<32x1xf32> to vector<32x128xf32>
    %17 = arith.subf %9, %16 : vector<32x128xf32>
    %18 = arith.mulf %17, %17 : vector<32x128xf32>
    %cst_13 = arith.constant dense<0.000000e+00> : vector<32xf32>
    %19 = vector.multi_reduction <add>, %18, %cst_13 [1] : vector<32x128xf32> to vector<32xf32>
    %20 = vector.shape_cast %19 : vector<32xf32> to vector<32x1xf32>
    %cst_14 = arith.constant 1.280000e+02 : f32
    %21 = vector.broadcast %cst_14 : f32 to vector<32x1xf32>
    %22 = arith.divf %20, %21 : vector<32x1xf32>
    %cst_15 = arith.constant 9.99999974E-6 : f32
    %23 = vector.broadcast %cst_15 : f32 to vector<32x1xf32>
    %24 = arith.addf %22, %23 : vector<32x1xf32>
    %25 = math.rsqrt %24 : vector<32x1xf32>
    %26 = vector.broadcast %25 : vector<32x1xf32> to vector<32x128xf32>
    %27 = arith.mulf %17, %26 : vector<32x128xf32>
    %28 = vector.broadcast %10 : vector<1x128xf32> to vector<32x128xf32>
    %29 = arith.mulf %27, %28 : vector<32x128xf32>
    %30 = vector.broadcast %11 : vector<1x128xf32> to vector<32x128xf32>
    %31 = arith.addf %29, %30 : vector<32x128xf32>
    %c0_16 = arith.constant 0 : index
    %c0_17 = arith.constant 0 : index
    %32 = vector.load %arg6[%c0_16, %c0_17] : memref<32x128xf32, #tpu.memory_space<vmem>>, vector<32x128xf32>
    tpu.vector_store %arg6[%c0_16, %c0_17], %31 {strides = array<i32>} : memref<32x128xf32, #tpu.memory_space<vmem>>, vector<32x128xf32>,
    return
  }
}

module attributes {stable_mosaic.version = 11 : i64} {
  func.func @_ffn_add_ln_kernel(%arg0: memref<32x128xf32, #tpu.memory_space<vmem>>, %arg1: memref<128x256xf32, #tpu.memory_space<vmem>>, %arg2: memref<1x256xf32, #tpu.memory_space<vmem>>, %arg3: memref<256x128xf32, #tpu.memory_space<vmem>>, %arg4: memref<1x128xf32, #tpu.memory_space<vmem>>, %arg5: memref<1x128xf32, #tpu.memory_space<vmem>>, %arg6: memref<1x128xf32, #tpu.memory_space<vmem>>, %arg7: memref<32x128xf32, #tpu.memory_space<vmem>>) attributes {dimension_semantics = [], scalar_prefetch = 0 : i64, scratch_operands = 0 : i64, tpu.core_type = #tpu.core_type<tc>} {
    %c0 = arith.constant 0 : index
    %c0_0 = arith.constant 0 : index
    %0 = vector.load %arg0[%c0, %c0_0] : memref<32x128xf32, #tpu.memory_space<vmem>>, vector<32x128xf32>
    %c0_1 = arith.constant 0 : index
    %c0_2 = arith.constant 0 : index
    %1 = vector.load %arg1[%c0_1, %c0_2] : memref<128x256xf32, #tpu.memory_space<vmem>>, vector<128x256xf32>
    %2 = arith.truncf %0 : vector<32x128xf32> to vector<32x128xbf16>
    %3 = arith.truncf %1 : vector<128x256xf32> to vector<128x256xbf16>
    %cst = arith.constant dense<0.000000e+00> : vector<32x256xf32>
    %4 = tpu.matmul %2, %3, %cst {dimension_numbers = #tpu.dot_dimension_numbers<[1], [0], [0], [1], [0, 0, 1, 1], [], []>} : vector<32x128xbf16>, vector<128x256xbf16>, vector<32x256xf32> -> vector<32x256xf32>
    %c0_3 = arith.constant 0 : index
    %c0_4 = arith.constant 0 : index
    %5 = vector.load %arg2[%c0_3, %c0_4] : memref<1x256xf32, #tpu.memory_space<vmem>>, vector<1x256xf32>
    %6 = vector.broadcast %5 : vector<1x256xf32> to vector<32x256xf32>
    %7 = arith.addf %4, %6 : vector<32x256xf32>
    %cst_5 = arith.constant 5.000000e-01 : f32
    %8 = vector.broadcast %cst_5 : f32 to vector<32x256xf32>
    %9 = arith.mulf %8, %7 : vector<32x256xf32>
    %cst_6 = arith.constant 0.707106769 : f32
    %10 = vector.broadcast %cst_6 : f32 to vector<32x256xf32>
    %11 = arith.mulf %7, %10 : vector<32x256xf32>
    %12 = math.absf %11 : vector<32x256xf32>
    %cst_7 = arith.constant 0.327591091 : f32
    %13 = vector.broadcast %cst_7 : f32 to vector<32x256xf32>
    %14 = arith.mulf %13, %12 : vector<32x256xf32>
    %cst_8 = arith.constant 1.000000e+00 : f32
    %15 = vector.broadcast %cst_8 : f32 to vector<32x256xf32>
    %16 = arith.addf %15, %14 : vector<32x256xf32>
    %cst_9 = arith.constant 1.000000e+00 : f32
    %17 = vector.broadcast %cst_9 : f32 to vector<32x256xf32>
    %18 = arith.divf %17, %16 : vector<32x256xf32>
    %cst_10 = arith.constant 1.06140542 : f32
    %19 = vector.broadcast %cst_10 : f32 to vector<32x256xf32>
    %20 = arith.mulf %19, %18 : vector<32x256xf32>
    %cst_11 = arith.constant -1.45315206 : f32
    %21 = vector.broadcast %cst_11 : f32 to vector<32x256xf32>
    %22 = arith.addf %20, %21 : vector<32x256xf32>
    %23 = arith.mulf %22, %18 : vector<32x256xf32>
    %cst_12 = arith.constant 1.42141378 : f32
    %24 = vector.broadcast %cst_12 : f32 to vector<32x256xf32>
    %25 = arith.addf %23, %24 : vector<32x256xf32>
    %26 = arith.mulf %25, %18 : vector<32x256xf32>
    %cst_13 = arith.constant -0.284496725 : f32
    %27 = vector.broadcast %cst_13 : f32 to vector<32x256xf32>
    %28 = arith.addf %26, %27 : vector<32x256xf32>
    %29 = arith.mulf %28, %18 : vector<32x256xf32>
    %cst_14 = arith.constant 0.254829586 : f32
    %30 = vector.broadcast %cst_14 : f32 to vector<32x256xf32>
    %31 = arith.addf %29, %30 : vector<32x256xf32>
    %32 = arith.mulf %31, %18 : vector<32x256xf32>
    %cst_15 = arith.constant 0.000000e+00 : f32
    %33 = vector.broadcast %cst_15 : f32 to vector<32x256xf32>
    %34 = arith.subf %33, %12 : vector<32x256xf32>
    %35 = arith.mulf %34, %12 : vector<32x256xf32>
    %36 = math.exp %35 : vector<32x256xf32>
    %37 = arith.mulf %32, %36 : vector<32x256xf32>
    %cst_16 = arith.constant 1.000000e+00 : f32
    %38 = vector.broadcast %cst_16 : f32 to vector<32x256xf32>
    %39 = arith.subf %38, %37 : vector<32x256xf32>
    %cst_17 = arith.constant 0.000000e+00 : f32
    %40 = vector.broadcast %cst_17 : f32 to vector<32x256xf32>
    %41 = arith.cmpf oge, %11, %40 : vector<32x256xf32>
    %cst_18 = arith.constant 0.000000e+00 : f32
    %42 = vector.broadcast %cst_18 : f32 to vector<32x256xf32>
    %43 = arith.subf %42, %39 : vector<32x256xf32>
    %44 = arith.select %41, %39, %43 : vector<32x256xi1>, vector<32x256xf32>
    %cst_19 = arith.constant 1.000000e+00 : f32
    %45 = vector.broadcast %cst_19 : f32 to vector<32x256xf32>
    %46 = arith.addf %45, %44 : vector<32x256xf32>
    %47 = arith.mulf %9, %46 : vector<32x256xf32>
    %c0_20 = arith.constant 0 : index
    %c0_21 = arith.constant 0 : index
    %48 = vector.load %arg3[%c0_20, %c0_21] : memref<256x128xf32, #tpu.memory_space<vmem>>, vector<256x128xf32>
    %49 = arith.truncf %47 : vector<32x256xf32> to vector<32x256xbf16>
    %50 = arith.truncf %48 : vector<256x128xf32> to vector<256x128xbf16>
    %cst_22 = arith.constant dense<0.000000e+00> : vector<32x128xf32>
    %51 = tpu.matmul %49, %50, %cst_22 {dimension_numbers = #tpu.dot_dimension_numbers<[1], [0], [0], [1], [0, 0, 1, 1], [], []>} : vector<32x256xbf16>, vector<256x128xbf16>, vector<32x128xf32> -> vector<32x128xf32>
    %c0_23 = arith.constant 0 : index
    %c0_24 = arith.constant 0 : index
    %52 = vector.load %arg4[%c0_23, %c0_24] : memref<1x128xf32, #tpu.memory_space<vmem>>, vector<1x128xf32>
    %53 = vector.broadcast %52 : vector<1x128xf32> to vector<32x128xf32>
    %54 = arith.addf %51, %53 : vector<32x128xf32>
    %55 = arith.addf %0, %54 : vector<32x128xf32>
    %c0_25 = arith.constant 0 : index
    %c0_26 = arith.constant 0 : index
    %56 = vector.load %arg5[%c0_25, %c0_26] : memref<1x128xf32, #tpu.memory_space<vmem>>, vector<1x128xf32>
    %c0_27 = arith.constant 0 : index
    %c0_28 = arith.constant 0 : index
    %57 = vector.load %arg6[%c0_27, %c0_28] : memref<1x128xf32, #tpu.memory_space<vmem>>, vector<1x128xf32>
    %cst_29 = arith.constant dense<0.000000e+00> : vector<32xf32>
    %58 = vector.multi_reduction <add>, %55, %cst_29 [1] : vector<32x128xf32> to vector<32xf32>
    %59 = vector.shape_cast %58 : vector<32xf32> to vector<32x1xf32>
    %cst_30 = arith.constant 1.280000e+02 : f32
    %60 = vector.broadcast %cst_30 : f32 to vector<32x1xf32>
    %61 = arith.divf %59, %60 : vector<32x1xf32>
    %62 = vector.broadcast %61 : vector<32x1xf32> to vector<32x128xf32>
    %63 = arith.subf %55, %62 : vector<32x128xf32>
    %64 = arith.mulf %63, %63 : vector<32x128xf32>
    %cst_31 = arith.constant dense<0.000000e+00> : vector<32xf32>
    %65 = vector.multi_reduction <add>, %64, %cst_31 [1] : vector<32x128xf32> to vector<32xf32>
    %66 = vector.shape_cast %65 : vector<32xf32> to vector<32x1xf32>
    %cst_32 = arith.constant 1.280000e+02 : f32
    %67 = vector.broadcast %cst_32 : f32 to vector<32x1xf32>
    %68 = arith.divf %66, %67 : vector<32x1xf32>
    %cst_33 = arith.constant 9.99999974E-6 : f32
    %69 = vector.broadcast %cst_33 : f32 to vector<32x1xf32>
    %70 = arith.addf %68, %69 : vector<32x1xf32>
    %71 = math.rsqrt %70 : vector<32x1xf32>
    %72 = vector.broadcast %71 : vector<32x1xf32> to vector<32x128xf32>
    %73 = arith.mulf %63, %72 : vector<32x128xf32>
    %74 = vector.broadcast %56 : vector<1x128xf32> to vector<32x128xf32>
    %75 = arith.mulf %73, %74 : vector<32x128xf32>
    %76 = vector.broadcast %57 : vector<1x128xf32> to vector<32x128xf32>
    %77 = arith.addf %75, %76 : vector<32x128xf32>
    %c0_34 = arith.constant 0 : index
    %c0_35 = arith.constant 0 : index
    %78 = vector.load %arg7[%c0_34, %c0_35] : memref<32x128xf32, #tpu.memory_space<vmem>>, vector<32x128xf32>
    tpu.vector_store %arg7[%c0_34, %c0_35], %77 {strides = array<i32>} : memref<32x128xf32, #tpu.memory_space<vmem>>, vector<32x128xf32>,
    return
  }
}

module attributes {stable_mosaic.version = 11 : i64} {
  func.func @_dense_kernel(%arg0: memref<32x128xf32, #tpu.memory_space<vmem>>, %arg1: memref<128x384xf32, #tpu.memory_space<vmem>>, %arg2: memref<1x384xf32, #tpu.memory_space<vmem>>, %arg3: memref<32x384xf32, #tpu.memory_space<vmem>>) attributes {dimension_semantics = [], scalar_prefetch = 0 : i64, scratch_operands = 0 : i64, tpu.core_type = #tpu.core_type<tc>} {
    %c0 = arith.constant 0 : index
    %c0_0 = arith.constant 0 : index
    %0 = vector.load %arg0[%c0, %c0_0] : memref<32x128xf32, #tpu.memory_space<vmem>>, vector<32x128xf32>
    %c0_1 = arith.constant 0 : index
    %c0_2 = arith.constant 0 : index
    %1 = vector.load %arg1[%c0_1, %c0_2] : memref<128x384xf32, #tpu.memory_space<vmem>>, vector<128x384xf32>
    %2 = arith.truncf %0 : vector<32x128xf32> to vector<32x128xbf16>
    %3 = arith.truncf %1 : vector<128x384xf32> to vector<128x384xbf16>
    %cst = arith.constant dense<0.000000e+00> : vector<32x384xf32>
    %4 = tpu.matmul %2, %3, %cst {dimension_numbers = #tpu.dot_dimension_numbers<[1], [0], [0], [1], [0, 0, 1, 1], [], []>} : vector<32x128xbf16>, vector<128x384xbf16>, vector<32x384xf32> -> vector<32x384xf32>
    %c0_3 = arith.constant 0 : index
    %c0_4 = arith.constant 0 : index
    %5 = vector.load %arg2[%c0_3, %c0_4] : memref<1x384xf32, #tpu.memory_space<vmem>>, vector<1x384xf32>
    %6 = vector.broadcast %5 : vector<1x384xf32> to vector<32x384xf32>
    %7 = arith.addf %4, %6 : vector<32x384xf32>
    %c0_5 = arith.constant 0 : index
    %c0_6 = arith.constant 0 : index
    %8 = vector.load %arg3[%c0_5, %c0_6] : memref<32x384xf32, #tpu.memory_space<vmem>>, vector<32x384xf32>
    tpu.vector_store %arg3[%c0_5, %c0_6], %7 {strides = array<i32>} : memref<32x384xf32, #tpu.memory_space<vmem>>, vector<32x384xf32>,
    return
  }
}

module attributes {stable_mosaic.version = 11 : i64} {
  func.func @_dense_kernel(%arg0: memref<32x128xf32, #tpu.memory_space<vmem>>, %arg1: memref<128x256xf32, #tpu.memory_space<vmem>>, %arg2: memref<1x256xf32, #tpu.memory_space<vmem>>, %arg3: memref<32x256xf32, #tpu.memory_space<vmem>>) attributes {dimension_semantics = [], scalar_prefetch = 0 : i64, scratch_operands = 0 : i64, tpu.core_type = #tpu.core_type<tc>} {
    %c0 = arith.constant 0 : index
    %c0_0 = arith.constant 0 : index
    %0 = vector.load %arg0[%c0, %c0_0] : memref<32x128xf32, #tpu.memory_space<vmem>>, vector<32x128xf32>
    %c0_1 = arith.constant 0 : index
    %c0_2 = arith.constant 0 : index
    %1 = vector.load %arg1[%c0_1, %c0_2] : memref<128x256xf32, #tpu.memory_space<vmem>>, vector<128x256xf32>
    %2 = arith.truncf %0 : vector<32x128xf32> to vector<32x128xbf16>
    %3 = arith.truncf %1 : vector<128x256xf32> to vector<128x256xbf16>
    %cst = arith.constant dense<0.000000e+00> : vector<32x256xf32>
    %4 = tpu.matmul %2, %3, %cst {dimension_numbers = #tpu.dot_dimension_numbers<[1], [0], [0], [1], [0, 0, 1, 1], [], []>} : vector<32x128xbf16>, vector<128x256xbf16>, vector<32x256xf32> -> vector<32x256xf32>
    %c0_3 = arith.constant 0 : index
    %c0_4 = arith.constant 0 : index
    %5 = vector.load %arg2[%c0_3, %c0_4] : memref<1x256xf32, #tpu.memory_space<vmem>>, vector<1x256xf32>
    %6 = vector.broadcast %5 : vector<1x256xf32> to vector<32x256xf32>
    %7 = arith.addf %4, %6 : vector<32x256xf32>
    %c0_5 = arith.constant 0 : index
    %c0_6 = arith.constant 0 : index
    %8 = vector.load %arg3[%c0_5, %c0_6] : memref<32x256xf32, #tpu.memory_space<vmem>>, vector<32x256xf32>
    tpu.vector_store %arg3[%c0_5, %c0_6], %7 {strides = array<i32>} : memref<32x256xf32, #tpu.memory_space<vmem>>, vector<32x256xf32>,
    return
  }
}

module attributes {stable_mosaic.version = 11 : i64} {
  func.func @_dense_kernel(%arg0: memref<8x128xf32, #tpu.memory_space<vmem>>, %arg1: memref<128x128xf32, #tpu.memory_space<vmem>>, %arg2: memref<1x128xf32, #tpu.memory_space<vmem>>, %arg3: memref<8x128xf32, #tpu.memory_space<vmem>>) attributes {dimension_semantics = [], scalar_prefetch = 0 : i64, scratch_operands = 0 : i64, tpu.core_type = #tpu.core_type<tc>} {
    %c0 = arith.constant 0 : index
    %c0_0 = arith.constant 0 : index
    %0 = vector.load %arg0[%c0, %c0_0] : memref<8x128xf32, #tpu.memory_space<vmem>>, vector<8x128xf32>
    %c0_1 = arith.constant 0 : index
    %c0_2 = arith.constant 0 : index
    %1 = vector.load %arg1[%c0_1, %c0_2] : memref<128x128xf32, #tpu.memory_space<vmem>>, vector<128x128xf32>
    %2 = arith.truncf %0 : vector<8x128xf32> to vector<8x128xbf16>
    %3 = arith.truncf %1 : vector<128x128xf32> to vector<128x128xbf16>
    %cst = arith.constant dense<0.000000e+00> : vector<8x128xf32>
    %4 = tpu.matmul %2, %3, %cst {dimension_numbers = #tpu.dot_dimension_numbers<[1], [0], [0], [1], [0, 0, 1, 1], [], []>} : vector<8x128xbf16>, vector<128x128xbf16>, vector<8x128xf32> -> vector<8x128xf32>
    %c0_3 = arith.constant 0 : index
    %c0_4 = arith.constant 0 : index
    %5 = vector.load %arg2[%c0_3, %c0_4] : memref<1x128xf32, #tpu.memory_space<vmem>>, vector<1x128xf32>
    %6 = vector.broadcast %5 : vector<1x128xf32> to vector<8x128xf32>
    %7 = arith.addf %4, %6 : vector<8x128xf32>
    %c0_5 = arith.constant 0 : index
    %c0_6 = arith.constant 0 : index
    %8 = vector.load %arg3[%c0_5, %c0_6] : memref<8x128xf32, #tpu.memory_space<vmem>>, vector<8x128xf32>
    tpu.vector_store %arg3[%c0_5, %c0_6], %7 {strides = array<i32>} : memref<8x128xf32, #tpu.memory_space<vmem>>, vector<8x128xf32>,
    return
  }
}

module attributes {stable_mosaic.version = 11 : i64} {
  func.func @_sq1_attn_kernel(%arg0: memref<32x32xf32, #tpu.memory_space<vmem>>, %arg1: memref<32x4x32xf32, #tpu.memory_space<vmem>>, %arg2: memref<32x4x32xf32, #tpu.memory_space<vmem>>, %arg3: memref<32x32xf32, #tpu.memory_space<vmem>>) attributes {dimension_semantics = [], scalar_prefetch = 0 : i64, scratch_operands = 0 : i64, tpu.core_type = #tpu.core_type<tc>} {
    %c0 = arith.constant 0 : index
    %c0_0 = arith.constant 0 : index
    %0 = vector.load %arg0[%c0, %c0_0] : memref<32x32xf32, #tpu.memory_space<vmem>>, vector<32x32xf32>
    %c0_1 = arith.constant 0 : index
    %c0_2 = arith.constant 0 : index
    %c0_3 = arith.constant 0 : index
    %1 = vector.load %arg1[%c0_1, %c0_2, %c0_3] : memref<32x4x32xf32, #tpu.memory_space<vmem>>, vector<32x4x32xf32>
    %c0_4 = arith.constant 0 : index
    %c0_5 = arith.constant 0 : index
    %c0_6 = arith.constant 0 : index
    %2 = vector.load %arg2[%c0_4, %c0_5, %c0_6] : memref<32x4x32xf32, #tpu.memory_space<vmem>>, vector<32x4x32xf32>
    %3 = vector.shape_cast %0 : vector<32x32xf32> to vector<32x1x32xf32>
    %4 = vector.broadcast %3 : vector<32x1x32xf32> to vector<32x4x32xf32>
    %5 = arith.mulf %4, %1 : vector<32x4x32xf32>
    %cst = arith.constant dense<0.000000e+00> : vector<32x4xf32>
    %6 = vector.multi_reduction <add>, %5, %cst [2] : vector<32x4x32xf32> to vector<32x4xf32>
    %cst_7 = arith.constant 0.176776692 : f32
    %7 = vector.broadcast %cst_7 : f32 to vector<32x4xf32>
    %8 = arith.mulf %6, %7 : vector<32x4xf32>
    %cst_8 = arith.constant dense<0xFF800000> : vector<32xf32>
    %9 = vector.multi_reduction <maximumf>, %8, %cst_8 [1] : vector<32x4xf32> to vector<32xf32>
    %10 = vector.shape_cast %9 : vector<32xf32> to vector<32x1xf32>
    %11 = vector.broadcast %10 : vector<32x1xf32> to vector<32x4xf32>
    %12 = arith.subf %8, %11 : vector<32x4xf32>
    %13 = math.exp %12 : vector<32x4xf32>
    %cst_9 = arith.constant dense<0.000000e+00> : vector<32xf32>
    %14 = vector.multi_reduction <add>, %13, %cst_9 [1] : vector<32x4xf32> to vector<32xf32>
    %15 = vector.shape_cast %14 : vector<32xf32> to vector<32x1xf32>
    %16 = tpu.reciprocal %15 {approx = true} : vector<32x1xf32> -> vector<32x1xf32>
    %17 = vector.broadcast %16 : vector<32x1xf32> to vector<32x4xf32>
    %18 = arith.mulf %13, %17 : vector<32x4xf32>
    %19 = vector.shape_cast %18 : vector<32x4xf32> to vector<32x4x1xf32>
    %20 = vector.broadcast %19 : vector<32x4x1xf32> to vector<32x4x32xf32>
    %21 = arith.mulf %20, %2 : vector<32x4x32xf32>
    %cst_10 = arith.constant dense<0.000000e+00> : vector<32x32xf32>
    %22 = vector.multi_reduction <add>, %21, %cst_10 [1] : vector<32x4x32xf32> to vector<32x32xf32>
    %c0_11 = arith.constant 0 : index
    %c0_12 = arith.constant 0 : index
    %23 = vector.load %arg3[%c0_11, %c0_12] : memref<32x32xf32, #tpu.memory_space<vmem>>, vector<32x32xf32>
    tpu.vector_store %arg3[%c0_11, %c0_12], %22 {strides = array<i32>} : memref<32x32xf32, #tpu.memory_space<vmem>>, vector<32x32xf32>,
    return
  }
}

module attributes {stable_mosaic.version = 11 : i64} {
  func.func @_dense_kernel(%arg0: memref<64x128xf32, #tpu.memory_space<vmem>>, %arg1: memref<128x256xf32, #tpu.memory_space<vmem>>, %arg2: memref<1x256xf32, #tpu.memory_space<vmem>>, %arg3: memref<64x256xf32, #tpu.memory_space<vmem>>) attributes {dimension_semantics = [], scalar_prefetch = 0 : i64, scratch_operands = 0 : i64, tpu.core_type = #tpu.core_type<tc>} {
    %c0 = arith.constant 0 : index
    %c0_0 = arith.constant 0 : index
    %0 = vector.load %arg0[%c0, %c0_0] : memref<64x128xf32, #tpu.memory_space<vmem>>, vector<64x128xf32>
    %c0_1 = arith.constant 0 : index
    %c0_2 = arith.constant 0 : index
    %1 = vector.load %arg1[%c0_1, %c0_2] : memref<128x256xf32, #tpu.memory_space<vmem>>, vector<128x256xf32>
    %2 = arith.truncf %0 : vector<64x128xf32> to vector<64x128xbf16>
    %3 = arith.truncf %1 : vector<128x256xf32> to vector<128x256xbf16>
    %cst = arith.constant dense<0.000000e+00> : vector<64x256xf32>
    %4 = tpu.matmul %2, %3, %cst {dimension_numbers = #tpu.dot_dimension_numbers<[1], [0], [0], [1], [0, 0, 1, 1], [], []>} : vector<64x128xbf16>, vector<128x256xbf16>, vector<64x256xf32> -> vector<64x256xf32>
    %c0_3 = arith.constant 0 : index
    %c0_4 = arith.constant 0 : index
    %5 = vector.load %arg2[%c0_3, %c0_4] : memref<1x256xf32, #tpu.memory_space<vmem>>, vector<1x256xf32>
    %6 = vector.broadcast %5 : vector<1x256xf32> to vector<64x256xf32>
    %7 = arith.addf %4, %6 : vector<64x256xf32>
    %c0_5 = arith.constant 0 : index
    %c0_6 = arith.constant 0 : index
    %8 = vector.load %arg3[%c0_5, %c0_6] : memref<64x256xf32, #tpu.memory_space<vmem>>, vector<64x256xf32>
    tpu.vector_store %arg3[%c0_5, %c0_6], %7 {strides = array<i32>} : memref<64x256xf32, #tpu.memory_space<vmem>>, vector<64x256xf32>,
    return
  }
}

module attributes {stable_mosaic.version = 11 : i64} {
  func.func @_pattern_attn_kernel(%arg0: memref<4x8x32xf32, #tpu.memory_space<vmem>>, %arg1: memref<4x64x32xf32, #tpu.memory_space<vmem>>, %arg2: memref<4x64x32xf32, #tpu.memory_space<vmem>>, %arg3: memref<4x8x32xf32, #tpu.memory_space<vmem>>, %arg4: memref<8x64xf32, #tpu.memory_space<vmem>>) attributes {dimension_semantics = [], scalar_prefetch = 0 : i64, scratch_operands = 0 : i64, tpu.core_type = #tpu.core_type<tc>} {
    %c0 = arith.constant 0 : index
    %c0_0 = arith.constant 0 : index
    %c0_1 = arith.constant 0 : index
    %0 = vector.load %arg0[%c0, %c0_0, %c0_1] : memref<4x8x32xf32, #tpu.memory_space<vmem>>, vector<4x8x32xf32>
    %1 = arith.truncf %0 : vector<4x8x32xf32> to vector<4x8x32xbf16>
    %c0_2 = arith.constant 0 : index
    %c0_3 = arith.constant 0 : index
    %c0_4 = arith.constant 0 : index
    %2 = vector.load %arg1[%c0_2, %c0_3, %c0_4] : memref<4x64x32xf32, #tpu.memory_space<vmem>>, vector<4x64x32xf32>
    %3 = arith.truncf %2 : vector<4x64x32xf32> to vector<4x64x32xbf16>
    "tpu.trace_start"() <{level = 10 : i32, message = "hbd,hmd->hbm"}> : () -> ()
    %cst = arith.constant dense<0.000000e+00> : vector<4x8x64xf32>
    %4 = tpu.matmul %1, %3, %cst {dimension_numbers = #tpu.dot_dimension_numbers<[2], [2], [1], [1], [0, 0, 0, 1, 1, 1], [0], [0]>} : vector<4x8x32xbf16>, vector<4x64x32xbf16>, vector<4x8x64xf32> -> vector<4x8x64xf32>
    "tpu.trace_stop"() : () -> ()
    %cst_5 = arith.constant 0.176776692 : f32
    %5 = vector.broadcast %cst_5 : f32 to vector<4x8x64xf32>
    %6 = arith.mulf %4, %5 : vector<4x8x64xf32>
    %cst_6 = arith.constant dense<0xFF800000> : vector<4x8xf32>
    %7 = vector.multi_reduction <maximumf>, %6, %cst_6 [2] : vector<4x8x64xf32> to vector<4x8xf32>
    %8 = vector.shape_cast %7 : vector<4x8xf32> to vector<4x8x1xf32>
    %9 = vector.broadcast %8 : vector<4x8x1xf32> to vector<4x8x64xf32>
    %10 = arith.subf %6, %9 : vector<4x8x64xf32>
    %11 = math.exp %10 : vector<4x8x64xf32>
    %cst_7 = arith.constant dense<0.000000e+00> : vector<4x8xf32>
    %12 = vector.multi_reduction <add>, %11, %cst_7 [2] : vector<4x8x64xf32> to vector<4x8xf32>
    %13 = vector.shape_cast %12 : vector<4x8xf32> to vector<4x8x1xf32>
    %14 = tpu.reciprocal %13 {approx = true} : vector<4x8x1xf32> -> vector<4x8x1xf32>
    %15 = vector.broadcast %14 : vector<4x8x1xf32> to vector<4x8x64xf32>
    %16 = arith.mulf %11, %15 : vector<4x8x64xf32>
    %17 = arith.truncf %16 : vector<4x8x64xf32> to vector<4x8x64xbf16>
    %c0_8 = arith.constant 0 : index
    %c0_9 = arith.constant 0 : index
    %c0_10 = arith.constant 0 : index
    %18 = vector.load %arg2[%c0_8, %c0_9, %c0_10] : memref<4x64x32xf32, #tpu.memory_space<vmem>>, vector<4x64x32xf32>
    %19 = arith.truncf %18 : vector<4x64x32xf32> to vector<4x64x32xbf16>
    "tpu.trace_start"() <{level = 10 : i32, message = "hbm,hmd->hbd"}> : () -> ()
    %cst_11 = arith.constant dense<0.000000e+00> : vector<4x8x32xf32>
    %20 = tpu.matmul %17, %19, %cst_11 {dimension_numbers = #tpu.dot_dimension_numbers<[2], [1], [1], [2], [0, 0, 0, 1, 1, 2], [0], [0]>} : vector<4x8x64xbf16>, vector<4x64x32xbf16>, vector<4x8x32xf32> -> vector<4x8x32xf32>
    "tpu.trace_stop"() : () -> ()
    %c0_12 = arith.constant 0 : index
    %c0_13 = arith.constant 0 : index
    %c0_14 = arith.constant 0 : index
    %21 = vector.load %arg3[%c0_12, %c0_13, %c0_14] : memref<4x8x32xf32, #tpu.memory_space<vmem>>, vector<4x8x32xf32>
    tpu.vector_store %arg3[%c0_12, %c0_13, %c0_14], %20 {strides = array<i32>} : memref<4x8x32xf32, #tpu.memory_space<vmem>>, vector<4x8x32xf32>,
    %cst_15 = arith.constant dense<0.000000e+00> : vector<8x64xf32>
    %22 = vector.multi_reduction <add>, %16, %cst_15 [0] : vector<4x8x64xf32> to vector<8x64xf32>
    %cst_16 = arith.constant 4.000000e+00 : f32
    %23 = vector.broadcast %cst_16 : f32 to vector<8x64xf32>
    %24 = arith.divf %22, %23 : vector<8x64xf32>
    %c0_17 = arith.constant 0 : index
    %c0_18 = arith.constant 0 : index
    %25 = vector.load %arg4[%c0_17, %c0_18] : memref<8x64xf32, #tpu.memory_space<vmem>>, vector<8x64xf32>
    tpu.vector_store %arg4[%c0_17, %c0_18], %24 {strides = array<i32>} : memref<8x64xf32, #tpu.memory_space<vmem>>, vector<8x64xf32>,
    return
  }
}

module attributes {stable_mosaic.version = 11 : i64} {
  func.func @_final_heads_kernel(%arg0: memref<8x128xf32, #tpu.memory_space<vmem>>, %arg1: memref<8x128xf32, #tpu.memory_space<vmem>>, %arg2: memref<1x128xf32, #tpu.memory_space<vmem>>, %arg3: memref<1x128xf32, #tpu.memory_space<vmem>>, %arg4: memref<128x256xf32, #tpu.memory_space<vmem>>, %arg5: memref<1x256xf32, #tpu.memory_space<vmem>>, %arg6: memref<256x128xf32, #tpu.memory_space<vmem>>, %arg7: memref<1x128xf32, #tpu.memory_space<vmem>>, %arg8: memref<128x64xf32, #tpu.memory_space<vmem>>, %arg9: memref<1x64xf32, #tpu.memory_space<vmem>>, %arg10: memref<128x64xf32, #tpu.memory_space<vmem>>, %arg11: memref<1x64xf32, #tpu.memory_space<vmem>>, %arg12: memref<64x1xf32, #tpu.memory_space<vmem>>, %arg13: memref<1x1xf32, #tpu.memory_space<vmem>>, %arg14: memref<8x64xf32, #tpu.memory_space<vmem>>, %arg15: memref<8x1xf32, #tpu.memory_space<vmem>>) attributes {dimension_semantics = [], scalar_prefetch = 0 : i64, scratch_operands = 0 : i64, tpu.core_type = #tpu.core_type<tc>} {
    %c0 = arith.constant 0 : index
    %c0_0 = arith.constant 0 : index
    %0 = vector.load %arg0[%c0, %c0_0] : memref<8x128xf32, #tpu.memory_space<vmem>>, vector<8x128xf32>
    %c0_1 = arith.constant 0 : index
    %c0_2 = arith.constant 0 : index
    %1 = vector.load %arg1[%c0_1, %c0_2] : memref<8x128xf32, #tpu.memory_space<vmem>>, vector<8x128xf32>
    %2 = arith.addf %0, %1 : vector<8x128xf32>
    %c0_3 = arith.constant 0 : index
    %c0_4 = arith.constant 0 : index
    %3 = vector.load %arg2[%c0_3, %c0_4] : memref<1x128xf32, #tpu.memory_space<vmem>>, vector<1x128xf32>
    %c0_5 = arith.constant 0 : index
    %c0_6 = arith.constant 0 : index
    %4 = vector.load %arg3[%c0_5, %c0_6] : memref<1x128xf32, #tpu.memory_space<vmem>>, vector<1x128xf32>
    %cst = arith.constant dense<0.000000e+00> : vector<8xf32>
    %5 = vector.multi_reduction <add>, %2, %cst [1] : vector<8x128xf32> to vector<8xf32>
    %6 = vector.shape_cast %5 : vector<8xf32> to vector<8x1xf32>
    %cst_7 = arith.constant 1.280000e+02 : f32
    %7 = vector.broadcast %cst_7 : f32 to vector<8x1xf32>
    %8 = arith.divf %6, %7 : vector<8x1xf32>
    %9 = vector.broadcast %8 : vector<8x1xf32> to vector<8x128xf32>
    %10 = arith.subf %2, %9 : vector<8x128xf32>
    %11 = arith.mulf %10, %10 : vector<8x128xf32>
    %cst_8 = arith.constant dense<0.000000e+00> : vector<8xf32>
    %12 = vector.multi_reduction <add>, %11, %cst_8 [1] : vector<8x128xf32> to vector<8xf32>
    %13 = vector.shape_cast %12 : vector<8xf32> to vector<8x1xf32>
    %cst_9 = arith.constant 1.280000e+02 : f32
    %14 = vector.broadcast %cst_9 : f32 to vector<8x1xf32>
    %15 = arith.divf %13, %14 : vector<8x1xf32>
    %cst_10 = arith.constant 9.99999974E-6 : f32
    %16 = vector.broadcast %cst_10 : f32 to vector<8x1xf32>
    %17 = arith.addf %15, %16 : vector<8x1xf32>
    %18 = math.rsqrt %17 : vector<8x1xf32>
    %19 = vector.broadcast %18 : vector<8x1xf32> to vector<8x128xf32>
    %20 = arith.mulf %10, %19 : vector<8x128xf32>
    %21 = vector.broadcast %3 : vector<1x128xf32> to vector<8x128xf32>
    %22 = arith.mulf %20, %21 : vector<8x128xf32>
    %23 = vector.broadcast %4 : vector<1x128xf32> to vector<8x128xf32>
    %24 = arith.addf %22, %23 : vector<8x128xf32>
    %c0_11 = arith.constant 0 : index
    %c0_12 = arith.constant 0 : index
    %25 = vector.load %arg4[%c0_11, %c0_12] : memref<128x256xf32, #tpu.memory_space<vmem>>, vector<128x256xf32>
    %26 = arith.truncf %24 : vector<8x128xf32> to vector<8x128xbf16>
    %27 = arith.truncf %25 : vector<128x256xf32> to vector<128x256xbf16>
    %cst_13 = arith.constant dense<0.000000e+00> : vector<8x256xf32>
    %28 = tpu.matmul %26, %27, %cst_13 {dimension_numbers = #tpu.dot_dimension_numbers<[1], [0], [0], [1], [0, 0, 1, 1], [], []>} : vector<8x128xbf16>, vector<128x256xbf16>, vector<8x256xf32> -> vector<8x256xf32>
    %c0_14 = arith.constant 0 : index
    %c0_15 = arith.constant 0 : index
    %29 = vector.load %arg5[%c0_14, %c0_15] : memref<1x256xf32, #tpu.memory_space<vmem>>, vector<1x256xf32>
    %30 = vector.broadcast %29 : vector<1x256xf32> to vector<8x256xf32>
    %31 = arith.addf %28, %30 : vector<8x256xf32>
    %cst_16 = arith.constant 5.000000e-01 : f32
    %32 = vector.broadcast %cst_16 : f32 to vector<8x256xf32>
    %33 = arith.mulf %32, %31 : vector<8x256xf32>
    %cst_17 = arith.constant 0.707106769 : f32
    %34 = vector.broadcast %cst_17 : f32 to vector<8x256xf32>
    %35 = arith.mulf %31, %34 : vector<8x256xf32>
    %36 = math.absf %35 : vector<8x256xf32>
    %cst_18 = arith.constant 0.327591091 : f32
    %37 = vector.broadcast %cst_18 : f32 to vector<8x256xf32>
    %38 = arith.mulf %37, %36 : vector<8x256xf32>
    %cst_19 = arith.constant 1.000000e+00 : f32
    %39 = vector.broadcast %cst_19 : f32 to vector<8x256xf32>
    %40 = arith.addf %39, %38 : vector<8x256xf32>
    %cst_20 = arith.constant 1.000000e+00 : f32
    %41 = vector.broadcast %cst_20 : f32 to vector<8x256xf32>
    %42 = arith.divf %41, %40 : vector<8x256xf32>
    %cst_21 = arith.constant 1.06140542 : f32
    %43 = vector.broadcast %cst_21 : f32 to vector<8x256xf32>
    %44 = arith.mulf %43, %42 : vector<8x256xf32>
    %cst_22 = arith.constant -1.45315206 : f32
    %45 = vector.broadcast %cst_22 : f32 to vector<8x256xf32>
    %46 = arith.addf %44, %45 : vector<8x256xf32>
    %47 = arith.mulf %46, %42 : vector<8x256xf32>
    %cst_23 = arith.constant 1.42141378 : f32
    %48 = vector.broadcast %cst_23 : f32 to vector<8x256xf32>
    %49 = arith.addf %47, %48 : vector<8x256xf32>
    %50 = arith.mulf %49, %42 : vector<8x256xf32>
    %cst_24 = arith.constant -0.284496725 : f32
    %51 = vector.broadcast %cst_24 : f32 to vector<8x256xf32>
    %52 = arith.addf %50, %51 : vector<8x256xf32>
    %53 = arith.mulf %52, %42 : vector<8x256xf32>
    %cst_25 = arith.constant 0.254829586 : f32
    %54 = vector.broadcast %cst_25 : f32 to vector<8x256xf32>
    %55 = arith.addf %53, %54 : vector<8x256xf32>
    %56 = arith.mulf %55, %42 : vector<8x256xf32>
    %cst_26 = arith.constant 0.000000e+00 : f32
    %57 = vector.broadcast %cst_26 : f32 to vector<8x256xf32>
    %58 = arith.subf %57, %36 : vector<8x256xf32>
    %59 = arith.mulf %58, %36 : vector<8x256xf32>
    %60 = math.exp %59 : vector<8x256xf32>
    %61 = arith.mulf %56, %60 : vector<8x256xf32>
    %cst_27 = arith.constant 1.000000e+00 : f32
    %62 = vector.broadcast %cst_27 : f32 to vector<8x256xf32>
    %63 = arith.subf %62, %61 : vector<8x256xf32>
    %cst_28 = arith.constant 0.000000e+00 : f32
    %64 = vector.broadcast %cst_28 : f32 to vector<8x256xf32>
    %65 = arith.cmpf oge, %35, %64 : vector<8x256xf32>
    %cst_29 = arith.constant 0.000000e+00 : f32
    %66 = vector.broadcast %cst_29 : f32 to vector<8x256xf32>
    %67 = arith.subf %66, %63 : vector<8x256xf32>
    %68 = arith.select %65, %63, %67 : vector<8x256xi1>, vector<8x256xf32>
    %cst_30 = arith.constant 1.000000e+00 : f32
    %69 = vector.broadcast %cst_30 : f32 to vector<8x256xf32>
    %70 = arith.addf %69, %68 : vector<8x256xf32>
    %71 = arith.mulf %33, %70 : vector<8x256xf32>
    %c0_31 = arith.constant 0 : index
    %c0_32 = arith.constant 0 : index
    %72 = vector.load %arg6[%c0_31, %c0_32] : memref<256x128xf32, #tpu.memory_space<vmem>>, vector<256x128xf32>
    %73 = arith.truncf %71 : vector<8x256xf32> to vector<8x256xbf16>
    %74 = arith.truncf %72 : vector<256x128xf32> to vector<256x128xbf16>
    %cst_33 = arith.constant dense<0.000000e+00> : vector<8x128xf32>
    %75 = tpu.matmul %73, %74, %cst_33 {dimension_numbers = #tpu.dot_dimension_numbers<[1], [0], [0], [1], [0, 0, 1, 1], [], []>} : vector<8x256xbf16>, vector<256x128xbf16>, vector<8x128xf32> -> vector<8x128xf32>
    %c0_34 = arith.constant 0 : index
    %c0_35 = arith.constant 0 : index
    %76 = vector.load %arg7[%c0_34, %c0_35] : memref<1x128xf32, #tpu.memory_space<vmem>>, vector<1x128xf32>
    %77 = vector.broadcast %76 : vector<1x128xf32> to vector<8x128xf32>
    %78 = arith.addf %75, %77 : vector<8x128xf32>
    %cst_36 = arith.constant 5.000000e-01 : f32
    %79 = vector.broadcast %cst_36 : f32 to vector<8x128xf32>
    %80 = arith.mulf %79, %78 : vector<8x128xf32>
    %cst_37 = arith.constant 0.707106769 : f32
    %81 = vector.broadcast %cst_37 : f32 to vector<8x128xf32>
    %82 = arith.mulf %78, %81 : vector<8x128xf32>
    %83 = math.absf %82 : vector<8x128xf32>
    %cst_38 = arith.constant 0.327591091 : f32
    %84 = vector.broadcast %cst_38 : f32 to vector<8x128xf32>
    %85 = arith.mulf %84, %83 : vector<8x128xf32>
    %cst_39 = arith.constant 1.000000e+00 : f32
    %86 = vector.broadcast %cst_39 : f32 to vector<8x128xf32>
    %87 = arith.addf %86, %85 : vector<8x128xf32>
    %cst_40 = arith.constant 1.000000e+00 : f32
    %88 = vector.broadcast %cst_40 : f32 to vector<8x128xf32>
    %89 = arith.divf %88, %87 : vector<8x128xf32>
    %cst_41 = arith.constant 1.06140542 : f32
    %90 = vector.broadcast %cst_41 : f32 to vector<8x128xf32>
    %91 = arith.mulf %90, %89 : vector<8x128xf32>
    %cst_42 = arith.constant -1.45315206 : f32
    %92 = vector.broadcast %cst_42 : f32 to vector<8x128xf32>
    %93 = arith.addf %91, %92 : vector<8x128xf32>
    %94 = arith.mulf %93, %89 : vector<8x128xf32>
    %cst_43 = arith.constant 1.42141378 : f32
    %95 = vector.broadcast %cst_43 : f32 to vector<8x128xf32>
    %96 = arith.addf %94, %95 : vector<8x128xf32>
    %97 = arith.mulf %96, %89 : vector<8x128xf32>
    %cst_44 = arith.constant -0.284496725 : f32
    %98 = vector.broadcast %cst_44 : f32 to vector<8x128xf32>
    %99 = arith.addf %97, %98 : vector<8x128xf32>
    %100 = arith.mulf %99, %89 : vector<8x128xf32>
    %cst_45 = arith.constant 0.254829586 : f32
    %101 = vector.broadcast %cst_45 : f32 to vector<8x128xf32>
    %102 = arith.addf %100, %101 : vector<8x128xf32>
    %103 = arith.mulf %102, %89 : vector<8x128xf32>
    %cst_46 = arith.constant 0.000000e+00 : f32
    %104 = vector.broadcast %cst_46 : f32 to vector<8x128xf32>
    %105 = arith.subf %104, %83 : vector<8x128xf32>
    %106 = arith.mulf %105, %83 : vector<8x128xf32>
    %107 = math.exp %106 : vector<8x128xf32>
    %108 = arith.mulf %103, %107 : vector<8x128xf32>
    %cst_47 = arith.constant 1.000000e+00 : f32
    %109 = vector.broadcast %cst_47 : f32 to vector<8x128xf32>
    %110 = arith.subf %109, %108 : vector<8x128xf32>
    %cst_48 = arith.constant 0.000000e+00 : f32
    %111 = vector.broadcast %cst_48 : f32 to vector<8x128xf32>
    %112 = arith.cmpf oge, %82, %111 : vector<8x128xf32>
    %cst_49 = arith.constant 0.000000e+00 : f32
    %113 = vector.broadcast %cst_49 : f32 to vector<8x128xf32>
    %114 = arith.subf %113, %110 : vector<8x128xf32>
    %115 = arith.select %112, %110, %114 : vector<8x128xi1>, vector<8x128xf32>
    %cst_50 = arith.constant 1.000000e+00 : f32
    %116 = vector.broadcast %cst_50 : f32 to vector<8x128xf32>
    %117 = arith.addf %116, %115 : vector<8x128xf32>
    %118 = arith.mulf %80, %117 : vector<8x128xf32>
    %c0_51 = arith.constant 0 : index
    %c0_52 = arith.constant 0 : index
    %119 = vector.load %arg8[%c0_51, %c0_52] : memref<128x64xf32, #tpu.memory_space<vmem>>, vector<128x64xf32>
    %120 = arith.truncf %118 : vector<8x128xf32> to vector<8x128xbf16>
    %121 = arith.truncf %119 : vector<128x64xf32> to vector<128x64xbf16>
    %cst_53 = arith.constant dense<0.000000e+00> : vector<8x64xf32>
    %122 = tpu.matmul %120, %121, %cst_53 {dimension_numbers = #tpu.dot_dimension_numbers<[1], [0], [0], [1], [0, 0, 1, 1], [], []>} : vector<8x128xbf16>, vector<128x64xbf16>, vector<8x64xf32> -> vector<8x64xf32>
    %c0_54 = arith.constant 0 : index
    %c0_55 = arith.constant 0 : index
    %123 = vector.load %arg9[%c0_54, %c0_55] : memref<1x64xf32, #tpu.memory_space<vmem>>, vector<1x64xf32>
    %124 = vector.broadcast %123 : vector<1x64xf32> to vector<8x64xf32>
    %125 = arith.addf %122, %124 : vector<8x64xf32>
    %c0_56 = arith.constant 0 : index
    %c0_57 = arith.constant 0 : index
    %126 = vector.load %arg14[%c0_56, %c0_57] : memref<8x64xf32, #tpu.memory_space<vmem>>, vector<8x64xf32>
    tpu.vector_store %arg14[%c0_56, %c0_57], %125 {strides = array<i32>} : memref<8x64xf32, #tpu.memory_space<vmem>>, vector<8x64xf32>,
    %c0_58 = arith.constant 0 : index
    %c0_59 = arith.constant 0 : index
    %127 = vector.load %arg10[%c0_58, %c0_59] : memref<128x64xf32, #tpu.memory_space<vmem>>, vector<128x64xf32>
    %128 = arith.truncf %24 : vector<8x128xf32> to vector<8x128xbf16>
    %129 = arith.truncf %127 : vector<128x64xf32> to vector<128x64xbf16>
    %cst_60 = arith.constant dense<0.000000e+00> : vector<8x64xf32>
    %130 = tpu.matmul %128, %129, %cst_60 {dimension_numbers = #tpu.dot_dimension_numbers<[1], [0], [0], [1], [0, 0, 1, 1], [], []>} : vector<8x128xbf16>, vector<128x64xbf16>, vector<8x64xf32> -> vector<8x64xf32>
    %c0_61 = arith.constant 0 : index
    %c0_62 = arith.constant 0 : index
    %131 = vector.load %arg11[%c0_61, %c0_62] : memref<1x64xf32, #tpu.memory_space<vmem>>, vector<1x64xf32>
    %132 = vector.broadcast %131 : vector<1x64xf32> to vector<8x64xf32>
    %133 = arith.addf %130, %132 : vector<8x64xf32>
    %cst_63 = arith.constant 5.000000e-01 : f32
    %134 = vector.broadcast %cst_63 : f32 to vector<8x64xf32>
    %135 = arith.mulf %134, %133 : vector<8x64xf32>
    %cst_64 = arith.constant 0.707106769 : f32
    %136 = vector.broadcast %cst_64 : f32 to vector<8x64xf32>
    %137 = arith.mulf %133, %136 : vector<8x64xf32>
    %138 = math.absf %137 : vector<8x64xf32>
    %cst_65 = arith.constant 0.327591091 : f32
    %139 = vector.broadcast %cst_65 : f32 to vector<8x64xf32>
    %140 = arith.mulf %139, %138 : vector<8x64xf32>
    %cst_66 = arith.constant 1.000000e+00 : f32
    %141 = vector.broadcast %cst_66 : f32 to vector<8x64xf32>
    %142 = arith.addf %141, %140 : vector<8x64xf32>
    %cst_67 = arith.constant 1.000000e+00 : f32
    %143 = vector.broadcast %cst_67 : f32 to vector<8x64xf32>
    %144 = arith.divf %143, %142 : vector<8x64xf32>
    %cst_68 = arith.constant 1.06140542 : f32
    %145 = vector.broadcast %cst_68 : f32 to vector<8x64xf32>
    %146 = arith.mulf %145, %144 : vector<8x64xf32>
    %cst_69 = arith.constant -1.45315206 : f32
    %147 = vector.broadcast %cst_69 : f32 to vector<8x64xf32>
    %148 = arith.addf %146, %147 : vector<8x64xf32>
    %149 = arith.mulf %148, %144 : vector<8x64xf32>
    %cst_70 = arith.constant 1.42141378 : f32
    %150 = vector.broadcast %cst_70 : f32 to vector<8x64xf32>
    %151 = arith.addf %149, %150 : vector<8x64xf32>
    %152 = arith.mulf %151, %144 : vector<8x64xf32>
    %cst_71 = arith.constant -0.284496725 : f32
    %153 = vector.broadcast %cst_71 : f32 to vector<8x64xf32>
    %154 = arith.addf %152, %153 : vector<8x64xf32>
    %155 = arith.mulf %154, %144 : vector<8x64xf32>
    %cst_72 = arith.constant 0.254829586 : f32
    %156 = vector.broadcast %cst_72 : f32 to vector<8x64xf32>
    %157 = arith.addf %155, %156 : vector<8x64xf32>
    %158 = arith.mulf %157, %144 : vector<8x64xf32>
    %cst_73 = arith.constant 0.000000e+00 : f32
    %159 = vector.broadcast %cst_73 : f32 to vector<8x64xf32>
    %160 = arith.subf %159, %138 : vector<8x64xf32>
    %161 = arith.mulf %160, %138 : vector<8x64xf32>
    %162 = math.exp %161 : vector<8x64xf32>
    %163 = arith.mulf %158, %162 : vector<8x64xf32>
    %cst_74 = arith.constant 1.000000e+00 : f32
    %164 = vector.broadcast %cst_74 : f32 to vector<8x64xf32>
    %165 = arith.subf %164, %163 : vector<8x64xf32>
    %cst_75 = arith.constant 0.000000e+00 : f32
    %166 = vector.broadcast %cst_75 : f32 to vector<8x64xf32>
    %167 = arith.cmpf oge, %137, %166 : vector<8x64xf32>
    %cst_76 = arith.constant 0.000000e+00 : f32
    %168 = vector.broadcast %cst_76 : f32 to vector<8x64xf32>
    %169 = arith.subf %168, %165 : vector<8x64xf32>
    %170 = arith.select %167, %165, %169 : vector<8x64xi1>, vector<8x64xf32>
    %cst_77 = arith.constant 1.000000e+00 : f32
    %171 = vector.broadcast %cst_77 : f32 to vector<8x64xf32>
    %172 = arith.addf %171, %170 : vector<8x64xf32>
    %173 = arith.mulf %135, %172 : vector<8x64xf32>
    %c0_78 = arith.constant 0 : index
    %c0_79 = arith.constant 0 : index
    %174 = vector.load %arg12[%c0_78, %c0_79] : memref<64x1xf32, #tpu.memory_space<vmem>>, vector<64x1xf32>
    %175 = arith.truncf %173 : vector<8x64xf32> to vector<8x64xbf16>
    %176 = arith.truncf %174 : vector<64x1xf32> to vector<64x1xbf16>
    %cst_80 = arith.constant dense<0.000000e+00> : vector<8x1xf32>
    %177 = tpu.matmul %175, %176, %cst_80 {dimension_numbers = #tpu.dot_dimension_numbers<[1], [0], [0], [1], [0, 0, 1, 1], [], []>} : vector<8x64xbf16>, vector<64x1xbf16>, vector<8x1xf32> -> vector<8x1xf32>
    %c0_81 = arith.constant 0 : index
    %c0_82 = arith.constant 0 : index
    %178 = vector.load %arg13[%c0_81, %c0_82] : memref<1x1xf32, #tpu.memory_space<vmem>>, vector<1x1xf32>
    %179 = vector.broadcast %178 : vector<1x1xf32> to vector<8x1xf32>
    %180 = arith.addf %177, %179 : vector<8x1xf32>
    %cst_83 = arith.constant 0.000000e+00 : f32
    %181 = vector.broadcast %cst_83 : f32 to vector<8x1xf32>
    %182 = arith.subf %181, %180 : vector<8x1xf32>
    %183 = math.exp %182 : vector<8x1xf32>
    %cst_84 = arith.constant 1.000000e+00 : f32
    %184 = vector.broadcast %cst_84 : f32 to vector<8x1xf32>
    %185 = arith.addf %184, %183 : vector<8x1xf32>
    %cst_85 = arith.constant 1.000000e+00 : f32
    %186 = vector.broadcast %cst_85 : f32 to vector<8x1xf32>
    %187 = arith.divf %186, %185 : vector<8x1xf32>
    %c0_86 = arith.constant 0 : index
    %c0_87 = arith.constant 0 : index
    %188 = vector.load %arg15[%c0_86, %c0_87] : memref<8x1xf32, #tpu.memory_space<vmem>>, vector<8x1xf32>
    tpu.vector_store %arg15[%c0_86, %c0_87], %187 {strides = array<i32>} : memref<8x1xf32, #tpu.memory_space<vmem>>, vector<8x1xf32>,
    return
  }
}

</mosaic_0001>

<bundles_post_ra>
// kernel: forward.17
= control target key start
LH: loop header
LB: loop body
LE: loop exit
PB: predicated region body
PF: predicated region fallthrough
CT: control target
= control target key end

     0   :  { %8 = vsyncpa [#allocation3], 0  ;;  %s227_s15 = smov [#allocation2]   ;;  %s228_s17 = smov 384   ;;  %s304_s0 = inlined_call_operand.vmem [shape: f32[32,128], index: 0, kind: input, shape index: {}]   ;;  %s305_s1 = inlined_call_operand.hbm [shape: f32[128,384], index: 1, kind: input, shape index: {}]   ;;  %s306_s2 = inlined_call_operand.vmem [shape: f32[1,384], index: 2, kind: input, shape index: {}]   ;;  %s307_s3 = inlined_call_operand.vmem [shape: f32[32,384], index: 3, kind: output, shape index: {}]  }
   0x1   :  { %s15_s14 = sshll.u32 %s305_s1, 4  ;;  %s17_s16 = sshll.u32 %s227_s15, 4  ;;  %s16_s14 = int_to_ptr.hbm [resolvable:$true] %s15_s14  ;;  %s18_s16 = int_to_ptr.vmem [resolvable:$true] %s17_s16 }
   0x2   :  { %s229_s18 = smov 24  }
   0x3   :  { %23 = dma.hbm_to_vmem [thread:$0]  %s16_s14, 6144, %s18_s16, [#allocation3], %s228_s17, %s228_s17, %s229_s18  }
   0x4   :  { %225 = dma.done.wait [#allocation3], 6144  }
   0x5   :  { %226 = vsyncadd [#allocation3], 4294961152  ;;  %v77_v0 = vld [vmem:[#allocation2 + $0x158] sm:$0xff]  ;;  %v80_v1 = vld [vmem:[#allocation2 + $0x170] sm:$0xff] }
   0x6   :  { %v78_v2 = vld [vmem:[#allocation2 + $0x160] sm:$0xff]  ;;  %v106_v3 = vpack.c.bf16 %v80_v1, %v77_v0  ;;  %v81_v4 = vld [vmem:[#allocation2 + $0x178] sm:$0xff]  ;;  %v71_v5 = vld [vmem:[#allocation2 + $0x128] sm:$0xff] }
   0x7   :  { %v74_v6 = vld [vmem:[#allocation2 + $0x140] sm:$0xff]  ;;  %v107_v7 = vpack.c.bf16 %v81_v4, %v78_v2  ;;  %v72_v8 = vld [vmem:[#allocation2 + $0x130] sm:$0xff]  ;;  %v75_v9 = vld [vmem:[#allocation2 + $0x148] sm:$0xff] }
   0x8   :  { %v76_v10 = vld [vmem:[#allocation2 + $0x150] sm:$0xff]  ;;  %135 = vmatpush.bf16.msra.mxu1 %v106_v3  ;;  %v103_v11 = vpack.c.bf16 %v74_v6, %v71_v5  ;;  %v79_v12 = vld [vmem:[#allocation2 + $0x168] sm:$0xff]  ;;  %v104_v13 = vpack.c.bf16 %v75_v9, %v72_v8  ;;  %v65_v15 = vld [vmem:[#allocation2 + $0xf8] sm:$0xff] }
   0x9   :  { %154 = vmatpush.bf16.msra.mxu2 %v107_v7  ;;  %v105_v14 = vpack.c.bf16 %v79_v12, %v76_v10  ;;  %v68_v16 = vld [vmem:[#allocation2 + $0x110] sm:$0xff]  ;;  %v70_v17 = vld [vmem:[#allocation2 + $0x120] sm:$0xff]  ;;  %v69_v19 = vld [vmem:[#allocation2 + $0x118] sm:$0xff] }
   0xa   :  { %v66_v18 = vld [vmem:[#allocation2 + $0x100] sm:$0xff]  ;;  %v73_v20 = vld [vmem:[#allocation2 + $0x138] sm:$0xff]  ;;  %v100_v22 = vpack.c.bf16 %v68_v16, %v65_v15  ;;  %v64_v23 = vld [vmem:[#allocation2 + $0xf0] sm:$0xff] }
   0xb   :  { %190 = vmatpush.bf16.msra.mxu3 %v105_v14  ;;  %v102_v21 = vpack.c.bf16 %v73_v20, %v70_v17  ;;  %116 = vmatpush.bf16.msra.mxu0 %v105_v14  ;;  %v67_v24 = vld [vmem:[#allocation2 + $0x108] sm:$0xff]  ;;  %v101_v25 = vpack.c.bf16 %v69_v19, %v66_v18  ;;  %v62_v27 = vld [vmem:[#allocation2 + $0xe0] sm:$0xff]  ;;  %v60_v28 = vld [vmem:[#allocation2 + $0xd0] sm:$0xff] }
   0xc   :  { %136 = vmatpush.bf16.msra.mxu1 %v103_v11  ;;  %v59_v26 = vld [vmem:[#allocation2 + $0xc8] sm:$0xff]  ;;  %v99_v30 = vpack.c.bf16 %v67_v24, %v64_v23  ;;  %v58_v32 = vld [vmem:[#allocation2 + $0xc0] sm:$0xff]  ;;  %v61_v33 = vld [vmem:[#allocation2 + $0xd8] sm:$0xff] }
   0xd   :  { %155 = vmatpush.bf16.msra.mxu2 %v104_v13  ;;  %v63_v29 = vld [vmem:[#allocation2 + $0xe8] sm:$0xff]  ;;  %v97_v31 = vpack.c.bf16 %v62_v27, %v59_v26  ;;  %v53_v35 = vld [vmem:[#allocation2 + $0x98] sm:$0xff]  ;;  %v56_v36 = vld [vmem:[#allocation2 + $0xb0] sm:$0xff]  ;;  %v96_v39 = vpack.c.bf16 %v61_v33, %v58_v32 }
   0xe   :  { %v98_v34 = vpack.c.bf16 %v63_v29, %v60_v28  ;;  %v54_v37 = vld [vmem:[#allocation2 + $0xa0] sm:$0xff]  ;;  %v57_v38 = vld [vmem:[#allocation2 + $0xb8] sm:$0xff]  ;;  %v94_v40 = vpack.c.bf16 %v56_v36, %v53_v35  ;;  %v52_v41 = vld [vmem:[#allocation2 + $0x90] sm:$0xff] }
   0xf   :  { %191 = vmatpush.bf16.msra.mxu3 %v102_v21  ;;  %117 = vmatpush.bf16.msra.mxu0 %v102_v21  ;;  %v55_v42 = vld [vmem:[#allocation2 + $0xa8] sm:$0xff]  ;;  %v95_v43 = vpack.c.bf16 %v57_v38, %v54_v37  ;;  %v50_v45 = vld [vmem:[#allocation2 + $0x80] sm:$0xff]  ;;  %v48_v46 = vld [vmem:[#allocation2 + $0x70] sm:$0xff] }
  0x10   :  { %137 = vmatpush.bf16.msra.mxu1 %v100_v22  ;;  %v47_v44 = vld [vmem:[#allocation2 + $0x68] sm:$0xff]  ;;  %v93_v48 = vpack.c.bf16 %v55_v42, %v52_v41  ;;  %v46_v50 = vld [vmem:[#allocation2 + $0x60] sm:$0xff]  ;;  %v49_v51 = vld [vmem:[#allocation2 + $0x78] sm:$0xff] }
  0x11   :  { %156 = vmatpush.bf16.msra.mxu2 %v101_v25  ;;  %v51_v47 = vld [vmem:[#allocation2 + $0x88] sm:$0xff]  ;;  %v91_v49 = vpack.c.bf16 %v50_v45, %v47_v44  ;;  %v41_v53 = vld [vmem:[#allocation2 + $0x38] sm:$0xff]  ;;  %v44_v54 = vld [vmem:[#allocation2 + $0x50] sm:$0xff]  ;;  %v90_v57 = vpack.c.bf16 %v49_v51, %v46_v50 }
  0x12   :  { %v92_v52 = vpack.c.bf16 %v51_v47, %v48_v46  ;;  %v42_v55 = vld [vmem:[#allocation2 + $0x40] sm:$0xff]  ;;  %v45_v56 = vld [vmem:[#allocation2 + $0x58] sm:$0xff]  ;;  %v88_v58 = vpack.c.bf16 %v44_v54, %v41_v53  ;;  %v40_v59 = vld [vmem:[#allocation2 + $0x30] sm:$0xff] }
  0x13   :  { %192 = vmatpush.bf16.msra.mxu3 %v99_v30  ;;  %118 = vmatpush.bf16.msra.mxu0 %v99_v30  ;;  %v43_v60 = vld [vmem:[#allocation2 + $0x48] sm:$0xff]  ;;  %v89_v61 = vpack.c.bf16 %v45_v56, %v42_v55  ;;  %v38_v63 = vld [vmem:[#allocation2 + $0x20] sm:$0xff]  ;;  %v36_v0 = vld [vmem:[#allocation2 + $0x10] sm:$0xff] }
  0x14   :  { %138 = vmatpush.bf16.msra.mxu1 %v97_v31  ;;  %v35_v62 = vld [vmem:[#allocation2 + $0x8] sm:$0xff]  ;;  %v30_v2 = vld [vmem:[%s304_s0] sm:$0xff]  ;;  %v87_v3 = vpack.c.bf16 %v43_v60, %v40_v59  ;;  %v37_v7 = vld [vmem:[#allocation2 + $0x18] sm:$0xff] }
  0x15   :  { %157 = vmatpush.bf16.msra.mxu2 %v98_v34  ;;  %v39_v1 = vld [vmem:[#allocation2 + $0x28] sm:$0xff]  ;;  %v85_v4 = vpack.c.bf16 %v38_v63, %v35_v62  ;;  %v34_v6 = vld [vmem:[#allocation2] sm:$0xff]  ;;  %v32_v11 = vld [vmem:[%s304_s0 + $0x10] sm:$0xff] }
  0x16   :  { %v31_v5 = vld [vmem:[%s304_s0 + $0x8] sm:$0xff]  ;;  %v86_v8 = vpack.c.bf16 %v39_v1, %v36_v0  ;;  %v84_v10 = vpack.c.bf16 %v37_v7, %v34_v6  ;;  %v33_v12 = vld [vmem:[%s304_s0 + $0x18] sm:$0xff]  ;;  %v108_v14 = vld [vmem:[%s306_s2] sm:$0x7] }
  0x17   :  { %193 = vmatpush.bf16.msra.mxu3 %v96_v39  ;;  %119 = vmatpush.bf16.msra.mxu0 %v96_v39  ;;  %v82_v9 = vpack.c.bf16 %v31_v5, %v30_v2  ;;  %v83_v13 = vpack.c.bf16 %v33_v12, %v32_v11  ;;  %v111_v15 = vperm.slane %v108_v14, 1  ;;  %v110_v18 = vperm.slane %v108_v14, 0 }
  0x18   :  { %139 = vmatpush.bf16.msra.mxu1 %v94_v40  ;;  %v112_v19 = vperm.slane %v108_v14, 2 }
  0x19   :  { %158 = vmatpush.bf16.msra.mxu2 %v95_v43 }
  0x1b   :  { %194 = vmatpush.bf16.msra.mxu3 %v93_v48  ;;  %120 = vmatpush.bf16.msra.mxu0 %v93_v48 }
  0x1c   :  { %140 = vmatpush.bf16.msra.mxu1 %v91_v49 }
  0x1d   :  { %159 = vmatpush.bf16.msra.mxu2 %v92_v52 }
  0x1f   :  { %195 = vmatpush.bf16.msra.mxu3 %v90_v57  ;;  %121 = vmatpush.bf16.msra.mxu0 %v90_v57 }
  0x20   :  { %141 = vmatpush.bf16.msra.mxu1 %v88_v58 }
  0x21   :  { %160 = vmatpush.bf16.msra.mxu2 %v89_v61 }
  0x23   :  { %196 = vmatpush.bf16.msra.mxu3 %v87_v3  ;;  %122 = vmatpush.bf16.msra.mxu0 %v87_v3 }
  0x24   :  { %142 = vmatpush.bf16.msra.mxu1 %v85_v4 }
  0x25   :  { %161 = vmatpush.bf16.msra.mxu2 %v86_v8 }
  0x27   :  { %143 = vmatmul.bf16.vlgmr.msra.gmra.mxu1 %v82_v9  ;;  %197 = vmatpush.bf16.msra.mxu3 %v84_v10 }
  0x28   :  { %162 = vmatmul.bf16.vlgmr.msra.gmra.mxu2 %v82_v9  ;;  %123 = vmatpush.bf16.msra.mxu0 %v84_v10 }
  0x2a   :  { %129 = vmatmul.bf16.vlgmr.msra.gmra.mxu3 %v83_v13 }
  0x2b   :  { %124 = vmatmul.bf16.vlgmr.msra.gmra.mxu0 %v82_v9 }
  0x37   :  { %148 = vmatmul.bf16.gmra.mxu1 %v83_v13 }
  0x38   :  { %167 = vmatmul.bf16.gmra.mxu2 %v83_v13 }
  0xa4   :  { %v144_v16 = vpop.f32.mrf.mxu1 }
  0xa5   :  { %v145_v17 = vadd.f32 %v144_v16, %v111_v15 }
  0xa7   :  { %174 = vst [vmem:[%s307_s3 + $0x8] sm:$0xff] %v145_v17 }
  0xa8   :  { %v125_v20 = vpop.f32.mrf.mxu0 }
  0xa9   :  { %v126_v21 = vadd.f32 %v125_v20, %v110_v18 }
  0xab   :  { %v163_v22 = vpop.f32.mrf.mxu2  ;;  %173 = vst [vmem:[%s307_s3] sm:$0xff] %v126_v21 }
  0xac   :  { %v164_v23 = vadd.f32 %v163_v22, %v112_v19  ;;  %v146_v24 = vpop.f32.mrf.mxu1 }
  0xad   :  { %v147_v25 = vadd.f32 %v146_v24, %v111_v15  ;;  %v130_v26 = vpop.f32.mrf.mxu3 }
  0xae   :  { %175 = vst [vmem:[%s307_s3 + $0x10] sm:$0xff] %v164_v23  ;;  %v131_v27 = vadd.f32 %v130_v26, %v110_v18 }
  0xaf   :  { %177 = vst [vmem:[%s307_s3 + $0x20] sm:$0xff] %v147_v25 }
  0xb0   :  { %179 = vst [vmem:[%s307_s3 + $0x30] sm:$0xff] %v131_v27  ;;  %v127_v28 = vpop.f32.mrf.mxu0 }
  0xb1   :  { %v128_v29 = vadd.f32 %v127_v28, %v110_v18 }
  0xb3   :  { %v165_v30 = vpop.f32.mrf.mxu2  ;;  %176 = vst [vmem:[%s307_s3 + $0x18] sm:$0xff] %v128_v29 }
  0xb4   :  { %v166_v31 = vadd.f32 %v165_v30, %v112_v19  ;;  %v149_v32 = vpop.f32.mrf.mxu1 }
  0xb5   :  { %v150_v33 = vadd.f32 %v149_v32, %v111_v15  ;;  %v132_v34 = vpop.f32.mrf.mxu3 }
  0xb6   :  { %178 = vst [vmem:[%s307_s3 + $0x28] sm:$0xff] %v166_v31  ;;  %v133_v35 = vadd.f32 %v132_v34, %v110_v18 }
  0xb7   :  { %180 = vst [vmem:[%s307_s3 + $0x38] sm:$0xff] %v150_v33 }
  0xb8   :  { %182 = vst [vmem:[%s307_s3 + $0x48] sm:$0xff] %v133_v35 }
  0xbb   :  { %v168_v36 = vpop.f32.mrf.mxu2 }
  0xbc   :  { %v169_v37 = vadd.f32 %v168_v36, %v112_v19  ;;  %v151_v38 = vpop.f32.mrf.mxu1 }
  0xbd   :  { %v152_v39 = vadd.f32 %v151_v38, %v111_v15 }
  0xbe   :  { %181 = vst [vmem:[%s307_s3 + $0x40] sm:$0xff] %v169_v37 }
  0xbf   :  { %183 = vst [vmem:[%s307_s3 + $0x50] sm:$0xff] %v152_v39 }
  0xc3   :  { %v170_v40 = vpop.f32.mrf.mxu2 }
  0xc4   :  { %v171_v41 = vadd.f32 %v170_v40, %v112_v19 }
  0xc6   :  { %184 = vst [vmem:[%s307_s3 + $0x58] sm:$0xff] %v171_v41 }
  0xc7   :  { %189 = vsyncpa [#allocation3], 1 }

// kernel: forward.19
= control target key start
LH: loop header
LB: loop body
LE: loop exit
PB: predicated region body
PF: predicated region fallthrough
CT: control target
= control target key end

     0   :  { %v217_v47 = vmov 128.0   ;;  %s356_s1 = inlined_call_operand.vmem [shape: f32[128,128], index: 1, kind: input, shape index: {}]   ;;  %s357_s2 = inlined_call_operand.vmem [shape: f32[1,128], index: 2, kind: input, shape index: {}]   ;;  %s358_s0 = inlined_call_operand.vmem [shape: f32[32,128], index: 0, kind: input, shape index: {}]   ;;  %s359_s3 = inlined_call_operand.vmem [shape: f32[32,128], index: 3, kind: input, shape index: {}]   ;;  %s360_s4 = inlined_call_operand.vmem [shape: f32[1,128], index: 4, kind: input, shape index: {}]   ;;  %s361_s5 = inlined_call_operand.vmem [shape: f32[1,128], index: 5, kind: input, shape index: {}]   ;;  %s362_s6 = inlined_call_operand.vmem [shape: f32[32,128], index: 6, kind: output, shape index: {}]  }
   0x1   :  { %v41_v0 = vld [vmem:[%s356_s1 + $0x70] sm:$0xff]  ;;  %v42_v1 = vld [vmem:[%s356_s1 + $0x78] sm:$0xff]  ;;  %v39_v2 = vld [vmem:[%s356_s1 + $0x60] sm:$0xff]  ;;  %207 = vrcp.f32 %v217_v47 }
   0x2   :  { %v52_v3 = vpack.c.bf16 %v42_v1, %v41_v0  ;;  %v40_v4 = vld [vmem:[%s356_s1 + $0x68] sm:$0xff]  ;;  %v37_v6 = vld [vmem:[%s356_s1 + $0x50] sm:$0xff]  ;;  %v38_v7 = vld [vmem:[%s356_s1 + $0x58] sm:$0xff] }
   0x3   :  { %v51_v5 = vpack.c.bf16 %v40_v4, %v39_v2  ;;  %v50_v8 = vpack.c.bf16 %v38_v7, %v37_v6  ;;  %v35_v9 = vld [vmem:[%s356_s1 + $0x40] sm:$0xff]  ;;  %v36_v10 = vld [vmem:[%s356_s1 + $0x48] sm:$0xff]  ;;  %v33_v12 = vld [vmem:[%s356_s1 + $0x30] sm:$0xff] }
   0x4   :  { %57 = vmatpush.bf16.msra.mxu0 %v52_v3  ;;  %195 = vmatpush.bf16.msra.mxu1 %v52_v3  ;;  %v49_v11 = vpack.c.bf16 %v36_v10, %v35_v9  ;;  %v34_v13 = vld [vmem:[%s356_s1 + $0x38] sm:$0xff]  ;;  %v31_v15 = vld [vmem:[%s356_s1 + $0x20] sm:$0xff]  ;;  %v32_v16 = vld [vmem:[%s356_s1 + $0x28] sm:$0xff] }
   0x5   :  { %v48_v14 = vpack.c.bf16 %v34_v13, %v33_v12  ;;  %v47_v17 = vpack.c.bf16 %v32_v16, %v31_v15  ;;  %v29_v18 = vld [vmem:[%s356_s1 + $0x10] sm:$0xff]  ;;  %v30_v19 = vld [vmem:[%s356_s1 + $0x18] sm:$0xff]  ;;  %v27_v21 = vld [vmem:[%s356_s1] sm:$0xff] }
   0x6   :  { %v46_v20 = vpack.c.bf16 %v30_v19, %v29_v18  ;;  %v28_v22 = vld [vmem:[%s356_s1 + $0x8] sm:$0xff]  ;;  %v23_v23 = vld [vmem:[%s358_s0] sm:$0xff]  ;;  %v25_v26 = vld [vmem:[%s358_s0 + $0x10] sm:$0xff] }
   0x7   :  { %v45_v24 = vpack.c.bf16 %v28_v22, %v27_v21  ;;  %v24_v25 = vld [vmem:[%s358_s0 + $0x8] sm:$0xff]  ;;  %v26_v27 = vld [vmem:[%s358_s0 + $0x18] sm:$0xff]  ;;  %v204_v30 = vld [vmem:[%s357_s2] ss:$0 sm:$0xff]  ;;  %v208_v48 = vpop.eup %207 }
   0x8   :  { %58 = vmatpush.bf16.msra.mxu0 %v51_v5  ;;  %196 = vmatpush.bf16.msra.mxu1 %v51_v5  ;;  %v43_v28 = vpack.c.bf16 %v24_v25, %v23_v23  ;;  %v44_v29 = vpack.c.bf16 %v26_v27, %v25_v26  ;;  %v78_v33 = vld [vmem:[%s359_s3 + $0x10] sm:$0xff]  ;;  %v76_v34 = vld [vmem:[%s359_s3] sm:$0xff]  ;;  %v79_v39 = vld [vmem:[%s359_s3 + $0x18] sm:$0xff]  ;;  %v95_v49 = vmul.f32 128.0, %v208_v48  ;;  %vm99_vm0 = vweird.f32 %v208_v48 }
   0x9   :  { %v77_v42 = vld [vmem:[%s359_s3 + $0x8] sm:$0xff] }
   0xa   :  { %v96_v50 = vsub.f32 1.0, %v95_v49 }
   0xc   :  { %59 = vmatpush.bf16.msra.mxu0 %v50_v8  ;;  %197 = vmatpush.bf16.msra.mxu1 %v50_v8  ;;  %v97_v51 = vmul.f32 %v208_v48, %v96_v50 }
   0xe   :  { %v98_v52 = vadd.f32 %v208_v48, %v97_v51 }
  0x10   :  { %60 = vmatpush.bf16.msra.mxu0 %v49_v11  ;;  %198 = vmatpush.bf16.msra.mxu1 %v49_v11  ;;  %v100_v53 = vsel %vm99_vm0, %v208_v48, %v98_v52 }
  0x14   :  { %61 = vmatpush.bf16.msra.mxu0 %v48_v14  ;;  %199 = vmatpush.bf16.msra.mxu1 %v48_v14 }
  0x18   :  { %62 = vmatpush.bf16.msra.mxu0 %v47_v17  ;;  %200 = vmatpush.bf16.msra.mxu1 %v47_v17 }
  0x1c   :  { %63 = vmatpush.bf16.msra.mxu0 %v46_v20  ;;  %201 = vmatpush.bf16.msra.mxu1 %v46_v20 }
  0x20   :  { %64 = vmatpush.bf16.msra.mxu0 %v45_v24  ;;  %202 = vmatpush.bf16.msra.mxu1 %v45_v24 }
  0x23   :  { %65 = vmatmul.bf16.vlgmr.msra.gmra.mxu0 %v43_v28  ;;  %70 = vmatmul.bf16.vlgmr.msra.gmra.mxu1 %v44_v29 }
  0xa0   :  { %v66_v31 = vpop.f32.mrf.mxu0  ;;  %v71_v32 = vpop.f32.mrf.mxu1 }
  0xa1   :  { %v67_v35 = vadd.f32 %v204_v30, %v66_v31  ;;  %v72_v36 = vadd.f32 %v204_v30, %v71_v32  ;;  %v205_v32 = vld [vmem:[%s360_s4] ss:$0 sm:$0xff] }
  0xa3   :  { %v82_v37 = vadd.f32 %v78_v33, %v72_v36  ;;  %v80_v38 = vadd.f32 %v76_v34, %v67_v35 }
  0xa5   :  { %90 = vadd.xlane.f32.xlu1 %v82_v37  ;;  %86 = vadd.xlane.f32.xlu0 %v80_v38 }
  0xa8   :  { %v68_v40 = vpop.f32.mrf.mxu0  ;;  %v73_v41 = vpop.f32.mrf.mxu1 }
  0xa9   :  { %v69_v43 = vadd.f32 %v204_v30, %v68_v40  ;;  %v74_v44 = vadd.f32 %v204_v30, %v73_v41 }
  0xab   :  { %v83_v45 = vadd.f32 %v79_v39, %v74_v44  ;;  %v81_v46 = vadd.f32 %v77_v42, %v69_v43 }
  0xad   :  { %92 = vadd.xlane.f32.xlu1 %v83_v45  ;;  %88 = vadd.xlane.f32.xlu0 %v81_v46 }
 0x118   :  { %v91_v54 = vpop.xlane.xlu1 %90  ;;  %v87_v55 = vpop.xlane.xlu0 %86 }
 0x119   :  { %v103_v56 = vmul.f32 %v100_v53, %v91_v54  ;;  %v101_v57 = vmul.f32 %v100_v53, %v87_v55 }
 0x11b   :  { %v107_v58 = vsub.f32 %v82_v37, %v103_v56  ;;  %v105_v59 = vsub.f32 %v80_v38, %v101_v57  ;;  %v206_v37 = vld [vmem:[%s361_s5] ss:$0 sm:$0xff] }
 0x11d   :  { %v111_v60 = vmul.f32 %v107_v58, %v107_v58  ;;  %v109_v61 = vmul.f32 %v105_v59, %v105_v59 }
 0x11f   :  { %117 = vadd.xlane.f32.xlu0 %v111_v60  ;;  %113 = vadd.xlane.f32.xlu2 %v109_v61 }
 0x120   :  { %v93_v62 = vpop.xlane.xlu1 %92  ;;  %v89_v63 = vpop.xlane.xlu0 %88 }
 0x121   :  { %v104_v0 = vmul.f32 %v100_v53, %v93_v62  ;;  %v102_v1 = vmul.f32 %v100_v53, %v89_v63 }
 0x123   :  { %v328_v2 = vsub.f32 %v83_v45, %v104_v0  ;;  %v330_v3 = vsub.f32 %v81_v46, %v102_v1 }
 0x125   :  { %v112_v4 = vmul.f32 %v328_v2, %v328_v2  ;;  %v110_v5 = vmul.f32 %v330_v3, %v330_v3 }
 0x127   :  { %119 = vadd.xlane.f32.xlu1 %v112_v4  ;;  %115 = vadd.xlane.f32.xlu2 %v110_v5 }
 0x192   :  { %v114_v6 = vpop.xlane.xlu2 %113  ;;  %v118_v7 = vpop.xlane.xlu0 %117 }
 0x193   :  { %v121_v8 = vmul.f32 %v114_v6, %v100_v53  ;;  %v123_v9 = vmul.f32 %v118_v7, %v100_v53 }
 0x195   :  { %v125_v10 = vadd.f32 1e-05, %v121_v8  ;;  %v127_v11 = vadd.f32 1e-05, %v123_v9 }
 0x197   :  { %209 = vrsqrt.f32 %v125_v10  ;;  %vm135_vm3 = vweird.f32 %v125_v10  ;;  %vm155_vm5 = vweird.f32 %v127_v11 }
 0x198   :  { %211 = vrsqrt.f32 %v127_v11 }
 0x19a   :  { %v120_v12 = vpop.xlane.xlu1 %119  ;;  %v116_v13 = vpop.xlane.xlu2 %115 }
 0x19b   :  { %v124_v14 = vmul.f32 %v120_v12, %v100_v53  ;;  %v122_v15 = vmul.f32 %v116_v13, %v100_v53 }
 0x19d   :  { %v210_v16 = vpop.eup %209  ;;  %v128_v17 = vadd.f32 1e-05, %v124_v14  ;;  %v126_v18 = vadd.f32 1e-05, %v122_v15 }
 0x19e   :  { %v212_v19 = vpop.eup %211  ;;  %v130_v20 = vmul.f32 %v210_v16, %v125_v10  ;;  %vm136_vm1 = vweird.f32 %v210_v16 }
 0x19f   :  { %v150_v21 = vmul.f32 %v212_v19, %v127_v11  ;;  %213 = vrsqrt.f32 %v128_v17  ;;  %vm156_vm2 = vweird.f32 %v212_v19  ;;  %vm137_vm4 = vmor %vm135_vm3, %vm136_vm1  ;;  %vm165_vm9 = vweird.f32 %v128_v17 }
 0x1a0   :  { %v131_v22 = vmul.f32 %v210_v16, %v130_v20  ;;  %215 = vrsqrt.f32 %v126_v18  ;;  %vm157_vm6 = vmor %vm155_vm5, %vm156_vm2  ;;  %vm145_vm11 = vweird.f32 %v126_v18 }
 0x1a1   :  { %v151_v23 = vmul.f32 %v212_v19, %v150_v21 }
 0x1a2   :  { %v132_v24 = vmul.f32 0.5, %v131_v22 }
 0x1a3   :  { %v152_v25 = vmul.f32 0.5, %v151_v23 }
 0x1a4   :  { %v133_v26 = vsub.f32 1.5, %v132_v24 }
 0x1a5   :  { %v214_v27 = vpop.eup %213  ;;  %v153_v28 = vsub.f32 1.5, %v152_v25 }
 0x1a6   :  { %v216_v29 = vpop.eup %215  ;;  %v134_v30 = vmul.f32 %v210_v16, %v133_v26  ;;  %v160_v31 = vmul.f32 %v214_v27, %v128_v17  ;;  %vm166_vm7 = vweird.f32 %v214_v27 }
 0x1a7   :  { %v154_v33 = vmul.f32 %v212_v19, %v153_v28  ;;  %v140_v34 = vmul.f32 %v216_v29, %v126_v18  ;;  %vm146_vm8 = vweird.f32 %v216_v29  ;;  %vm167_vm10 = vmor %vm165_vm9, %vm166_vm7 }
 0x1a8   :  { %v138_v35 = vsel %vm137_vm4, %v210_v16, %v134_v30  ;;  %v161_v36 = vmul.f32 %v214_v27, %v160_v31  ;;  %vm147_vm12 = vmor %vm145_vm11, %vm146_vm8 }
 0x1a9   :  { %v169_v38 = vmul.f32 %v138_v35, %v105_v59  ;;  %v158_v39 = vsel %vm157_vm6, %v212_v19, %v154_v33  ;;  %v141_v40 = vmul.f32 %v216_v29, %v140_v34 }
 0x1aa   :  { %v171_v41 = vmul.f32 %v158_v39, %v107_v58  ;;  %v162_v42 = vmul.f32 0.5, %v161_v36 }
 0x1ab   :  { %v176_v43 = vmul.f32 %v205_v32, %v169_v38  ;;  %v142_v44 = vmul.f32 0.5, %v141_v40 }
 0x1ac   :  { %v178_v45 = vmul.f32 %v205_v32, %v171_v41  ;;  %v163_v46 = vsub.f32 1.5, %v162_v42 }
 0x1ad   :  { %v183_v47 = vadd.f32 %v206_v37, %v176_v43  ;;  %v143_v48 = vsub.f32 1.5, %v142_v44 }
 0x1ae   :  { %v185_v49 = vadd.f32 %v206_v37, %v178_v45  ;;  %v164_v50 = vmul.f32 %v214_v27, %v163_v46 }
 0x1af   :  { %187 = vst [vmem:[%s362_s6] sm:$0xff] %v183_v47  ;;  %v144_v51 = vmul.f32 %v216_v29, %v143_v48 }
 0x1b0   :  { %189 = vst [vmem:[%s362_s6 + $0x10] sm:$0xff] %v185_v49  ;;  %v168_v52 = vsel %vm167_vm10, %v214_v27, %v164_v50 }
 0x1b1   :  { %v172_v53 = vmul.f32 %v168_v52, %v328_v2  ;;  %v148_v54 = vsel %vm147_vm12, %v216_v29, %v144_v51 }
 0x1b2   :  { %v170_v55 = vmul.f32 %v148_v54, %v330_v3 }
 0x1b3   :  { %v179_v56 = vmul.f32 %v205_v32, %v172_v53 }
 0x1b4   :  { %v177_v57 = vmul.f32 %v205_v32, %v170_v55 }
 0x1b5   :  { %v186_v58 = vadd.f32 %v206_v37, %v179_v56 }
 0x1b6   :  { %v184_v59 = vadd.f32 %v206_v37, %v177_v57 }
 0x1b7   :  { %190 = vst [vmem:[%s362_s6 + $0x18] sm:$0xff] %v186_v58 }
 0x1b8   :  { %188 = vst [vmem:[%s362_s6 + $0x8] sm:$0xff] %v184_v59 }

// kernel: forward.18
= control target key start
LH: loop header
LB: loop body
LE: loop exit
PB: predicated region body
PF: predicated region fallthrough
CT: control target
= control target key end

     0   :  { %vm89_vm0 = vcmask 261120   ;;  %vm336_vm1 = vcmask 130048   ;;  %s1297_s1 = inlined_call_operand.vmem [shape: f32[8,16,32], index: 1, kind: input, shape index: {}]   ;;  %s1298_s0 = inlined_call_operand.vmem [shape: f32[8,16,32], index: 0, kind: input, shape index: {}]   ;;  %s1299_s2 = inlined_call_operand.vmem [shape: f32[8,16,32], index: 2, kind: input, shape index: {}]   ;;  %s1300_s3 = inlined_call_operand.vmem [shape: f32[8,16,32], index: 3, kind: output, shape index: {}]  }
   0x1   :  { %v47_v0 = vld [vmem:[%s1297_s1] sm:$0xff]  ;;  %v48_v1 = vld [vmem:[%s1297_s1 + $0x8] sm:$0xff]  ;;  %v49_v2 = vld [vmem:[%s1297_s1 + $0x10] sm:$0xff] }
   0x2   :  { %v63_v3 = vpack.c.bf16 %v47_v0, %v47_v0  ;;  %v64_v4 = vpack.c.bf16 %v48_v1, %v48_v1  ;;  %v50_v5 = vld [vmem:[%s1297_s1 + $0x18] sm:$0xff]  ;;  %v65_v6 = vpack.c.bf16 %v49_v2, %v49_v2  ;;  %v51_v7 = vld [vmem:[%s1297_s1 + $0x20] sm:$0xff]  ;;  %v52_v8 = vld [vmem:[%s1297_s1 + $0x28] sm:$0xff] }
   0x3   :  { %v66_v9 = vpack.c.bf16 %v50_v5, %v50_v5  ;;  %v67_v10 = vpack.c.bf16 %v51_v7, %v51_v7  ;;  %v68_v11 = vpack.c.bf16 %v52_v8, %v52_v8  ;;  %v53_v12 = vld [vmem:[%s1297_s1 + $0x30] sm:$0xff]  ;;  %v54_v13 = vld [vmem:[%s1297_s1 + $0x38] sm:$0xff]  ;;  %v15_v14 = vld [vmem:[%s1298_s0] sm:$0xff] }
   0x4   :  { %v86_v15 = vunpack.c.l.b16 %v63_v3  ;;  %v87_v16 = vunpack.c.l.b16 %v64_v4  ;;  %v117_v17 = vunpack.c.l.b16 %v65_v6  ;;  %v69_v18 = vpack.c.bf16 %v53_v12, %v53_v12  ;;  %v16_v19 = vld [vmem:[%s1298_s0 + $0x8] sm:$0xff]  ;;  %v17_v20 = vld [vmem:[%s1298_s0 + $0x10] sm:$0xff]  ;;  %v18_v25 = vld [vmem:[%s1298_s0 + $0x18] sm:$0xff] }
   0x5   :  { %v118_v21 = vunpack.c.l.b16 %v66_v9  ;;  %v147_v22 = vunpack.c.l.b16 %v67_v10  ;;  %v148_v23 = vunpack.c.l.b16 %v68_v11  ;;  %v70_v24 = vpack.c.bf16 %v54_v13, %v54_v13  ;;  %v19_v34 = vld [vmem:[%s1298_s0 + $0x20] sm:$0xff]  ;;  %v20_v35 = vld [vmem:[%s1298_s0 + $0x28] sm:$0xff]  ;;  %v21_v40 = vld [vmem:[%s1298_s0 + $0x30] sm:$0xff] }
   0x6   :  { %v88_v26 = vpack.c.b16 %v87_v16, %v86_v15  ;;  %v177_v27 = vunpack.c.l.b16 %v69_v18  ;;  %v31_v28 = vpack.c.bf16 %v15_v14, %v15_v14  ;;  %v32_v29 = vpack.c.bf16 %v16_v19, %v16_v19  ;;  %v22_v41 = vld [vmem:[%s1298_s0 + $0x38] sm:$0xff]  ;;  %v59_v42 = vld [vmem:[%s1297_s1 + $0x60] sm:$0xff]  ;;  %v60_v47 = vld [vmem:[%s1297_s1 + $0x68] sm:$0xff] }
   0x7   :  { %v119_v30 = vpack.c.b16 %v118_v21, %v117_v17  ;;  %v149_v31 = vpack.c.b16 %v148_v23, %v147_v22  ;;  %v178_v32 = vunpack.c.l.b16 %v70_v24  ;;  %v33_v33 = vpack.c.bf16 %v17_v20, %v17_v20  ;;  %v61_v52 = vld [vmem:[%s1297_s1 + $0x70] sm:$0xff]  ;;  %v62_v57 = vld [vmem:[%s1297_s1 + $0x78] sm:$0xff]  ;;  %v55_v58 = vld [vmem:[%s1297_s1 + $0x40] sm:$0xff] }
   0x8   :  { %v94_v36 = vsel %vm89_vm0, %v88_v26, 0  ;;  %v81_v37 = vunpack.c.l.b16 %v31_v28  ;;  %v82_v38 = vunpack.c.l.b16 %v32_v29  ;;  %v34_v39 = vpack.c.bf16 %v18_v25, %v18_v25  ;;  %v56_v63 = vld [vmem:[%s1297_s1 + $0x48] sm:$0xff]  ;;  %v57_v8 = vld [vmem:[%s1297_s1 + $0x50] sm:$0xff]  ;;  %v58_v9 = vld [vmem:[%s1297_s1 + $0x58] sm:$0xff] }
   0x9   :  { %103 = vmatpush.bf16.xpose.msra.mxu0 %v94_v36  ;;  %v124_v43 = vsel %vm89_vm0, %v119_v30, 0  ;;  %v154_v44 = vsel %vm89_vm0, %v149_v31, 0  ;;  %v179_v45 = vpack.c.b16 %v178_v32, %v177_v27  ;;  %v112_v46 = vunpack.c.l.b16 %v33_v33  ;;  %v23_v17 = vld [vmem:[%s1298_s0 + $0x40] sm:$0xff]  ;;  %v24_v18 = vld [vmem:[%s1298_s0 + $0x48] sm:$0xff]  ;;  %v25_v28 = vld [vmem:[%s1298_s0 + $0x50] sm:$0xff] }
   0xa   :  { %133 = vmatpush.bf16.xpose.msra.mxu1 %v124_v43  ;;  %163 = vmatpush.bf16.xpose.msra.mxu2 %v154_v44  ;;  %v83_v48 = vpack.c.b16 %v82_v38, %v81_v37  ;;  %v113_v49 = vunpack.c.l.b16 %v34_v39  ;;  %v35_v50 = vpack.c.bf16 %v19_v34, %v19_v34  ;;  %v36_v51 = vpack.c.bf16 %v20_v35, %v20_v35  ;;  %v27_v23 = vld [vmem:[%s1298_s0 + $0x60] sm:$0xff]  ;;  %v28_v24 = vld [vmem:[%s1298_s0 + $0x68] sm:$0xff]  ;;  %v26_v29 = vld [vmem:[%s1298_s0 + $0x58] sm:$0xff] }
   0xb   :  { %v184_v53 = vsel %vm89_vm0, %v179_v45, 0  ;;  %v37_v54 = vpack.c.bf16 %v21_v40, %v21_v40  ;;  %v38_v55 = vpack.c.bf16 %v22_v41, %v22_v41  ;;  %v75_v56 = vpack.c.bf16 %v59_v42, %v59_v42  ;;  %v29_v33 = vld [vmem:[%s1298_s0 + $0x70] sm:$0xff]  ;;  %v30_v34 = vld [vmem:[%s1298_s0 + $0x78] sm:$0xff] }
   0xc   :  { %193 = vmatpush.bf16.xpose.msra.mxu3 %v184_v53  ;;  %v114_v59 = vpack.c.b16 %v113_v49, %v112_v46  ;;  %v142_v60 = vunpack.c.l.b16 %v35_v50  ;;  %v143_v61 = vunpack.c.l.b16 %v36_v51  ;;  %v76_v62 = vpack.c.bf16 %v60_v47, %v60_v47 }
   0xd   :  { %v172_v0 = vunpack.c.l.b16 %v37_v54  ;;  %v173_v1 = vunpack.c.l.b16 %v38_v55  ;;  %v267_v2 = vunpack.c.l.b16 %v75_v56  ;;  %v77_v3 = vpack.c.bf16 %v61_v52, %v61_v52 }
   0xe   :  { %v144_v4 = vpack.c.b16 %v143_v61, %v142_v60  ;;  %v268_v5 = vunpack.c.l.b16 %v76_v62  ;;  %v78_v6 = vpack.c.bf16 %v62_v57, %v62_v57  ;;  %v71_v7 = vpack.c.bf16 %v55_v58, %v55_v58 }
   0xf   :  { %v174_v10 = vpack.c.b16 %v173_v1, %v172_v0  ;;  %v297_v11 = vunpack.c.l.b16 %v77_v3  ;;  %v72_v12 = vpack.c.bf16 %v56_v63, %v56_v63  ;;  %v73_v19 = vpack.c.bf16 %v57_v8, %v57_v8 }
  0x10   :  { %805 = vmatmul.msk.bf16.vlgmr.msra.gmra.mxu0 %vm89_vm0, %v83_v48  ;;  %v269_v13 = vpack.c.b16 %v268_v5, %v267_v2  ;;  %v298_v14 = vunpack.c.l.b16 %v78_v6  ;;  %v207_v15 = vunpack.c.l.b16 %v71_v7  ;;  %v74_v20 = vpack.c.bf16 %v58_v9, %v58_v9 }
  0x11   :  { %806 = vmatmul.msk.bf16.vlgmr.msra.gmra.mxu1 %vm89_vm0, %v114_v59  ;;  %807 = vmatmul.msk.bf16.vlgmr.msra.gmra.mxu2 %vm89_vm0, %v144_v4  ;;  %v208_v16 = vunpack.c.l.b16 %v72_v12  ;;  %v237_v26 = vunpack.c.l.b16 %v73_v19  ;;  %v39_v31 = vpack.c.bf16 %v23_v17, %v23_v17  ;;  %v40_v32 = vpack.c.bf16 %v24_v18, %v24_v18 }
  0x12   :  { %v274_v21 = vsel %vm89_vm0, %v269_v13, 0  ;;  %v299_v22 = vpack.c.b16 %v298_v14, %v297_v11  ;;  %v238_v27 = vunpack.c.l.b16 %v74_v20  ;;  %v43_v37 = vpack.c.bf16 %v27_v23, %v27_v23 }
  0x13   :  { %808 = vmatmul.msk.bf16.vlgmr.msra.gmra.mxu3 %vm89_vm0, %v174_v10  ;;  %283 = vmatpush.bf16.xpose.msrb.mxu2 %v274_v21  ;;  %v209_v25 = vpack.c.b16 %v208_v16, %v207_v15  ;;  %v44_v38 = vpack.c.bf16 %v28_v24, %v28_v24  ;;  %v41_v39 = vpack.c.bf16 %v25_v28, %v25_v28  ;;  %v202_v44 = vunpack.c.l.b16 %v39_v31 }
  0x14   :  { %v304_v30 = vsel %vm89_vm0, %v299_v22, 0  ;;  %v239_v36 = vpack.c.b16 %v238_v27, %v237_v26  ;;  %v42_v40 = vpack.c.bf16 %v26_v29, %v26_v29  ;;  %v45_v42 = vpack.c.bf16 %v29_v33, %v29_v33 }
  0x15   :  { %313 = vmatpush.bf16.xpose.msrb.mxu3 %v304_v30  ;;  %v214_v35 = vsel %vm89_vm0, %v209_v25, 0  ;;  %v46_v43 = vpack.c.bf16 %v30_v34, %v30_v34  ;;  %v203_v45 = vunpack.c.l.b16 %v40_v32  ;;  %v262_v46 = vunpack.c.l.b16 %v43_v37 }
  0x16   :  { %223 = vmatpush.bf16.xpose.msrb.mxu0 %v214_v35  ;;  %v244_v41 = vsel %vm89_vm0, %v239_v36, 0  ;;  %v263_v47 = vunpack.c.l.b16 %v44_v38  ;;  %v232_v48 = vunpack.c.l.b16 %v41_v39  ;;  %v233_v49 = vunpack.c.l.b16 %v42_v40 }
  0x17   :  { %253 = vmatpush.bf16.xpose.msrb.mxu1 %v244_v41  ;;  %v292_v50 = vunpack.c.l.b16 %v45_v42  ;;  %v293_v51 = vunpack.c.l.b16 %v46_v43  ;;  %v204_v52 = vpack.c.b16 %v203_v45, %v202_v44 }
  0x18   :  { %v264_v53 = vpack.c.b16 %v263_v47, %v262_v46  ;;  %v234_v54 = vpack.c.b16 %v233_v49, %v232_v48 }
  0x19   :  { %v294_v55 = vpack.c.b16 %v293_v51, %v292_v50 }
  0x20   :  { %809 = vmatmul.msk.bf16.vlgmr.msrb.gmra.mxu0 %vm89_vm0, %v204_v52 }
  0x21   :  { %811 = vmatmul.msk.bf16.vlgmr.msrb.gmra.mxu2 %vm89_vm0, %v264_v53  ;;  %810 = vmatmul.msk.bf16.vlgmr.msrb.gmra.mxu1 %vm89_vm0, %v234_v54 }
  0x23   :  { %812 = vmatmul.msk.bf16.vlgmr.msrb.gmra.mxu3 %vm89_vm0, %v294_v55 }
  0x8d   :  { %v105_v56 = vpop.f32.mrf.mxu0 }
  0x8e   :  { %v1017_v57 = vmul.f32 0.17677669, %v105_v56  ;;  %v135_v58 = vpop.f32.mrf.mxu1 }
  0x8f   :  { %v1019_v59 = vmul.f32 0.17677669, %v135_v58 }
  0x90   :  { %v337_v60 = vsel %vm336_vm1, %v1017_v57, -inf }
  0x91   :  { %v343_v61 = vsel %vm336_vm1, %v1019_v59, -inf  ;;  %338 = vmax.xlane.f32.xlu2 %v337_v60 }
  0x92   :  { %344 = vmax.xlane.f32.xlu0 %v343_v61 }
  0x94   :  { %v165_v62 = vpop.f32.mrf.mxu2 }
  0x95   :  { %v1025_v63 = vmul.f32 0.17677669, %v165_v62  ;;  %v107_v0 = vpop.f32.mrf.mxu0 }
  0x96   :  { %v195_v1 = vpop.f32.mrf.mxu3  ;;  %v1027_v2 = vmul.f32 0.17677669, %v107_v0  ;;  %v137_v11 = vpop.f32.mrf.mxu1 }
  0x97   :  { %v1029_v3 = vmul.f32 0.17677669, %v195_v1  ;;  %v349_v4 = vsel %vm336_vm1, %v1025_v63, -inf  ;;  %v1047_v17 = vmul.f32 0.17677669, %v137_v11 }
  0x98   :  { %v340_v5 = vsel %vm336_vm1, %v1027_v2, -inf }
  0x99   :  { %v355_v6 = vsel %vm336_vm1, %v1029_v3, -inf  ;;  %341 = vmax.xlane.f32.xlu2 %v340_v5  ;;  %v346_v23 = vsel %vm336_vm1, %v1047_v17, -inf }
  0x9a   :  { %356 = vmax.xlane.f32.xlu1 %v355_v6  ;;  %350 = vmax.xlane.f32.xlu0 %v349_v4 }
  0x9c   :  { %v167_v7 = vpop.f32.mrf.mxu2 }
  0x9d   :  { %v1037_v8 = vmul.f32 0.17677669, %v167_v7  ;;  %v225_v14 = vpop.f32.mrf.mxu0 }
  0x9e   :  { %v197_v9 = vpop.f32.mrf.mxu3  ;;  %v1045_v15 = vmul.f32 0.17677669, %v225_v14  ;;  %v255_v22 = vpop.f32.mrf.mxu1 }
  0x9f   :  { %v1039_v10 = vmul.f32 0.17677669, %v197_v9  ;;  %v352_v13 = vsel %vm336_vm1, %v1037_v8, -inf  ;;  %v1071_v35 = vmul.f32 0.17677669, %v255_v22 }
  0xa0   :  { %v361_v21 = vsel %vm336_vm1, %v1045_v15, -inf }
  0xa1   :  { %v358_v12 = vsel %vm336_vm1, %v1039_v10, -inf  ;;  %v367_v37 = vsel %vm336_vm1, %v1071_v35, -inf }
  0xa2   :  { %359 = vmax.xlane.f32.xlu1 %v358_v12  ;;  %353 = vmax.xlane.f32.xlu0 %v352_v13 }
  0xa4   :  { %v285_v16 = vpop.f32.mrf.mxu2 }
  0xa5   :  { %v1049_v18 = vmul.f32 0.17677669, %v285_v16  ;;  %v227_v31 = vpop.f32.mrf.mxu0 }
  0xa6   :  { %v315_v19 = vpop.f32.mrf.mxu3  ;;  %v257_v33 = vpop.f32.mrf.mxu1  ;;  %v1069_v34 = vmul.f32 0.17677669, %v227_v31 }
  0xa7   :  { %v373_v20 = vsel %vm336_vm1, %v1049_v18, -inf  ;;  %v1057_v25 = vmul.f32 0.17677669, %v315_v19  ;;  %v1073_v36 = vmul.f32 0.17677669, %v257_v33 }
  0xa8   :  { %374 = vmax.xlane.f32.xlu2 %v373_v20  ;;  %v364_v38 = vsel %vm336_vm1, %v1069_v34, -inf }
  0xa9   :  { %v379_v29 = vsel %vm336_vm1, %v1057_v25, -inf  ;;  %v370_v39 = vsel %vm336_vm1, %v1073_v36, -inf }
  0xaa   :  { %347 = vmax.xlane.f32.xlu1 %v346_v23  ;;  %362 = vmax.xlane.f32.xlu0 %v361_v21 }
  0xac   :  { %v287_v24 = vpop.f32.mrf.mxu2 }
  0xad   :  { %v1059_v26 = vmul.f32 0.17677669, %v287_v24 }
  0xae   :  { %v317_v27 = vpop.f32.mrf.mxu3 }
  0xaf   :  { %v1061_v28 = vmul.f32 0.17677669, %v317_v27  ;;  %v376_v32 = vsel %vm336_vm1, %v1059_v26, -inf }
  0xb1   :  { %v382_v30 = vsel %vm336_vm1, %v1061_v28, -inf }
  0xb2   :  { %380 = vmax.xlane.f32.xlu1 %v379_v29  ;;  %383 = vmax.xlane.f32.xlu2 %v382_v30 }
  0xb3   :  { %377 = vmax.xlane.f32.xlu0 %v376_v32 }
  0xba   :  { %368 = vmax.xlane.f32.xlu2 %v367_v37  ;;  %365 = vmax.xlane.f32.xlu1 %v364_v38 }
  0xbb   :  { %371 = vmax.xlane.f32.xlu0 %v370_v39 }
 0x104   :  { %v339_v40 = vpop.xlane.xlu2 %338 }
 0x105   :  { %v345_v41 = vpop.xlane.xlu0 %344  ;;  %v385_v42 = vsub.f32 %v1017_v57, %v339_v40 }
 0x106   :  { %v387_v43 = vsub.f32 %v1019_v59, %v345_v41 }
 0x107   :  { %v401_v44 = vmul.f32 1.442695, %v385_v42 }
 0x108   :  { %v405_v45 = vmul.f32 1.442695, %v387_v43 }
 0x109   :  { %821 = vpow2.f32 %v401_v44 }
 0x10a   :  { %823 = vpow2.f32 %v405_v45 }
 0x10c   :  { %v342_v46 = vpop.xlane.xlu2 %341 }
 0x10d   :  { %v357_v47 = vpop.xlane.xlu1 %356  ;;  %v351_v48 = vpop.xlane.xlu0 %350  ;;  %v386_v55 = vsub.f32 %v1027_v2, %v342_v46 }
 0x10e   :  { %v391_v49 = vsub.f32 %v1029_v3, %v357_v47  ;;  %v389_v50 = vsub.f32 %v1025_v63, %v351_v48 }
 0x10f   :  { %v1085_v51 = vpop.eup %821  ;;  %v403_v58 = vmul.f32 1.442695, %v386_v55 }
 0x110   :  { %v1087_v52 = vpop.eup %823  ;;  %v413_v53 = vmul.f32 1.442695, %v391_v49  ;;  %v409_v54 = vmul.f32 1.442695, %v389_v50  ;;  %v433_v56 = vsel %vm336_vm1, %v1085_v51, 0.0 }
 0x111   :  { %434 = vadd.xlane.f32.xlu2 %v433_v56  ;;  %v439_v57 = vsel %vm336_vm1, %v1087_v52, 0.0 }
 0x112   :  { %825 = vpow2.f32 %v413_v53  ;;  %440 = vadd.xlane.f32.xlu1 %v439_v57 }
 0x113   :  { %827 = vpow2.f32 %v409_v54 }
 0x114   :  { %829 = vpow2.f32 %v403_v58  ;;  %v529_v58 = vld [vmem:[%s1299_s2] sm:$0xff] }
 0x115   :  { %v360_v59 = vpop.xlane.xlu1 %359  ;;  %v354_v60 = vpop.xlane.xlu0 %353 }
 0x116   :  { %v392_v61 = vsub.f32 %v1039_v10, %v360_v59  ;;  %v390_v62 = vsub.f32 %v1037_v8, %v354_v60  ;;  %v530_v59 = vld [vmem:[%s1299_s2 + $0x8] sm:$0xff]  ;;  %v545_v60 = vpack.c.bf16 %v529_v58, %v529_v58 }
 0x118   :  { %v1096_v63 = vpop.eup %825  ;;  %v415_v0 = vmul.f32 1.442695, %v392_v61  ;;  %v411_v1 = vmul.f32 1.442695, %v390_v62  ;;  %v546_v61 = vpack.c.bf16 %v530_v59, %v530_v59  ;;  %v533_v62 = vld [vmem:[%s1299_s2 + $0x20] sm:$0xff] }
 0x119   :  { %v1098_v2 = vpop.eup %827  ;;  %v451_v3 = vsel %vm336_vm1, %v1096_v63, 0.0 }
 0x11a   :  { %831 = vpow2.f32 %v415_v0  ;;  %452 = vadd.xlane.f32.xlu0 %v451_v3  ;;  %v445_v4 = vsel %vm336_vm1, %v1098_v2, 0.0  ;;  %v1105_v9 = vpop.eup %829  ;;  %v534_v0 = vld [vmem:[%s1299_s2 + $0x28] sm:$0xff]  ;;  %v549_v3 = vpack.c.bf16 %v533_v62, %v533_v62  ;;  %v539_v62 = vld [vmem:[%s1299_s2 + $0x50] sm:$0xff] }
 0x11b   :  { %833 = vpow2.f32 %v411_v1  ;;  %446 = vadd.xlane.f32.xlu1 %v445_v4  ;;  %v375_v5 = vpop.xlane.xlu2 %374  ;;  %v436_v20 = vsel %vm336_vm1, %v1105_v9, 0.0  ;;  %v535_v1 = vld [vmem:[%s1299_s2 + $0x30] sm:$0xff]  ;;  %v550_v4 = vpack.c.bf16 %v534_v0, %v534_v0 }
 0x11c   :  { %v397_v6 = vsub.f32 %v1049_v18, %v375_v5  ;;  %v536_v5 = vld [vmem:[%s1299_s2 + $0x38] sm:$0xff] }
 0x11d   :  { %v348_v7 = vpop.xlane.xlu1 %347  ;;  %v363_v8 = vpop.xlane.xlu0 %362 }
 0x11e   :  { %v388_v10 = vsub.f32 %v1047_v17, %v348_v7  ;;  %v425_v11 = vmul.f32 1.442695, %v397_v6  ;;  %v393_v12 = vsub.f32 %v1045_v15, %v363_v8  ;;  %v551_v6 = vpack.c.bf16 %v535_v1, %v535_v1 }
 0x11f   :  { %v568_v7 = vunpack.c.l.b16 %v545_v60  ;;  %v552_v8 = vpack.c.bf16 %v536_v5, %v536_v5  ;;  %v537_v60 = vld [vmem:[%s1299_s2 + $0x40] sm:$0xff] }
 0x120   :  { %v1109_v13 = vpop.eup %831  ;;  %v407_v14 = vmul.f32 1.442695, %v388_v10  ;;  %835 = vpow2.f32 %v425_v11  ;;  %v417_v16 = vmul.f32 1.442695, %v393_v12  ;;  %v569_v10 = vunpack.c.l.b16 %v546_v61  ;;  %v538_v61 = vld [vmem:[%s1299_s2 + $0x48] sm:$0xff] }
 0x121   :  { %v1111_v19 = vpop.eup %833  ;;  %v454_v17 = vsel %vm336_vm1, %v1109_v13, 0.0  ;;  %v624_v11 = vunpack.c.l.b16 %v549_v3  ;;  %v625_v12 = vunpack.c.l.b16 %v550_v4  ;;  %v553_v1 = vpack.c.bf16 %v537_v60, %v537_v60  ;;  %v540_v4 = vld [vmem:[%s1299_s2 + $0x58] sm:$0xff] }
 0x122   :  { %837 = vpow2.f32 %v407_v14  ;;  %437 = vadd.xlane.f32.xlu0 %v436_v20  ;;  %v448_v18 = vsel %vm336_vm1, %v1111_v19, 0.0  ;;  %v652_v14 = vunpack.c.l.b16 %v551_v6  ;;  %v570_v20 = vpack.c.b16 %v569_v10, %v568_v7 }
 0x123   :  { %839 = vpow2.f32 %v417_v16  ;;  %449 = vadd.xlane.f32.xlu2 %v448_v18  ;;  %455 = vadd.xlane.f32.xlu1 %v454_v17  ;;  %v653_v16 = vunpack.c.l.b16 %v552_v8  ;;  %v626_v18 = vpack.c.b16 %v625_v12, %v624_v11  ;;  %v554_v3 = vpack.c.bf16 %v538_v61, %v538_v61 }
 0x124   :  { %582 = vmatpush.bf16.msra.mxu0 %v570_v20  ;;  %v555_v6 = vpack.c.bf16 %v539_v62, %v539_v62  ;;  %v556_v7 = vpack.c.bf16 %v540_v4, %v540_v4  ;;  %v680_v10 = vunpack.c.l.b16 %v553_v1 }
 0x125   :  { %v381_v15 = vpop.xlane.xlu1 %380  ;;  %v384_v21 = vpop.xlane.xlu2 %383  ;;  %v654_v17 = vpack.c.b16 %v653_v16, %v652_v14  ;;  %638 = vmatpush.bf16.msra.mxu2 %v626_v18  ;;  %v681_v11 = vunpack.c.l.b16 %v554_v3 }
 0x126   :  { %v1119_v22 = vpop.eup %835  ;;  %v399_v23 = vsub.f32 %v1057_v25, %v381_v15  ;;  %v400_v24 = vsub.f32 %v1061_v28, %v384_v21  ;;  %v378_v27 = vpop.xlane.xlu0 %377  ;;  %v531_v21 = vld [vmem:[%s1299_s2 + $0x10] sm:$0xff]  ;;  %v708_v14 = vunpack.c.l.b16 %v555_v6  ;;  %v709_v16 = vunpack.c.l.b16 %v556_v7 }
 0x127   :  { %v398_v29 = vsub.f32 %v1059_v26, %v378_v27  ;;  %v469_v30 = vsel %vm336_vm1, %v1119_v22, 0.0  ;;  %666 = vmatpush.bf16.msra.mxu3 %v654_v17  ;;  %v682_v18 = vpack.c.b16 %v681_v11, %v680_v10 }
 0x128   :  { %v1126_v31 = vpop.eup %837  ;;  %v429_v32 = vmul.f32 1.442695, %v399_v23  ;;  %v431_v33 = vmul.f32 1.442695, %v400_v24  ;;  %v532_v23 = vld [vmem:[%s1299_s2 + $0x18] sm:$0xff]  ;;  %v547_v24 = vpack.c.bf16 %v531_v21, %v531_v21  ;;  %v710_v21 = vpack.c.b16 %v709_v16, %v708_v14 }
 0x129   :  { %v1128_v37 = vpop.eup %839  ;;  %v427_v38 = vmul.f32 1.442695, %v398_v29  ;;  %v442_v25 = vsel %vm336_vm1, %v1126_v31, 0.0  ;;  %v548_v27 = vpack.c.bf16 %v532_v23, %v532_v23  ;;  %694 = vmatpush.bf16.msrb.mxu0 %v682_v18 }
 0x12a   :  { %841 = vpow2.f32 %v429_v32  ;;  %470 = vadd.xlane.f32.xlu0 %v469_v30  ;;  %v457_v28 = vsel %vm336_vm1, %v1128_v37, 0.0  ;;  %v596_v29 = vunpack.c.l.b16 %v547_v24 }
 0x12b   :  { %843 = vpow2.f32 %v431_v33  ;;  %443 = vadd.xlane.f32.xlu2 %v442_v25  ;;  %458 = vadd.xlane.f32.xlu1 %v457_v28  ;;  %v597_v30 = vunpack.c.l.b16 %v548_v27  ;;  %v541_v28 = vld [vmem:[%s1299_s2 + $0x60] sm:$0xff] }
 0x12c   :  { %845 = vpow2.f32 %v427_v38 }
 0x12d   :  { %v369_v26 = vpop.xlane.xlu2 %368  ;;  %v366_v39 = vpop.xlane.xlu1 %365  ;;  %v598_v32 = vpack.c.b16 %v597_v30, %v596_v29 }
 0x12e   :  { %v395_v40 = vsub.f32 %v1071_v35, %v369_v26  ;;  %v394_v41 = vsub.f32 %v1069_v34, %v366_v39  ;;  %v372_v42 = vpop.xlane.xlu0 %371  ;;  %v542_v26 = vld [vmem:[%s1299_s2 + $0x68] sm:$0xff]  ;;  %v543_v39 = vld [vmem:[%s1299_s2 + $0x70] sm:$0xff] }
 0x12f   :  { %v396_v43 = vsub.f32 %v1073_v36, %v372_v42  ;;  %610 = vmatpush.bf16.msra.mxu1 %v598_v32  ;;  %v544_v42 = vld [vmem:[%s1299_s2 + $0x78] sm:$0xff] }
 0x130   :  { %v1137_v44 = vpop.eup %841  ;;  %v421_v45 = vmul.f32 1.442695, %v395_v40  ;;  %v419_v46 = vmul.f32 1.442695, %v394_v41  ;;  %v557_v40 = vpack.c.bf16 %v541_v28, %v541_v28  ;;  %v558_v41 = vpack.c.bf16 %v542_v26, %v542_v26 }
 0x131   :  { %v1139_v47 = vpop.eup %843  ;;  %v423_v48 = vmul.f32 1.442695, %v396_v43  ;;  %v475_v35 = vsel %vm336_vm1, %v1137_v44, 0.0  ;;  %v559_v43 = vpack.c.bf16 %v543_v39, %v543_v39 }
 0x132   :  { %v1141_v49 = vpop.eup %845  ;;  %847 = vpow2.f32 %v421_v45  ;;  %v478_v50 = vsel %vm336_vm1, %v1139_v47, 0.0  ;;  %v560_v45 = vpack.c.bf16 %v544_v42, %v544_v42 }
 0x133   :  { %849 = vpow2.f32 %v419_v46  ;;  %479 = vadd.xlane.f32.xlu0 %v478_v50  ;;  %476 = vadd.xlane.f32.xlu2 %v475_v35  ;;  %v472_v34 = vsel %vm336_vm1, %v1141_v49, 0.0  ;;  %v736_v46 = vunpack.c.l.b16 %v557_v40  ;;  %v764_v50 = vunpack.c.l.b16 %v559_v43 }
 0x134   :  { %851 = vpow2.f32 %v423_v48  ;;  %473 = vadd.xlane.f32.xlu1 %v472_v34  ;;  %v737_v48 = vunpack.c.l.b16 %v558_v41  ;;  %v765_v35 = vunpack.c.l.b16 %v560_v45  ;;  %722 = vmatpush.bf16.msrb.mxu1 %v710_v21 }
 0x136   :  { %v738_v34 = vpack.c.b16 %v737_v48, %v736_v46 }
 0x138   :  { %v1149_v36 = vpop.eup %847  ;;  %750 = vmatpush.bf16.msrb.mxu2 %v738_v34 }
 0x139   :  { %v1151_v53 = vpop.eup %849  ;;  %v463_v54 = vsel %vm336_vm1, %v1149_v36, 0.0 }
 0x13a   :  { %v1155_v55 = vpop.eup %851  ;;  %v460_v56 = vsel %vm336_vm1, %v1151_v53, 0.0 }
 0x13b   :  { %464 = vadd.xlane.f32.xlu0 %v463_v54  ;;  %v466_v57 = vsel %vm336_vm1, %v1155_v55, 0.0  ;;  %461 = vadd.xlane.f32.xlu2 %v460_v56  ;;  %v766_v54 = vpack.c.b16 %v765_v35, %v764_v50 }
 0x13c   :  { %467 = vadd.xlane.f32.xlu1 %v466_v57 }
 0x13d   :  { %778 = vmatpush.bf16.msrb.mxu3 %v766_v54 }
 0x184   :  { %v435_v33 = vpop.xlane.xlu2 %434 }
 0x185   :  { %v441_v15 = vpop.xlane.xlu1 %440  ;;  %853 = vrcp.f32 %v435_v33 }
 0x18b   :  { %v854_v57 = vpop.eup %853 }
 0x18c   :  { %v497_v8 = vmul.f32 %v854_v57, %v1085_v51 }
 0x18d   :  { %v453_v38 = vpop.xlane.xlu0 %452 }
 0x18e   :  { %v447_v25 = vpop.xlane.xlu1 %446  ;;  %v513_v24 = vpack.c.bf16 %v497_v8, %v497_v8 }
 0x18f   :  { %855 = vrcp.f32 %v447_v25 }
 0x190   :  { %857 = vrcp.f32 %v453_v38  ;;  %v563_v26 = vunpack.c.l.b16 %v513_v24 }
 0x195   :  { %v438_v56 = vpop.xlane.xlu0 %437  ;;  %v856_v0 = vpop.eup %855 }
 0x196   :  { %859 = vrcp.f32 %v438_v56  ;;  %v450_v58 = vpop.xlane.xlu2 %449  ;;  %v456_v59 = vpop.xlane.xlu1 %455  ;;  %v501_v12 = vmul.f32 %v856_v0, %v1098_v2 }
 0x197   :  { %861 = vrcp.f32 %v450_v58  ;;  %v858_v5 = vpop.eup %857 }
 0x198   :  { %863 = vrcp.f32 %v456_v59  ;;  %v503_v20 = vmul.f32 %v858_v5, %v1096_v63  ;;  %v517_v51 = vpack.c.bf16 %v501_v12, %v501_v12 }
 0x199   :  { %865 = vrcp.f32 %v441_v15 }
 0x19a   :  { %v519_v38 = vpack.c.bf16 %v503_v20, %v503_v20  ;;  %v619_v41 = vunpack.c.l.b16 %v517_v51 }
 0x19c   :  { %v860_v17 = vpop.eup %859  ;;  %v647_v43 = vunpack.c.l.b16 %v519_v38 }
 0x19d   :  { %v862_v23 = vpop.eup %861  ;;  %v498_v27 = vmul.f32 %v860_v17, %v1105_v9  ;;  %v471_v29 = vpop.xlane.xlu0 %470 }
 0x19e   :  { %v864_v30 = vpop.eup %863  ;;  %v502_v15 = vmul.f32 %v862_v23, %v1111_v19  ;;  %v444_v32 = vpop.xlane.xlu2 %443 }
 0x19f   :  { %v459_v33 = vpop.xlane.xlu1 %458  ;;  %v866_v2 = vpop.eup %865  ;;  %v514_v25 = vpack.c.bf16 %v498_v27, %v498_v27  ;;  %v504_v63 = vmul.f32 %v864_v30, %v1109_v13  ;;  %867 = vrcp.f32 %v444_v32 }
 0x1a0   :  { %v518_v28 = vpack.c.bf16 %v502_v15, %v502_v15  ;;  %v499_v9 = vmul.f32 %v866_v2, %v1087_v52  ;;  %869 = vrcp.f32 %v471_v29 }
 0x1a1   :  { %v564_v39 = vunpack.c.l.b16 %v514_v25  ;;  %v520_v40 = vpack.c.bf16 %v504_v63, %v504_v63 }
 0x1a2   :  { %v620_v42 = vunpack.c.l.b16 %v518_v28  ;;  %v515_v35 = vpack.c.bf16 %v499_v9, %v499_v9 }
 0x1a3   :  { %v565_v45 = vpack.c.b16 %v564_v39, %v563_v26  ;;  %v648_v19 = vunpack.c.l.b16 %v520_v40 }
 0x1a4   :  { %v621_v46 = vpack.c.b16 %v620_v42, %v619_v41  ;;  %v591_v58 = vunpack.c.l.b16 %v515_v35 }
 0x1a5   :  { %v868_v48 = vpop.eup %867  ;;  %v649_v50 = vpack.c.b16 %v648_v19, %v647_v43  ;;  %813 = vmatmul.msk.bf16.vlgmr.msra.gmra.mxu0 %vm336_vm1, %v565_v45 }
 0x1a6   :  { %v500_v13 = vmul.f32 %v868_v48, %v1126_v31  ;;  %v480_v34 = vpop.xlane.xlu0 %479  ;;  %v477_v54 = vpop.xlane.xlu2 %476  ;;  %815 = vmatmul.msk.bf16.vlgmr.msra.gmra.mxu2 %vm336_vm1, %v621_v46 }
 0x1a7   :  { %871 = vrcp.f32 %v480_v34  ;;  %816 = vmatmul.msk.bf16.vlgmr.msra.gmra.mxu3 %vm336_vm1, %v649_v50  ;;  %v474_v52 = vpop.xlane.xlu1 %473  ;;  %v870_v57 = vpop.eup %869 }
 0x1a8   :  { %v516_v56 = vpack.c.bf16 %v500_v13, %v500_v13  ;;  %873 = vrcp.f32 %v477_v54  ;;  %v509_v60 = vmul.f32 %v870_v57, %v1119_v22 }
 0x1a9   :  { %875 = vrcp.f32 %v474_v52 }
 0x1aa   :  { %v592_v59 = vunpack.c.l.b16 %v516_v56  ;;  %877 = vrcp.f32 %v459_v33  ;;  %v525_v8 = vpack.c.bf16 %v509_v60, %v509_v60 }
 0x1ac   :  { %v593_v61 = vpack.c.b16 %v592_v59, %v591_v58  ;;  %v731_v20 = vunpack.c.l.b16 %v525_v8 }
 0x1ad   :  { %v872_v62 = vpop.eup %871 }
 0x1ae   :  { %v874_v31 = vpop.eup %873  ;;  %v512_v0 = vmul.f32 %v872_v62, %v1139_v47  ;;  %v465_v1 = vpop.xlane.xlu0 %464  ;;  %814 = vmatmul.msk.bf16.vlgmr.msra.gmra.mxu1 %vm336_vm1, %v593_v61 }
 0x1af   :  { %v462_v3 = vpop.xlane.xlu2 %461  ;;  %v876_v4 = vpop.eup %875  ;;  %v511_v5 = vmul.f32 %v874_v31, %v1137_v44  ;;  %879 = vrcp.f32 %v465_v1 }
 0x1b0   :  { %v468_v6 = vpop.xlane.xlu1 %467  ;;  %v878_v7 = vpop.eup %877  ;;  %v528_v10 = vpack.c.bf16 %v512_v0, %v512_v0  ;;  %v510_v11 = vmul.f32 %v876_v4, %v1141_v49  ;;  %881 = vrcp.f32 %v462_v3 }
 0x1b1   :  { %v527_v22 = vpack.c.bf16 %v511_v5, %v511_v5  ;;  %883 = vrcp.f32 %v468_v6  ;;  %v505_v47 = vmul.f32 %v878_v7, %v1128_v37 }
 0x1b2   :  { %v526_v12 = vpack.c.bf16 %v510_v11, %v510_v11  ;;  %v760_v14 = vunpack.c.l.b16 %v528_v10 }
 0x1b3   :  { %v759_v16 = vunpack.c.l.b16 %v527_v22  ;;  %v521_v29 = vpack.c.bf16 %v505_v47, %v505_v47 }
 0x1b4   :  { %v732_v18 = vunpack.c.l.b16 %v526_v12 }
 0x1b5   :  { %v880_v17 = vpop.eup %879  ;;  %v761_v21 = vpack.c.b16 %v760_v14, %v759_v16  ;;  %v675_v32 = vunpack.c.l.b16 %v521_v29 }
 0x1b6   :  { %v882_v44 = vpop.eup %881  ;;  %v733_v23 = vpack.c.b16 %v732_v18, %v731_v20  ;;  %v507_v24 = vmul.f32 %v880_v17, %v1149_v36 }
 0x1b7   :  { %v884_v27 = vpop.eup %883  ;;  %v506_v49 = vmul.f32 %v882_v44, %v1151_v53  ;;  %820 = vmatmul.msk.bf16.vlgmr.msrb.gmra.mxu3 %vm336_vm1, %v761_v21 }
 0x1b8   :  { %v523_v30 = vpack.c.bf16 %v507_v24, %v507_v24  ;;  %v508_v51 = vmul.f32 %v884_v27, %v1155_v55  ;;  %819 = vmatmul.msk.bf16.vlgmr.msrb.gmra.mxu2 %vm336_vm1, %v733_v23 }
 0x1b9   :  { %v522_v37 = vpack.c.bf16 %v506_v49, %v506_v49 }
 0x1ba   :  { %v524_v15 = vpack.c.bf16 %v508_v51, %v508_v51  ;;  %v703_v2 = vunpack.c.l.b16 %v523_v30 }
 0x1bb   :  { %v676_v33 = vunpack.c.l.b16 %v522_v37 }
 0x1bc   :  { %v704_v38 = vunpack.c.l.b16 %v524_v15 }
 0x1bd   :  { %v677_v25 = vpack.c.b16 %v676_v33, %v675_v32 }
 0x1be   :  { %v705_v63 = vpack.c.b16 %v704_v38, %v703_v2 }
 0x1bf   :  { %817 = vmatmul.msk.bf16.vlgmr.msrb.gmra.mxu0 %vm336_vm1, %v677_v25 }
 0x1c0   :  { %818 = vmatmul.msk.bf16.vlgmr.msrb.gmra.mxu1 %vm336_vm1, %v705_v63 }
 0x222   :  { %v584_v36 = vpop.f32.mrf.mxu0 }
 0x223   :  { %785 = vst.msk [vmem:[%s1300_s3] sm:$0xff] %vm89_vm0, %v584_v36 }
 0x229   :  { %v640_v53 = vpop.f32.mrf.mxu2 }
 0x22a   :  { %v586_v55 = vpop.f32.mrf.mxu0  ;;  %789 = vst.msk [vmem:[%s1300_s3 + $0x20] sm:$0xff] %vm89_vm0, %v640_v53  ;;  %v668_v28 = vpop.f32.mrf.mxu3 }
 0x22b   :  { %786 = vst.msk [vmem:[%s1300_s3 + $0x8] sm:$0xff] %vm89_vm0, %v586_v55  ;;  %v612_v26 = vpop.f32.mrf.mxu1 }
 0x22c   :  { %791 = vst.msk [vmem:[%s1300_s3 + $0x30] sm:$0xff] %vm89_vm0, %v668_v28 }
 0x22d   :  { %787 = vst.msk [vmem:[%s1300_s3 + $0x10] sm:$0xff] %vm89_vm0, %v612_v26 }
 0x231   :  { %v642_v39 = vpop.f32.mrf.mxu2 }
 0x232   :  { %790 = vst.msk [vmem:[%s1300_s3 + $0x28] sm:$0xff] %vm89_vm0, %v642_v39  ;;  %v670_v40 = vpop.f32.mrf.mxu3 }
 0x233   :  { %792 = vst.msk [vmem:[%s1300_s3 + $0x38] sm:$0xff] %vm89_vm0, %v670_v40  ;;  %v614_v9 = vpop.f32.mrf.mxu1 }
 0x234   :  { %788 = vst.msk [vmem:[%s1300_s3 + $0x18] sm:$0xff] %vm89_vm0, %v614_v9 }
 0x23a   :  { %v780_v41 = vpop.f32.mrf.mxu3 }
 0x23b   :  { %v752_v42 = vpop.f32.mrf.mxu2  ;;  %799 = vst.msk [vmem:[%s1300_s3 + $0x70] sm:$0xff] %vm89_vm0, %v780_v41 }
 0x23c   :  { %797 = vst.msk [vmem:[%s1300_s3 + $0x60] sm:$0xff] %vm89_vm0, %v752_v42  ;;  %v696_v43 = vpop.f32.mrf.mxu0 }
 0x23d   :  { %793 = vst.msk [vmem:[%s1300_s3 + $0x40] sm:$0xff] %vm89_vm0, %v696_v43  ;;  %v724_v45 = vpop.f32.mrf.mxu1 }
 0x23e   :  { %795 = vst.msk [vmem:[%s1300_s3 + $0x50] sm:$0xff] %vm89_vm0, %v724_v45 }
 0x242   :  { %v782_v19 = vpop.f32.mrf.mxu3 }
 0x243   :  { %v754_v46 = vpop.f32.mrf.mxu2  ;;  %800 = vst.msk [vmem:[%s1300_s3 + $0x78] sm:$0xff] %vm89_vm0, %v782_v19 }
 0x244   :  { %798 = vst.msk [vmem:[%s1300_s3 + $0x68] sm:$0xff] %vm89_vm0, %v754_v46  ;;  %v698_v48 = vpop.f32.mrf.mxu0 }
 0x245   :  { %794 = vst.msk [vmem:[%s1300_s3 + $0x48] sm:$0xff] %vm89_vm0, %v698_v48  ;;  %v726_v50 = vpop.f32.mrf.mxu1 }
 0x246   :  { %796 = vst.msk [vmem:[%s1300_s3 + $0x58] sm:$0xff] %vm89_vm0, %v726_v50 }

// kernel: forward.20
= control target key start
LH: loop header
LB: loop body
LE: loop exit
PB: predicated region body
PF: predicated region fallthrough
CT: control target
= control target key end

     0   :  { %s1399_s1 = inlined_call_operand.vmem [shape: f32[128,256], index: 1, kind: input, shape index: {}]   ;;  %s1400_s0 = inlined_call_operand.vmem [shape: f32[32,128], index: 0, kind: input, shape index: {}]   ;;  %s1401_s4 = inlined_call_operand.vmem [shape: f32[1,128], index: 4, kind: input, shape index: {}]   ;;  %s1402_s2 = inlined_call_operand.vmem [shape: f32[1,256], index: 2, kind: input, shape index: {}]   ;;  %s1403_s3 = inlined_call_operand.vmem [shape: f32[256,128], index: 3, kind: input, shape index: {}]   ;;  %s1404_s5 = inlined_call_operand.vmem [shape: f32[1,128], index: 5, kind: input, shape index: {}]   ;;  %s1405_s6 = inlined_call_operand.vmem [shape: f32[1,128], index: 6, kind: input, shape index: {}]   ;;  %s1406_s7 = inlined_call_operand.vmem [shape: f32[32,128], index: 7, kind: output, shape index: {}]  }
   0x1   :  { %v58_v0 = vld [vmem:[%s1399_s1 + $0xe0] sm:$0xff]  ;;  %v60_v1 = vld [vmem:[%s1399_s1 + $0xf0] sm:$0xff]  ;;  %v59_v2 = vld [vmem:[%s1399_s1 + $0xe8] sm:$0xff] }
   0x2   :  { %v78_v3 = vpack.c.bf16 %v60_v1, %v58_v0  ;;  %v61_v4 = vld [vmem:[%s1399_s1 + $0xf8] sm:$0xff]  ;;  %v54_v5 = vld [vmem:[%s1399_s1 + $0xc0] sm:$0xff]  ;;  %v56_v6 = vld [vmem:[%s1399_s1 + $0xd0] sm:$0xff] }
   0x3   :  { %v79_v7 = vpack.c.bf16 %v61_v4, %v59_v2  ;;  %v55_v8 = vld [vmem:[%s1399_s1 + $0xc8] sm:$0xff]  ;;  %v57_v9 = vld [vmem:[%s1399_s1 + $0xd8] sm:$0xff]  ;;  %v76_v10 = vpack.c.bf16 %v56_v6, %v54_v5  ;;  %v50_v12 = vld [vmem:[%s1399_s1 + $0xa0] sm:$0xff] }
   0x4   :  { %86 = vmatpush.bf16.msra.mxu0 %v78_v3  ;;  %v77_v11 = vpack.c.bf16 %v57_v9, %v55_v8  ;;  %v52_v13 = vld [vmem:[%s1399_s1 + $0xb0] sm:$0xff]  ;;  %v51_v14 = vld [vmem:[%s1399_s1 + $0xa8] sm:$0xff]  ;;  %v53_v15 = vld [vmem:[%s1399_s1 + $0xb8] sm:$0xff] }
   0x5   :  { %105 = vmatpush.bf16.msra.mxu1 %v79_v7  ;;  %v74_v16 = vpack.c.bf16 %v52_v13, %v50_v12  ;;  %v75_v17 = vpack.c.bf16 %v53_v15, %v51_v14  ;;  %v46_v18 = vld [vmem:[%s1399_s1 + $0x80] sm:$0xff]  ;;  %v48_v19 = vld [vmem:[%s1399_s1 + $0x90] sm:$0xff]  ;;  %v47_v20 = vld [vmem:[%s1399_s1 + $0x88] sm:$0xff] }
   0x6   :  { %v49_v21 = vld [vmem:[%s1399_s1 + $0x98] sm:$0xff]  ;;  %v72_v22 = vpack.c.bf16 %v48_v19, %v46_v18  ;;  %v42_v24 = vld [vmem:[%s1399_s1 + $0x60] sm:$0xff]  ;;  %v44_v25 = vld [vmem:[%s1399_s1 + $0x70] sm:$0xff] }
   0x7   :  { %v73_v23 = vpack.c.bf16 %v49_v21, %v47_v20  ;;  %v43_v26 = vld [vmem:[%s1399_s1 + $0x68] sm:$0xff]  ;;  %v45_v27 = vld [vmem:[%s1399_s1 + $0x78] sm:$0xff]  ;;  %v70_v28 = vpack.c.bf16 %v44_v25, %v42_v24  ;;  %v38_v30 = vld [vmem:[%s1399_s1 + $0x40] sm:$0xff] }
   0x8   :  { %87 = vmatpush.bf16.msra.mxu0 %v76_v10  ;;  %v71_v29 = vpack.c.bf16 %v45_v27, %v43_v26  ;;  %v40_v31 = vld [vmem:[%s1399_s1 + $0x50] sm:$0xff]  ;;  %v39_v32 = vld [vmem:[%s1399_s1 + $0x48] sm:$0xff]  ;;  %v41_v33 = vld [vmem:[%s1399_s1 + $0x58] sm:$0xff] }
   0x9   :  { %106 = vmatpush.bf16.msra.mxu1 %v77_v11  ;;  %v68_v34 = vpack.c.bf16 %v40_v31, %v38_v30  ;;  %v69_v35 = vpack.c.bf16 %v41_v33, %v39_v32  ;;  %v34_v36 = vld [vmem:[%s1399_s1 + $0x20] sm:$0xff]  ;;  %v36_v37 = vld [vmem:[%s1399_s1 + $0x30] sm:$0xff]  ;;  %v35_v38 = vld [vmem:[%s1399_s1 + $0x28] sm:$0xff] }
   0xa   :  { %v37_v39 = vld [vmem:[%s1399_s1 + $0x38] sm:$0xff]  ;;  %v66_v40 = vpack.c.bf16 %v36_v37, %v34_v36  ;;  %v30_v42 = vld [vmem:[%s1399_s1] sm:$0xff]  ;;  %v32_v43 = vld [vmem:[%s1399_s1 + $0x10] sm:$0xff] }
   0xb   :  { %v67_v41 = vpack.c.bf16 %v37_v39, %v35_v38  ;;  %v31_v44 = vld [vmem:[%s1399_s1 + $0x8] sm:$0xff]  ;;  %v33_v45 = vld [vmem:[%s1399_s1 + $0x18] sm:$0xff]  ;;  %v64_v46 = vpack.c.bf16 %v32_v43, %v30_v42  ;;  %v839_v47 = vld [vmem:[%s1400_s0] sm:$0xff] }
   0xc   :  { %88 = vmatpush.bf16.msra.mxu0 %v74_v16  ;;  %1414 = vst [vmem:[#allocation2_spill] sm:$0xff] %v839_v47  ;;  %v844_v48 = vld [vmem:[%s1400_s0 + $0x8] sm:$0xff]  ;;  %v65_v49 = vpack.c.bf16 %v33_v45, %v31_v44  ;;  %v851_v51 = vld [vmem:[%s1400_s0 + $0x10] sm:$0xff]  ;;  %v856_v52 = vld [vmem:[%s1400_s0 + $0x18] sm:$0xff] }
   0xd   :  { %107 = vmatpush.bf16.msra.mxu1 %v75_v17  ;;  %1415 = vst [vmem:[#allocation3_spill] sm:$0xff] %v844_v48  ;;  %v62_v50 = vpack.c.bf16 %v844_v48, %v839_v47  ;;  %v63_v53 = vpack.c.bf16 %v856_v52, %v851_v51  ;;  %v80_v54 = vld [vmem:[%s1402_s2] sm:$0x3]  ;;  %v458_v9 = vld [vmem:[%s1403_s3 + $0x70] sm:$0xff]  ;;  %v459_v10 = vld [vmem:[%s1403_s3 + $0x78] sm:$0xff] }
   0xe   :  { %1416 = vst [vmem:[#allocation4_spill] sm:$0xff] %v851_v51  ;;  %v863_v55 = vperm.slane %v80_v54, 0  ;;  %v865_v56 = vperm.slane %v80_v54, 1  ;;  %v474_v11 = vld [vmem:[%s1403_s3 + $0xf0] sm:$0xff]  ;;  %v475_v13 = vld [vmem:[%s1403_s3 + $0xf8] sm:$0xff]  ;;  %v487_v18 = vpack.c.bf16 %v459_v10, %v458_v9  ;;  %v472_v36 = vld [vmem:[%s1403_s3 + $0xe0] sm:$0xff] }
   0xf   :  { %1417 = vst [vmem:[#allocation5_spill] sm:$0xff] %v856_v52  ;;  %v495_v19 = vpack.c.bf16 %v475_v13, %v474_v11  ;;  %v473_v37 = vld [vmem:[%s1403_s3 + $0xe8] sm:$0xff]  ;;  %v454_v42 = vld [vmem:[%s1403_s3 + $0x50] sm:$0xff]  ;;  %v455_v43 = vld [vmem:[%s1403_s3 + $0x58] sm:$0xff] }
  0x10   :  { %89 = vmatpush.bf16.msra.mxu0 %v72_v22  ;;  %v456_v22 = vld [vmem:[%s1403_s3 + $0x60] sm:$0xff]  ;;  %500 = vmatpush.bf16.msra.mxu2 %v487_v18  ;;  %v1120_v51 = vld [vmem:[%s1403_s3 + $0x8] sm:$0xff] }
  0x11   :  { %108 = vmatpush.bf16.msra.mxu1 %v73_v23  ;;  %v457_v23 = vld [vmem:[%s1403_s3 + $0x68] sm:$0xff]  ;;  %519 = vmatpush.bf16.msra.mxu3 %v495_v19  ;;  %v1115_v52 = vld [vmem:[%s1403_s3] sm:$0xff] }
  0x12   :  { %v486_v25 = vpack.c.bf16 %v457_v23, %v456_v22 }
  0x14   :  { %90 = vmatpush.bf16.msra.mxu0 %v70_v28  ;;  %501 = vmatpush.bf16.msra.mxu2 %v486_v25 }
  0x15   :  { %109 = vmatpush.bf16.msra.mxu1 %v71_v29 }
  0x18   :  { %91 = vmatpush.bf16.msra.mxu0 %v68_v34 }
  0x19   :  { %110 = vmatpush.bf16.msra.mxu1 %v69_v35 }
  0x1c   :  { %92 = vmatpush.bf16.msra.mxu0 %v66_v40 }
  0x1d   :  { %111 = vmatpush.bf16.msra.mxu1 %v67_v41 }
  0x20   :  { %93 = vmatpush.bf16.msra.mxu0 %v64_v46 }
  0x21   :  { %112 = vmatpush.bf16.msra.mxu1 %v65_v49 }
  0x23   :  { %94 = vmatmul.bf16.vlgmr.msra.gmra.mxu0 %v62_v50 }
  0x24   :  { %113 = vmatmul.bf16.vlgmr.msra.gmra.mxu1 %v62_v50 }
  0x33   :  { %99 = vmatmul.bf16.gmra.mxu0 %v63_v53 }
  0x34   :  { %118 = vmatmul.bf16.gmra.mxu1 %v63_v53 }
  0xa0   :  { %v95_v57 = vpop.f32.mrf.mxu0 }
  0xa1   :  { %v96_v58 = vadd.f32 %v95_v57, %v863_v55  ;;  %v114_v59 = vpop.f32.mrf.mxu1 }
  0xa2   :  { %v115_v60 = vadd.f32 %v114_v59, %v865_v56  ;;  %v470_v59 = vld [vmem:[%s1403_s3 + $0xd0] sm:$0xff] }
  0xa3   :  { %v869_v61 = vmul.f32 0.70710677, %v96_v58  ;;  %v932_v39 = vmul.f32 0.5, %v96_v58  ;;  %v494_v58 = vpack.c.bf16 %v473_v37, %v472_v36 }
  0xa4   :  { %v871_v62 = vmul.f32 0.70710677, %v115_v60  ;;  %v934_v41 = vmul.f32 0.5, %v115_v60  ;;  %v471_v60 = vld [vmem:[%s1403_s3 + $0xd8] sm:$0xff] }
  0xa5   :  { %v140_v63 = vand.u32 2147483647, %v869_v61  ;;  %520 = vmatpush.bf16.msra.mxu3 %v494_v58 }
  0xa6   :  { %v141_v0 = vand.u32 2147483647, %v871_v62 }
  0xa7   :  { %v148_v1 = vmul.f32 0.3275911, %v140_v63  ;;  %v356_v14 = vsub.f32 0.0, %v140_v63 }
  0xa8   :  { %v149_v2 = vmul.f32 0.3275911, %v141_v0  ;;  %v97_v3 = vpop.f32.mrf.mxu0  ;;  %v357_v16 = vsub.f32 0.0, %v141_v0 }
  0xa9   :  { %v876_v4 = vadd.f32 %v97_v3, %v863_v55  ;;  %v116_v5 = vpop.f32.mrf.mxu1  ;;  %v878_v6 = vadd.f32 1.0, %v148_v1  ;;  %v364_v26 = vmul.f32 %v356_v14, %v140_v63 }
  0xaa   :  { %v881_v7 = vadd.f32 %v116_v5, %v865_v56  ;;  %v883_v8 = vadd.f32 1.0, %v149_v2  ;;  %v365_v29 = vmul.f32 %v357_v16, %v141_v0  ;;  %v485_v2 = vpack.c.bf16 %v455_v43, %v454_v42 }
  0xab   :  { %v895_v12 = vmul.f32 0.70710677, %v876_v4  ;;  %657 = vrcp.f32 %v878_v6  ;;  %v175_v28 = vand.u32 2147483648, %v878_v6  ;;  %v372_v40 = vmul.f32 1.442695, %v364_v26 }
  0xac   :  { %v902_v15 = vmul.f32 0.70710677, %v881_v7  ;;  %659 = vrcp.f32 %v883_v8  ;;  %v190_v46 = vand.u32 2147483648, %v883_v8  ;;  %v374_v49 = vmul.f32 1.442695, %v365_v29  ;;  %502 = vmatpush.bf16.msra.mxu2 %v485_v2 }
  0xad   :  { %v142_v17 = vand.u32 2147483647, %v895_v12  ;;  %v945_v45 = vor.u32 1.1754944e-38, %v175_v28  ;;  %v966_v3 = vmul.f32 0.5, %v876_v4  ;;  %vm169_vm1 = vweird.f32 %v878_v6 }
  0xae   :  { %v143_v20 = vand.u32 2147483647, %v902_v15  ;;  %v974_v11 = vor.u32 1.1754944e-38, %v190_v46  ;;  %vm184_vm5 = vweird.f32 %v883_v8 }
  0xaf   :  { %v150_v24 = vmul.f32 0.3275911, %v142_v17  ;;  %v358_v35 = vsub.f32 0.0, %v142_v17 }
  0xb0   :  { %v100_v21 = vpop.f32.mrf.mxu0  ;;  %v151_v27 = vmul.f32 0.3275911, %v143_v20  ;;  %v359_v50 = vsub.f32 0.0, %v143_v20 }
  0xb1   :  { %v914_v30 = vadd.f32 1.0, %v150_v24  ;;  %v119_v31 = vpop.f32.mrf.mxu1  ;;  %v916_v32 = vpop.eup %657  ;;  %v921_v34 = vadd.f32 %v100_v21, %v863_v55  ;;  %v366_v0 = vmul.f32 %v358_v35, %v142_v17 }
  0xb2   :  { %v918_v33 = vadd.f32 1.0, %v151_v27  ;;  %v930_v38 = vpop.eup %659  ;;  %v165_v44 = vmul.f32 %v916_v32, %v878_v6  ;;  %v952_v54 = vadd.f32 %v119_v31, %v865_v56  ;;  %v367_v16 = vmul.f32 %v359_v50, %v143_v20 }
  0xb3   :  { %661 = vrcp.f32 %v914_v30  ;;  %v949_v53 = vmul.f32 0.70710677, %v921_v34  ;;  %v180_v63 = vmul.f32 %v930_v38, %v883_v8  ;;  %v205_v21 = vand.u32 2147483648, %v914_v30 }
  0xb4   :  { %663 = vrcp.f32 %v918_v33  ;;  %1418 = vst [vmem:[#allocation6_spill] sm:$0xff] %v952_v54  ;;  %v970_v9 = vmul.f32 0.70710677, %v952_v54  ;;  %v166_v4 = vsub.f32 1.0, %v165_v44  ;;  %v376_v22 = vmul.f32 1.442695, %v366_v0 }
  0xb5   :  { %665 = vpow2.f32 %v372_v40  ;;  %v144_v5 = vand.u32 2147483647, %v949_v53  ;;  %v181_v19 = vsub.f32 1.0, %v180_v63  ;;  %v220_v26 = vand.u32 2147483648, %v918_v33  ;;  %v469_v63 = vld [vmem:[%s1403_s3 + $0xc8] sm:$0xff] }
  0xb6   :  { %667 = vpow2.f32 %v374_v49  ;;  %v145_v23 = vand.u32 2147483647, %v970_v9  ;;  %v996_v37 = vmul.f32 %v916_v32, %v166_v4  ;;  %v999_v40 = vmul.f32 0.5, %v881_v7 }
  0xb7   :  { %v152_v17 = vmul.f32 0.3275911, %v144_v5  ;;  %v360_v18 = vsub.f32 0.0, %v144_v5  ;;  %v1007_v44 = vor.u32 1.1754944e-38, %v205_v21  ;;  %v378_v46 = vmul.f32 1.442695, %v367_v16 }
  0xb8   :  { %v102_v57 = vpop.f32.mrf.mxu0  ;;  %v153_v31 = vmul.f32 0.3275911, %v145_v23  ;;  %v361_v35 = vsub.f32 0.0, %v145_v23  ;;  %vm170_vm0 = vweird.f32 %v916_v32  ;;  %v1016_v7 = vmul.f32 %v930_v38, %v181_v19 }
  0xb9   :  { %v963_v1 = vadd.f32 %v102_v57, %v863_v55  ;;  %v972_v10 = vpop.eup %661  ;;  %v493_v55 = vpack.c.bf16 %v471_v60, %v470_v59  ;;  %v121_v24 = vpop.f32.mrf.mxu1  ;;  %v986_v27 = vadd.f32 1.0, %v152_v17  ;;  %v368_v29 = vmul.f32 %v360_v18, %v144_v5  ;;  %v452_v57 = vld [vmem:[%s1403_s3 + $0x40] sm:$0xff]  ;;  %v453_v59 = vld [vmem:[%s1403_s3 + $0x48] sm:$0xff]  ;;  %v450_v18 = vld [vmem:[%s1403_s3 + $0x30] sm:$0xff] }
  0xba   :  { %v979_v14 = vpop.eup %663  ;;  %v195_v25 = vmul.f32 %v972_v10, %v914_v30  ;;  %v1003_v42 = vadd.f32 %v121_v24, %v865_v56  ;;  %v1009_v49 = vadd.f32 1.0, %v153_v31  ;;  %v369_v50 = vmul.f32 %v361_v35, %v145_v23  ;;  %v468_v60 = vld [vmem:[%s1403_s3 + $0xc0] sm:$0xff]  ;;  %v451_v24 = vld [vmem:[%s1403_s3 + $0x38] sm:$0xff]  ;;  %vm1145_vm9 = vmor %vm169_vm1, %vm170_vm0 }
  0xbb   :  { %v977_v13 = vmul.f32 0.70710677, %v963_v1  ;;  %521 = vmatpush.bf16.msra.mxu3 %v493_v55  ;;  %v991_v20 = vmul.f32 %v979_v14, %v918_v33  ;;  %v993_v36 = vpop.eup %665  ;;  %669 = vrcp.f32 %v986_v27  ;;  %v1028_v5 = vor.u32 1.1754944e-38, %v220_v26  ;;  %v467_v26 = vld [vmem:[%s1403_s3 + $0xb8] sm:$0xff] }
  0xbc   :  { %1419 = vst [vmem:[#allocation7_spill] sm:$0xff] %v1003_v42  ;;  %v1005_v43 = vpop.eup %667  ;;  %671 = vpow2.f32 %v376_v22  ;;  %v196_v0 = vsub.f32 1.0, %v195_v25  ;;  %v380_v55 = vmul.f32 1.442695, %v368_v29  ;;  %v1035_v17 = vmul.f32 0.70710677, %v1003_v42 }
  0xbd   :  { %v146_v28 = vand.u32 2147483647, %v977_v13  ;;  %v211_v2 = vsub.f32 1.0, %v991_v20  ;;  %673 = vrcp.f32 %v1009_v49  ;;  %v235_v19 = vand.u32 2147483648, %v986_v27  ;;  %v466_v25 = vld [vmem:[%s1403_s3 + $0xb0] sm:$0xff] }
  0xbe   :  { %1420 = vst [vmem:[#allocation8_spill] sm:$0xff] %v1035_v17  ;;  %v382_v21 = vmul.f32 1.442695, %v369_v50  ;;  %v484_v22 = vpack.c.bf16 %v453_v59, %v452_v57  ;;  %v492_v23 = vpack.c.bf16 %v469_v63, %v468_v60  ;;  %v250_v20 = vand.u32 2147483648, %v1009_v49  ;;  %v448_v57 = vld [vmem:[%s1403_s3 + $0x20] sm:$0xff] }
  0xbf   :  { %v154_v56 = vmul.f32 0.3275911, %v146_v28  ;;  %v362_v58 = vsub.f32 0.0, %v146_v28  ;;  %vm185_vm2 = vweird.f32 %v930_v38  ;;  %vm199_vm3 = vweird.f32 %v914_v30  ;;  %v464_v63 = vld [vmem:[%s1403_s3 + $0xa0] sm:$0xff] }
  0xc0   :  { %vm200_vm4 = vweird.f32 %v972_v10  ;;  %v1061_v50 = vand.u32 2147483647, %v1035_v17  ;;  %503 = vmatpush.bf16.msra.mxu2 %v484_v22  ;;  %522 = vmatpush.bf16.msra.mxu3 %v492_v23  ;;  %v483_v59 = vpack.c.bf16 %v451_v24, %v450_v18  ;;  %v491_v60 = vpack.c.bf16 %v467_v26, %v466_v25  ;;  %v1089_v18 = vld [vmem:[%s1403_s3 + $0x10] sm:$0xff]  ;;  %v447_v23 = vld [vmem:[%s1403_s3 + $0x18] sm:$0xff]  ;;  %vm1198_vm15 = vmor %vm184_vm5, %vm185_vm2 }
  0xc1   :  { %v1032_v4 = vadd.f32 1.0, %v154_v56  ;;  %v370_v16 = vmul.f32 %v362_v58, %v146_v28  ;;  %v1050_v28 = vpop.eup %669  ;;  %v197_v58 = vmul.f32 %v972_v10, %v196_v0  ;;  %v1080_v22 = vmul.f32 %v979_v14, %v211_v2  ;;  %vm1174_vm13 = vmor %vm199_vm3, %vm200_vm4 }
  0xc2   :  { %v225_v35 = vmul.f32 %v1050_v28, %v986_v27  ;;  %v1066_v56 = vpop.eup %671  ;;  %vm215_vm6 = vweird.f32 %v979_v14  ;;  %v1083_v0 = vor.u32 1.1754944e-38, %v235_v19  ;;  %v1096_v25 = vor.u32 1.1754944e-38, %v250_v20  ;;  %v462_v19 = vld [vmem:[%s1403_s3 + $0x90] sm:$0xff] }
  0xc3   :  { %675 = vrcp.f32 %v1032_v4  ;;  %v265_v29 = vand.u32 2147483648, %v1032_v4  ;;  %v384_v31 = vmul.f32 1.442695, %v370_v16  ;;  %v465_v16 = vld [vmem:[%s1403_s3 + $0xa8] sm:$0xff]  ;;  %v1094_v24 = vpop.eup %673  ;;  %vm214_vm7 = vweird.f32 %v918_v33 }
  0xc4   :  { %677 = vpow2.f32 %v378_v46  ;;  %v449_v46 = vld [vmem:[%s1403_s3 + $0x28] sm:$0xff]  ;;  %v226_v2 = vsub.f32 1.0, %v225_v35  ;;  %vm230_vm8 = vweird.f32 %v1050_v28  ;;  %v240_v35 = vmul.f32 %v1094_v24, %v1009_v49  ;;  %504 = vmatpush.bf16.msra.mxu2 %v483_v59  ;;  %523 = vmatpush.bf16.msra.mxu3 %v491_v60  ;;  %vm216_vm2 = vmor %vm214_vm7, %vm215_vm6 }
  0xc5   :  { %679 = vpow2.f32 %v380_v55  ;;  %v155_v55 = vmul.f32 0.3275911, %v1061_v50  ;;  %v1098_v26 = vor.u32 1.1754944e-38, %v265_v29  ;;  %v482_v29 = vpack.c.bf16 %v449_v46, %v448_v57  ;;  %v1129_v57 = vld [vmem:[%s1403_s3 + $0x80] sm:$0xff]  ;;  %v1134_v59 = vld [vmem:[%s1403_s3 + $0x88] sm:$0xff] }
  0xc6   :  { %681 = vpow2.f32 %v382_v21  ;;  %v463_v21 = vld [vmem:[%s1403_s3 + $0x98] sm:$0xff]  ;;  %v168_v60 = vadd.f32 %v916_v32, %v996_v37  ;;  %v173_v46 = vand.u32 2147483647, %v878_v6  ;;  %vm229_vm10 = vweird.f32 %v986_v27 }
  0xc7   :  { %683 = vpow2.f32 %v384_v31  ;;  %v1110_v20 = vadd.f32 1.0, %v155_v55  ;;  %v490_v31 = vpack.c.bf16 %v465_v16, %v464_v63  ;;  %v481_v55 = vpack.c.bf16 %v447_v23, %v1089_v18  ;;  %vm1234_vm6 = vmor %vm229_vm10, %vm230_vm8 }
  0xc8   :  { %v241_v18 = vsub.f32 1.0, %v240_v35  ;;  %v489_v37 = vpack.c.bf16 %v463_v21, %v462_v19  ;;  %v227_v42 = vmul.f32 %v1050_v28, %v226_v2  ;;  %v480_v6 = vpack.c.bf16 %v1120_v51, %v1115_v52  ;;  %505 = vmatpush.bf16.msra.mxu2 %v482_v29 }
  0xc9   :  { %v1122_v48 = vpop.eup %675  ;;  %685 = vrcp.f32 %v1110_v20  ;;  %v280_v54 = vand.u32 2147483648, %v1110_v20  ;;  %v172_v17 = vsel %vm1145_vm9, %v916_v32, %v168_v60  ;;  %524 = vmatpush.bf16.msra.mxu3 %v490_v31  ;;  %v488_v19 = vpack.c.bf16 %v1134_v59, %v1129_v57 }
  0xca   :  { %v1139_v63 = vpop.eup %677  ;;  %v255_v23 = vmul.f32 %v1122_v48, %v1032_v4  ;;  %vm260_vm11 = vweird.f32 %v1122_v48  ;;  %vm174_vm12 = vcmp.eq.f32.partialorder %v173_v46, 8.507059e+37  ;;  %v198_v2 = vadd.f32 %v972_v10, %v197_v58 }
  0xcb   :  { %v1153_v47 = vpop.eup %679  ;;  %v1179_v52 = vmul.f32 %v1094_v24, %v241_v18  ;;  %vm259_vm14 = vweird.f32 %v1032_v4  ;;  %v1183_v29 = vsel %vm174_vm12, %v945_v45, %v172_v17  ;;  %v203_v58 = vand.u32 2147483647, %v914_v30 }
  0xcc   :  { %v1162_v35 = vpop.eup %681  ;;  %v256_v32 = vsub.f32 1.0, %v255_v23  ;;  %v1186_v31 = vor.u32 1.1754944e-38, %v280_v54  ;;  %v202_v57 = vsel %vm1174_vm13, %v972_v10, %v198_v2  ;;  %v284_v59 = vmul.f32 1.0614054, %v1183_v29  ;;  %506 = vmatpush.bf16.msra.mxu2 %v481_v55  ;;  %vm1256_vm9 = vmor %vm259_vm14, %vm260_vm11 }
  0xcd   :  { %v1168_v21 = vpop.eup %683  ;;  %v183_v60 = vadd.f32 %v930_v38, %v1016_v7  ;;  %vm245_vm0 = vweird.f32 %v1094_v24  ;;  %vm204_vm1 = vcmp.eq.f32.partialorder %v203_v58, 8.507059e+37  ;;  %v188_v30 = vand.u32 2147483647, %v883_v8  ;;  %525 = vmatpush.bf16.msra.mxu3 %v489_v37 }
  0xce   :  { %v213_v54 = vadd.f32 %v979_v14, %v1080_v22  ;;  %v218_v10 = vand.u32 2147483647, %v918_v33  ;;  %v1210_v7 = vsel %vm204_vm1, %v1007_v44, %v202_v57  ;;  %v292_v46 = vadd.f32 -1.4531521, %v284_v59 }
  0xcf   :  { %v1207_v17 = vpop.eup %685  ;;  %v187_v16 = vsel %vm1198_vm15, %v930_v38, %v183_v60  ;;  %v228_v18 = vadd.f32 %v1050_v28, %v227_v42  ;;  %vm244_vm3 = vweird.f32 %v1009_v49  ;;  %v257_v8 = vmul.f32 %v1122_v48, %v256_v32 }
  0xd0   :  { %v270_v44 = vmul.f32 %v1207_v17, %v1110_v20  ;;  %v286_v22 = vmul.f32 1.0614054, %v1210_v7  ;;  %vm189_vm4 = vcmp.eq.f32.partialorder %v188_v30, 8.507059e+37  ;;  %v300_v55 = vmul.f32 %v292_v46, %v1183_v29  ;;  %507 = vmatpush.bf16.msra.mxu2 %v480_v6  ;;  %vm1281_vm12 = vmor %vm244_vm3, %vm245_vm0 }
  0xd1   :  { %v1227_v38 = vsel %vm189_vm4, %v974_v11, %v187_v16  ;;  %v217_v42 = vsel %vm216_vm2, %v979_v14, %v213_v54  ;;  %vm219_vm5 = vcmp.eq.f32.partialorder %v218_v10, 8.507059e+37  ;;  %vm275_vm7 = vweird.f32 %v1207_v17  ;;  %526 = vmatpush.bf16.msra.mxu3 %v488_v19 }
  0xd2   :  { %v271_v23 = vsub.f32 1.0, %v270_v44  ;;  %v294_v37 = vadd.f32 -1.4531521, %v286_v22  ;;  %v1240_v2 = vsel %vm219_vm5, %v1028_v5, %v217_v42  ;;  %v285_v11 = vmul.f32 1.0614054, %v1227_v38 }
  0xd3   :  { %v308_v14 = vadd.f32 1.4214138, %v300_v55  ;;  %v287_v51 = vmul.f32 1.0614054, %v1240_v2  ;;  %v232_v32 = vsel %vm1234_vm6, %v1050_v28, %v228_v18  ;;  %v233_v58 = vand.u32 2147483647, %v986_v27 }
  0xd4   :  { %v272_v57 = vmul.f32 %v1207_v17, %v271_v23  ;;  %vm274_vm8 = vweird.f32 %v1110_v20  ;;  %v302_v5 = vmul.f32 %v294_v37, %v1210_v7  ;;  %v293_v59 = vadd.f32 -1.4531521, %v285_v11 }
  0xd5   :  { %v258_v60 = vadd.f32 %v1122_v48, %v257_v8  ;;  %v316_v28 = vmul.f32 %v308_v14, %v1183_v29  ;;  %v295_v27 = vadd.f32 -1.4531521, %v287_v51  ;;  %vm234_vm10 = vcmp.eq.f32.partialorder %v233_v58, 8.507059e+37  ;;  %vm1301_vm15 = vmor %vm274_vm8, %vm275_vm7 }
  0xd6   :  { %v263_v19 = vand.u32 2147483647, %v1032_v4  ;;  %v310_v45 = vadd.f32 1.4214138, %v302_v5  ;;  %v301_v30 = vmul.f32 %v293_v59, %v1227_v38  ;;  %v1264_v54 = vsel %vm234_vm10, %v1083_v0, %v232_v32 }
  0xd7   :  { %v262_v10 = vsel %vm1256_vm9, %v1122_v48, %v258_v60  ;;  %v324_v46 = vadd.f32 -0.28449672, %v316_v28  ;;  %v303_v16 = vmul.f32 %v295_v27, %v1240_v2  ;;  %v288_v18 = vmul.f32 1.0614054, %v1264_v54 }
  0xd8   :  { %vm264_vm11 = vcmp.eq.f32.partialorder %v263_v19, 8.507059e+37  ;;  %v318_v8 = vmul.f32 %v310_v45, %v1210_v7  ;;  %v309_v44 = vadd.f32 1.4214138, %v301_v30  ;;  %v243_v0 = vadd.f32 %v1094_v24, %v1179_v52 }
  0xd9   :  { %v1273_v4 = vsel %vm264_vm11, %v1098_v26, %v262_v10  ;;  %v332_v22 = vmul.f32 %v324_v46, %v1183_v29  ;;  %v311_v55 = vadd.f32 1.4214138, %v303_v16  ;;  %v296_v33 = vadd.f32 -1.4531521, %v288_v18 }
  0xda   :  { %v290_v42 = vmul.f32 1.0614054, %v1273_v4  ;;  %v326_v23 = vadd.f32 -0.28449672, %v318_v8  ;;  %v317_v26 = vmul.f32 %v309_v44, %v1227_v38  ;;  %v247_v52 = vsel %vm1281_vm12, %v1094_v24, %v243_v0 }
  0xdb   :  { %v248_v37 = vand.u32 2147483647, %v1009_v49  ;;  %v340_v11 = vadd.f32 0.2548296, %v332_v22  ;;  %v319_v14 = vmul.f32 %v311_v55, %v1240_v2  ;;  %v304_v32 = vmul.f32 %v296_v33, %v1264_v54 }
  0xdc   :  { %v298_v51 = vadd.f32 -1.4531521, %v290_v42  ;;  %vm404_vm13 = vcmp.ge.f32.partialorder %v869_v61, 0.0  ;;  %v334_v58 = vmul.f32 %v326_v23, %v1210_v7  ;;  %v325_v5 = vadd.f32 -0.28449672, %v317_v26 }
  0xdd   :  { %vm249_vm14 = vcmp.eq.f32.partialorder %v248_v37, 8.507059e+37  ;;  %v273_v59 = vadd.f32 %v1207_v17, %v272_v57  ;;  %v348_v24 = vmul.f32 %v340_v11, %v1183_v29  ;;  %v327_v60 = vadd.f32 -0.28449672, %v319_v14 }
  0xde   :  { %v306_v6 = vmul.f32 %v298_v51, %v1273_v4  ;;  %v312_v28 = vadd.f32 1.4214138, %v304_v32  ;;  %v342_v27 = vadd.f32 0.2548296, %v334_v58  ;;  %v333_v19 = vmul.f32 %v325_v5, %v1227_v38 }
  0xdf   :  { %v1309_v45 = vsel %vm249_vm14, %v1096_v25, %v247_v52  ;;  %v277_v57 = vsel %vm1301_vm15, %v1207_v17, %v273_v59  ;;  %vm406_vm0 = vcmp.ge.f32.partialorder %v895_v12, 0.0  ;;  %v388_v30 = vmul.f32 %v993_v36, %v348_v24 }
  0xe0   :  { %v335_v29 = vmul.f32 %v327_v60, %v1240_v2  ;;  %v314_v10 = vadd.f32 1.4214138, %v306_v6  ;;  %v320_v46 = vmul.f32 %v312_v28, %v1264_v54  ;;  %v350_v16 = vmul.f32 %v342_v27, %v1210_v7 }
  0xe1   :  { %v341_v18 = vadd.f32 0.2548296, %v333_v19  ;;  %v278_v8 = vand.u32 2147483647, %v1110_v20  ;;  %v289_v25 = vmul.f32 1.0614054, %v1309_v45 }
  0xe2   :  { %vm405_vm1 = vcmp.ge.f32.partialorder %v871_v62, 0.0  ;;  %v396_v44 = vsub.f32 1.0, %v388_v30  ;;  %v343_v17 = vadd.f32 0.2548296, %v335_v29  ;;  %v322_v0 = vmul.f32 %v314_v10, %v1273_v4 }
  0xe3   :  { %v328_v48 = vadd.f32 -0.28449672, %v320_v46  ;;  %vm407_vm2 = vcmp.ge.f32.partialorder %v902_v15, 0.0  ;;  %v390_v36 = vmul.f32 %v1066_v56, %v350_v16  ;;  %v349_v22 = vmul.f32 %v341_v18, %v1227_v38 }
  0xe4   :  { %vm279_vm3 = vcmp.eq.f32.partialorder %v278_v8, 8.507059e+37  ;;  %v297_v7 = vadd.f32 -1.4531521, %v289_v25  ;;  %v412_v55 = vsub.f32 0.0, %v396_v44  ;;  %v351_v20 = vmul.f32 %v343_v17, %v1240_v2 }
  0xe5   :  { %v330_v42 = vadd.f32 -0.28449672, %v322_v0  ;;  %v336_v33 = vmul.f32 %v328_v48, %v1264_v54  ;;  %v398_v23 = vsub.f32 1.0, %v390_v36  ;;  %v389_v26 = vmul.f32 %v1005_v43, %v349_v22 }
  0xe6   :  { %v282_v52 = vsel %vm279_vm3, %v1186_v31, %v277_v57  ;;  %v305_v37 = vmul.f32 %v297_v7, %v1309_v45  ;;  %v420_v56 = vsel %vm404_vm13, %v396_v44, %v412_v55  ;;  %v391_v38 = vmul.f32 %v1139_v63, %v351_v20 }
  0xe7   :  { %v338_v11 = vmul.f32 %v330_v42, %v1273_v4  ;;  %v344_v14 = vadd.f32 0.2548296, %v336_v33  ;;  %v414_v51 = vsub.f32 0.0, %v398_v23  ;;  %v428_v2 = vadd.f32 1.0, %v420_v56 }
  0xe8   :  { %v397_v32 = vsub.f32 1.0, %v389_v26  ;;  %v291_v58 = vmul.f32 1.0614054, %v282_v52  ;;  %v399_v5 = vsub.f32 1.0, %v391_v38  ;;  %v313_v49 = vadd.f32 1.4214138, %v305_v37 }
  0xe9   :  { %v346_v59 = vadd.f32 0.2548296, %v338_v11  ;;  %v352_v43 = vmul.f32 %v344_v14, %v1264_v54  ;;  %v1435_v31 = vsub.f32 0.0, %v1061_v50  ;;  %v422_v61 = vsel %vm406_vm0, %v398_v23, %v414_v51 }
  0xea   :  { %v413_v63 = vsub.f32 0.0, %v397_v32  ;;  %v299_v60 = vadd.f32 -1.4531521, %v291_v58  ;;  %v430_v6 = vadd.f32 1.0, %v422_v61  ;;  %v415_v28 = vsub.f32 0.0, %v399_v5  ;;  %v1436_v58 = vld [vmem:[#allocation8_spill] sm:$0xff] }
  0xeb   :  { %v371_v24 = vmul.f32 %v1435_v31, %v1061_v50  ;;  %v354_v27 = vmul.f32 %v346_v59, %v1273_v4  ;;  %v392_v19 = vmul.f32 %v1153_v47, %v352_v43  ;;  %v436_v57 = vmul.f32 %v428_v2, %v932_v39  ;;  %v1438_v59 = vld [vmem:[#allocation7_spill] sm:$0xff] }
  0xec   :  { %v421_v54 = vsel %vm405_vm1, %v397_v32, %v413_v63  ;;  %v307_v30 = vmul.f32 %v299_v60, %v282_v52  ;;  %v321_v29 = vmul.f32 %v313_v49, %v1309_v45  ;;  %v438_v50 = vmul.f32 %v430_v6, %v966_v3 }
  0xed   :  { %v423_v12 = vsel %vm407_vm2, %v399_v5, %v415_v28  ;;  %v429_v10 = vadd.f32 1.0, %v421_v54  ;;  %v394_v46 = vmul.f32 %v1168_v21, %v354_v27  ;;  %v400_v4 = vsub.f32 1.0, %v392_v19  ;;  %v1437_v5 = vld [vmem:[#allocation6_spill] sm:$0xff] }
  0xee   :  { %v431_v16 = vadd.f32 1.0, %v423_v12  ;;  %v315_v18 = vadd.f32 1.4214138, %v307_v30  ;;  %v329_v47 = vadd.f32 -0.28449672, %v321_v29  ;;  %v476_v39 = vpack.c.bf16 %v438_v50, %v436_v57  ;;  %v1439_v28 = vld [vmem:[#allocation2_spill] sm:$0xff] }
  0xef   :  { %v386_v8 = vmul.f32 1.442695, %v371_v24  ;;  %v437_v62 = vmul.f32 %v429_v10, %v934_v41  ;;  %v402_v25 = vsub.f32 1.0, %v394_v46  ;;  %v416_v17 = vsub.f32 0.0, %v400_v4  ;;  %v1440_v29 = vld [vmem:[#allocation3_spill] sm:$0xff] }
  0xf0   :  { %v439_v44 = vmul.f32 %v431_v16, %v999_v40  ;;  %v323_v0 = vmul.f32 %v315_v18, %v282_v52  ;;  %v337_v3 = vmul.f32 %v329_v47, %v1309_v45  ;;  %508 = vmatmul.bf16.vlgmr.msra.gmra.mxu2 %v476_v39  ;;  %vm410_vm4 = vcmp.ge.f32.partialorder %v977_v13, 0.0  ;;  %v1441_v18 = vld [vmem:[#allocation4_spill] sm:$0xff] }
  0xf1   :  { %v418_v15 = vsub.f32 0.0, %v402_v25  ;;  %vm408_vm5 = vcmp.ge.f32.partialorder %v949_v53, 0.0  ;;  %687 = vpow2.f32 %v386_v8  ;;  %v130_v33 = vmul.f32 0.5, %v963_v1 }
  0xf2   :  { %v477_v21 = vpack.c.bf16 %v439_v44, %v437_v62  ;;  %v331_v48 = vadd.f32 -0.28449672, %v323_v0  ;;  %v345_v36 = vadd.f32 0.2548296, %v337_v3  ;;  %v424_v41 = vsel %vm408_vm5, %v400_v4, %v416_v17 }
  0xf3   :  { %v426_v22 = vsel %vm410_vm4, %v402_v25, %v418_v15  ;;  %v432_v23 = vadd.f32 1.0, %v424_v41  ;;  %v128_v56 = vmul.f32 0.5, %v921_v34  ;;  %vm409_vm6 = vcmp.ge.f32.partialorder %v970_v9, 0.0  ;;  %v654_v9 = vld [vmem:[%s1401_s4] ss:$0 sm:$0xff]  ;;  %v1442_v25 = vld [vmem:[#allocation5_spill] sm:$0xff] }
  0xf4   :  { %527 = vmatmul.bf16.vlgmr.msra.gmra.mxu3 %v477_v21  ;;  %v339_v7 = vmul.f32 %v331_v48, %v282_v52  ;;  %v353_v40 = vmul.f32 %v345_v36, %v1309_v45  ;;  %v434_v55 = vadd.f32 1.0, %v426_v22  ;;  %vm411_vm7 = vcmp.ge.f32.partialorder %v1436_v58, 0.0 }
  0xf5   :  { %v440_v14 = vmul.f32 %v432_v23, %v128_v56  ;;  %v131_v43 = vmul.f32 0.5, %v1438_v59  ;;  %v699_v17 = vmov 128.0  }
  0xf6   :  { %v347_v20 = vadd.f32 0.2548296, %v339_v7  ;;  %v393_v42 = vmul.f32 %v1162_v35, %v353_v40  ;;  %v442_v53 = vmul.f32 %v434_v55, %v130_v33  ;;  %689 = vrcp.f32 %v699_v17 }
  0xf7   :  { %v688_v37 = vpop.eup %687 }
  0xf8   :  { %v355_v13 = vmul.f32 %v347_v20, %v282_v52  ;;  %v401_v26 = vsub.f32 1.0, %v393_v42  ;;  %v478_v2 = vpack.c.bf16 %v442_v53, %v440_v14  ;;  %v129_v52 = vmul.f32 0.5, %v1437_v5 }
  0xfa   :  { %v395_v38 = vmul.f32 %v688_v37, %v355_v13  ;;  %v417_v11 = vsub.f32 0.0, %v401_v26 }
  0xfc   :  { %v403_v51 = vsub.f32 1.0, %v395_v38  ;;  %v425_v45 = vsel %vm409_vm6, %v401_v26, %v417_v11  ;;  %v690_v0 = vpop.eup %689 }
  0xfd   :  { %v433_v35 = vadd.f32 1.0, %v425_v45  ;;  %v553_v3 = vmul.f32 128.0, %v690_v0  ;;  %vm557_vm8 = vweird.f32 %v690_v0 }
  0xfe   :  { %v419_v32 = vsub.f32 0.0, %v403_v51 }
  0xff   :  { %v441_v49 = vmul.f32 %v433_v35, %v129_v52  ;;  %v554_v15 = vsub.f32 1.0, %v553_v3 }
 0x100   :  { %v427_v1 = vsel %vm411_vm7, %v403_v51, %v419_v32  ;;  %513 = vmatmul.bf16.gmra.mxu2 %v478_v2 }
 0x101   :  { %v435_v34 = vadd.f32 1.0, %v427_v1  ;;  %v555_v21 = vmul.f32 %v690_v0, %v554_v15 }
 0x103   :  { %v443_v31 = vmul.f32 %v435_v34, %v131_v43  ;;  %v556_v48 = vadd.f32 %v690_v0, %v555_v21 }
 0x105   :  { %v479_v24 = vpack.c.bf16 %v443_v31, %v441_v49  ;;  %v558_v36 = vsel %vm557_vm8, %v690_v0, %v556_v48 }
 0x107   :  { %532 = vmatmul.bf16.gmra.mxu3 %v479_v24 }
 0x173   :  { %v509_v61 = vpop.f32.mrf.mxu2 }
 0x174   :  { %v510_v63 = vadd.f32 %v654_v9, %v509_v61 }
 0x177   :  { %v528_v60 = vpop.f32.mrf.mxu3 }
 0x178   :  { %v529_v6 = vadd.f32 %v528_v60, %v510_v63 }
 0x17a   :  { %v538_v27 = vadd.f32 %v529_v6, %v1439_v28  ;;  %v656_v6 = vld [vmem:[%s1405_s6] ss:$0 sm:$0xff] }
 0x17b   :  { %v511_v19 = vpop.f32.mrf.mxu2 }
 0x17c   :  { %544 = vadd.xlane.f32.xlu0 %v538_v27  ;;  %v512_v57 = vadd.f32 %v654_v9, %v511_v19 }
 0x17f   :  { %v530_v54 = vpop.f32.mrf.mxu3 }
 0x180   :  { %v531_v30 = vadd.f32 %v530_v54, %v512_v57 }
 0x182   :  { %v539_v50 = vadd.f32 %v531_v30, %v1440_v29 }
 0x183   :  { %v514_v12 = vpop.f32.mrf.mxu2 }
 0x184   :  { %546 = vadd.xlane.f32.xlu0 %v539_v50  ;;  %v515_v10 = vadd.f32 %v654_v9, %v514_v12 }
 0x18a   :  { %v533_v46 = vpop.f32.mrf.mxu3 }
 0x18b   :  { %v534_v16 = vadd.f32 %v533_v46, %v515_v10  ;;  %v516_v4 = vpop.f32.mrf.mxu2 }
 0x18c   :  { %v517_v8 = vadd.f32 %v654_v9, %v516_v4  ;;  %v655_v9 = vld [vmem:[%s1404_s5] ss:$0 sm:$0xff] }
 0x18d   :  { %v540_v47 = vadd.f32 %v534_v16, %v1441_v18 }
 0x18f   :  { %548 = vadd.xlane.f32.xlu1 %v540_v47 }
 0x192   :  { %v535_v39 = vpop.f32.mrf.mxu3 }
 0x193   :  { %v536_v62 = vadd.f32 %v535_v39, %v517_v8 }
 0x195   :  { %v541_v44 = vadd.f32 %v536_v62, %v1442_v25 }
 0x197   :  { %550 = vadd.xlane.f32.xlu1 %v541_v44 }
 0x1ef   :  { %v545_v22 = vpop.xlane.xlu0 %544 }
 0x1f0   :  { %v559_v41 = vmul.f32 %v558_v36, %v545_v22 }
 0x1f2   :  { %v563_v7 = vsub.f32 %v538_v27, %v559_v41 }
 0x1f4   :  { %v567_v40 = vmul.f32 %v563_v7, %v563_v7 }
 0x1f6   :  { %571 = vadd.xlane.f32.xlu2 %v567_v40 }
 0x1f7   :  { %v547_v55 = vpop.xlane.xlu0 %546 }
 0x1f8   :  { %v560_v20 = vmul.f32 %v558_v36, %v547_v55 }
 0x1fa   :  { %v564_v42 = vsub.f32 %v539_v50, %v560_v20 }
 0x1fc   :  { %v568_v33 = vmul.f32 %v564_v42, %v564_v42 }
 0x1fe   :  { %573 = vadd.xlane.f32.xlu2 %v568_v33 }
 0x202   :  { %v549_v23 = vpop.xlane.xlu1 %548 }
 0x203   :  { %v561_v13 = vmul.f32 %v558_v36, %v549_v23 }
 0x205   :  { %v1371_v26 = vsub.f32 %v540_v47, %v561_v13 }
 0x207   :  { %v569_v37 = vmul.f32 %v1371_v26, %v1371_v26 }
 0x209   :  { %575 = vadd.xlane.f32.xlu0 %v569_v37 }
 0x20a   :  { %v551_v56 = vpop.xlane.xlu1 %550 }
 0x20b   :  { %v562_v53 = vmul.f32 %v558_v36, %v551_v56 }
 0x20d   :  { %v1375_v38 = vsub.f32 %v541_v44, %v562_v53 }
 0x20f   :  { %v570_v11 = vmul.f32 %v1375_v38, %v1375_v38 }
 0x211   :  { %577 = vadd.xlane.f32.xlu1 %v570_v11 }
 0x269   :  { %v572_v14 = vpop.xlane.xlu2 %571 }
 0x26a   :  { %v579_v51 = vmul.f32 %v572_v14, %v558_v36 }
 0x26c   :  { %v583_v45 = vadd.f32 1e-05, %v579_v51 }
 0x26e   :  { %691 = vrsqrt.f32 %v583_v45  ;;  %vm593_vm10 = vweird.f32 %v583_v45 }
 0x271   :  { %v574_v2 = vpop.xlane.xlu2 %573 }
 0x272   :  { %v580_v32 = vmul.f32 %v574_v2, %v558_v36 }
 0x274   :  { %v692_v58 = vpop.eup %691  ;;  %v584_v35 = vadd.f32 1e-05, %v580_v32 }
 0x275   :  { %v588_v1 = vmul.f32 %v692_v58, %v583_v45  ;;  %vm594_vm9 = vweird.f32 %v692_v58 }
 0x276   :  { %693 = vrsqrt.f32 %v584_v35  ;;  %vm595_vm11 = vmor %vm593_vm10, %vm594_vm9  ;;  %vm603_vm13 = vweird.f32 %v584_v35 }
 0x277   :  { %v589_v5 = vmul.f32 %v692_v58, %v588_v1 }
 0x279   :  { %v590_v52 = vmul.f32 0.5, %v589_v5 }
 0x27b   :  { %v591_v59 = vsub.f32 1.5, %v590_v52 }
 0x27c   :  { %v694_v43 = vpop.eup %693  ;;  %v576_v34 = vpop.xlane.xlu0 %575 }
 0x27d   :  { %v592_v49 = vmul.f32 %v692_v58, %v591_v59  ;;  %v598_v31 = vmul.f32 %v694_v43, %v584_v35  ;;  %v581_v24 = vmul.f32 %v576_v34, %v558_v36  ;;  %vm604_vm12 = vweird.f32 %v694_v43 }
 0x27e   :  { %vm605_vm14 = vmor %vm603_vm13, %vm604_vm12 }
 0x27f   :  { %v596_v61 = vsel %vm595_vm11, %v692_v58, %v592_v49  ;;  %v599_v63 = vmul.f32 %v694_v43, %v598_v31  ;;  %v585_v60 = vadd.f32 1e-05, %v581_v24 }
 0x280   :  { %v627_v28 = vmul.f32 %v596_v61, %v563_v7 }
 0x281   :  { %v600_v27 = vmul.f32 0.5, %v599_v63  ;;  %695 = vrsqrt.f32 %v585_v60  ;;  %vm613_vm0 = vweird.f32 %v585_v60 }
 0x282   :  { %v634_v19 = vmul.f32 %v655_v9, %v627_v28 }
 0x283   :  { %v601_v57 = vsub.f32 1.5, %v600_v27 }
 0x284   :  { %v641_v54 = vadd.f32 %v656_v6, %v634_v19  ;;  %v578_v30 = vpop.xlane.xlu1 %577 }
 0x285   :  { %v602_v29 = vmul.f32 %v694_v43, %v601_v57  ;;  %v582_v50 = vmul.f32 %v578_v30, %v558_v36 }
 0x286   :  { %645 = vst [vmem:[%s1406_s7] sm:$0xff] %v641_v54 }
 0x287   :  { %v696_v12 = vpop.eup %695  ;;  %v606_v10 = vsel %vm605_vm14, %v694_v43, %v602_v29  ;;  %v586_v46 = vadd.f32 1e-05, %v582_v50 }
 0x288   :  { %v628_v16 = vmul.f32 %v606_v10, %v564_v42  ;;  %v608_v4 = vmul.f32 %v696_v12, %v585_v60  ;;  %vm614_vm15 = vweird.f32 %v696_v12 }
 0x289   :  { %697 = vrsqrt.f32 %v586_v46  ;;  %vm615_vm1 = vmor %vm613_vm0, %vm614_vm15  ;;  %vm623_vm3 = vweird.f32 %v586_v46 }
 0x28a   :  { %v635_v18 = vmul.f32 %v655_v9, %v628_v16  ;;  %v609_v47 = vmul.f32 %v696_v12, %v608_v4 }
 0x28c   :  { %v642_v8 = vadd.f32 %v656_v6, %v635_v18  ;;  %v610_v39 = vmul.f32 0.5, %v609_v47 }
 0x28e   :  { %646 = vst [vmem:[%s1406_s7 + $0x8] sm:$0xff] %v642_v8  ;;  %v611_v62 = vsub.f32 1.5, %v610_v39 }
 0x28f   :  { %v698_v25 = vpop.eup %697 }
 0x290   :  { %v612_v44 = vmul.f32 %v696_v12, %v611_v62  ;;  %v618_v17 = vmul.f32 %v698_v25, %v586_v46  ;;  %vm624_vm2 = vweird.f32 %v698_v25 }
 0x291   :  { %vm625_vm4 = vmor %vm623_vm3, %vm624_vm2 }
 0x292   :  { %v616_v0 = vsel %vm615_vm1, %v696_v12, %v612_v44  ;;  %v619_v3 = vmul.f32 %v698_v25, %v618_v17 }
 0x293   :  { %v629_v15 = vmul.f32 %v616_v0, %v1371_v26 }
 0x294   :  { %v620_v21 = vmul.f32 0.5, %v619_v3 }
 0x295   :  { %v636_v48 = vmul.f32 %v655_v9, %v629_v15 }
 0x296   :  { %v621_v36 = vsub.f32 1.5, %v620_v21 }
 0x297   :  { %v643_v22 = vadd.f32 %v656_v6, %v636_v48 }
 0x298   :  { %v622_v41 = vmul.f32 %v698_v25, %v621_v36 }
 0x299   :  { %647 = vst [vmem:[%s1406_s7 + $0x10] sm:$0xff] %v643_v22 }
 0x29a   :  { %v626_v7 = vsel %vm625_vm4, %v698_v25, %v622_v41 }
 0x29b   :  { %v630_v40 = vmul.f32 %v626_v7, %v1375_v38 }
 0x29d   :  { %v637_v55 = vmul.f32 %v655_v9, %v630_v40 }
 0x29f   :  { %v644_v20 = vadd.f32 %v656_v6, %v637_v55 }
 0x2a1   :  { %648 = vst [vmem:[%s1406_s7 + $0x18] sm:$0xff] %v644_v20 }

// kernel: forward.21
= control target key start
LH: loop header
LB: loop body
LE: loop exit
PB: predicated region body
PF: predicated region fallthrough
CT: control target
= control target key end

     0   :  { %s396_s1 = inlined_call_operand.vmem [shape: f32[128,384], index: 1, kind: input, shape index: {}]   ;;  %s397_s0 = inlined_call_operand.vmem [shape: f32[32,128], index: 0, kind: input, shape index: {}]   ;;  %s398_s2 = inlined_call_operand.vmem [shape: f32[1,384], index: 2, kind: input, shape index: {}]   ;;  %s399_s3 = inlined_call_operand.vmem [shape: f32[32,384], index: 3, kind: output, shape index: {}]  }
   0x1   :  { %v61_v0 = vld [vmem:[%s396_s1 + $0x158] sm:$0xff]  ;;  %v64_v1 = vld [vmem:[%s396_s1 + $0x170] sm:$0xff]  ;;  %v62_v2 = vld [vmem:[%s396_s1 + $0x160] sm:$0xff] }
   0x2   :  { %v90_v3 = vpack.c.bf16 %v64_v1, %v61_v0  ;;  %v65_v4 = vld [vmem:[%s396_s1 + $0x178] sm:$0xff]  ;;  %v55_v5 = vld [vmem:[%s396_s1 + $0x128] sm:$0xff]  ;;  %v58_v6 = vld [vmem:[%s396_s1 + $0x140] sm:$0xff] }
   0x3   :  { %v91_v7 = vpack.c.bf16 %v65_v4, %v62_v2  ;;  %v56_v8 = vld [vmem:[%s396_s1 + $0x130] sm:$0xff]  ;;  %v59_v9 = vld [vmem:[%s396_s1 + $0x148] sm:$0xff]  ;;  %v87_v11 = vpack.c.bf16 %v58_v6, %v55_v5  ;;  %v49_v15 = vld [vmem:[%s396_s1 + $0xf8] sm:$0xff] }
   0x4   :  { %v60_v10 = vld [vmem:[%s396_s1 + $0x150] sm:$0xff]  ;;  %119 = vmatpush.bf16.msra.mxu1 %v90_v3  ;;  %v63_v12 = vld [vmem:[%s396_s1 + $0x168] sm:$0xff]  ;;  %v88_v13 = vpack.c.bf16 %v59_v9, %v56_v8  ;;  %v54_v17 = vld [vmem:[%s396_s1 + $0x120] sm:$0xff] }
   0x5   :  { %138 = vmatpush.bf16.msra.mxu2 %v91_v7  ;;  %v89_v14 = vpack.c.bf16 %v63_v12, %v60_v10  ;;  %v52_v16 = vld [vmem:[%s396_s1 + $0x110] sm:$0xff]  ;;  %v50_v18 = vld [vmem:[%s396_s1 + $0x100] sm:$0xff]  ;;  %v53_v19 = vld [vmem:[%s396_s1 + $0x118] sm:$0xff] }
   0x6   :  { %v57_v20 = vld [vmem:[%s396_s1 + $0x138] sm:$0xff]  ;;  %v84_v22 = vpack.c.bf16 %v52_v16, %v49_v15  ;;  %v48_v23 = vld [vmem:[%s396_s1 + $0xf0] sm:$0xff]  ;;  %v51_v24 = vld [vmem:[%s396_s1 + $0x108] sm:$0xff]  ;;  %v85_v25 = vpack.c.bf16 %v53_v19, %v50_v18 }
   0x7   :  { %173 = vmatpush.bf16.msra.mxu3 %v89_v14  ;;  %v86_v21 = vpack.c.bf16 %v57_v20, %v54_v17  ;;  %100 = vmatpush.bf16.msra.mxu0 %v89_v14  ;;  %v43_v26 = vld [vmem:[%s396_s1 + $0xc8] sm:$0xff]  ;;  %v46_v27 = vld [vmem:[%s396_s1 + $0xe0] sm:$0xff]  ;;  %v44_v28 = vld [vmem:[%s396_s1 + $0xd0] sm:$0xff]  ;;  %v83_v30 = vpack.c.bf16 %v51_v24, %v48_v23 }
   0x8   :  { %120 = vmatpush.bf16.msra.mxu1 %v87_v11  ;;  %v47_v29 = vld [vmem:[%s396_s1 + $0xe8] sm:$0xff]  ;;  %v81_v31 = vpack.c.bf16 %v46_v27, %v43_v26  ;;  %v42_v32 = vld [vmem:[%s396_s1 + $0xc0] sm:$0xff]  ;;  %v45_v33 = vld [vmem:[%s396_s1 + $0xd8] sm:$0xff] }
   0x9   :  { %139 = vmatpush.bf16.msra.mxu2 %v88_v13  ;;  %v82_v34 = vpack.c.bf16 %v47_v29, %v44_v28  ;;  %v37_v35 = vld [vmem:[%s396_s1 + $0x98] sm:$0xff]  ;;  %v40_v36 = vld [vmem:[%s396_s1 + $0xb0] sm:$0xff]  ;;  %v38_v37 = vld [vmem:[%s396_s1 + $0xa0] sm:$0xff]  ;;  %v80_v39 = vpack.c.bf16 %v45_v33, %v42_v32 }
   0xa   :  { %v41_v38 = vld [vmem:[%s396_s1 + $0xb8] sm:$0xff]  ;;  %v78_v40 = vpack.c.bf16 %v40_v36, %v37_v35  ;;  %v36_v41 = vld [vmem:[%s396_s1 + $0x90] sm:$0xff]  ;;  %v39_v42 = vld [vmem:[%s396_s1 + $0xa8] sm:$0xff] }
   0xb   :  { %174 = vmatpush.bf16.msra.mxu3 %v86_v21  ;;  %101 = vmatpush.bf16.msra.mxu0 %v86_v21  ;;  %v79_v43 = vpack.c.bf16 %v41_v38, %v38_v37  ;;  %v31_v44 = vld [vmem:[%s396_s1 + $0x68] sm:$0xff]  ;;  %v34_v45 = vld [vmem:[%s396_s1 + $0x80] sm:$0xff]  ;;  %v32_v46 = vld [vmem:[%s396_s1 + $0x70] sm:$0xff]  ;;  %v77_v48 = vpack.c.bf16 %v39_v42, %v36_v41 }
   0xc   :  { %121 = vmatpush.bf16.msra.mxu1 %v84_v22  ;;  %v35_v47 = vld [vmem:[%s396_s1 + $0x88] sm:$0xff]  ;;  %v75_v49 = vpack.c.bf16 %v34_v45, %v31_v44  ;;  %v30_v50 = vld [vmem:[%s396_s1 + $0x60] sm:$0xff]  ;;  %v33_v51 = vld [vmem:[%s396_s1 + $0x78] sm:$0xff] }
   0xd   :  { %140 = vmatpush.bf16.msra.mxu2 %v85_v25  ;;  %v76_v52 = vpack.c.bf16 %v35_v47, %v32_v46  ;;  %v25_v53 = vld [vmem:[%s396_s1 + $0x38] sm:$0xff]  ;;  %v28_v54 = vld [vmem:[%s396_s1 + $0x50] sm:$0xff]  ;;  %v26_v55 = vld [vmem:[%s396_s1 + $0x40] sm:$0xff]  ;;  %v74_v57 = vpack.c.bf16 %v33_v51, %v30_v50 }
   0xe   :  { %v29_v56 = vld [vmem:[%s396_s1 + $0x58] sm:$0xff]  ;;  %v72_v58 = vpack.c.bf16 %v28_v54, %v25_v53  ;;  %v24_v59 = vld [vmem:[%s396_s1 + $0x30] sm:$0xff]  ;;  %v27_v60 = vld [vmem:[%s396_s1 + $0x48] sm:$0xff] }
   0xf   :  { %175 = vmatpush.bf16.msra.mxu3 %v83_v30  ;;  %102 = vmatpush.bf16.msra.mxu0 %v83_v30  ;;  %v73_v61 = vpack.c.bf16 %v29_v56, %v26_v55  ;;  %v19_v62 = vld [vmem:[%s396_s1 + $0x8] sm:$0xff]  ;;  %v22_v63 = vld [vmem:[%s396_s1 + $0x20] sm:$0xff]  ;;  %v20_v0 = vld [vmem:[%s396_s1 + $0x10] sm:$0xff]  ;;  %v71_v3 = vpack.c.bf16 %v27_v60, %v24_v59 }
  0x10   :  { %122 = vmatpush.bf16.msra.mxu1 %v81_v31  ;;  %v23_v1 = vld [vmem:[%s396_s1 + $0x28] sm:$0xff]  ;;  %v14_v2 = vld [vmem:[%s397_s0] sm:$0xff]  ;;  %v69_v4 = vpack.c.bf16 %v22_v63, %v19_v62  ;;  %v21_v7 = vld [vmem:[%s396_s1 + $0x18] sm:$0xff] }
  0x11   :  { %141 = vmatpush.bf16.msra.mxu2 %v82_v34  ;;  %v15_v5 = vld [vmem:[%s397_s0 + $0x8] sm:$0xff]  ;;  %v18_v6 = vld [vmem:[%s396_s1] sm:$0xff]  ;;  %v70_v8 = vpack.c.bf16 %v23_v1, %v20_v0  ;;  %v16_v11 = vld [vmem:[%s397_s0 + $0x10] sm:$0xff] }
  0x12   :  { %v66_v9 = vpack.c.bf16 %v15_v5, %v14_v2  ;;  %v68_v10 = vpack.c.bf16 %v21_v7, %v18_v6  ;;  %v17_v12 = vld [vmem:[%s397_s0 + $0x18] sm:$0xff]  ;;  %v92_v14 = vld [vmem:[%s398_s2] sm:$0x7] }
  0x13   :  { %176 = vmatpush.bf16.msra.mxu3 %v80_v39  ;;  %103 = vmatpush.bf16.msra.mxu0 %v80_v39  ;;  %v67_v13 = vpack.c.bf16 %v17_v12, %v16_v11  ;;  %v95_v15 = vperm.slane %v92_v14, 1  ;;  %v94_v18 = vperm.slane %v92_v14, 0  ;;  %v96_v19 = vperm.slane %v92_v14, 2 }
  0x14   :  { %123 = vmatpush.bf16.msra.mxu1 %v78_v40 }
  0x15   :  { %142 = vmatpush.bf16.msra.mxu2 %v79_v43 }
  0x17   :  { %177 = vmatpush.bf16.msra.mxu3 %v77_v48  ;;  %104 = vmatpush.bf16.msra.mxu0 %v77_v48 }
  0x18   :  { %124 = vmatpush.bf16.msra.mxu1 %v75_v49 }
  0x19   :  { %143 = vmatpush.bf16.msra.mxu2 %v76_v52 }
  0x1b   :  { %178 = vmatpush.bf16.msra.mxu3 %v74_v57  ;;  %105 = vmatpush.bf16.msra.mxu0 %v74_v57 }
  0x1c   :  { %125 = vmatpush.bf16.msra.mxu1 %v72_v58 }
  0x1d   :  { %144 = vmatpush.bf16.msra.mxu2 %v73_v61 }
  0x1f   :  { %179 = vmatpush.bf16.msra.mxu3 %v71_v3  ;;  %106 = vmatpush.bf16.msra.mxu0 %v71_v3 }
  0x20   :  { %126 = vmatpush.bf16.msra.mxu1 %v69_v4 }
  0x21   :  { %145 = vmatpush.bf16.msra.mxu2 %v70_v8 }
  0x23   :  { %127 = vmatmul.bf16.vlgmr.msra.gmra.mxu1 %v66_v9  ;;  %180 = vmatpush.bf16.msra.mxu3 %v68_v10 }
  0x24   :  { %146 = vmatmul.bf16.vlgmr.msra.gmra.mxu2 %v66_v9  ;;  %107 = vmatpush.bf16.msra.mxu0 %v68_v10 }
  0x26   :  { %113 = vmatmul.bf16.vlgmr.msra.gmra.mxu3 %v67_v13 }
  0x27   :  { %108 = vmatmul.bf16.vlgmr.msra.gmra.mxu0 %v66_v9 }
  0x33   :  { %132 = vmatmul.bf16.gmra.mxu1 %v67_v13 }
  0x34   :  { %151 = vmatmul.bf16.gmra.mxu2 %v67_v13 }
  0xa0   :  { %v128_v16 = vpop.f32.mrf.mxu1 }
  0xa1   :  { %v129_v17 = vadd.f32 %v128_v16, %v95_v15 }
  0xa3   :  { %158 = vst [vmem:[%s399_s3 + $0x8] sm:$0xff] %v129_v17 }
  0xa4   :  { %v109_v20 = vpop.f32.mrf.mxu0 }
  0xa5   :  { %v110_v21 = vadd.f32 %v109_v20, %v94_v18 }
  0xa7   :  { %v147_v22 = vpop.f32.mrf.mxu2  ;;  %157 = vst [vmem:[%s399_s3] sm:$0xff] %v110_v21 }
  0xa8   :  { %v148_v23 = vadd.f32 %v147_v22, %v96_v19  ;;  %v130_v24 = vpop.f32.mrf.mxu1 }
  0xa9   :  { %v131_v25 = vadd.f32 %v130_v24, %v95_v15  ;;  %v114_v26 = vpop.f32.mrf.mxu3 }
  0xaa   :  { %159 = vst [vmem:[%s399_s3 + $0x10] sm:$0xff] %v148_v23  ;;  %v115_v27 = vadd.f32 %v114_v26, %v94_v18 }
  0xab   :  { %161 = vst [vmem:[%s399_s3 + $0x20] sm:$0xff] %v131_v25 }
  0xac   :  { %163 = vst [vmem:[%s399_s3 + $0x30] sm:$0xff] %v115_v27  ;;  %v111_v28 = vpop.f32.mrf.mxu0 }
  0xad   :  { %v112_v29 = vadd.f32 %v111_v28, %v94_v18 }
  0xaf   :  { %v149_v30 = vpop.f32.mrf.mxu2  ;;  %160 = vst [vmem:[%s399_s3 + $0x18] sm:$0xff] %v112_v29 }
  0xb0   :  { %v150_v31 = vadd.f32 %v149_v30, %v96_v19  ;;  %v133_v32 = vpop.f32.mrf.mxu1 }
  0xb1   :  { %v134_v33 = vadd.f32 %v133_v32, %v95_v15  ;;  %v116_v34 = vpop.f32.mrf.mxu3 }
  0xb2   :  { %162 = vst [vmem:[%s399_s3 + $0x28] sm:$0xff] %v150_v31  ;;  %v117_v35 = vadd.f32 %v116_v34, %v94_v18 }
  0xb3   :  { %164 = vst [vmem:[%s399_s3 + $0x38] sm:$0xff] %v134_v33 }
  0xb4   :  { %166 = vst [vmem:[%s399_s3 + $0x48] sm:$0xff] %v117_v35 }
  0xb7   :  { %v152_v36 = vpop.f32.mrf.mxu2 }
  0xb8   :  { %v153_v37 = vadd.f32 %v152_v36, %v96_v19  ;;  %v135_v38 = vpop.f32.mrf.mxu1 }
  0xb9   :  { %v136_v39 = vadd.f32 %v135_v38, %v95_v15 }
  0xba   :  { %165 = vst [vmem:[%s399_s3 + $0x40] sm:$0xff] %v153_v37 }
  0xbb   :  { %167 = vst [vmem:[%s399_s3 + $0x50] sm:$0xff] %v136_v39 }
  0xbf   :  { %v154_v40 = vpop.f32.mrf.mxu2 }
  0xc0   :  { %v155_v41 = vadd.f32 %v154_v40, %v96_v19 }
  0xc2   :  { %168 = vst [vmem:[%s399_s3 + $0x58] sm:$0xff] %v155_v41 }

// kernel: forward.26
= control target key start
LH: loop header
LB: loop body
LE: loop exit
PB: predicated region body
PF: predicated region fallthrough
CT: control target
= control target key end

     0   :  { %s295_s1 = inlined_call_operand.vmem [shape: f32[128,256], index: 1, kind: input, shape index: {}]   ;;  %s296_s0 = inlined_call_operand.vmem [shape: f32[32,128], index: 0, kind: input, shape index: {}]   ;;  %s297_s2 = inlined_call_operand.vmem [shape: f32[1,256], index: 2, kind: input, shape index: {}]   ;;  %s298_s3 = inlined_call_operand.vmem [shape: f32[32,256], index: 3, kind: output, shape index: {}]  }
   0x1   :  { %v46_v0 = vld [vmem:[%s295_s1 + $0xe0] sm:$0xff]  ;;  %v48_v1 = vld [vmem:[%s295_s1 + $0xf0] sm:$0xff]  ;;  %v47_v2 = vld [vmem:[%s295_s1 + $0xe8] sm:$0xff] }
   0x2   :  { %v66_v3 = vpack.c.bf16 %v48_v1, %v46_v0  ;;  %v49_v4 = vld [vmem:[%s295_s1 + $0xf8] sm:$0xff]  ;;  %v42_v5 = vld [vmem:[%s295_s1 + $0xc0] sm:$0xff]  ;;  %v44_v6 = vld [vmem:[%s295_s1 + $0xd0] sm:$0xff] }
   0x3   :  { %v67_v7 = vpack.c.bf16 %v49_v4, %v47_v2  ;;  %v43_v8 = vld [vmem:[%s295_s1 + $0xc8] sm:$0xff]  ;;  %v45_v9 = vld [vmem:[%s295_s1 + $0xd8] sm:$0xff]  ;;  %v64_v10 = vpack.c.bf16 %v44_v6, %v42_v5  ;;  %v38_v12 = vld [vmem:[%s295_s1 + $0xa0] sm:$0xff] }
   0x4   :  { %74 = vmatpush.bf16.msra.mxu0 %v66_v3  ;;  %124 = vmatpush.bf16.msra.mxu2 %v66_v3  ;;  %v65_v11 = vpack.c.bf16 %v45_v9, %v43_v8  ;;  %v40_v13 = vld [vmem:[%s295_s1 + $0xb0] sm:$0xff]  ;;  %v39_v14 = vld [vmem:[%s295_s1 + $0xa8] sm:$0xff]  ;;  %v41_v15 = vld [vmem:[%s295_s1 + $0xb8] sm:$0xff] }
   0x5   :  { %93 = vmatpush.bf16.msra.mxu1 %v67_v7  ;;  %132 = vmatpush.bf16.msra.mxu3 %v67_v7  ;;  %v62_v16 = vpack.c.bf16 %v40_v13, %v38_v12  ;;  %v63_v17 = vpack.c.bf16 %v41_v15, %v39_v14  ;;  %v34_v18 = vld [vmem:[%s295_s1 + $0x80] sm:$0xff]  ;;  %v36_v19 = vld [vmem:[%s295_s1 + $0x90] sm:$0xff]  ;;  %v35_v20 = vld [vmem:[%s295_s1 + $0x88] sm:$0xff] }
   0x6   :  { %v37_v21 = vld [vmem:[%s295_s1 + $0x98] sm:$0xff]  ;;  %v60_v22 = vpack.c.bf16 %v36_v19, %v34_v18  ;;  %v30_v24 = vld [vmem:[%s295_s1 + $0x60] sm:$0xff]  ;;  %v32_v25 = vld [vmem:[%s295_s1 + $0x70] sm:$0xff] }
   0x7   :  { %v61_v23 = vpack.c.bf16 %v37_v21, %v35_v20  ;;  %v31_v26 = vld [vmem:[%s295_s1 + $0x68] sm:$0xff]  ;;  %v33_v27 = vld [vmem:[%s295_s1 + $0x78] sm:$0xff]  ;;  %v58_v28 = vpack.c.bf16 %v32_v25, %v30_v24  ;;  %v26_v30 = vld [vmem:[%s295_s1 + $0x40] sm:$0xff] }
   0x8   :  { %75 = vmatpush.bf16.msra.mxu0 %v64_v10  ;;  %125 = vmatpush.bf16.msra.mxu2 %v64_v10  ;;  %v59_v29 = vpack.c.bf16 %v33_v27, %v31_v26  ;;  %v28_v31 = vld [vmem:[%s295_s1 + $0x50] sm:$0xff]  ;;  %v27_v32 = vld [vmem:[%s295_s1 + $0x48] sm:$0xff]  ;;  %v29_v33 = vld [vmem:[%s295_s1 + $0x58] sm:$0xff] }
   0x9   :  { %94 = vmatpush.bf16.msra.mxu1 %v65_v11  ;;  %133 = vmatpush.bf16.msra.mxu3 %v65_v11  ;;  %v56_v34 = vpack.c.bf16 %v28_v31, %v26_v30  ;;  %v57_v35 = vpack.c.bf16 %v29_v33, %v27_v32  ;;  %v22_v36 = vld [vmem:[%s295_s1 + $0x20] sm:$0xff]  ;;  %v24_v37 = vld [vmem:[%s295_s1 + $0x30] sm:$0xff]  ;;  %v23_v38 = vld [vmem:[%s295_s1 + $0x28] sm:$0xff] }
   0xa   :  { %v25_v39 = vld [vmem:[%s295_s1 + $0x38] sm:$0xff]  ;;  %v54_v40 = vpack.c.bf16 %v24_v37, %v22_v36  ;;  %v18_v42 = vld [vmem:[%s295_s1] sm:$0xff]  ;;  %v20_v43 = vld [vmem:[%s295_s1 + $0x10] sm:$0xff] }
   0xb   :  { %v55_v41 = vpack.c.bf16 %v25_v39, %v23_v38  ;;  %v19_v44 = vld [vmem:[%s295_s1 + $0x8] sm:$0xff]  ;;  %v21_v45 = vld [vmem:[%s295_s1 + $0x18] sm:$0xff]  ;;  %v14_v46 = vld [vmem:[%s296_s0] sm:$0xff]  ;;  %v52_v47 = vpack.c.bf16 %v20_v43, %v18_v42 }
   0xc   :  { %76 = vmatpush.bf16.msra.mxu0 %v62_v16  ;;  %126 = vmatpush.bf16.msra.mxu2 %v62_v16  ;;  %v15_v48 = vld [vmem:[%s296_s0 + $0x8] sm:$0xff]  ;;  %v16_v49 = vld [vmem:[%s296_s0 + $0x10] sm:$0xff]  ;;  %v17_v50 = vld [vmem:[%s296_s0 + $0x18] sm:$0xff]  ;;  %v53_v51 = vpack.c.bf16 %v21_v45, %v19_v44 }
   0xd   :  { %95 = vmatpush.bf16.msra.mxu1 %v63_v17  ;;  %134 = vmatpush.bf16.msra.mxu3 %v63_v17  ;;  %v50_v52 = vpack.c.bf16 %v15_v48, %v14_v46  ;;  %v51_v53 = vpack.c.bf16 %v17_v50, %v16_v49  ;;  %v68_v54 = vld [vmem:[%s297_s2] sm:$0x3] }
   0xe   :  { %v70_v55 = vperm.slane %v68_v54, 0  ;;  %v71_v56 = vperm.slane %v68_v54, 1 }
  0x10   :  { %77 = vmatpush.bf16.msra.mxu0 %v60_v22  ;;  %127 = vmatpush.bf16.msra.mxu2 %v60_v22 }
  0x11   :  { %96 = vmatpush.bf16.msra.mxu1 %v61_v23  ;;  %135 = vmatpush.bf16.msra.mxu3 %v61_v23 }
  0x14   :  { %78 = vmatpush.bf16.msra.mxu0 %v58_v28  ;;  %128 = vmatpush.bf16.msra.mxu2 %v58_v28 }
  0x15   :  { %97 = vmatpush.bf16.msra.mxu1 %v59_v29  ;;  %136 = vmatpush.bf16.msra.mxu3 %v59_v29 }
  0x18   :  { %79 = vmatpush.bf16.msra.mxu0 %v56_v34  ;;  %129 = vmatpush.bf16.msra.mxu2 %v56_v34 }
  0x19   :  { %98 = vmatpush.bf16.msra.mxu1 %v57_v35  ;;  %137 = vmatpush.bf16.msra.mxu3 %v57_v35 }
  0x1c   :  { %80 = vmatpush.bf16.msra.mxu0 %v54_v40  ;;  %130 = vmatpush.bf16.msra.mxu2 %v54_v40 }
  0x1d   :  { %99 = vmatpush.bf16.msra.mxu1 %v55_v41  ;;  %138 = vmatpush.bf16.msra.mxu3 %v55_v41 }
  0x20   :  { %81 = vmatpush.bf16.msra.mxu0 %v52_v47  ;;  %131 = vmatpush.bf16.msra.mxu2 %v52_v47 }
  0x21   :  { %100 = vmatpush.bf16.msra.mxu1 %v53_v51  ;;  %139 = vmatpush.bf16.msra.mxu3 %v53_v51 }
  0x23   :  { %82 = vmatmul.bf16.vlgmr.msra.gmra.mxu0 %v50_v52  ;;  %87 = vmatmul.bf16.vlgmr.msra.gmra.mxu2 %v51_v53 }
  0x24   :  { %101 = vmatmul.bf16.vlgmr.msra.gmra.mxu1 %v50_v52  ;;  %106 = vmatmul.bf16.vlgmr.msra.gmra.mxu3 %v51_v53 }
  0xa0   :  { %v83_v57 = vpop.f32.mrf.mxu0 }
  0xa1   :  { %v84_v58 = vadd.f32 %v83_v57, %v70_v55  ;;  %v102_v59 = vpop.f32.mrf.mxu1 }
  0xa2   :  { %v103_v60 = vadd.f32 %v102_v59, %v71_v56 }
  0xa3   :  { %112 = vst [vmem:[%s298_s3] sm:$0xff] %v84_v58 }
  0xa4   :  { %113 = vst [vmem:[%s298_s3 + $0x8] sm:$0xff] %v103_v60 }
  0xa6   :  { %v88_v61 = vpop.f32.mrf.mxu2 }
  0xa7   :  { %v89_v62 = vadd.f32 %v88_v61, %v70_v55  ;;  %v107_v63 = vpop.f32.mrf.mxu3 }
  0xa8   :  { %v108_v0 = vadd.f32 %v107_v63, %v71_v56  ;;  %v85_v1 = vpop.f32.mrf.mxu0 }
  0xa9   :  { %116 = vst [vmem:[%s298_s3 + $0x20] sm:$0xff] %v89_v62  ;;  %v86_v2 = vadd.f32 %v85_v1, %v70_v55  ;;  %v104_v3 = vpop.f32.mrf.mxu1 }
  0xaa   :  { %117 = vst [vmem:[%s298_s3 + $0x28] sm:$0xff] %v108_v0  ;;  %v105_v4 = vadd.f32 %v104_v3, %v71_v56 }
  0xab   :  { %114 = vst [vmem:[%s298_s3 + $0x10] sm:$0xff] %v86_v2 }
  0xac   :  { %115 = vst [vmem:[%s298_s3 + $0x18] sm:$0xff] %v105_v4 }
  0xae   :  { %v90_v5 = vpop.f32.mrf.mxu2 }
  0xaf   :  { %v91_v6 = vadd.f32 %v90_v5, %v70_v55  ;;  %v109_v7 = vpop.f32.mrf.mxu3 }
  0xb0   :  { %v110_v8 = vadd.f32 %v109_v7, %v71_v56 }
  0xb1   :  { %118 = vst [vmem:[%s298_s3 + $0x30] sm:$0xff] %v91_v6 }
  0xb2   :  { %119 = vst [vmem:[%s298_s3 + $0x38] sm:$0xff] %v110_v8 }

// kernel: forward.25
= control target key start
LH: loop header
LB: loop body
LE: loop exit
PB: predicated region body
PF: predicated region fallthrough
CT: control target
= control target key end

     0   :  { %s140_s1 = inlined_call_operand.vmem [shape: f32[128,128], index: 1, kind: input, shape index: {}]   ;;  %s141_s2 = inlined_call_operand.vmem [shape: f32[1,128], index: 2, kind: input, shape index: {}]   ;;  %s142_s0 = inlined_call_operand.vmem [shape: f32[8,128], index: 0, kind: input, shape index: {}]   ;;  %s143_s3 = inlined_call_operand.vmem [shape: f32[8,128], index: 3, kind: output, shape index: {}]  }
   0x1   :  { %v29_v0 = vld [vmem:[%s140_s1 + $0x70] sm:$0xff]  ;;  %v30_v1 = vld [vmem:[%s140_s1 + $0x78] sm:$0xff]  ;;  %v27_v2 = vld [vmem:[%s140_s1 + $0x60] sm:$0xff] }
   0x2   :  { %v39_v3 = vpack.c.bf16 %v30_v1, %v29_v0  ;;  %v28_v4 = vld [vmem:[%s140_s1 + $0x68] sm:$0xff]  ;;  %v25_v6 = vld [vmem:[%s140_s1 + $0x50] sm:$0xff]  ;;  %v26_v7 = vld [vmem:[%s140_s1 + $0x58] sm:$0xff] }
   0x3   :  { %v38_v5 = vpack.c.bf16 %v28_v4, %v27_v2  ;;  %v37_v8 = vpack.c.bf16 %v26_v7, %v25_v6  ;;  %v23_v9 = vld [vmem:[%s140_s1 + $0x40] sm:$0xff]  ;;  %v24_v10 = vld [vmem:[%s140_s1 + $0x48] sm:$0xff]  ;;  %v21_v12 = vld [vmem:[%s140_s1 + $0x30] sm:$0xff] }
   0x4   :  { %44 = vmatpush.bf16.msra.mxu0 %v39_v3  ;;  %v36_v11 = vpack.c.bf16 %v24_v10, %v23_v9  ;;  %v22_v13 = vld [vmem:[%s140_s1 + $0x38] sm:$0xff]  ;;  %v19_v15 = vld [vmem:[%s140_s1 + $0x20] sm:$0xff]  ;;  %v20_v16 = vld [vmem:[%s140_s1 + $0x28] sm:$0xff] }
   0x5   :  { %v35_v14 = vpack.c.bf16 %v22_v13, %v21_v12  ;;  %v34_v17 = vpack.c.bf16 %v20_v16, %v19_v15  ;;  %v17_v18 = vld [vmem:[%s140_s1 + $0x10] sm:$0xff]  ;;  %v18_v19 = vld [vmem:[%s140_s1 + $0x18] sm:$0xff]  ;;  %v15_v21 = vld [vmem:[%s140_s1] sm:$0xff] }
   0x6   :  { %v33_v20 = vpack.c.bf16 %v18_v19, %v17_v18  ;;  %v16_v22 = vld [vmem:[%s140_s1 + $0x8] sm:$0xff]  ;;  %v14_v24 = vld [vmem:[%s142_s0] sm:$0xff] }
   0x7   :  { %v32_v23 = vpack.c.bf16 %v16_v22, %v15_v21  ;;  %v31_v25 = vpack.c.bf16 %v14_v24, %v14_v24  ;;  %v62_v26 = vld [vmem:[%s141_s2] ss:$0 sm:$0xff] }
   0x8   :  { %45 = vmatpush.bf16.msra.mxu0 %v38_v5 }
   0xc   :  { %46 = vmatpush.bf16.msra.mxu0 %v37_v8 }
  0x10   :  { %47 = vmatpush.bf16.msra.mxu0 %v36_v11 }
  0x14   :  { %48 = vmatpush.bf16.msra.mxu0 %v35_v14 }
  0x18   :  { %49 = vmatpush.bf16.msra.mxu0 %v34_v17 }
  0x1c   :  { %50 = vmatpush.bf16.msra.mxu0 %v33_v20 }
  0x20   :  { %51 = vmatpush.bf16.msra.mxu0 %v32_v23 }
  0x23   :  { %52 = vmatmul.bf16.vlgmr.msra.gmra.mxu0 %v31_v25 }
  0xa0   :  { %v53_v27 = vpop.f32.mrf.mxu0 }
  0xa1   :  { %v54_v28 = vadd.f32 %v62_v26, %v53_v27 }
  0xa3   :  { %57 = vst [vmem:[%s143_s3] sm:$0xff] %v54_v28 }
  0xa8   :  { %v55_v29 = vpop.f32.mrf.mxu0 }

// kernel: forward.30
= control target key start
LH: loop header
LB: loop body
LE: loop exit
PB: predicated region body
PF: predicated region fallthrough
CT: control target
= control target key end

     0   :  { %s365_s1 = inlined_call_operand.vmem [shape: f32[128,256], index: 1, kind: input, shape index: {}]   ;;  %s366_s0 = inlined_call_operand.vmem [shape: f32[64,128], index: 0, kind: input, shape index: {}]   ;;  %s367_s2 = inlined_call_operand.vmem [shape: f32[1,256], index: 2, kind: input, shape index: {}]   ;;  %s368_s3 = inlined_call_operand.vmem [shape: f32[64,256], index: 3, kind: output, shape index: {}]  }
   0x1   :  { %v50_v0 = vld [vmem:[%s365_s1 + $0xe0] sm:$0xff]  ;;  %v52_v1 = vld [vmem:[%s365_s1 + $0xf0] sm:$0xff]  ;;  %v51_v2 = vld [vmem:[%s365_s1 + $0xe8] sm:$0xff] }
   0x2   :  { %v72_v3 = vpack.c.bf16 %v52_v1, %v50_v0  ;;  %v53_v4 = vld [vmem:[%s365_s1 + $0xf8] sm:$0xff]  ;;  %v46_v5 = vld [vmem:[%s365_s1 + $0xc0] sm:$0xff]  ;;  %v48_v6 = vld [vmem:[%s365_s1 + $0xd0] sm:$0xff] }
   0x3   :  { %v73_v7 = vpack.c.bf16 %v53_v4, %v51_v2  ;;  %v47_v8 = vld [vmem:[%s365_s1 + $0xc8] sm:$0xff]  ;;  %v49_v9 = vld [vmem:[%s365_s1 + $0xd8] sm:$0xff]  ;;  %v70_v10 = vpack.c.bf16 %v48_v6, %v46_v5  ;;  %v42_v12 = vld [vmem:[%s365_s1 + $0xa0] sm:$0xff] }
   0x4   :  { %80 = vmatpush.bf16.msra.mxu0 %v72_v3  ;;  %158 = vmatpush.bf16.msra.mxu2 %v72_v3  ;;  %v71_v11 = vpack.c.bf16 %v49_v9, %v47_v8  ;;  %v44_v13 = vld [vmem:[%s365_s1 + $0xb0] sm:$0xff]  ;;  %v43_v14 = vld [vmem:[%s365_s1 + $0xa8] sm:$0xff]  ;;  %v45_v15 = vld [vmem:[%s365_s1 + $0xb8] sm:$0xff] }
   0x5   :  { %109 = vmatpush.bf16.msra.mxu1 %v73_v7  ;;  %166 = vmatpush.bf16.msra.mxu3 %v73_v7  ;;  %v68_v16 = vpack.c.bf16 %v44_v13, %v42_v12  ;;  %v69_v17 = vpack.c.bf16 %v45_v15, %v43_v14  ;;  %v38_v18 = vld [vmem:[%s365_s1 + $0x80] sm:$0xff]  ;;  %v40_v19 = vld [vmem:[%s365_s1 + $0x90] sm:$0xff]  ;;  %v39_v20 = vld [vmem:[%s365_s1 + $0x88] sm:$0xff] }
   0x6   :  { %v41_v21 = vld [vmem:[%s365_s1 + $0x98] sm:$0xff]  ;;  %v66_v22 = vpack.c.bf16 %v40_v19, %v38_v18  ;;  %v34_v24 = vld [vmem:[%s365_s1 + $0x60] sm:$0xff]  ;;  %v36_v25 = vld [vmem:[%s365_s1 + $0x70] sm:$0xff] }
   0x7   :  { %v67_v23 = vpack.c.bf16 %v41_v21, %v39_v20  ;;  %v35_v26 = vld [vmem:[%s365_s1 + $0x68] sm:$0xff]  ;;  %v37_v27 = vld [vmem:[%s365_s1 + $0x78] sm:$0xff]  ;;  %v64_v28 = vpack.c.bf16 %v36_v25, %v34_v24  ;;  %v30_v30 = vld [vmem:[%s365_s1 + $0x40] sm:$0xff] }
   0x8   :  { %81 = vmatpush.bf16.msra.mxu0 %v70_v10  ;;  %159 = vmatpush.bf16.msra.mxu2 %v70_v10  ;;  %v65_v29 = vpack.c.bf16 %v37_v27, %v35_v26  ;;  %v32_v31 = vld [vmem:[%s365_s1 + $0x50] sm:$0xff]  ;;  %v31_v32 = vld [vmem:[%s365_s1 + $0x48] sm:$0xff]  ;;  %v33_v33 = vld [vmem:[%s365_s1 + $0x58] sm:$0xff] }
   0x9   :  { %110 = vmatpush.bf16.msra.mxu1 %v71_v11  ;;  %167 = vmatpush.bf16.msra.mxu3 %v71_v11  ;;  %v62_v34 = vpack.c.bf16 %v32_v31, %v30_v30  ;;  %v63_v35 = vpack.c.bf16 %v33_v33, %v31_v32  ;;  %v26_v36 = vld [vmem:[%s365_s1 + $0x20] sm:$0xff]  ;;  %v28_v37 = vld [vmem:[%s365_s1 + $0x30] sm:$0xff]  ;;  %v27_v38 = vld [vmem:[%s365_s1 + $0x28] sm:$0xff] }
   0xa   :  { %v29_v39 = vld [vmem:[%s365_s1 + $0x38] sm:$0xff]  ;;  %v60_v40 = vpack.c.bf16 %v28_v37, %v26_v36  ;;  %v22_v42 = vld [vmem:[%s365_s1] sm:$0xff]  ;;  %v24_v43 = vld [vmem:[%s365_s1 + $0x10] sm:$0xff] }
   0xb   :  { %v61_v41 = vpack.c.bf16 %v29_v39, %v27_v38  ;;  %v23_v44 = vld [vmem:[%s365_s1 + $0x8] sm:$0xff]  ;;  %v25_v45 = vld [vmem:[%s365_s1 + $0x18] sm:$0xff]  ;;  %v14_v46 = vld [vmem:[%s366_s0] sm:$0xff]  ;;  %v58_v47 = vpack.c.bf16 %v24_v43, %v22_v42 }
   0xc   :  { %82 = vmatpush.bf16.msra.mxu0 %v68_v16  ;;  %160 = vmatpush.bf16.msra.mxu2 %v68_v16  ;;  %v15_v48 = vld [vmem:[%s366_s0 + $0x8] sm:$0xff]  ;;  %v18_v49 = vld [vmem:[%s366_s0 + $0x20] sm:$0xff]  ;;  %v59_v51 = vpack.c.bf16 %v25_v45, %v23_v44  ;;  %v16_v54 = vld [vmem:[%s366_s0 + $0x10] sm:$0xff] }
   0xd   :  { %111 = vmatpush.bf16.msra.mxu1 %v69_v17  ;;  %168 = vmatpush.bf16.msra.mxu3 %v69_v17  ;;  %v19_v50 = vld [vmem:[%s366_s0 + $0x28] sm:$0xff]  ;;  %v54_v52 = vpack.c.bf16 %v15_v48, %v14_v46  ;;  %v17_v55 = vld [vmem:[%s366_s0 + $0x18] sm:$0xff]  ;;  %v20_v56 = vld [vmem:[%s366_s0 + $0x30] sm:$0xff] }
   0xe   :  { %v56_v53 = vpack.c.bf16 %v19_v50, %v18_v49  ;;  %v21_v57 = vld [vmem:[%s366_s0 + $0x38] sm:$0xff]  ;;  %v55_v58 = vpack.c.bf16 %v17_v55, %v16_v54  ;;  %v74_v60 = vld [vmem:[%s367_s2] sm:$0x3] }
   0xf   :  { %v57_v59 = vpack.c.bf16 %v21_v57, %v20_v56  ;;  %v76_v61 = vperm.slane %v74_v60, 0  ;;  %v77_v62 = vperm.slane %v74_v60, 1 }
  0x10   :  { %83 = vmatpush.bf16.msra.mxu0 %v66_v22  ;;  %161 = vmatpush.bf16.msra.mxu2 %v66_v22 }
  0x11   :  { %112 = vmatpush.bf16.msra.mxu1 %v67_v23  ;;  %169 = vmatpush.bf16.msra.mxu3 %v67_v23 }
  0x14   :  { %84 = vmatpush.bf16.msra.mxu0 %v64_v28  ;;  %162 = vmatpush.bf16.msra.mxu2 %v64_v28 }
  0x15   :  { %113 = vmatpush.bf16.msra.mxu1 %v65_v29  ;;  %170 = vmatpush.bf16.msra.mxu3 %v65_v29 }
  0x18   :  { %85 = vmatpush.bf16.msra.mxu0 %v62_v34  ;;  %163 = vmatpush.bf16.msra.mxu2 %v62_v34 }
  0x19   :  { %114 = vmatpush.bf16.msra.mxu1 %v63_v35  ;;  %171 = vmatpush.bf16.msra.mxu3 %v63_v35 }
  0x1c   :  { %86 = vmatpush.bf16.msra.mxu0 %v60_v40  ;;  %164 = vmatpush.bf16.msra.mxu2 %v60_v40 }
  0x1d   :  { %115 = vmatpush.bf16.msra.mxu1 %v61_v41  ;;  %172 = vmatpush.bf16.msra.mxu3 %v61_v41 }
  0x20   :  { %87 = vmatpush.bf16.msra.mxu0 %v58_v47  ;;  %165 = vmatpush.bf16.msra.mxu2 %v58_v47 }
  0x21   :  { %116 = vmatpush.bf16.msra.mxu1 %v59_v51  ;;  %173 = vmatpush.bf16.msra.mxu3 %v59_v51 }
  0x23   :  { %88 = vmatmul.bf16.vlgmr.msra.gmra.mxu0 %v54_v52  ;;  %98 = vmatmul.bf16.vlgmr.msra.gmra.mxu2 %v56_v53 }
  0x24   :  { %117 = vmatmul.bf16.vlgmr.msra.gmra.mxu1 %v54_v52  ;;  %127 = vmatmul.bf16.vlgmr.msra.gmra.mxu3 %v56_v53 }
  0x33   :  { %93 = vmatmul.bf16.gmra.mxu0 %v55_v58  ;;  %103 = vmatmul.bf16.gmra.mxu2 %v57_v59 }
  0x34   :  { %122 = vmatmul.bf16.gmra.mxu1 %v55_v58  ;;  %132 = vmatmul.bf16.gmra.mxu3 %v57_v59 }
  0xa0   :  { %v89_v63 = vpop.f32.mrf.mxu0 }
  0xa1   :  { %v90_v0 = vadd.f32 %v89_v63, %v76_v61  ;;  %v118_v1 = vpop.f32.mrf.mxu1 }
  0xa2   :  { %v119_v2 = vadd.f32 %v118_v1, %v77_v62 }
  0xa3   :  { %138 = vst [vmem:[%s368_s3] sm:$0xff] %v90_v0 }
  0xa4   :  { %139 = vst [vmem:[%s368_s3 + $0x8] sm:$0xff] %v119_v2 }
  0xa6   :  { %v99_v3 = vpop.f32.mrf.mxu2 }
  0xa7   :  { %v100_v4 = vadd.f32 %v99_v3, %v76_v61  ;;  %v128_v5 = vpop.f32.mrf.mxu3 }
  0xa8   :  { %v129_v6 = vadd.f32 %v128_v5, %v77_v62  ;;  %v91_v7 = vpop.f32.mrf.mxu0 }
  0xa9   :  { %146 = vst [vmem:[%s368_s3 + $0x40] sm:$0xff] %v100_v4  ;;  %v92_v8 = vadd.f32 %v91_v7, %v76_v61  ;;  %v120_v9 = vpop.f32.mrf.mxu1 }
  0xaa   :  { %147 = vst [vmem:[%s368_s3 + $0x48] sm:$0xff] %v129_v6  ;;  %v121_v10 = vadd.f32 %v120_v9, %v77_v62 }
  0xab   :  { %140 = vst [vmem:[%s368_s3 + $0x10] sm:$0xff] %v92_v8 }
  0xac   :  { %141 = vst [vmem:[%s368_s3 + $0x18] sm:$0xff] %v121_v10 }
  0xae   :  { %v101_v11 = vpop.f32.mrf.mxu2 }
  0xaf   :  { %v102_v12 = vadd.f32 %v101_v11, %v76_v61  ;;  %v130_v13 = vpop.f32.mrf.mxu3 }
  0xb0   :  { %v131_v14 = vadd.f32 %v130_v13, %v77_v62  ;;  %v94_v15 = vpop.f32.mrf.mxu0 }
  0xb1   :  { %148 = vst [vmem:[%s368_s3 + $0x50] sm:$0xff] %v102_v12  ;;  %v95_v16 = vadd.f32 %v94_v15, %v76_v61  ;;  %v123_v17 = vpop.f32.mrf.mxu1 }
  0xb2   :  { %149 = vst [vmem:[%s368_s3 + $0x58] sm:$0xff] %v131_v14  ;;  %v124_v18 = vadd.f32 %v123_v17, %v77_v62 }
  0xb3   :  { %142 = vst [vmem:[%s368_s3 + $0x20] sm:$0xff] %v95_v16 }
  0xb4   :  { %143 = vst [vmem:[%s368_s3 + $0x28] sm:$0xff] %v124_v18 }
  0xb6   :  { %v104_v19 = vpop.f32.mrf.mxu2 }
  0xb7   :  { %v105_v20 = vadd.f32 %v104_v19, %v76_v61  ;;  %v133_v21 = vpop.f32.mrf.mxu3 }
  0xb8   :  { %v134_v22 = vadd.f32 %v133_v21, %v77_v62  ;;  %v96_v23 = vpop.f32.mrf.mxu0 }
  0xb9   :  { %150 = vst [vmem:[%s368_s3 + $0x60] sm:$0xff] %v105_v20  ;;  %v97_v24 = vadd.f32 %v96_v23, %v76_v61  ;;  %v125_v25 = vpop.f32.mrf.mxu1 }
  0xba   :  { %151 = vst [vmem:[%s368_s3 + $0x68] sm:$0xff] %v134_v22  ;;  %v126_v26 = vadd.f32 %v125_v25, %v77_v62 }
  0xbb   :  { %144 = vst [vmem:[%s368_s3 + $0x30] sm:$0xff] %v97_v24 }
  0xbc   :  { %145 = vst [vmem:[%s368_s3 + $0x38] sm:$0xff] %v126_v26 }
  0xbe   :  { %v106_v27 = vpop.f32.mrf.mxu2 }
  0xbf   :  { %v107_v28 = vadd.f32 %v106_v27, %v76_v61  ;;  %v135_v29 = vpop.f32.mrf.mxu3 }
  0xc0   :  { %v136_v30 = vadd.f32 %v135_v29, %v77_v62 }
  0xc1   :  { %152 = vst [vmem:[%s368_s3 + $0x70] sm:$0xff] %v107_v28 }
  0xc2   :  { %153 = vst [vmem:[%s368_s3 + $0x78] sm:$0xff] %v136_v30 }

// kernel: forward.27
= control target key start
LH: loop header
LB: loop body
LE: loop exit
PB: predicated region body
PF: predicated region fallthrough
CT: control target
= control target key end

     0   :  { %vm210_vm0 = vcmask 257024   ;;  %vm405_vm1 = vcmask 1041409   ;;  %vm407_vm2 = vcmask 1042434   ;;  %vm409_vm3 = vcmask 1043459   ;;  %s2245_s0 = inlined_call_operand.vmem [shape: f32[32,32], index: 0, kind: input, shape index: {}]   ;;  %s2246_s1 = inlined_call_operand.vmem [shape: f32[32,4,32], index: 1, kind: input, shape index: {}]   ;;  %s2247_s2 = inlined_call_operand.vmem [shape: f32[32,4,32], index: 2, kind: input, shape index: {}]   ;;  %s2248_s3 = inlined_call_operand.vmem [shape: f32[32,32], index: 3, kind: output, shape index: {}]  }
   0x1   :  { %v14_v0 = vld [vmem:[%s2245_s0] sm:$0xff]  ;;  %v22_v6 = vld [vmem:[%s2246_s1 + $0x10] sm:$0xf]  ;;  %v20_v7 = vld [vmem:[%s2246_s1 + $0x8] sm:$0xf]  ;;  %vm411_vm4 = vcmask 1044484  }
   0x2   :  { %v18_v1 = vld [vmem:[%s2246_s1] sm:$0xf]  ;;  %v114_v2 = vperm.slane %v14_v0, 0  ;;  %v89_v3 = vrot.slane %v14_v0, 4  ;;  %v87_v4 = vrot.slane %v14_v0, 2  ;;  %v86_v5 = vrot.slane %v14_v0, 1 }
   0x3   :  { %v90_v8 = vrot.slane %v14_v0, 5  ;;  %v88_v9 = vrot.slane %v14_v0, 3  ;;  %v19_v14 = vld [vmem:[%s2246_s1 + $0x4] sm:$0xf]  ;;  %v23_v20 = vld [vmem:[%s2246_s1 + $0x14] sm:$0xf] }
   0x4   :  { %v178_v10 = vmul.f32 %v114_v2, %v18_v1  ;;  %v118_v11 = vperm.slane %v89_v3, 0  ;;  %v116_v12 = vperm.slane %v87_v4, 0  ;;  %v115_v13 = vperm.slane %v86_v5, 0  ;;  %v21_v21 = vld [vmem:[%s2246_s1 + $0xc] sm:$0xf] }
   0x5   :  { %v119_v15 = vperm.slane %v90_v8, 0  ;;  %v117_v19 = vperm.slane %v88_v9, 0  ;;  %v91_v25 = vrot.slane %v14_v0, 6  ;;  %v92_v28 = vrot.slane %v14_v0, 7  ;;  %v15_v29 = vld [vmem:[%s2245_s0 + $0x8] sm:$0xff]  ;;  %v1586_v9 = vld [vmem:[%s2245_s0 + $0x18] sm:$0xff] }
   0x6   :  { %v211_v16 = vsel %vm210_vm0, %v178_v10, 0.0  ;;  %v182_v17 = vmul.f32 %v118_v11, %v22_v6  ;;  %v180_v18 = vmul.f32 %v116_v12, %v20_v7  ;;  %v179_v24 = vmul.f32 %v115_v13, %v19_v14  ;;  %v24_v32 = vld [vmem:[%s2246_s1 + $0x18] sm:$0xf]  ;;  %v26_v37 = vld [vmem:[%s2246_s1 + $0x20] sm:$0xf]  ;;  %v1581_v6 = vld [vmem:[%s2245_s0 + $0x10] sm:$0xff] }
   0x7   :  { %212 = vadd.xlane.f32.xlu0 %v211_v16  ;;  %v183_v26 = vmul.f32 %v119_v15, %v23_v20  ;;  %v181_v27 = vmul.f32 %v117_v19, %v21_v21  ;;  %v120_v31 = vperm.slane %v91_v25, 0  ;;  %v122_v35 = vperm.slane %v15_v29, 0  ;;  %v25_v38 = vld [vmem:[%s2246_s1 + $0x1c] sm:$0xf]  ;;  %v27_v47 = vld [vmem:[%s2246_s1 + $0x24] sm:$0xf] }
   0x8   :  { %v223_v22 = vsel %vm210_vm0, %v182_v17, 0.0  ;;  %v217_v23 = vsel %vm210_vm0, %v180_v18, 0.0  ;;  %v214_v30 = vsel %vm210_vm0, %v179_v24, 0.0  ;;  %v121_v36 = vperm.slane %v92_v28, 0  ;;  %v29_v52 = vld [vmem:[%s2246_s1 + $0x2c] sm:$0xf] }
   0x9   :  { %224 = vadd.xlane.f32.xlu2 %v223_v22  ;;  %218 = vadd.xlane.f32.xlu1 %v217_v23  ;;  %v226_v33 = vsel %vm210_vm0, %v183_v26, 0.0  ;;  %v220_v34 = vsel %vm210_vm0, %v181_v27, 0.0  ;;  %v184_v39 = vmul.f32 %v120_v31, %v24_v32  ;;  %v93_v40 = vrot.slane %v15_v29, 1  ;;  %v28_v53 = vld [vmem:[%s2246_s1 + $0x28] sm:$0xf] }
   0xa   :  { %v186_v41 = vmul.f32 %v122_v35, %v26_v37  ;;  %v185_v42 = vmul.f32 %v121_v36, %v25_v38  ;;  %v95_v43 = vrot.slane %v15_v29, 3  ;;  %v94_v44 = vrot.slane %v15_v29, 2  ;;  %v30_v62 = vld [vmem:[%s2246_s1 + $0x30] sm:$0xf]  ;;  %v32_v2 = vld [vmem:[%s2246_s1 + $0x38] sm:$0xf] }
   0xb   :  { %v229_v45 = vsel %vm210_vm0, %v184_v39, 0.0  ;;  %v123_v46 = vperm.slane %v93_v40, 0  ;;  %v96_v55 = vrot.slane %v15_v29, 4  ;;  %v98_v56 = vrot.slane %v15_v29, 6  ;;  %v31_v4 = vld [vmem:[%s2246_s1 + $0x34] sm:$0xf] }
   0xc   :  { %v235_v48 = vsel %vm210_vm0, %v186_v41, 0.0  ;;  %v232_v49 = vsel %vm210_vm0, %v185_v42, 0.0  ;;  %v125_v50 = vperm.slane %v95_v43, 0  ;;  %v124_v51 = vperm.slane %v94_v44, 0  ;;  %v42_v10 = vld [vmem:[%s2246_s1 + $0x60] sm:$0xf] }
   0xd   :  { %v187_v54 = vmul.f32 %v123_v46, %v27_v47  ;;  %v97_v59 = vrot.slane %v15_v29, 5  ;;  %v126_v61 = vperm.slane %v96_v55, 0  ;;  %v128_v63 = vperm.slane %v98_v56, 0  ;;  %v33_v18 = vld [vmem:[%s2246_s1 + $0x3c] sm:$0xf] }
   0xe   :  { %v189_v57 = vmul.f32 %v125_v50, %v29_v52  ;;  %v188_v58 = vmul.f32 %v124_v51, %v28_v53  ;;  %v99_v5 = vrot.slane %v15_v29, 7  ;;  %v100_v12 = vrot.slane %v1581_v6, 1  ;;  %v43_v22 = vld [vmem:[%s2246_s1 + $0x64] sm:$0xf]  ;;  %v44_v28 = vld [vmem:[%s2246_s1 + $0x68] sm:$0xf] }
   0xf   :  { %215 = vadd.xlane.f32.xlu0 %v214_v30  ;;  %v238_v60 = vsel %vm210_vm0, %v187_v54, 0.0  ;;  %v127_v3 = vperm.slane %v97_v59, 0  ;;  %v190_v7 = vmul.f32 %v126_v61, %v30_v62  ;;  %v192_v8 = vmul.f32 %v128_v63, %v32_v2  ;;  %v35_v30 = vld [vmem:[%s2246_s1 + $0x44] sm:$0xf]  ;;  %v34_v31 = vld [vmem:[%s2246_s1 + $0x40] sm:$0xf] }
  0x10   :  { %v244_v0 = vsel %vm210_vm0, %v189_v57, 0.0  ;;  %v241_v1 = vsel %vm210_vm0, %v188_v58, 0.0  ;;  %v138_v13 = vperm.slane %v1586_v9, 0  ;;  %v107_v14 = vrot.slane %v1586_v9, 1  ;;  %v45_v37 = vld [vmem:[%s2246_s1 + $0x6c] sm:$0xf] }
  0x11   :  { %227 = vadd.xlane.f32.xlu2 %v226_v33  ;;  %221 = vadd.xlane.f32.xlu1 %v220_v34  ;;  %v191_v11 = vmul.f32 %v127_v3, %v31_v4  ;;  %v129_v15 = vperm.slane %v99_v5, 0  ;;  %v108_v16 = vrot.slane %v1586_v9, 2  ;;  %v247_v17 = vsel %vm210_vm0, %v190_v7, 0.0  ;;  %v36_v44 = vld [vmem:[%s2246_s1 + $0x48] sm:$0xf] }
  0x12   :  { %v1599_v19 = vmul.f32 %v138_v13, %v42_v10  ;;  %v139_v20 = vperm.slane %v107_v14, 0  ;;  %v253_v21 = vsel %vm210_vm0, %v192_v8, 0.0  ;;  %v131_v25 = vperm.slane %v100_v12, 0  ;;  %v46_v51 = vld [vmem:[%s2246_s1 + $0x70] sm:$0xf] }
  0x13   :  { %v140_v23 = vperm.slane %v108_v16, 0  ;;  %v250_v24 = vsel %vm210_vm0, %v191_v11, 0.0  ;;  %v130_v26 = vperm.slane %v1581_v6, 0  ;;  %v193_v29 = vmul.f32 %v129_v15, %v33_v18  ;;  %v38_v55 = vld [vmem:[%s2246_s1 + $0x50] sm:$0xf] }
  0x14   :  { %v1607_v27 = vmul.f32 %v139_v20, %v43_v22  ;;  %v101_v33 = vrot.slane %v1581_v6, 2  ;;  %v102_v34 = vrot.slane %v1581_v6, 3  ;;  %v109_v35 = vrot.slane %v1586_v9, 3  ;;  %v47_v57 = vld [vmem:[%s2246_s1 + $0x74] sm:$0xf] }
  0x15   :  { %v1618_v32 = vmul.f32 %v140_v23, %v44_v28  ;;  %v103_v36 = vrot.slane %v1581_v6, 4  ;;  %v195_v38 = vmul.f32 %v131_v25, %v35_v30  ;;  %v194_v39 = vmul.f32 %v130_v26, %v34_v31  ;;  %v39_v12 = vld [vmem:[%s2246_s1 + $0x54] sm:$0xf]  ;;  %v49_v13 = vld [vmem:[%s2246_s1 + $0x7c] sm:$0xf] }
  0x16   :  { %v141_v40 = vperm.slane %v109_v35, 0  ;;  %v110_v41 = vrot.slane %v1586_v9, 4  ;;  %v256_v42 = vsel %vm210_vm0, %v193_v29, 0.0  ;;  %v111_v43 = vrot.slane %v1586_v9, 5  ;;  %v40_v16 = vld [vmem:[%s2246_s1 + $0x58] sm:$0xf] }
  0x17   :  { %230 = vadd.xlane.f32.xlu0 %v229_v45  ;;  %v132_v45 = vperm.slane %v101_v33, 0  ;;  %v133_v46 = vperm.slane %v102_v34, 0  ;;  %v134_v50 = vperm.slane %v103_v36, 0  ;;  %v262_v53 = vsel %vm210_vm0, %v195_v38, 0.0 }
  0x18   :  { %v205_v47 = vmul.f32 %v141_v40, %v45_v37  ;;  %v143_v52 = vperm.slane %v111_v43, 0  ;;  %v259_v54 = vsel %vm210_vm0, %v194_v39, 0.0  ;;  %v112_v61 = vrot.slane %v1586_v9, 6 }
  0x19   :  { %236 = vadd.xlane.f32.xlu2 %v235_v48  ;;  %233 = vadd.xlane.f32.xlu1 %v232_v49  ;;  %v142_v48 = vperm.slane %v110_v41, 0  ;;  %v37_v49 = vld [vmem:[%s2246_s1 + $0x4c] sm:$0xf]  ;;  %v196_v59 = vmul.f32 %v132_v45, %v36_v44  ;;  %v198_v63 = vmul.f32 %v134_v50, %v38_v55  ;;  %v106_v2 = vrot.slane %v1581_v6, 7 }
  0x1a   :  { %v207_v58 = vmul.f32 %v143_v52, %v47_v57  ;;  %v197_v62 = vmul.f32 %v133_v46, %v37_v49  ;;  %v144_v3 = vperm.slane %v112_v61, 0  ;;  %v113_v4 = vrot.slane %v1586_v9, 7 }
  0x1b   :  { %v206_v56 = vmul.f32 %v142_v48, %v46_v51  ;;  %v265_v5 = vsel %vm210_vm0, %v196_v59, 0.0  ;;  %v137_v15 = vperm.slane %v106_v2, 0  ;;  %v283_v25 = vsel %vm210_vm0, %v1599_v19, 0.0 }
  0x1c   :  { %v145_v10 = vperm.slane %v113_v4, 0  ;;  %v268_v11 = vsel %vm210_vm0, %v197_v62, 0.0  ;;  %v286_v26 = vsel %vm210_vm0, %v1607_v27, 0.0  ;;  %v289_v28 = vsel %vm210_vm0, %v1618_v32, 0.0 }
  0x1d   :  { %v292_v29 = vsel %vm210_vm0, %v205_v47, 0.0  ;;  %v295_v30 = vsel %vm210_vm0, %v206_v56, 0.0  ;;  %v298_v31 = vsel %vm210_vm0, %v207_v58, 0.0  ;;  %v371_v35 = vlaneseq }
  0x1e   :  { %v209_v9 = vmul.f32 %v145_v10, %v49_v13  ;;  %vm413_vm5 = vcmask 1045509   ;;  %vm415_vm6 = vcmask 1046534   ;;  %vm417_vm7 = vcmask 1047559  }
  0x1f   :  { %239 = vadd.xlane.f32.xlu0 %v238_v60  ;;  %v104_v60 = vrot.slane %v1581_v6, 5  ;;  %v1684_v36 = vand.u32 127, %v371_v35  ;;  %vm444_vm8 = vcmask 31744   ;;  %vm1409_vm9 = vcmask 261120  }
  0x20   :  { %v304_v33 = vsel %vm210_vm0, %v209_v9, 0.0 }
  0x21   :  { %245 = vadd.xlane.f32.xlu2 %v244_v0  ;;  %242 = vadd.xlane.f32.xlu1 %v241_v1  ;;  %v48_v0 = vld [vmem:[%s2246_s1 + $0x78] sm:$0xf]  ;;  %v105_v1 = vrot.slane %v1581_v6, 6  ;;  %v135_v7 = vperm.slane %v104_v60, 0  ;;  %v271_v6 = vsel %vm210_vm0, %v198_v63, 0.0 }
  0x22   :  { %v208_v8 = vmul.f32 %v144_v3, %v48_v0 }
  0x23   :  { %v136_v14 = vperm.slane %v105_v1, 0  ;;  %v199_v18 = vmul.f32 %v135_v7, %v39_v12 }
  0x24   :  { %v301_v19 = vsel %vm210_vm0, %v208_v8, 0.0 }
  0x25   :  { %v200_v20 = vmul.f32 %v136_v14, %v40_v16  ;;  %v274_v22 = vsel %vm210_vm0, %v199_v18, 0.0 }
  0x27   :  { %248 = vadd.xlane.f32.xlu0 %v247_v17  ;;  %v41_v17 = vld [vmem:[%s2246_s1 + $0x5c] sm:$0xf]  ;;  %v277_v23 = vsel %vm210_vm0, %v200_v20, 0.0 }
  0x29   :  { %254 = vadd.xlane.f32.xlu2 %v253_v21  ;;  %251 = vadd.xlane.f32.xlu1 %v250_v24  ;;  %v201_v21 = vmul.f32 %v137_v15, %v41_v17 }
  0x2b   :  { %v280_v24 = vsel %vm210_vm0, %v201_v21, 0.0 }
  0x2f   :  { %257 = vadd.xlane.f32.xlu0 %v256_v42 }
  0x31   :  { %263 = vadd.xlane.f32.xlu2 %v262_v53  ;;  %260 = vadd.xlane.f32.xlu1 %v259_v54 }
  0x37   :  { %266 = vadd.xlane.f32.xlu0 %v265_v5 }
  0x39   :  { %269 = vadd.xlane.f32.xlu1 %v268_v11  ;;  %272 = vadd.xlane.f32.xlu2 %v271_v6 }
  0x3f   :  { %275 = vadd.xlane.f32.xlu0 %v274_v22 }
  0x41   :  { %278 = vadd.xlane.f32.xlu1 %v277_v23  ;;  %281 = vadd.xlane.f32.xlu2 %v280_v24 }
  0x47   :  { %284 = vadd.xlane.f32.xlu0 %v283_v25 }
  0x49   :  { %287 = vadd.xlane.f32.xlu1 %v286_v26  ;;  %290 = vadd.xlane.f32.xlu2 %v289_v28 }
  0x4f   :  { %293 = vadd.xlane.f32.xlu0 %v292_v29 }
  0x51   :  { %296 = vadd.xlane.f32.xlu1 %v295_v30  ;;  %299 = vadd.xlane.f32.xlu2 %v298_v31 }
  0x57   :  { %302 = vadd.xlane.f32.xlu0 %v301_v19 }
  0x59   :  { %305 = vadd.xlane.f32.xlu1 %v304_v33 }
  0x7a   :  { %v213_v27 = vpop.xlane.xlu0 %212 }
  0x7b   :  { %v1686_v37 = vmul.f32 0.17677669, %v213_v27 }
  0x7c   :  { %v225_v32 = vpop.xlane.xlu2 %224  ;;  %v219_v34 = vpop.xlane.xlu1 %218 }
  0x7d   :  { %v1688_v38 = vmul.f32 0.17677669, %v219_v34  ;;  %v373_v43 = vperm.slane %v1686_v37, %v1684_v36  ;;  %v1694_v44 = vmul.f32 0.17677669, %v225_v32 }
  0x7f   :  { %v375_v47 = vperm.slane %v1688_v38, %v1684_v36  ;;  %v377_v52 = vperm.slane %v1694_v44, %v1684_v36 }
  0x82   :  { %v216_v39 = vpop.xlane.xlu0 %215 }
  0x83   :  { %v1690_v40 = vmul.f32 0.17677669, %v216_v39 }
  0x84   :  { %v228_v41 = vpop.xlane.xlu2 %227  ;;  %v222_v42 = vpop.xlane.xlu1 %221 }
  0x85   :  { %v374_v45 = vperm.slane %v1690_v40, %v1684_v36  ;;  %v1698_v46 = vmul.f32 0.17677669, %v222_v42  ;;  %v1702_v48 = vmul.f32 0.17677669, %v228_v41 }
  0x87   :  { %v406_v49 = vsel %vm405_vm1, %v374_v45, %v373_v43  ;;  %v376_v50 = vperm.slane %v1698_v46, %v1684_v36  ;;  %v378_v54 = vperm.slane %v1702_v48, %v1684_v36 }
  0x88   :  { %v408_v51 = vsel %vm407_vm2, %v375_v47, %v406_v49 }
  0x89   :  { %v410_v53 = vsel %vm409_vm3, %v376_v50, %v408_v51 }
  0x8a   :  { %v231_v55 = vpop.xlane.xlu0 %230  ;;  %v412_v57 = vsel %vm411_vm4, %v377_v52, %v410_v53 }
  0x8b   :  { %v1713_v56 = vmul.f32 0.17677669, %v231_v55  ;;  %v414_v62 = vsel %vm413_vm5, %v378_v54, %v412_v57 }
  0x8c   :  { %v237_v58 = vpop.xlane.xlu2 %236  ;;  %v234_v59 = vpop.xlane.xlu1 %233 }
  0x8d   :  { %v379_v60 = vperm.slane %v1713_v56, %v1684_v36  ;;  %v1718_v61 = vmul.f32 0.17677669, %v234_v59  ;;  %v1726_v4 = vmul.f32 0.17677669, %v237_v58 }
  0x8f   :  { %v380_v63 = vperm.slane %v1718_v61, %v1684_v36  ;;  %v416_v0 = vsel %vm415_vm6, %v379_v60, %v414_v62  ;;  %v381_v12 = vperm.slane %v1726_v4, %v1684_v36 }
  0x91   :  { %v418_v1 = vsel %vm417_vm7, %v380_v63, %v416_v0 }
  0x92   :  { %v240_v2 = vpop.xlane.xlu0 %239  ;;  %v445_v3 = vsel %vm444_vm8, %v418_v1, -inf }
  0x93   :  { %v1728_v5 = vmul.f32 0.17677669, %v240_v2  ;;  %446 = vmax.xlane.f32.xlu2 %v445_v3 }
  0x94   :  { %v246_v7 = vpop.xlane.xlu2 %245  ;;  %v243_v8 = vpop.xlane.xlu1 %242 }
  0x95   :  { %v382_v10 = vperm.slane %v1728_v5, %v1684_v36  ;;  %v1732_v11 = vmul.f32 0.17677669, %v243_v8  ;;  %v1736_v13 = vmul.f32 0.17677669, %v246_v7 }
  0x97   :  { %v383_v6 = vperm.slane %v1732_v11, %v1684_v36  ;;  %v419_v14 = vsel %vm405_vm1, %v382_v10, %v381_v12  ;;  %v384_v9 = vperm.slane %v1736_v13, %v1684_v36 }
  0x99   :  { %v420_v17 = vsel %vm407_vm2, %v383_v6, %v419_v14 }
  0x9a   :  { %v249_v15 = vpop.xlane.xlu0 %248  ;;  %v421_v24 = vsel %vm409_vm3, %v384_v9, %v420_v17 }
  0x9b   :  { %v1743_v16 = vmul.f32 0.17677669, %v249_v15 }
  0x9c   :  { %v255_v18 = vpop.xlane.xlu2 %254  ;;  %v252_v20 = vpop.xlane.xlu1 %251 }
  0x9d   :  { %v385_v21 = vperm.slane %v1743_v16, %v1684_v36  ;;  %v1748_v22 = vmul.f32 0.17677669, %v252_v20  ;;  %v1750_v23 = vmul.f32 0.17677669, %v255_v18 }
  0x9f   :  { %v386_v25 = vperm.slane %v1748_v22, %v1684_v36  ;;  %v422_v26 = vsel %vm411_vm4, %v385_v21, %v421_v24  ;;  %v387_v28 = vperm.slane %v1750_v23, %v1684_v36 }
  0xa1   :  { %v423_v31 = vsel %vm413_vm5, %v386_v25, %v422_v26 }
  0xa2   :  { %v258_v29 = vpop.xlane.xlu0 %257  ;;  %v424_v32 = vsel %vm415_vm6, %v387_v28, %v423_v31 }
  0xa3   :  { %v1758_v30 = vmul.f32 0.17677669, %v258_v29 }
  0xa4   :  { %v264_v19 = vpop.xlane.xlu2 %263  ;;  %v261_v33 = vpop.xlane.xlu1 %260 }
  0xa5   :  { %v388_v27 = vperm.slane %v1758_v30, %v1684_v36  ;;  %v1764_v34 = vmul.f32 0.17677669, %v264_v19  ;;  %v1766_v35 = vmul.f32 0.17677669, %v261_v33 }
  0xa7   :  { %v425_v39 = vsel %vm417_vm7, %v388_v27, %v424_v32  ;;  %v390_v43 = vperm.slane %v1764_v34, %v1684_v36  ;;  %v389_v45 = vperm.slane %v1766_v35, %v1684_v36 }
  0xa8   :  { %v448_v41 = vsel %vm444_vm8, %v425_v39, -inf }
  0xa9   :  { %449 = vmax.xlane.f32.xlu0 %v448_v41  ;;  %v426_v54 = vsel %vm405_vm1, %v390_v43, %v389_v45 }
  0xaa   :  { %v267_v42 = vpop.xlane.xlu0 %266 }
  0xab   :  { %v1774_v47 = vmul.f32 0.17677669, %v267_v42 }
  0xac   :  { %v270_v49 = vpop.xlane.xlu1 %269  ;;  %v273_v50 = vpop.xlane.xlu2 %272 }
  0xad   :  { %v391_v51 = vperm.slane %v1774_v47, %v1684_v36  ;;  %v1778_v52 = vmul.f32 0.17677669, %v270_v49  ;;  %v1780_v53 = vmul.f32 0.17677669, %v273_v50 }
  0xaf   :  { %v392_v55 = vperm.slane %v1778_v52, %v1684_v36  ;;  %v427_v57 = vsel %vm407_vm2, %v391_v51, %v426_v54  ;;  %v393_v58 = vperm.slane %v1780_v53, %v1684_v36 }
  0xb1   :  { %v428_v60 = vsel %vm409_vm3, %v392_v55, %v427_v57 }
  0xb2   :  { %v276_v59 = vpop.xlane.xlu0 %275  ;;  %v429_v7 = vsel %vm411_vm4, %v393_v58, %v428_v60 }
  0xb3   :  { %v1789_v62 = vmul.f32 0.17677669, %v276_v59 }
  0xb4   :  { %v279_v63 = vpop.xlane.xlu1 %278  ;;  %v282_v0 = vpop.xlane.xlu2 %281 }
  0xb5   :  { %v394_v1 = vperm.slane %v1789_v62, %v1684_v36  ;;  %v1793_v2 = vmul.f32 0.17677669, %v279_v63  ;;  %v1795_v3 = vmul.f32 0.17677669, %v282_v0 }
  0xb7   :  { %v395_v8 = vperm.slane %v1793_v2, %v1684_v36  ;;  %v396_v10 = vperm.slane %v1795_v3, %v1684_v36  ;;  %v430_v12 = vsel %vm413_vm5, %v394_v1, %v429_v7  ;;  %v1494_v7 = vmov 0  }
  0xb8   :  { %1421 = vset.pattern.permute.xlu2 %v1494_v7  ;;  %1420 = vset.pattern.permute.xlu1 %v1494_v7 }
  0xb9   :  { %v431_v6 = vsel %vm415_vm6, %v395_v8, %v430_v12  ;;  %1419 = vset.pattern.permute.xlu0 %v1494_v7 }
  0xba   :  { %v285_v14 = vpop.xlane.xlu0 %284  ;;  %v432_v15 = vsel %vm417_vm7, %v396_v10, %v431_v6 }
  0xbb   :  { %v451_v9 = vsel %vm444_vm8, %v432_v15, -inf  ;;  %v1806_v17 = vmul.f32 0.17677669, %v285_v14 }
  0xbc   :  { %v288_v18 = vpop.xlane.xlu1 %287  ;;  %452 = vmax.xlane.f32.xlu1 %v451_v9  ;;  %v291_v20 = vpop.xlane.xlu2 %290 }
  0xbd   :  { %v1808_v21 = vmul.f32 0.17677669, %v288_v18  ;;  %v1810_v24 = vmul.f32 0.17677669, %v291_v20  ;;  %v397_v25 = vperm.slane %v1806_v17, %v1684_v36 }
  0xbf   :  { %v398_v26 = vperm.slane %v1808_v21, %v1684_v36  ;;  %v399_v29 = vperm.slane %v1810_v24, %v1684_v36 }
  0xc1   :  { %v433_v19 = vsel %vm405_vm1, %v398_v26, %v397_v25 }
  0xc2   :  { %v294_v28 = vpop.xlane.xlu0 %293  ;;  %v434_v42 = vsel %vm407_vm2, %v399_v29, %v433_v19 }
  0xc3   :  { %v1818_v31 = vmul.f32 0.17677669, %v294_v28 }
  0xc4   :  { %v297_v33 = vpop.xlane.xlu1 %296  ;;  %v300_v27 = vpop.xlane.xlu2 %299 }
  0xc5   :  { %v400_v32 = vperm.slane %v1818_v31, %v1684_v36  ;;  %v1823_v39 = vmul.f32 0.17677669, %v297_v33  ;;  %v1825_v41 = vmul.f32 0.17677669, %v300_v27 }
  0xc7   :  { %v401_v43 = vperm.slane %v1823_v39, %v1684_v36  ;;  %v435_v45 = vsel %vm409_vm3, %v400_v32, %v434_v42  ;;  %v402_v49 = vperm.slane %v1825_v41, %v1684_v36 }
  0xc9   :  { %v436_v51 = vsel %vm411_vm4, %v401_v43, %v435_v45 }
  0xca   :  { %v303_v50 = vpop.xlane.xlu0 %302  ;;  %v437_v59 = vsel %vm413_vm5, %v402_v49, %v436_v51 }
  0xcb   :  { %v1834_v54 = vmul.f32 0.17677669, %v303_v50 }
  0xcc   :  { %v306_v55 = vpop.xlane.xlu1 %305 }
  0xcd   :  { %v403_v57 = vperm.slane %v1834_v54, %v1684_v36  ;;  %v1838_v58 = vmul.f32 0.17677669, %v306_v55 }
  0xcf   :  { %v404_v60 = vperm.slane %v1838_v58, %v1684_v36  ;;  %v438_v63 = vsel %vm415_vm6, %v403_v57, %v437_v59 }
  0xd1   :  { %v439_v0 = vsel %vm417_vm7, %v404_v60, %v438_v63 }
  0xd2   :  { %v454_v1 = vsel %vm444_vm8, %v439_v0, -inf }
  0xd3   :  { %455 = vmax.xlane.f32.xlu2 %v454_v1 }
 0x106   :  { %v447_v8 = vpop.xlane.xlu2 %446 }
 0x107   :  { %v461_v10 = vperm.slane %v447_v8, 0  ;;  %v462_v12 = vperm.slane %v447_v8, 1  ;;  %v463_v6 = vperm.slane %v447_v8, 2  ;;  %v468_v18 = vperm.slane %v447_v8, 7 }
 0x108   :  { %v465_v20 = vperm.slane %v447_v8, 4  ;;  %v464_v25 = vperm.slane %v447_v8, 3  ;;  %v467_v32 = vperm.slane %v447_v8, 6  ;;  %v466_v42 = vperm.slane %v447_v8, 5 }
 0x109   :  { %v525_v14 = vsub.f32 %v1686_v37, %v461_v10  ;;  %v526_v15 = vsub.f32 %v1690_v40, %v462_v12  ;;  %v527_v9 = vsub.f32 %v1688_v38, %v463_v6  ;;  %v532_v19 = vsub.f32 %v1718_v61, %v468_v18 }
 0x10a   :  { %v529_v33 = vsub.f32 %v1694_v44, %v465_v20  ;;  %v528_v27 = vsub.f32 %v1698_v46, %v464_v25  ;;  %v531_v44 = vsub.f32 %v1713_v56, %v467_v32  ;;  %v530_v46 = vsub.f32 %v1702_v48, %v466_v42 }
 0x10b   :  { %v557_v26 = vmul.f32 1.442695, %v525_v14  ;;  %v559_v28 = vmul.f32 1.442695, %v526_v15  ;;  %v561_v29 = vmul.f32 1.442695, %v527_v9 }
 0x10c   :  { %v571_v37 = vmul.f32 1.442695, %v532_v19  ;;  %v565_v40 = vmul.f32 1.442695, %v529_v33  ;;  %v563_v43 = vmul.f32 1.442695, %v528_v27 }
 0x10d   :  { %1422 = vpow2.f32 %v557_v26  ;;  %v569_v61 = vmul.f32 1.442695, %v531_v44  ;;  %v567_v50 = vmul.f32 1.442695, %v530_v46 }
 0x10e   :  { %1424 = vpow2.f32 %v559_v28 }
 0x10f   :  { %1426 = vpow2.f32 %v561_v29 }
 0x110   :  { %1428 = vpow2.f32 %v571_v37 }
 0x111   :  { %1430 = vpow2.f32 %v565_v40 }
 0x112   :  { %1432 = vpow2.f32 %v563_v43 }
 0x113   :  { %v1852_v38 = vpop.eup %1422  ;;  %1434 = vpow2.f32 %v569_v61 }
 0x114   :  { %v1854_v45 = vpop.eup %1424  ;;  %654 = vperm.xlu0 %1419, %v1852_v38   ;;  %1436 = vpow2.f32 %v567_v50 }
 0x115   :  { %v1857_v49 = vpop.eup %1426  ;;  %657 = vperm.xlu1 %1420, %v1854_v45  }
 0x116   :  { %660 = vperm.xlu2 %1421, %v1857_v49   ;;  %v1863_v51 = vpop.eup %1428 }
 0x117   :  { %v1865_v55 = vpop.eup %1430 }
 0x118   :  { %v1868_v59 = vpop.eup %1432 }
 0x119   :  { %v1875_v6 = vpop.eup %1434 }
 0x11a   :  { %v1878_v18 = vpop.eup %1436 }
 0x11c   :  { %675 = vperm.xlu0 %1419, %v1863_v51   ;;  %v450_v57 = vpop.xlane.xlu0 %449 }
 0x11d   :  { %666 = vperm.xlu1 %1420, %v1865_v55   ;;  %v471_v56 = vperm.slane %v450_v57, 2  ;;  %v470_v60 = vperm.slane %v450_v57, 1  ;;  %v469_v63 = vperm.slane %v450_v57, 0  ;;  %v474_v7 = vperm.slane %v450_v57, 5 }
 0x11e   :  { %663 = vperm.xlu2 %1421, %v1868_v59   ;;  %v473_v12 = vperm.slane %v450_v57, 4  ;;  %v472_v9 = vperm.slane %v450_v57, 3  ;;  %v476_v25 = vperm.slane %v450_v57, 7  ;;  %v475_v28 = vperm.slane %v450_v57, 6 }
 0x11f   :  { %v535_v48 = vsub.f32 %v1732_v11, %v471_v56  ;;  %v534_v0 = vsub.f32 %v1728_v5, %v470_v60  ;;  %v533_v1 = vsub.f32 %v1726_v4, %v469_v63  ;;  %v538_v15 = vsub.f32 %v1748_v22, %v474_v7 }
 0x120   :  { %v537_v4 = vsub.f32 %v1743_v16, %v473_v12  ;;  %v536_v11 = vsub.f32 %v1736_v13, %v472_v9  ;;  %v540_v16 = vsub.f32 %v1758_v30, %v476_v25  ;;  %v539_v33 = vsub.f32 %v1750_v23, %v475_v28 }
 0x121   :  { %v577_v8 = vmul.f32 1.442695, %v535_v48  ;;  %v575_v10 = vmul.f32 1.442695, %v534_v0  ;;  %v573_v14 = vmul.f32 1.442695, %v533_v1 }
 0x122   :  { %v583_v5 = vmul.f32 1.442695, %v538_v15  ;;  %v581_v22 = vmul.f32 1.442695, %v537_v4  ;;  %v579_v26 = vmul.f32 1.442695, %v536_v11 }
 0x123   :  { %1438 = vpow2.f32 %v577_v8  ;;  %v587_v32 = vmul.f32 1.442695, %v540_v16  ;;  %v585_v44 = vmul.f32 1.442695, %v539_v33 }
 0x124   :  { %1440 = vpow2.f32 %v575_v10 }
 0x125   :  { %672 = vperm.xlu1 %1420, %v1875_v6   ;;  %1442 = vpow2.f32 %v573_v14 }
 0x126   :  { %669 = vperm.xlu2 %1421, %v1878_v18   ;;  %1444 = vpow2.f32 %v583_v5 }
 0x127   :  { %1446 = vpow2.f32 %v581_v22 }
 0x128   :  { %1448 = vpow2.f32 %v579_v26 }
 0x129   :  { %v1884_v20 = vpop.eup %1438  ;;  %1450 = vpow2.f32 %v587_v32 }
 0x12a   :  { %684 = vperm.xlu0 %1419, %v1884_v20   ;;  %v1887_v29 = vpop.eup %1440 }
 0x12b   :  { %v1889_v19 = vpop.eup %1442 }
 0x12c   :  { %v1895_v37 = vpop.eup %1444 }
 0x12d   :  { %681 = vperm.xlu1 %1420, %v1887_v29   ;;  %v1899_v30 = vpop.eup %1446 }
 0x12e   :  { %678 = vperm.xlu2 %1421, %v1889_v19   ;;  %v1901_v50 = vpop.eup %1448 }
 0x12f   :  { %v453_v13 = vpop.xlane.xlu1 %452  ;;  %v1908_v0 = vpop.eup %1450 }
 0x130   :  { %v477_v27 = vperm.slane %v453_v13, 0  ;;  %v479_v40 = vperm.slane %v453_v13, 2  ;;  %v480_v43 = vperm.slane %v453_v13, 3  ;;  %v478_v46 = vperm.slane %v453_v13, 1 }
 0x131   :  { %v482_v60 = vperm.slane %v453_v13, 5  ;;  %v483_v48 = vperm.slane %v453_v13, 6  ;;  %v481_v7 = vperm.slane %v453_v13, 4  ;;  %v484_v15 = vperm.slane %v453_v13, 7 }
 0x132   :  { %693 = vperm.xlu0 %1419, %v1895_v37   ;;  %v541_v42 = vsub.f32 %v1766_v35, %v477_v27  ;;  %v543_v23 = vsub.f32 %v1774_v47, %v479_v40  ;;  %v544_v57 = vsub.f32 %v1778_v52, %v480_v43  ;;  %v542_v35 = vsub.f32 %v1764_v34, %v478_v46 }
 0x133   :  { %v546_v47 = vsub.f32 %v1789_v62, %v482_v60  ;;  %v547_v34 = vsub.f32 %v1793_v2, %v483_v48  ;;  %v545_v52 = vsub.f32 %v1780_v53, %v481_v7  ;;  %v548_v53 = vsub.f32 %v1795_v3, %v484_v15 }
 0x134   :  { %v589_v61 = vmul.f32 1.442695, %v541_v42  ;;  %v593_v56 = vmul.f32 1.442695, %v543_v23  ;;  %v595_v63 = vmul.f32 1.442695, %v544_v57 }
 0x135   :  { %690 = vperm.xlu1 %1420, %v1899_v30   ;;  %v591_v1 = vmul.f32 1.442695, %v542_v35  ;;  %v599_v12 = vmul.f32 1.442695, %v546_v47  ;;  %v601_v14 = vmul.f32 1.442695, %v547_v34 }
 0x136   :  { %687 = vperm.xlu2 %1421, %v1901_v50   ;;  %1452 = vpow2.f32 %v589_v61  ;;  %v597_v4 = vmul.f32 1.442695, %v545_v52  ;;  %v603_v16 = vmul.f32 1.442695, %v548_v53 }
 0x137   :  { %1454 = vpow2.f32 %v585_v44 }
 0x138   :  { %1456 = vpow2.f32 %v593_v56 }
 0x139   :  { %1458 = vpow2.f32 %v595_v63 }
 0x13a   :  { %1460 = vpow2.f32 %v591_v1 }
 0x13b   :  { %1462 = vpow2.f32 %v599_v12 }
 0x13c   :  { %v1910_v8 = vpop.eup %1452  ;;  %1464 = vpow2.f32 %v601_v14 }
 0x13d   :  { %v1912_v10 = vpop.eup %1454  ;;  %699 = vperm.xlu1 %1420, %v1908_v0   ;;  %702 = vperm.xlu0 %1419, %v1910_v8   ;;  %1466 = vpow2.f32 %v597_v4 }
 0x13e   :  { %696 = vperm.xlu2 %1421, %v1912_v10   ;;  %v1920_v9 = vpop.eup %1456 }
 0x13f   :  { %v1922_v5 = vpop.eup %1458 }
 0x140   :  { %v1924_v11 = vpop.eup %1460 }
 0x141   :  { %v1932_v33 = vpop.eup %1462 }
 0x142   :  { %v1934_v42 = vpop.eup %1464 }
 0x143   :  { %v1936_v43 = vpop.eup %1466 }
 0x145   :  { %708 = vperm.xlu1 %1420, %v1920_v9   ;;  %711 = vperm.xlu0 %1419, %v1922_v5  }
 0x146   :  { %705 = vperm.xlu2 %1421, %v1924_v11   ;;  %v456_v62 = vpop.xlane.xlu2 %455 }
 0x147   :  { %v485_v2 = vperm.slane %v456_v62, 0  ;;  %v486_v25 = vperm.slane %v456_v62, 1  ;;  %v488_v28 = vperm.slane %v456_v62, 3  ;;  %v489_v13 = vperm.slane %v456_v62, 4 }
 0x148   :  { %v487_v40 = vperm.slane %v456_v62, 2  ;;  %v491_v46 = vperm.slane %v456_v62, 6  ;;  %v492_v23 = vperm.slane %v456_v62, 7  ;;  %v490_v56 = vperm.slane %v456_v62, 5 }
 0x149   :  { %v549_v22 = vsub.f32 %v1806_v17, %v485_v2  ;;  %v550_v26 = vsub.f32 %v1808_v21, %v486_v25  ;;  %v552_v3 = vsub.f32 %v1818_v31, %v488_v28  ;;  %v553_v17 = vsub.f32 %v1823_v39, %v489_v13 }
 0x14a   :  { %v551_v21 = vsub.f32 %v1810_v24, %v487_v40  ;;  %v555_v31 = vsub.f32 %v1834_v54, %v491_v46  ;;  %v556_v24 = vsub.f32 %v1838_v58, %v492_v23  ;;  %v554_v39 = vsub.f32 %v1825_v41, %v490_v56 }
 0x14b   :  { %v605_v27 = vmul.f32 1.442695, %v549_v22  ;;  %v607_v32 = vmul.f32 1.442695, %v550_v26  ;;  %v611_v44 = vmul.f32 1.442695, %v552_v3 }
 0x14c   :  { %v613_v61 = vmul.f32 1.442695, %v553_v17  ;;  %v609_v35 = vmul.f32 1.442695, %v551_v21  ;;  %v617_v48 = vmul.f32 1.442695, %v555_v31 }
 0x14d   :  { %717 = vperm.xlu1 %1420, %v1932_v33   ;;  %720 = vperm.xlu0 %1419, %v1934_v42   ;;  %1468 = vpow2.f32 %v605_v27  ;;  %v619_v1 = vmul.f32 1.442695, %v556_v24  ;;  %v615_v47 = vmul.f32 1.442695, %v554_v39 }
 0x14e   :  { %714 = vperm.xlu2 %1421, %v1936_v43   ;;  %1470 = vpow2.f32 %v607_v32 }
 0x14f   :  { %1472 = vpow2.f32 %v603_v16 }
 0x150   :  { %1474 = vpow2.f32 %v611_v44 }
 0x151   :  { %1476 = vpow2.f32 %v613_v61 }
 0x152   :  { %1478 = vpow2.f32 %v609_v35 }
 0x153   :  { %v1944_v57 = vpop.eup %1468  ;;  %1480 = vpow2.f32 %v617_v48 }
 0x154   :  { %v1946_v60 = vpop.eup %1470  ;;  %1482 = vpow2.f32 %v619_v1 }
 0x155   :  { %v1948_v63 = vpop.eup %1472  ;;  %726 = vperm.xlu1 %1420, %v1944_v57   ;;  %729 = vperm.xlu0 %1419, %v1946_v60   ;;  %1484 = vpow2.f32 %v615_v47 }
 0x156   :  { %723 = vperm.xlu2 %1421, %v1948_v63   ;;  %v1956_v7 = vpop.eup %1474 }
 0x157   :  { %v1958_v34 = vpop.eup %1476 }
 0x158   :  { %v1960_v52 = vpop.eup %1478 }
 0x159   :  { %v1965_v54 = vpop.eup %1480 }
 0x15a   :  { %v1967_v41 = vpop.eup %1482 }
 0x15b   :  { %v1969_v58 = vpop.eup %1484 }
 0x15d   :  { %735 = vperm.xlu1 %1420, %v1956_v7   ;;  %738 = vperm.xlu0 %1419, %v1958_v34  }
 0x15e   :  { %732 = vperm.xlu2 %1421, %v1960_v52  }
 0x165   :  { %744 = vperm.xlu1 %1420, %v1965_v54   ;;  %747 = vperm.xlu0 %1419, %v1967_v41  }
 0x166   :  { %741 = vperm.xlu2 %1421, %v1969_v58  }
 0x170   :  { %v661_v12 = vpop.permute.xlu2 %660 }
 0x171   :  { %v751_v28 = vperm.slane %v661_v12, %v1684_v36 }
 0x178   :  { %v664_v14 = vpop.permute.xlu2 %663 }
 0x179   :  { %v752_v27 = vperm.slane %v664_v14, %v1684_v36 }
 0x180   :  { %v670_v15 = vpop.permute.xlu2 %669 }
 0x181   :  { %v754_v21 = vperm.slane %v670_v15, %v1684_v36 }
 0x186   :  { %v655_v62 = vpop.permute.xlu0 %654 }
 0x187   :  { %v658_v4 = vpop.permute.xlu1 %657  ;;  %v749_v2 = vperm.slane %v655_v62, %v1684_v36 }
 0x188   :  { %v750_v53 = vperm.slane %v658_v4, %v1684_v36  ;;  %v679_v25 = vpop.permute.xlu2 %678 }
 0x189   :  { %v757_v47 = vperm.slane %v679_v25, %v1684_v36 }
 0x18a   :  { %v781_v22 = vsel %vm405_vm1, %v750_v53, %v749_v2 }
 0x18b   :  { %v782_v16 = vsel %vm407_vm2, %v751_v28, %v781_v22 }
 0x18c   :  { %v783_v32 = vsel %vm409_vm3, %v752_v27, %v782_v16 }
 0x18e   :  { %v676_v40 = vpop.permute.xlu0 %675 }
 0x18f   :  { %v667_v26 = vpop.permute.xlu1 %666  ;;  %v756_v61 = vperm.slane %v676_v40, %v1684_v36 }
 0x190   :  { %v753_v13 = vperm.slane %v667_v26, %v1684_v36  ;;  %v688_v17 = vpop.permute.xlu2 %687 }
 0x191   :  { %v760_v53 = vperm.slane %v688_v17, %v1684_v36 }
 0x192   :  { %v784_v3 = vsel %vm411_vm4, %v753_v13, %v783_v32 }
 0x193   :  { %v785_v23 = vsel %vm413_vm5, %v754_v21, %v784_v3 }
 0x197   :  { %v673_v44 = vpop.permute.xlu1 %672 }
 0x198   :  { %v755_v46 = vperm.slane %v673_v44, %v1684_v36  ;;  %v697_v48 = vpop.permute.xlu2 %696 }
 0x199   :  { %v763_v13 = vperm.slane %v697_v48, %v1684_v36 }
 0x19a   :  { %v786_v35 = vsel %vm415_vm6, %v755_v46, %v785_v23 }
 0x19b   :  { %v787_v56 = vsel %vm417_vm7, %v756_v61, %v786_v35 }
 0x19c   :  { %v813_v31 = vsel %vm444_vm8, %v787_v56, 0.0  ;;  %v685_v24 = vpop.permute.xlu0 %684 }
 0x19d   :  { %814 = vadd.xlane.f32.xlu2 %v813_v31  ;;  %v759_v14 = vperm.slane %v685_v24, %v1684_v36 }
 0x19f   :  { %v682_v39 = vpop.permute.xlu1 %681 }
 0x1a0   :  { %v758_v1 = vperm.slane %v682_v39, %v1684_v36  ;;  %v706_v22 = vpop.permute.xlu2 %705 }
 0x1a1   :  { %v766_v35 = vperm.slane %v706_v22, %v1684_v36 }
 0x1a2   :  { %v788_v12 = vsel %vm405_vm1, %v758_v1, %v757_v47 }
 0x1a3   :  { %v789_v15 = vsel %vm407_vm2, %v759_v14, %v788_v12 }
 0x1a4   :  { %v694_v4 = vpop.permute.xlu0 %693  ;;  %v790_v26 = vsel %vm409_vm3, %v760_v53, %v789_v15 }
 0x1a5   :  { %v762_v16 = vperm.slane %v694_v4, %v1684_v36 }
 0x1a7   :  { %v691_v62 = vpop.permute.xlu1 %690 }
 0x1a8   :  { %v761_v2 = vperm.slane %v691_v62, %v1684_v36  ;;  %v715_v44 = vpop.permute.xlu2 %714 }
 0x1a9   :  { %v769_v47 = vperm.slane %v715_v44, %v1684_v36 }
 0x1aa   :  { %v791_v28 = vsel %vm411_vm4, %v761_v2, %v790_v26 }
 0x1ab   :  { %v792_v25 = vsel %vm413_vm5, %v762_v16, %v791_v28 }
 0x1ac   :  { %v793_v3 = vsel %vm415_vm6, %v763_v13, %v792_v25 }
 0x1af   :  { %v700_v27 = vpop.permute.xlu1 %699  ;;  %v703_v32 = vpop.permute.xlu0 %702 }
 0x1b0   :  { %v764_v40 = vperm.slane %v700_v27, %v1684_v36  ;;  %v765_v46 = vperm.slane %v703_v32, %v1684_v36  ;;  %v724_v48 = vpop.permute.xlu2 %723 }
 0x1b1   :  { %v772_v53 = vperm.slane %v724_v48, %v1684_v36 }
 0x1b2   :  { %v794_v17 = vsel %vm417_vm7, %v764_v40, %v793_v3  ;;  %v795_v31 = vsel %vm405_vm1, %v766_v35, %v765_v46 }
 0x1b3   :  { %v816_v21 = vsel %vm444_vm8, %v794_v17, 0.0 }
 0x1b4   :  { %817 = vadd.xlane.f32.xlu1 %v816_v21 }
 0x1b7   :  { %v709_v61 = vpop.permute.xlu1 %708  ;;  %v712_v23 = vpop.permute.xlu0 %711 }
 0x1b8   :  { %v767_v56 = vperm.slane %v709_v61, %v1684_v36  ;;  %v768_v24 = vperm.slane %v712_v23, %v1684_v36  ;;  %v733_v13 = vpop.permute.xlu2 %732 }
 0x1b9   :  { %v775_v21 = vperm.slane %v733_v13, %v1684_v36 }
 0x1ba   :  { %v796_v39 = vsel %vm407_vm2, %v767_v56, %v795_v31 }
 0x1bb   :  { %v797_v1 = vsel %vm409_vm3, %v768_v24, %v796_v39 }
 0x1bc   :  { %v798_v62 = vsel %vm411_vm4, %v769_v47, %v797_v1 }
 0x1bf   :  { %v718_v12 = vpop.permute.xlu1 %717  ;;  %v721_v14 = vpop.permute.xlu0 %720 }
 0x1c0   :  { %v770_v15 = vperm.slane %v718_v12, %v1684_v36  ;;  %v771_v4 = vperm.slane %v721_v14, %v1684_v36  ;;  %v742_v35 = vpop.permute.xlu2 %741 }
 0x1c1   :  { %v778_v31 = vperm.slane %v742_v35, %v1684_v36 }
 0x1c2   :  { %v799_v2 = vsel %vm413_vm5, %v770_v15, %v798_v62 }
 0x1c3   :  { %v800_v22 = vsel %vm415_vm6, %v771_v4, %v799_v2 }
 0x1c4   :  { %v801_v26 = vsel %vm417_vm7, %v772_v53, %v800_v22 }
 0x1c5   :  { %v819_v28 = vsel %vm444_vm8, %v801_v26, 0.0 }
 0x1c6   :  { %820 = vadd.xlane.f32.xlu0 %v819_v28 }
 0x1c7   :  { %v727_v16 = vpop.permute.xlu1 %726  ;;  %v730_v25 = vpop.permute.xlu0 %729 }
 0x1c8   :  { %v773_v27 = vperm.slane %v727_v16, %v1684_v36  ;;  %v774_v32 = vperm.slane %v730_v25, %v1684_v36 }
 0x1ca   :  { %v802_v40 = vsel %vm405_vm1, %v774_v32, %v773_v27 }
 0x1cb   :  { %v803_v46 = vsel %vm407_vm2, %v775_v21, %v802_v40 }
 0x1cf   :  { %v736_v3 = vpop.permute.xlu1 %735  ;;  %v739_v17 = vpop.permute.xlu0 %738 }
 0x1d0   :  { %v776_v44 = vperm.slane %v736_v3, %v1684_v36  ;;  %v777_v61 = vperm.slane %v739_v17, %v1684_v36 }
 0x1d2   :  { %v804_v23 = vsel %vm409_vm3, %v776_v44, %v803_v46 }
 0x1d3   :  { %v805_v56 = vsel %vm411_vm4, %v777_v61, %v804_v23 }
 0x1d4   :  { %v806_v47 = vsel %vm413_vm5, %v778_v31, %v805_v56 }
 0x1d7   :  { %v745_v24 = vpop.permute.xlu1 %744  ;;  %v748_v39 = vpop.permute.xlu0 %747 }
 0x1d8   :  { %v779_v48 = vperm.slane %v745_v24, %v1684_v36  ;;  %v780_v1 = vperm.slane %v748_v39, %v1684_v36 }
 0x1da   :  { %v807_v12 = vsel %vm415_vm6, %v779_v48, %v806_v47 }
 0x1db   :  { %v808_v14 = vsel %vm417_vm7, %v780_v1, %v807_v12 }
 0x1dc   :  { %v822_v15 = vsel %vm444_vm8, %v808_v14, 0.0 }
 0x1dd   :  { %823 = vadd.xlane.f32.xlu2 %v822_v15 }
 0x210   :  { %v815_v4 = vpop.xlane.xlu2 %814 }
 0x211   :  { %1486 = vrcp.f32 %v815_v4 }
 0x217   :  { %v1487_v62 = vpop.eup %1486 }
 0x218   :  { %v833_v53 = vperm.slane %v1487_v62, 0  ;;  %v835_v2 = vperm.slane %v1487_v62, 2  ;;  %v834_v22 = vperm.slane %v1487_v62, 1  ;;  %v836_v16 = vperm.slane %v1487_v62, 3 }
 0x219   :  { %v837_v25 = vperm.slane %v1487_v62, 4  ;;  %v838_v13 = vperm.slane %v1487_v62, 5  ;;  %v840_v3 = vperm.slane %v1487_v62, 7 }
 0x21a   :  { %v897_v26 = vmul.f32 %v1852_v38, %v833_v53  ;;  %v899_v28 = vmul.f32 %v1857_v49, %v835_v2  ;;  %v898_v36 = vmul.f32 %v1854_v45, %v834_v22  ;;  %v900_v27 = vmul.f32 %v1868_v59, %v836_v16 }
 0x21b   :  { %v901_v32 = vmul.f32 %v1865_v55, %v837_v25  ;;  %v902_v40 = vmul.f32 %v1878_v18, %v838_v13  ;;  %v839_v38 = vperm.slane %v1487_v62, 6  ;;  %v904_v17 = vmul.f32 %v1863_v51, %v840_v3 }
 0x21c   :  { %931 = vperm.xlu1 %1420, %v897_v26   ;;  %941 = vperm.xlu0 %1419, %v899_v28  }
 0x21d   :  { %936 = vperm.xlu2 %1421, %v898_v36   ;;  %v903_v45 = vmul.f32 %v1875_v6, %v839_v38 }
 0x224   :  { %946 = vperm.xlu1 %1420, %v900_v27   ;;  %951 = vperm.xlu0 %1419, %v901_v32  }
 0x225   :  { %956 = vperm.xlu2 %1421, %v902_v40   ;;  %v51_v40 = vld [vmem:[%s2247_s2 + $0x4] sm:$0xf] }
 0x227   :  { %v818_v49 = vpop.xlane.xlu1 %817 }
 0x228   :  { %1488 = vrcp.f32 %v818_v49 }
 0x22c   :  { %961 = vperm.xlu1 %1420, %v903_v45   ;;  %966 = vperm.xlu0 %1419, %v904_v17   ;;  %v52_v45 = vld [vmem:[%s2247_s2 + $0x8] sm:$0xf] }
 0x22e   :  { %v1489_v21 = vpop.eup %1488 }
 0x22f   :  { %v841_v44 = vperm.slane %v1489_v21, 0  ;;  %v842_v59 = vperm.slane %v1489_v21, 1  ;;  %v843_v46 = vperm.slane %v1489_v21, 2  ;;  %v844_v23 = vperm.slane %v1489_v21, 3 }
 0x230   :  { %v845_v35 = vperm.slane %v1489_v21, 4  ;;  %v846_v6 = vperm.slane %v1489_v21, 5 }
 0x231   :  { %v905_v55 = vmul.f32 %v1889_v19, %v841_v44  ;;  %v906_v18 = vmul.f32 %v1887_v29, %v842_v59  ;;  %v907_v61 = vmul.f32 %v1884_v20, %v843_v46  ;;  %v908_v51 = vmul.f32 %v1901_v50, %v844_v23 }
 0x232   :  { %v909_v31 = vmul.f32 %v1899_v30, %v845_v35  ;;  %v910_v24 = vmul.f32 %v1895_v37, %v846_v6  ;;  %v847_v29 = vperm.slane %v1489_v21, 6  ;;  %v848_v19 = vperm.slane %v1489_v21, 7 }
 0x233   :  { %971 = vperm.xlu2 %1421, %v905_v55  }
 0x234   :  { %976 = vperm.xlu1 %1420, %v906_v18   ;;  %981 = vperm.xlu0 %1419, %v907_v61   ;;  %v911_v39 = vmul.f32 %v1912_v10, %v847_v29  ;;  %v912_v1 = vmul.f32 %v1908_v0, %v848_v19  ;;  %v53_v29 = vld [vmem:[%s2247_s2 + $0xc] sm:$0xf]  ;;  %v54_v19 = vld [vmem:[%s2247_s2 + $0x10] sm:$0xf] }
 0x239   :  { %v821_v56 = vpop.xlane.xlu0 %820 }
 0x23a   :  { %1490 = vrcp.f32 %v821_v56 }
 0x23b   :  { %986 = vperm.xlu2 %1421, %v908_v51  }
 0x23c   :  { %991 = vperm.xlu1 %1420, %v909_v31   ;;  %996 = vperm.xlu0 %1419, %v910_v24  }
 0x240   :  { %v1491_v20 = vpop.eup %1490 }
 0x241   :  { %v849_v48 = vperm.slane %v1491_v20, 0  ;;  %v850_v50 = vperm.slane %v1491_v20, 1  ;;  %v851_v30 = vperm.slane %v1491_v20, 2  ;;  %v852_v12 = vperm.slane %v1491_v20, 3 }
 0x242   :  { %v853_v10 = vperm.slane %v1491_v20, 4  ;;  %v854_v4 = vperm.slane %v1491_v20, 5 }
 0x243   :  { %1001 = vperm.xlu2 %1421, %v911_v39   ;;  %v913_v47 = vmul.f32 %v1910_v8, %v849_v48  ;;  %v914_v37 = vmul.f32 %v1924_v11, %v850_v50  ;;  %v915_v14 = vmul.f32 %v1920_v9, %v851_v30  ;;  %v916_v15 = vmul.f32 %v1922_v5, %v852_v12 }
 0x244   :  { %1006 = vperm.xlu1 %1420, %v912_v1   ;;  %v917_v8 = vmul.f32 %v1936_v43, %v853_v10  ;;  %v918_v62 = vmul.f32 %v1932_v33, %v854_v4 }
 0x245   :  { %1011 = vperm.xlu0 %1419, %v913_v47  }
 0x24b   :  { %1016 = vperm.xlu2 %1421, %v914_v37  }
 0x24c   :  { %1021 = vperm.xlu1 %1420, %v915_v14  }
 0x24d   :  { %1026 = vperm.xlu0 %1419, %v916_v15  }
 0x250   :  { %v824_v0 = vpop.xlane.xlu2 %823 }
 0x251   :  { %1492 = vrcp.f32 %v824_v0 }
 0x253   :  { %1031 = vperm.xlu2 %1421, %v917_v8  }
 0x254   :  { %1036 = vperm.xlu1 %1420, %v918_v62  }
 0x257   :  { %v1493_v53 = vpop.eup %1492 }
 0x258   :  { %v859_v2 = vperm.slane %v1493_v53, 2  ;;  %v858_v11 = vperm.slane %v1493_v53, 1  ;;  %v857_v22 = vperm.slane %v1493_v53, 0  ;;  %v862_v28 = vperm.slane %v1493_v53, 5 }
 0x259   :  { %v861_v36 = vperm.slane %v1493_v53, 4  ;;  %v860_v43 = vperm.slane %v1493_v53, 3  ;;  %v863_v13 = vperm.slane %v1493_v53, 6 }
 0x25a   :  { %v923_v9 = vmul.f32 %v1960_v52, %v859_v2  ;;  %v922_v5 = vmul.f32 %v1946_v60, %v858_v11  ;;  %v921_v26 = vmul.f32 %v1944_v57, %v857_v22  ;;  %v926_v33 = vmul.f32 %v1969_v58, %v862_v28  ;;  %v57_v28 = vld [vmem:[%s2247_s2 + $0x1c] sm:$0xf] }
 0x25b   :  { %v925_v16 = vmul.f32 %v1958_v34, %v861_v36  ;;  %v924_v25 = vmul.f32 %v1956_v7, %v860_v43  ;;  %v856_v52 = vperm.slane %v1491_v20, 7  ;;  %v855_v60 = vperm.slane %v1491_v20, 6  ;;  %v58_v20 = vld [vmem:[%s2247_s2 + $0x20] sm:$0xf] }
 0x25c   :  { %1061 = vperm.xlu1 %1420, %v923_v9   ;;  %1056 = vperm.xlu2 %1421, %v922_v5   ;;  %v927_v27 = vmul.f32 %v1965_v54, %v863_v13  ;;  %v864_v58 = vperm.slane %v1493_v53, 7 }
 0x25d   :  { %1051 = vperm.xlu0 %1419, %v921_v26   ;;  %v920_v57 = vmul.f32 %v1948_v63, %v856_v52  ;;  %v919_v32 = vmul.f32 %v1934_v42, %v855_v60  ;;  %v55_v42 = vld [vmem:[%s2247_s2 + $0x14] sm:$0xf]  ;;  %v56_v26 = vld [vmem:[%s2247_s2 + $0x18] sm:$0xf] }
 0x25e   :  { %v928_v34 = vmul.f32 %v1967_v41, %v864_v58  ;;  %v50_v41 = vld [vmem:[%s2247_s2] sm:$0xf] }
 0x264   :  { %1076 = vperm.xlu1 %1420, %v926_v33   ;;  %1071 = vperm.xlu2 %1421, %v925_v16   ;;  %v61_v16 = vld [vmem:[%s2247_s2 + $0x2c] sm:$0xf] }
 0x265   :  { %1066 = vperm.xlu0 %1419, %v924_v25  }
 0x26c   :  { %1046 = vperm.xlu1 %1420, %v920_v57   ;;  %1081 = vperm.xlu2 %1421, %v927_v27  }
 0x26d   :  { %1041 = vperm.xlu0 %1419, %v919_v32  }
 0x275   :  { %1086 = vperm.xlu0 %1419, %v928_v34  }
 0x277   :  { %v937_v7 = vpop.permute.xlu2 %936 }
 0x278   :  { %v1090_v38 = vmul.f32 %v937_v7, %v51_v40 }
 0x27a   :  { %v1128_v63 = vsel %vm210_vm0, %v1090_v38, 0.0 }
 0x27b   :  { %v1129_v54 = vrot.slane %v1128_v63, 4 }
 0x27d   :  { %v1130_v59 = vadd.f32 %v1129_v54, %v1128_v63 }
 0x27f   :  { %v957_v3 = vpop.permute.xlu2 %956  ;;  %v1131_v56 = vrot.slane %v1130_v59, 2 }
 0x280   :  { %v1094_v49 = vmul.f32 %v957_v3, %v55_v42 }
 0x281   :  { %v1132_v50 = vadd.f32 %v1131_v56, %v1130_v59 }
 0x282   :  { %v1156_v18 = vsel %vm210_vm0, %v1094_v49, 0.0 }
 0x283   :  { %v1157_v51 = vrot.slane %v1156_v18, 4  ;;  %v1133_v11 = vrot.slane %v1132_v50, 1 }
 0x285   :  { %v1158_v30 = vadd.f32 %v1157_v51, %v1156_v18  ;;  %v1134_v57 = vadd.f32 %v1133_v11, %v1132_v50 }
 0x287   :  { %v1159_v22 = vrot.slane %v1158_v30, 2 }
 0x289   :  { %v1160_v27 = vadd.f32 %v1159_v22, %v1158_v30 }
 0x28b   :  { %v1161_v51 = vrot.slane %v1160_v27, 1 }
 0x28d   :  { %v972_v17 = vpop.permute.xlu2 %971 }
 0x28e   :  { %v932_v21 = vpop.permute.xlu1 %931  ;;  %v942_v44 = vpop.permute.xlu0 %941  ;;  %v1097_v10 = vmul.f32 %v972_v17, %v58_v20 }
 0x28f   :  { %v1089_v46 = vmul.f32 %v932_v21, %v50_v41  ;;  %v1091_v55 = vmul.f32 %v942_v44, %v52_v45  ;;  %v64_v44 = vld [vmem:[%s2247_s2 + $0x38] sm:$0xf] }
 0x290   :  { %v1177_v36 = vsel %vm210_vm0, %v1097_v10, 0.0 }
 0x291   :  { %v1121_v61 = vsel %vm210_vm0, %v1089_v46, 0.0  ;;  %v1135_v23 = vsel %vm210_vm0, %v1091_v55, 0.0  ;;  %v1178_v34 = vrot.slane %v1177_v36, 4 }
 0x292   :  { %v1122_v35 = vrot.slane %v1121_v61, 4  ;;  %v1136_v6 = vrot.slane %v1135_v23, 4 }
 0x294   :  { %v1123_v31 = vadd.f32 %v1122_v35, %v1121_v61  ;;  %v1137_v24 = vadd.f32 %v1136_v6, %v1135_v23  ;;  %v59_v61 = vld [vmem:[%s2247_s2 + $0x24] sm:$0xf]  ;;  %v60_v23 = vld [vmem:[%s2247_s2 + $0x28] sm:$0xf]  ;;  %v1179_v35 = vadd.f32 %v1178_v34, %v1177_v36  ;;  %v63_v36 = vld [vmem:[%s2247_s2 + $0x34] sm:$0xf] }
 0x295   :  { %v987_v15 = vpop.permute.xlu2 %986 }
 0x296   :  { %v1124_v39 = vrot.slane %v1123_v31, 2  ;;  %v1138_v48 = vrot.slane %v1137_v24, 2  ;;  %v947_v1 = vpop.permute.xlu1 %946  ;;  %v952_v47 = vpop.permute.xlu0 %951  ;;  %v1100_v7 = vmul.f32 %v987_v15, %v61_v16 }
 0x297   :  { %v1092_v12 = vmul.f32 %v947_v1, %v53_v29  ;;  %v1093_v37 = vmul.f32 %v952_v47, %v54_v19 }
 0x298   :  { %v1125_v14 = vadd.f32 %v1124_v39, %v1123_v31  ;;  %v1139_v4 = vadd.f32 %v1138_v48, %v1137_v24  ;;  %v1198_v59 = vsel %vm210_vm0, %v1100_v7, 0.0 }
 0x299   :  { %v1142_v0 = vsel %vm210_vm0, %v1092_v12, 0.0  ;;  %v1149_v8 = vsel %vm210_vm0, %v1093_v37, 0.0  ;;  %v1199_v39 = vrot.slane %v1198_v59, 4  ;;  %v1180_v12 = vrot.slane %v1179_v35, 2 }
 0x29a   :  { %v1126_v62 = vrot.slane %v1125_v14, 1  ;;  %v1143_v53 = vrot.slane %v1142_v0, 4  ;;  %v1150_v2 = vrot.slane %v1149_v8, 4  ;;  %v1140_v33 = vrot.slane %v1139_v4, 1 }
 0x29c   :  { %v1144_v9 = vadd.f32 %v1143_v53, %v1142_v0  ;;  %v1151_v5 = vadd.f32 %v1150_v2, %v1149_v8  ;;  %v1127_v43 = vadd.f32 %v1126_v62, %v1125_v14  ;;  %v1141_v63 = vadd.f32 %v1140_v33, %v1139_v4 }
 0x29d   :  { %v1002_v45 = vpop.permute.xlu2 %1001  ;;  %v1162_v62 = vadd.f32 %v1161_v51, %v1160_v27  ;;  %v1200_v53 = vadd.f32 %v1199_v39, %v1198_v59  ;;  %v1181_v33 = vadd.f32 %v1180_v12, %v1179_v35 }
 0x29e   :  { %v1145_v25 = vrot.slane %v1144_v9, 2  ;;  %v1152_v52 = vrot.slane %v1151_v5, 2  ;;  %v962_v13 = vpop.permute.xlu1 %961  ;;  %v967_v60 = vpop.permute.xlu0 %966  ;;  %v1377_v3 = vsel %vm405_vm1, %v1134_v57, %v1127_v43  ;;  %v1103_v48 = vmul.f32 %v1002_v45, %v64_v44 }
 0x29f   :  { %v1095_v32 = vmul.f32 %v962_v13, %v56_v26  ;;  %v1096_v58 = vmul.f32 %v967_v60, %v57_v28  ;;  %v1378_v6 = vsel %vm407_vm2, %v1141_v63, %v1377_v3  ;;  %v62_v28 = vld [vmem:[%s2247_s2 + $0x30] sm:$0xf]  ;;  %v1201_v34 = vrot.slane %v1200_v53, 2 }
 0x2a0   :  { %v1146_v40 = vadd.f32 %v1145_v25, %v1144_v9  ;;  %v1153_v38 = vadd.f32 %v1152_v52, %v1151_v5  ;;  %v1219_v2 = vsel %vm210_vm0, %v1103_v48, 0.0  ;;  %v1182_v63 = vrot.slane %v1181_v33, 1 }
 0x2a1   :  { %v1163_v42 = vsel %vm210_vm0, %v1095_v32, 0.0  ;;  %v1170_v54 = vsel %vm210_vm0, %v1096_v58, 0.0  ;;  %v1220_v57 = vrot.slane %v1219_v2, 4 }
 0x2a2   :  { %v1147_v49 = vrot.slane %v1146_v40, 1  ;;  %v1154_v41 = vrot.slane %v1153_v38, 1  ;;  %v1164_v17 = vrot.slane %v1163_v42, 4  ;;  %v1171_v21 = vrot.slane %v1170_v54, 4 }
 0x2a4   :  { %v1148_v46 = vadd.f32 %v1147_v49, %v1146_v40  ;;  %v1165_v55 = vadd.f32 %v1164_v17, %v1163_v42  ;;  %v1172_v18 = vadd.f32 %v1171_v21, %v1170_v54  ;;  %v1155_v56 = vadd.f32 %v1154_v41, %v1153_v38 }
 0x2a5   :  { %v2126_v9 = vpop.permute.xlu2 %1016  ;;  %v1221_v41 = vadd.f32 %v1220_v57, %v1219_v2  ;;  %v1202_v17 = vadd.f32 %v1201_v34, %v1200_v53  ;;  %v75_v34 = vld [vmem:[%s2247_s2 + $0x64] sm:$0xf] }
 0x2a6   :  { %v1379_v31 = vsel %vm409_vm3, %v1148_v46, %v1378_v6  ;;  %v1166_v24 = vrot.slane %v1165_v55, 2  ;;  %v1173_v29 = vrot.slane %v1172_v18, 2  ;;  %v977_v19 = vpop.permute.xlu1 %976  ;;  %v982_v20 = vpop.permute.xlu0 %981  ;;  %v65_v46 = vld [vmem:[%s2247_s2 + $0x3c] sm:$0xf] }
 0x2a7   :  { %v1098_v1 = vmul.f32 %v977_v19, %v59_v61  ;;  %v1099_v47 = vmul.f32 %v982_v20, %v60_v23  ;;  %v1380_v37 = vsel %vm411_vm4, %v1155_v56, %v1379_v31  ;;  %v1222_v6 = vrot.slane %v1221_v41, 2 }
 0x2a8   :  { %v1167_v50 = vadd.f32 %v1166_v24, %v1165_v55  ;;  %v1174_v30 = vadd.f32 %v1173_v29, %v1172_v18  ;;  %v1381_v43 = vsel %vm413_vm5, %v1162_v62, %v1380_v37  ;;  %v1183_v55 = vadd.f32 %v1182_v63, %v1181_v33  ;;  %v67_v62 = vld [vmem:[%s2247_s2 + $0x44] sm:$0xf]  ;;  %v70_v33 = vld [vmem:[%s2247_s2 + $0x50] sm:$0xf] }
 0x2a9   :  { %v1184_v14 = vsel %vm210_vm0, %v1098_v1, 0.0  ;;  %v1191_v15 = vsel %vm210_vm0, %v1099_v47, 0.0  ;;  %v1203_v31 = vrot.slane %v1202_v17, 1  ;;  %v1223_v47 = vadd.f32 %v1222_v6, %v1221_v41 }
 0x2aa   :  { %v1168_v10 = vrot.slane %v1167_v50, 1  ;;  %v1175_v4 = vrot.slane %v1174_v30, 1  ;;  %v1185_v0 = vrot.slane %v1184_v14, 4  ;;  %v1192_v8 = vrot.slane %v1191_v15, 4 }
 0x2ac   :  { %v1169_v11 = vadd.f32 %v1168_v10, %v1167_v50  ;;  %v1176_v22 = vadd.f32 %v1175_v4, %v1174_v30  ;;  %v1186_v5 = vadd.f32 %v1185_v0, %v1184_v14  ;;  %v1193_v26 = vadd.f32 %v1192_v8, %v1191_v15 }
 0x2ad   :  { %v1032_v18 = vpop.permute.xlu2 %1031  ;;  %v1204_v30 = vadd.f32 %v1203_v31, %v1202_v17  ;;  %v1224_v8 = vrot.slane %v1223_v47, 1  ;;  %v76_v17 = vld [vmem:[%s2247_s2 + $0x68] sm:$0xf] }
 0x2ae   :  { %v1382_v16 = vsel %vm415_vm6, %v1169_v11, %v1381_v43  ;;  %v1187_v25 = vrot.slane %v1186_v5, 2  ;;  %v1194_v52 = vrot.slane %v1193_v26, 2  ;;  %v992_v13 = vpop.permute.xlu1 %991  ;;  %v997_v60 = vpop.permute.xlu0 %996 }
 0x2af   :  { %v1383_v27 = vsel %vm417_vm7, %v1176_v22, %v1382_v16  ;;  %v1101_v32 = vmul.f32 %v992_v13, %v62_v28  ;;  %v1102_v58 = vmul.f32 %v997_v60, %v63_v36  ;;  %v66_v22 = vld [vmem:[%s2247_s2 + $0x40] sm:$0xf]  ;;  %v68_v36 = vld [vmem:[%s2247_s2 + $0x48] sm:$0xf]  ;;  %v1225_v43 = vadd.f32 %v1224_v8, %v1223_v47 }
 0x2b0   :  { %1410 = vst.msk [vmem:[%s2248_s3] sm:$0xff] %vm1409_vm9, %v1383_v27  ;;  %v1188_v7 = vadd.f32 %v1187_v25, %v1186_v5  ;;  %v1195_v40 = vadd.f32 %v1194_v52, %v1193_v26  ;;  %v1106_v5 = vmul.f32 %v2126_v9, %v67_v62  ;;  %v1109_v9 = vmul.f32 %v1032_v18, %v70_v33  ;;  %v69_v27 = vld [vmem:[%s2247_s2 + $0x4c] sm:$0xf] }
 0x2b1   :  { %v1205_v38 = vsel %vm210_vm0, %v1101_v32, 0.0  ;;  %v1212_v3 = vsel %vm210_vm0, %v1102_v58, 0.0 }
 0x2b2   :  { %v1189_v42 = vrot.slane %v1188_v7, 1  ;;  %v1206_v54 = vrot.slane %v1205_v38, 4  ;;  %v1213_v49 = vrot.slane %v1212_v3, 4  ;;  %v1196_v45 = vrot.slane %v1195_v40, 1 }
 0x2b3   :  { %v1240_v60 = vsel %vm210_vm0, %v1106_v5, 0.0  ;;  %v1261_v63 = vsel %vm210_vm0, %v1109_v9, 0.0 }
 0x2b4   :  { %v1190_v21 = vadd.f32 %v1189_v42, %v1188_v7  ;;  %v1207_v44 = vadd.f32 %v1206_v54, %v1205_v38  ;;  %v1214_v59 = vadd.f32 %v1213_v49, %v1212_v3  ;;  %v1197_v56 = vadd.f32 %v1196_v45, %v1195_v40  ;;  %v71_v45 = vld [vmem:[%s2247_s2 + $0x54] sm:$0xf] }
 0x2b5   :  { %v1241_v40 = vrot.slane %v1240_v60, 4 }
 0x2b6   :  { %v1208_v61 = vrot.slane %v1207_v44, 2  ;;  %v1215_v23 = vrot.slane %v1214_v59, 2  ;;  %v1007_v35 = vpop.permute.xlu1 %1006  ;;  %v1384_v24 = vsel %vm405_vm1, %v1190_v21, %v1183_v55  ;;  %v1057_v11 = vpop.permute.xlu2 %1056 }
 0x2b7   :  { %v1104_v51 = vmul.f32 %v1007_v35, %v65_v46  ;;  %v1385_v50 = vsel %vm407_vm2, %v1197_v56, %v1384_v24  ;;  %v1012_v14 = vpop.permute.xlu0 %1011  ;;  %v1114_v42 = vmul.f32 %v1057_v11, %v75_v34  ;;  %v1242_v21 = vadd.f32 %v1241_v40, %v1240_v60  ;;  %v74_v46 = vld [vmem:[%s2247_s2 + $0x60] sm:$0xf] }
 0x2b8   :  { %v1209_v29 = vadd.f32 %v1208_v61, %v1207_v44  ;;  %v1216_v19 = vadd.f32 %v1215_v23, %v1214_v59  ;;  %v1386_v15 = vsel %vm409_vm3, %v1204_v30, %v1385_v50  ;;  %v1105_v25 = vmul.f32 %v1012_v14, %v66_v22  ;;  %v80_v50 = vld [vmem:[%s2247_s2 + $0x78] sm:$0xf] }
 0x2b9   :  { %v1226_v20 = vsel %vm210_vm0, %v1104_v51, 0.0  ;;  %v1262_v44 = vrot.slane %v1261_v63, 4  ;;  %v1296_v55 = vsel %vm210_vm0, %v1114_v42, 0.0  ;;  %v78_v51 = vld [vmem:[%s2247_s2 + $0x70] sm:$0xf] }
 0x2ba   :  { %v1210_v39 = vrot.slane %v1209_v29, 1  ;;  %v1217_v48 = vrot.slane %v1216_v19, 1  ;;  %v1227_v1 = vrot.slane %v1226_v20, 4  ;;  %v1233_v7 = vsel %vm210_vm0, %v1105_v25, 0.0 }
 0x2bb   :  { %v1234_v49 = vrot.slane %v1233_v7, 4 }
 0x2bc   :  { %v1211_v12 = vadd.f32 %v1210_v39, %v1209_v29  ;;  %v1228_v37 = vadd.f32 %v1227_v1, %v1226_v20  ;;  %v1218_v10 = vadd.f32 %v1217_v48, %v1216_v19  ;;  %v1243_v29 = vrot.slane %v1242_v21, 2 }
 0x2bd   :  { %v1235_v61 = vadd.f32 %v1234_v49, %v1233_v7  ;;  %v1263_v19 = vadd.f32 %v1262_v44, %v1261_v63  ;;  %v1297_v20 = vrot.slane %v1296_v55, 4 }
 0x2be   :  { %v1229_v4 = vrot.slane %v1228_v37, 2  ;;  %v1022_v0 = vpop.permute.xlu1 %1021  ;;  %v1387_v53 = vsel %vm411_vm4, %v1211_v12, %v1386_v15  ;;  %v1072_v54 = vpop.permute.xlu2 %1071 }
 0x2bf   :  { %v1388_v26 = vsel %vm413_vm5, %v1218_v10, %v1387_v53  ;;  %v1107_v13 = vmul.f32 %v1022_v0, %v68_v36  ;;  %v1027_v32 = vpop.permute.xlu0 %1026  ;;  %v1236_v48 = vrot.slane %v1235_v61, 2  ;;  %v1117_v1 = vmul.f32 %v1072_v54, %v78_v51  ;;  %v77_v53 = vld [vmem:[%s2247_s2 + $0x6c] sm:$0xf]  ;;  %v73_v54 = vld [vmem:[%s2247_s2 + $0x5c] sm:$0xf] }
 0x2c0   :  { %v1230_v2 = vadd.f32 %v1229_v4, %v1228_v37  ;;  %v1389_v52 = vsel %vm415_vm6, %v1225_v43, %v1388_v26  ;;  %v1108_v3 = vmul.f32 %v1027_v32, %v69_v27  ;;  %v79_v4 = vld [vmem:[%s2247_s2 + $0x74] sm:$0xf]  ;;  %v1244_v0 = vadd.f32 %v1243_v29, %v1242_v21  ;;  %v72_v21 = vld [vmem:[%s2247_s2 + $0x58] sm:$0xf] }
 0x2c1   :  { %v1247_v38 = vsel %vm210_vm0, %v1107_v13, 0.0  ;;  %v1264_v8 = vrot.slane %v1263_v19, 2  ;;  %v1298_v62 = vadd.f32 %v1297_v20, %v1296_v55  ;;  %v1237_v5 = vadd.f32 %v1236_v48, %v1235_v61 }
 0x2c2   :  { %v1231_v28 = vrot.slane %v1230_v2, 1  ;;  %v1248_v41 = vrot.slane %v1247_v38, 4  ;;  %v1254_v59 = vsel %vm210_vm0, %v1108_v3, 0.0  ;;  %v1317_v26 = vsel %vm210_vm0, %v1117_v1, 0.0 }
 0x2c3   :  { %v1255_v31 = vrot.slane %v1254_v59, 4  ;;  %v1245_v13 = vrot.slane %v1244_v0, 1  ;;  %v1265_v60 = vadd.f32 %v1264_v8, %v1263_v19  ;;  %v1299_v9 = vrot.slane %v1298_v62, 2 }
 0x2c4   :  { %v1232_v16 = vadd.f32 %v1231_v28, %v1230_v2  ;;  %v1249_v56 = vadd.f32 %v1248_v41, %v1247_v38  ;;  %v1318_v27 = vrot.slane %v1317_v26, 4  ;;  %v1238_v7 = vrot.slane %v1237_v5, 1 }
 0x2c5   :  { %v1256_v37 = vadd.f32 %v1255_v31, %v1254_v59  ;;  %v1246_v49 = vadd.f32 %v1245_v13, %v1244_v0  ;;  %v1266_v44 = vrot.slane %v1265_v60, 1  ;;  %v1300_v59 = vadd.f32 %v1299_v9, %v1298_v62 }
 0x2c6   :  { %v1390_v57 = vsel %vm417_vm7, %v1232_v16, %v1389_v52  ;;  %v1037_v58 = vpop.permute.xlu1 %1036  ;;  %v1250_v12 = vrot.slane %v1249_v56, 2  ;;  %v1082_v14 = vpop.permute.xlu2 %1081  ;;  %v1239_v61 = vadd.f32 %v1238_v7, %v1237_v5 }
 0x2c7   :  { %1411 = vst.msk [vmem:[%s2248_s3 + $0x8] sm:$0xff] %vm1409_vm9, %v1390_v57  ;;  %v1110_v23 = vmul.f32 %v1037_v58, %v71_v45  ;;  %v1119_v28 = vmul.f32 %v1082_v14, %v80_v50  ;;  %v1257_v16 = vrot.slane %v1256_v37, 2 }
 0x2c8   :  { %v1251_v33 = vadd.f32 %v1250_v12, %v1249_v56  ;;  %v1301_v12 = vrot.slane %v1300_v59, 1 }
 0x2c9   :  { %v1268_v47 = vsel %vm210_vm0, %v1110_v23, 0.0  ;;  %v1258_v3 = vadd.f32 %v1257_v16, %v1256_v37  ;;  %v1331_v63 = vsel %vm210_vm0, %v1119_v28, 0.0  ;;  %v1391_v37 = vsel %vm405_vm1, %v1246_v49, %v1239_v61 }
 0x2ca   :  { %v1269_v2 = vrot.slane %v1268_v47, 4  ;;  %v1252_v38 = vrot.slane %v1251_v33, 1  ;;  %v1332_v23 = vrot.slane %v1331_v63, 4 }
 0x2cb   :  { %v1259_v31 = vrot.slane %v1258_v3, 1 }
 0x2cc   :  { %v1270_v32 = vadd.f32 %v1269_v2, %v1268_v47  ;;  %v1253_v51 = vadd.f32 %v1252_v38, %v1251_v33  ;;  %v1333_v14 = vadd.f32 %v1332_v23, %v1331_v63 }
 0x2ce   :  { %v1062_v18 = vpop.permute.xlu1 %1061  ;;  %v1271_v55 = vrot.slane %v1270_v32, 2  ;;  %v1334_v33 = vrot.slane %v1333_v14, 2 }
 0x2cf   :  { %v1115_v35 = vmul.f32 %v1062_v18, %v76_v17  ;;  %v1052_v6 = vpop.permute.xlu0 %1051 }
 0x2d0   :  { %v1113_v24 = vmul.f32 %v1052_v6, %v74_v46  ;;  %v1319_v46 = vadd.f32 %v1318_v27, %v1317_v26  ;;  %v1272_v47 = vadd.f32 %v1271_v55, %v1270_v32 }
 0x2d1   :  { %v1303_v39 = vsel %vm210_vm0, %v1115_v35, 0.0 }
 0x2d2   :  { %v1289_v30 = vsel %vm210_vm0, %v1113_v24, 0.0  ;;  %v1304_v15 = vrot.slane %v1303_v39, 4  ;;  %v1320_v1 = vrot.slane %v1319_v46, 2  ;;  %v1273_v26 = vrot.slane %v1272_v47, 1 }
 0x2d3   :  { %v1290_v10 = vrot.slane %v1289_v30, 4 }
 0x2d4   :  { %v1305_v25 = vadd.f32 %v1304_v15, %v1303_v39  ;;  %v1321_v5 = vadd.f32 %v1320_v1, %v1319_v46 }
 0x2d5   :  { %v1291_v11 = vadd.f32 %v1290_v10, %v1289_v30  ;;  %v1392_v10 = vsel %vm407_vm2, %v1253_v51, %v1391_v37 }
 0x2d6   :  { %v1077_v22 = vpop.permute.xlu1 %1076  ;;  %v1306_v42 = vrot.slane %v1305_v25, 2  ;;  %v1322_v7 = vrot.slane %v1321_v5, 1 }
 0x2d7   :  { %v1118_v36 = vmul.f32 %v1077_v22, %v79_v4  ;;  %v1067_v43 = vpop.permute.xlu0 %1066  ;;  %v1292_v57 = vrot.slane %v1291_v11, 2  ;;  %v1260_v4 = vadd.f32 %v1259_v31, %v1258_v3  ;;  %v81_v22 = vld [vmem:[%s2247_s2 + $0x7c] sm:$0xf] }
 0x2d8   :  { %v1116_v52 = vmul.f32 %v1067_v43, %v77_v53  ;;  %v1307_v24 = vadd.f32 %v1306_v42, %v1305_v25  ;;  %v1302_v43 = vadd.f32 %v1301_v12, %v1300_v59  ;;  %v1323_v59 = vadd.f32 %v1322_v7, %v1321_v5 }
 0x2d9   :  { %v1324_v58 = vsel %vm210_vm0, %v1118_v36, 0.0  ;;  %v1293_v41 = vadd.f32 %v1292_v57, %v1291_v11  ;;  %v1267_v36 = vadd.f32 %v1266_v44, %v1265_v60 }
 0x2da   :  { %v1310_v34 = vsel %vm210_vm0, %v1116_v52, 0.0  ;;  %v1325_v45 = vrot.slane %v1324_v58, 4  ;;  %v1308_v0 = vrot.slane %v1307_v24, 1  ;;  %v1393_v52 = vsel %vm409_vm3, %v1260_v4, %v1392_v10 }
 0x2db   :  { %v1311_v40 = vrot.slane %v1310_v34, 4  ;;  %v1294_v19 = vrot.slane %v1293_v41, 1  ;;  %v1394_v42 = vsel %vm411_vm4, %v1267_v36, %v1393_v52 }
 0x2dc   :  { %v1326_v20 = vadd.f32 %v1325_v45, %v1324_v58  ;;  %v1309_v13 = vadd.f32 %v1308_v0, %v1307_v24 }
 0x2dd   :  { %v1312_v17 = vadd.f32 %v1311_v40, %v1310_v34  ;;  %v1295_v62 = vadd.f32 %v1294_v19, %v1293_v41  ;;  %v1274_v40 = vadd.f32 %v1273_v26, %v1272_v47 }
 0x2de   :  { %v1047_v18 = vpop.permute.xlu1 %1046  ;;  %v1327_v53 = vrot.slane %v1326_v20, 2 }
 0x2df   :  { %v1313_v35 = vrot.slane %v1312_v17, 2  ;;  %v1112_v6 = vmul.f32 %v1047_v18, %v73_v54  ;;  %v1042_v56 = vpop.permute.xlu0 %1041  ;;  %v1398_v27 = vsel %vm405_vm1, %v1302_v43, %v1295_v62  ;;  %v1335_v54 = vadd.f32 %v1334_v33, %v1333_v14 }
 0x2e0   :  { %v1111_v29 = vmul.f32 %v1042_v56, %v72_v21  ;;  %v1328_v32 = vadd.f32 %v1327_v53, %v1326_v20  ;;  %v1399_v49 = vsel %vm407_vm2, %v1309_v13, %v1398_v27  ;;  %v1395_v46 = vsel %vm413_vm5, %v1274_v40, %v1394_v42 }
 0x2e1   :  { %v1314_v39 = vadd.f32 %v1313_v35, %v1312_v17  ;;  %v1282_v48 = vsel %vm210_vm0, %v1112_v6, 0.0  ;;  %v1336_v61 = vrot.slane %v1335_v54, 1 }
 0x2e2   :  { %v1283_v50 = vrot.slane %v1282_v48, 4  ;;  %v1275_v30 = vsel %vm210_vm0, %v1111_v29, 0.0  ;;  %v1329_v45 = vrot.slane %v1328_v32, 1 }
 0x2e3   :  { %v1276_v15 = vrot.slane %v1275_v30, 4  ;;  %v1315_v2 = vrot.slane %v1314_v39, 1  ;;  %v1337_v24 = vadd.f32 %v1336_v61, %v1335_v54 }
 0x2e4   :  { %v1284_v8 = vadd.f32 %v1283_v50, %v1282_v48  ;;  %v1330_v6 = vadd.f32 %v1329_v45, %v1328_v32 }
 0x2e5   :  { %v1277_v11 = vadd.f32 %v1276_v15, %v1275_v30  ;;  %v1316_v58 = vadd.f32 %v1315_v2, %v1314_v39 }
 0x2e6   :  { %v1285_v28 = vrot.slane %v1284_v8, 2 }
 0x2e7   :  { %v1278_v16 = vrot.slane %v1277_v11, 2  ;;  %v1087_v25 = vpop.permute.xlu0 %1086  ;;  %v1400_v17 = vsel %vm409_vm3, %v1316_v58, %v1399_v49 }
 0x2e8   :  { %v1286_v9 = vadd.f32 %v1285_v28, %v1284_v8  ;;  %v1120_v57 = vmul.f32 %v1087_v25, %v81_v22  ;;  %v1401_v23 = vsel %vm411_vm4, %v1323_v59, %v1400_v17 }
 0x2e9   :  { %v1279_v34 = vadd.f32 %v1278_v16, %v1277_v11  ;;  %v1402_v51 = vsel %vm413_vm5, %v1330_v6, %v1401_v23 }
 0x2ea   :  { %v1287_v38 = vrot.slane %v1286_v9, 1  ;;  %v1338_v3 = vsel %vm210_vm0, %v1120_v57, 0.0  ;;  %v1403_v19 = vsel %vm415_vm6, %v1337_v24, %v1402_v51 }
 0x2eb   :  { %v1280_v60 = vrot.slane %v1279_v34, 1  ;;  %v1339_v63 = vrot.slane %v1338_v3, 4 }
 0x2ec   :  { %v1288_v41 = vadd.f32 %v1287_v38, %v1286_v9 }
 0x2ed   :  { %v1281_v21 = vadd.f32 %v1280_v60, %v1279_v34  ;;  %v1340_v44 = vadd.f32 %v1339_v63, %v1338_v3 }
 0x2ef   :  { %v1396_v55 = vsel %vm415_vm6, %v1281_v21, %v1395_v46  ;;  %v1341_v18 = vrot.slane %v1340_v44, 2 }
 0x2f0   :  { %v1397_v35 = vsel %vm417_vm7, %v1288_v41, %v1396_v55 }
 0x2f1   :  { %1412 = vst.msk [vmem:[%s2248_s3 + $0x10] sm:$0xff] %vm1409_vm9, %v1397_v35  ;;  %v1342_v56 = vadd.f32 %v1341_v18, %v1340_v44 }
 0x2f3   :  { %v1343_v31 = vrot.slane %v1342_v56, 1 }
 0x2f5   :  { %v1344_v29 = vadd.f32 %v1343_v31, %v1342_v56 }
 0x2f7   :  { %v1404_v20 = vsel %vm417_vm7, %v1344_v29, %v1403_v19 }
 0x2f8   :  { %1413 = vst.msk [vmem:[%s2248_s3 + $0x18] sm:$0xff] %vm1409_vm9, %v1404_v20 }

// kernel: forward.31
= control target key start
LH: loop header
LB: loop body
LE: loop exit
PB: predicated region body
PF: predicated region fallthrough
CT: control target
= control target key end

     0   :  { %vm110_vm0 = vcmask 261120   ;;  %s957_s0 = inlined_call_operand.vmem [shape: f32[4,8,32], index: 0, kind: input, shape index: {}]   ;;  %s958_s1 = inlined_call_operand.vmem [shape: f32[4,64,32], index: 1, kind: input, shape index: {}]   ;;  %s959_s2 = inlined_call_operand.vmem [shape: f32[4,64,32], index: 2, kind: input, shape index: {}]   ;;  %s960_s3 = inlined_call_operand.vmem [shape: f32[4,8,32], index: 3, kind: output, shape index: {0}]   ;;  %s961_s4 = inlined_call_operand.hbm [shape: f32[8,64], index: 4, kind: output, shape index: {1}]  }
   0x1   :  { %v32_v0 = vld [vmem:[%s958_s1 + $0x30] sm:$0xff]  ;;  %v33_v1 = vld [vmem:[%s958_s1 + $0x38] sm:$0xff]  ;;  %v30_v12 = vld [vmem:[%s958_s1 + $0x20] sm:$0xff] }
   0x2   :  { %v48_v2 = vld [vmem:[%s958_s1 + $0xb0] sm:$0xff]  ;;  %v64_v3 = vpack.c.bf16 %v32_v0, %v32_v0  ;;  %v65_v4 = vpack.c.bf16 %v33_v1, %v33_v1  ;;  %v49_v5 = vld [vmem:[%s958_s1 + $0xb8] sm:$0xff]  ;;  %v31_v13 = vld [vmem:[%s958_s1 + $0x28] sm:$0xff]  ;;  %v62_v18 = vpack.c.bf16 %v30_v12, %v30_v12 }
   0x3   :  { %v80_v6 = vpack.c.bf16 %v48_v2, %v48_v2  ;;  %v56_v7 = vld [vmem:[%s958_s1 + $0xf0] sm:$0xff]  ;;  %v57_v8 = vld [vmem:[%s958_s1 + $0xf8] sm:$0xff]  ;;  %v81_v9 = vpack.c.bf16 %v49_v5, %v49_v5  ;;  %v46_v20 = vld [vmem:[%s958_s1 + $0xa0] sm:$0xff]  ;;  %v63_v24 = vpack.c.bf16 %v31_v13, %v31_v13 }
   0x4   :  { %v88_v10 = vpack.c.bf16 %v56_v7, %v56_v7  ;;  %v89_v11 = vpack.c.bf16 %v57_v8, %v57_v8  ;;  %v40_v14 = vld [vmem:[%s958_s1 + $0x70] sm:$0xff]  ;;  %v104_v15 = vunpack.c.l.b16 %v64_v3  ;;  %v105_v16 = vunpack.c.l.b16 %v65_v4  ;;  %v41_v19 = vld [vmem:[%s958_s1 + $0x78] sm:$0xff]  ;;  %v47_v25 = vld [vmem:[%s958_s1 + $0xa8] sm:$0xff] }
   0x5   :  { %v201_v17 = vunpack.c.l.b16 %v80_v6  ;;  %v202_v21 = vunpack.c.l.b16 %v81_v9  ;;  %v102_v27 = vunpack.c.l.b16 %v62_v18  ;;  %v72_v28 = vpack.c.bf16 %v40_v14, %v40_v14  ;;  %v54_v34 = vld [vmem:[%s958_s1 + $0xe0] sm:$0xff]  ;;  %v55_v35 = vld [vmem:[%s958_s1 + $0xe8] sm:$0xff]  ;;  %v28_v40 = vld [vmem:[%s958_s1 + $0x10] sm:$0xff] }
   0x6   :  { %v249_v22 = vunpack.c.l.b16 %v88_v10  ;;  %v250_v23 = vunpack.c.l.b16 %v89_v11  ;;  %v109_v26 = vpack.c.b16 %v105_v16, %v104_v15  ;;  %v73_v29 = vpack.c.bf16 %v41_v19, %v41_v19  ;;  %v29_v41 = vld [vmem:[%s958_s1 + $0x18] sm:$0xff]  ;;  %v38_v42 = vld [vmem:[%s958_s1 + $0x60] sm:$0xff]  ;;  %v39_v51 = vld [vmem:[%s958_s1 + $0x68] sm:$0xff] }
   0x7   :  { %v206_v30 = vpack.c.b16 %v202_v21, %v201_v17  ;;  %v103_v32 = vunpack.c.l.b16 %v63_v24  ;;  %v78_v33 = vpack.c.bf16 %v46_v20, %v46_v20  ;;  %v153_v37 = vunpack.c.l.b16 %v72_v28  ;;  %v44_v55 = vld [vmem:[%s958_s1 + $0x90] sm:$0xff]  ;;  %v45_v56 = vld [vmem:[%s958_s1 + $0x98] sm:$0xff] }
   0x8   :  { %v254_v31 = vpack.c.b16 %v250_v23, %v249_v22  ;;  %v124_v36 = vsel %vm110_vm0, %v109_v26, 0  ;;  %v154_v38 = vunpack.c.l.b16 %v73_v29  ;;  %v79_v39 = vpack.c.bf16 %v47_v25, %v47_v25  ;;  %v52_v61 = vld [vmem:[%s958_s1 + $0xd0] sm:$0xff]  ;;  %v53_v62 = vld [vmem:[%s958_s1 + $0xd8] sm:$0xff] }
   0x9   :  { %130 = vmatpush.bf16.xpose.msra.mxu0 %v124_v36  ;;  %v220_v43 = vsel %vm110_vm0, %v206_v30, 0  ;;  %v108_v45 = vpack.c.b16 %v103_v32, %v102_v27  ;;  %v199_v46 = vunpack.c.l.b16 %v78_v33  ;;  %v86_v49 = vpack.c.bf16 %v54_v34, %v54_v34 }
   0xa   :  { %v268_v44 = vsel %vm110_vm0, %v254_v31, 0  ;;  %226 = vmatpush.bf16.xpose.msra.mxu2 %v220_v43  ;;  %v158_v47 = vpack.c.b16 %v154_v38, %v153_v37  ;;  %v200_v48 = vunpack.c.l.b16 %v79_v39  ;;  %v87_v50 = vpack.c.bf16 %v55_v35, %v55_v35 }
   0xb   :  { %274 = vmatpush.bf16.xpose.msra.mxu3 %v268_v44  ;;  %v60_v52 = vpack.c.bf16 %v28_v40, %v28_v40  ;;  %v61_v53 = vpack.c.bf16 %v29_v41, %v29_v41  ;;  %v70_v54 = vpack.c.bf16 %v38_v42, %v38_v42  ;;  %v247_v59 = vunpack.c.l.b16 %v86_v49 }
   0xc   :  { %v172_v57 = vsel %vm110_vm0, %v158_v47, 0  ;;  %v205_v58 = vpack.c.b16 %v200_v48, %v199_v46  ;;  %v248_v60 = vunpack.c.l.b16 %v87_v50  ;;  %v71_v1 = vpack.c.bf16 %v39_v51, %v39_v51 }
   0xd   :  { %178 = vmatpush.bf16.xpose.msra.mxu1 %v172_v57  ;;  %v100_v63 = vunpack.c.l.b16 %v60_v52  ;;  %v101_v0 = vunpack.c.l.b16 %v61_v53  ;;  %v151_v2 = vunpack.c.l.b16 %v70_v54 }
   0xe   :  { %10 = vsyncpa [#allocation3], 0  ;;  %v121_v3 = vsel %vm110_vm0, %v108_v45, 0  ;;  %v253_v4 = vpack.c.b16 %v248_v60, %v247_v59  ;;  %v76_v5 = vpack.c.bf16 %v44_v55, %v44_v55  ;;  %v77_v6 = vpack.c.bf16 %v45_v56, %v45_v56  ;;  %v26_v7 = vld [vmem:[%s958_s1] sm:$0xff]  ;;  %v27_v12 = vld [vmem:[%s958_s1 + $0x8] sm:$0xff]  ;;  %s589_s18 = sshll.u32 %s961_s4, 4  ;;  %s590_s18 = int_to_ptr.hbm [resolvable:$true] %s589_s18 }
   0xf   :  { %v217_v8 = vsel %vm110_vm0, %v205_v58, 0  ;;  %v152_v9 = vunpack.c.l.b16 %v71_v1  ;;  %v84_v10 = vpack.c.bf16 %v52_v61, %v52_v61  ;;  %v85_v11 = vpack.c.bf16 %v53_v62, %v53_v62  ;;  %v36_v13 = vld [vmem:[%s958_s1 + $0x50] sm:$0xff]  ;;  %v37_v18 = vld [vmem:[%s958_s1 + $0x58] sm:$0xff]  ;;  %v42_v19 = vld [vmem:[%s958_s1 + $0x80] sm:$0xff] }
  0x10   :  { %v265_v14 = vsel %vm110_vm0, %v253_v4, 0  ;;  %v107_v15 = vpack.c.b16 %v101_v0, %v100_v63  ;;  %v197_v16 = vunpack.c.l.b16 %v76_v5  ;;  %v198_v17 = vunpack.c.l.b16 %v77_v6  ;;  %v43_v24 = vld [vmem:[%s958_s1 + $0x88] sm:$0xff]  ;;  %v50_v28 = vld [vmem:[%s958_s1 + $0xc0] sm:$0xff]  ;;  %v20_v0 = vld [vmem:[%s957_s0 + $0x10] sm:$0xff] }
  0x11   :  { %131 = vmatpush.bf16.xpose.msra.mxu0 %v121_v3  ;;  %v157_v20 = vpack.c.b16 %v152_v9, %v151_v2  ;;  %v245_v21 = vunpack.c.l.b16 %v84_v10  ;;  %v246_v22 = vunpack.c.l.b16 %v85_v11  ;;  %v58_v23 = vpack.c.bf16 %v26_v7, %v26_v7  ;;  %v51_v33 = vld [vmem:[%s958_s1 + $0xc8] sm:$0xff]  ;;  %v34_v40 = vld [vmem:[%s958_s1 + $0x40] sm:$0xff]  ;;  %v21_v1 = vld [vmem:[%s957_s0 + $0x18] sm:$0xff] }
  0x12   :  { %227 = vmatpush.bf16.xpose.msra.mxu2 %v217_v8  ;;  %v204_v25 = vpack.c.b16 %v198_v17, %v197_v16  ;;  %v59_v26 = vpack.c.bf16 %v27_v12, %v27_v12  ;;  %v68_v27 = vpack.c.bf16 %v36_v13, %v36_v13  ;;  %v69_v31 = vpack.c.bf16 %v37_v18, %v37_v18  ;;  %v35_v45 = vld [vmem:[%s958_s1 + $0x48] sm:$0xff]  ;;  %v18_v63 = vld [vmem:[%s957_s0] sm:$0xff] }
  0x13   :  { %275 = vmatpush.bf16.xpose.msra.mxu3 %v265_v14  ;;  %v169_v29 = vsel %vm110_vm0, %v157_v20, 0  ;;  %v252_v30 = vpack.c.b16 %v246_v22, %v245_v21  ;;  %v74_v32 = vpack.c.bf16 %v42_v19, %v42_v19  ;;  %v75_v35 = vpack.c.bf16 %v43_v24, %v43_v24  ;;  %v19_v6 = vld [vmem:[%s957_s0 + $0x8] sm:$0xff]  ;;  %v342_v24 = vld [vmem:[%s959_s2 + $0x30] sm:$0xff] }
  0x14   :  { %v149_v34 = vunpack.c.l.b16 %v68_v27  ;;  %v118_v36 = vsel %vm110_vm0, %v107_v15, 0  ;;  %v98_v37 = vunpack.c.l.b16 %v58_v23  ;;  %v150_v38 = vunpack.c.l.b16 %v69_v31 }
  0x15   :  { %179 = vmatpush.bf16.xpose.msra.mxu1 %v169_v29  ;;  %v82_v39 = vpack.c.bf16 %v50_v28, %v50_v28  ;;  %v214_v41 = vsel %vm110_vm0, %v204_v25, 0  ;;  %v262_v42 = vsel %vm110_vm0, %v252_v30, 0  ;;  %v99_v43 = vunpack.c.l.b16 %v59_v26  ;;  %v343_v25 = vld [vmem:[%s959_s2 + $0x38] sm:$0xff] }
  0x16   :  { %v83_v44 = vpack.c.bf16 %v51_v33, %v51_v33  ;;  %v156_v46 = vpack.c.b16 %v150_v38, %v149_v34  ;;  %v195_v47 = vunpack.c.l.b16 %v74_v32  ;;  %v196_v48 = vunpack.c.l.b16 %v75_v35 }
  0x17   :  { %v243_v49 = vunpack.c.l.b16 %v82_v39  ;;  %v66_v51 = vpack.c.bf16 %v34_v40, %v34_v40  ;;  %v67_v52 = vpack.c.bf16 %v35_v45, %v35_v45  ;;  %v106_v53 = vpack.c.b16 %v99_v43, %v98_v37 }
  0x18   :  { %v244_v50 = vunpack.c.l.b16 %v83_v44  ;;  %v166_v54 = vsel %vm110_vm0, %v156_v46, 0  ;;  %v203_v56 = vpack.c.b16 %v196_v48, %v195_v47  ;;  %v22_v3 = vpack.c.bf16 %v18_v63, %v18_v63  ;;  %v350_v63 = vld [vmem:[%s959_s2 + $0x70] sm:$0xff] }
  0x19   :  { %132 = vmatpush.bf16.xpose.msra.mxu0 %v118_v36  ;;  %v147_v55 = vunpack.c.l.b16 %v66_v51  ;;  %v148_v58 = vunpack.c.l.b16 %v67_v52  ;;  %v115_v59 = vsel %vm110_vm0, %v106_v53, 0  ;;  %v24_v4 = vpack.c.bf16 %v20_v0, %v20_v0  ;;  %v340_v51 = vld [vmem:[%s959_s2 + $0x20] sm:$0xff]  ;;  %v341_v52 = vld [vmem:[%s959_s2 + $0x28] sm:$0xff] }
  0x1a   :  { %228 = vmatpush.bf16.xpose.msra.mxu2 %v214_v41  ;;  %v251_v57 = vpack.c.b16 %v244_v50, %v243_v49  ;;  %v211_v61 = vsel %vm110_vm0, %v203_v56, 0  ;;  %v25_v5 = vpack.c.bf16 %v21_v1, %v21_v1  ;;  %v23_v7 = vpack.c.bf16 %v19_v6, %v19_v6  ;;  %v359_v56 = vld [vmem:[%s959_s2 + $0xb8] sm:$0xff] }
  0x1b   :  { %276 = vmatpush.bf16.xpose.msra.mxu3 %v262_v42  ;;  %v155_v60 = vpack.c.b16 %v148_v58, %v147_v55  ;;  %vm287_vm1 = vcmask 523264   ;;  %v374_v26 = vpack.c.bf16 %v342_v24, %v342_v24  ;;  %v375_v27 = vpack.c.bf16 %v343_v25, %v343_v25  ;;  %v358_v55 = vld [vmem:[%s959_s2 + $0xb0] sm:$0xff]  ;;  %v349_v24 = vld [vmem:[%s959_s2 + $0x68] sm:$0xff] }
  0x1c   :  { %v259_v62 = vsel %vm110_vm0, %v251_v57, 0  ;;  %v372_v53 = vpack.c.bf16 %v340_v51, %v340_v51  ;;  %v382_v6 = vpack.c.bf16 %v350_v63, %v350_v63 }
  0x1d   :  { %180 = vmatpush.bf16.xpose.msra.mxu1 %v166_v54  ;;  %v163_v2 = vsel %vm110_vm0, %v155_v60, 0  ;;  %v414_v28 = vunpack.c.l.b16 %v374_v26  ;;  %v415_v29 = vunpack.c.l.b16 %v375_v27  ;;  %v373_v54 = vpack.c.bf16 %v341_v52, %v341_v52 }
  0x1e   :  { %v412_v57 = vunpack.c.l.b16 %v372_v53  ;;  %v391_v60 = vpack.c.bf16 %v359_v56, %v359_v56  ;;  %v365_v56 = vld [vmem:[%s959_s2 + $0xe8] sm:$0xff] }
  0x1f   :  { %v419_v32 = vpack.c.b16 %v415_v29, %v414_v28  ;;  %v413_v58 = vunpack.c.l.b16 %v373_v54  ;;  %v381_v28 = vpack.c.bf16 %v349_v24, %v349_v24  ;;  %v366_v29 = vld [vmem:[%s959_s2 + $0xf0] sm:$0xff]  ;;  %v360_v24 = vld [vmem:[%s959_s2 + $0xc0] sm:$0xff] }
  0x21   :  { %133 = vmatpush.bf16.xpose.msra.mxu0 %v115_v59  ;;  %v390_v59 = vpack.c.bf16 %v358_v55, %v358_v55  ;;  %v418_v0 = vpack.c.b16 %v413_v58, %v412_v57  ;;  %v364_v55 = vld [vmem:[%s959_s2 + $0xe0] sm:$0xff] }
  0x22   :  { %229 = vmatpush.bf16.xpose.msra.mxu2 %v211_v61  ;;  %v338_v61 = vld [vmem:[%s959_s2 + $0x10] sm:$0xff]  ;;  %v352_v57 = vld [vmem:[%s959_s2 + $0x80] sm:$0xff] }
  0x23   :  { %277 = vmatpush.bf16.xpose.msra.mxu3 %v259_v62  ;;  %v339_v62 = vld [vmem:[%s959_s2 + $0x18] sm:$0xff]  ;;  %v494_v1 = vunpack.c.l.b16 %v390_v59 }
  0x25   :  { %181 = vmatpush.bf16.xpose.msra.mxu1 %v163_v2  ;;  %v495_v2 = vunpack.c.l.b16 %v391_v60  ;;  %v396_v60 = vpack.c.bf16 %v364_v55, %v364_v55 }
  0x28   :  { %600 = vmatmul.msk.bf16.vlgmr.msra.gmra.mxu0 %vm110_vm0, %v22_v3  ;;  %v370_v3 = vpack.c.bf16 %v338_v61, %v338_v61  ;;  %v397_v61 = vpack.c.bf16 %v365_v56, %v365_v56 }
  0x29   :  { %602 = vmatmul.msk.bf16.vlgmr.msra.gmra.mxu2 %vm110_vm0, %v24_v4  ;;  %431 = vmatpush.bf16.msrb.mxu0 %v419_v32  ;;  %v351_v4 = vld [vmem:[%s959_s2 + $0x78] sm:$0xff] }
  0x2a   :  { %603 = vmatmul.msk.bf16.vlgmr.msra.gmra.mxu3 %vm110_vm0, %v25_v5  ;;  %v371_v5 = vpack.c.bf16 %v339_v62, %v339_v62  ;;  %v353_v62 = vld [vmem:[%s959_s2 + $0x88] sm:$0xff] }
  0x2c   :  { %601 = vmatmul.msk.bf16.vlgmr.msra.gmra.mxu1 %vm110_vm0, %v23_v7  ;;  %v383_v7 = vpack.c.bf16 %v351_v4, %v351_v4  ;;  %v345_v4 = vld [vmem:[%s959_s2 + $0x48] sm:$0xff] }
  0x2d   :  { %432 = vmatpush.bf16.msrb.mxu0 %v418_v0 }
  0xa5   :  { %v135_v8 = vpop.f32.mrf.mxu0 }
  0xa6   :  { %v283_v9 = vmul.f32 0.17677669, %v135_v8  ;;  %v356_v8 = vld [vmem:[%s959_s2 + $0xa0] sm:$0xff] }
  0xa8   :  { %v288_v10 = vsel %vm287_vm1, %v283_v9, -inf }
  0xa9   :  { %289 = vmax.xlane.f32.xlu1 %v288_v10  ;;  %v183_v11 = vpop.f32.mrf.mxu1  ;;  %v499_v10 = vpack.c.b16 %v495_v2, %v494_v1  ;;  %v384_v1 = vpack.c.bf16 %v352_v57, %v352_v57  ;;  %v385_v2 = vpack.c.bf16 %v353_v62, %v353_v62 }
  0xaa   :  { %v284_v12 = vmul.f32 0.17677669, %v183_v11  ;;  %v410_v11 = vunpack.c.l.b16 %v370_v3  ;;  %v344_v3 = vld [vmem:[%s959_s2 + $0x40] sm:$0xff] }
  0xab   :  { %511 = vmatpush.bf16.msrb.mxu2 %v499_v10  ;;  %v488_v10 = vunpack.c.l.b16 %v384_v1 }
  0xac   :  { %v231_v13 = vpop.f32.mrf.mxu2  ;;  %v291_v17 = vsel %vm287_vm1, %v284_v12, -inf }
  0xad   :  { %v279_v14 = vpop.f32.mrf.mxu3  ;;  %v285_v15 = vmul.f32 0.17677669, %v231_v13  ;;  %v137_v16 = vpop.f32.mrf.mxu0 }
  0xae   :  { %v286_v19 = vmul.f32 0.17677669, %v279_v14  ;;  %v411_v14 = vunpack.c.l.b16 %v371_v5  ;;  %v455_v16 = vunpack.c.l.b16 %v383_v7  ;;  %v533_v7 = vunpack.c.l.b16 %v397_v61 }
  0xaf   :  { %v294_v18 = vsel %vm287_vm1, %v285_v15, -inf }
  0xb0   :  { %295 = vmax.xlane.f32.xlu0 %v294_v18  ;;  %v297_v23 = vsel %vm287_vm1, %v286_v19, -inf  ;;  %v337_v18 = vld [vmem:[%s959_s2 + $0x8] sm:$0xff]  ;;  %v417_v25 = vpack.c.b16 %v411_v14, %v410_v11  ;;  %v489_v11 = vunpack.c.l.b16 %v385_v2  ;;  %v363_v14 = vld [vmem:[%s959_s2 + $0xd8] sm:$0xff] }
  0xb1   :  { %292 = vmax.xlane.f32.xlu1 %v291_v17  ;;  %v185_v20 = vpop.f32.mrf.mxu1  ;;  %v336_v17 = vld [vmem:[%s959_s2] sm:$0xff] }
  0xb2   :  { %433 = vmatpush.bf16.msrb.mxu0 %v417_v25  ;;  %v361_v25 = vld [vmem:[%s959_s2 + $0xc8] sm:$0xff] }
  0xb4   :  { %v233_v21 = vpop.f32.mrf.mxu2 }
  0xb5   :  { %v281_v22 = vpop.f32.mrf.mxu3 }
  0xb6   :  { %v368_v22 = vpack.c.bf16 %v336_v17, %v336_v17 }
  0xb8   :  { %298 = vmax.xlane.f32.xlu0 %v297_v23  ;;  %v369_v23 = vpack.c.bf16 %v337_v18, %v337_v18  ;;  %v395_v18 = vpack.c.bf16 %v363_v14, %v363_v14 }
 0x11c   :  { %v290_v30 = vpop.xlane.xlu1 %289 }
 0x11d   :  { %v300_v31 = vsub.f32 %v283_v9, %v290_v30  ;;  %v357_v9 = vld [vmem:[%s959_s2 + $0xa8] sm:$0xff]  ;;  %v367_v30 = vld [vmem:[%s959_s2 + $0xf8] sm:$0xff] }
 0x11e   :  { %v389_v13 = vpack.c.bf16 %v357_v9, %v357_v9 }
 0x11f   :  { %v304_v33 = vmul.f32 1.442695, %v300_v31  ;;  %v354_v31 = vld [vmem:[%s959_s2 + $0x90] sm:$0xff] }
 0x120   :  { %v493_v21 = vunpack.c.l.b16 %v389_v13  ;;  %v362_v13 = vld [vmem:[%s959_s2 + $0xd0] sm:$0xff] }
 0x121   :  { %610 = vpow2.f32 %v304_v33  ;;  %v408_v33 = vunpack.c.l.b16 %v368_v22  ;;  %v394_v17 = vpack.c.bf16 %v362_v13, %v362_v13  ;;  %v531_v22 = vunpack.c.l.b16 %v395_v18 }
 0x123   :  { %v296_v34 = vpop.xlane.xlu0 %295 }
 0x124   :  { %v302_v35 = vsub.f32 %v285_v15, %v296_v34  ;;  %v293_v36 = vpop.xlane.xlu1 %292  ;;  %v454_v15 = vunpack.c.l.b16 %v382_v6  ;;  %v409_v34 = vunpack.c.l.b16 %v369_v23  ;;  %v532_v6 = vunpack.c.l.b16 %v396_v60 }
 0x125   :  { %v301_v37 = vsub.f32 %v284_v12, %v293_v36  ;;  %v388_v12 = vpack.c.bf16 %v356_v8, %v356_v8  ;;  %v355_v36 = vld [vmem:[%s959_s2 + $0x98] sm:$0xff]  ;;  %v376_v8 = vpack.c.bf16 %v344_v3, %v344_v3 }
 0x126   :  { %v308_v38 = vmul.f32 1.442695, %v302_v35  ;;  %v459_v26 = vpack.c.b16 %v455_v16, %v454_v15  ;;  %v398_v35 = vpack.c.bf16 %v366_v29, %v366_v29  ;;  %v538_v15 = vpack.c.b16 %v533_v7, %v532_v6 }
 0x127   :  { %v819_v39 = vpop.eup %610  ;;  %v306_v40 = vmul.f32 1.442695, %v301_v37  ;;  %v492_v20 = vunpack.c.l.b16 %v388_v12  ;;  %v377_v12 = vpack.c.bf16 %v345_v4, %v345_v4  ;;  %v448_v16 = vunpack.c.l.b16 %v376_v8 }
 0x128   :  { %612 = vpow2.f32 %v308_v38  ;;  %v312_v41 = vsel %vm287_vm1, %v819_v39, 0.0  ;;  %471 = vmatpush.bf16.msrb.mxu1 %v459_v26  ;;  %v453_v38 = vunpack.c.l.b16 %v381_v28  ;;  %v393_v28 = vpack.c.bf16 %v361_v25, %v361_v25 }
 0x129   :  { %614 = vpow2.f32 %v306_v40  ;;  %313 = vadd.xlane.f32.xlu0 %v312_v41  ;;  %v498_v32 = vpack.c.b16 %v493_v21, %v492_v20  ;;  %v399_v40 = vpack.c.bf16 %v367_v30, %v367_v30  ;;  %v386_v41 = vpack.c.bf16 %v354_v31, %v354_v31 }
 0x12a   :  { %v449_v20 = vunpack.c.l.b16 %v377_v12  ;;  %v530_v21 = vunpack.c.l.b16 %v394_v17  ;;  %v529_v30 = vunpack.c.l.b16 %v393_v28 }
 0x12b   :  { %v299_v42 = vpop.xlane.xlu0 %298  ;;  %512 = vmatpush.bf16.msrb.mxu2 %v498_v32  ;;  %v535_v52 = vunpack.c.l.b16 %v399_v40  ;;  %v490_v53 = vunpack.c.l.b16 %v386_v41 }
 0x12c   :  { %v303_v43 = vsub.f32 %v286_v19, %v299_v42  ;;  %v348_v19 = vld [vmem:[%s959_s2 + $0x60] sm:$0xff]  ;;  %v346_v42 = vld [vmem:[%s959_s2 + $0x50] sm:$0xff]  ;;  %v456_v23 = vpack.c.b16 %v449_v20, %v448_v16  ;;  %v537_v26 = vpack.c.b16 %v531_v22, %v530_v21 }
 0x12d   :  { %v380_v27 = vpack.c.bf16 %v348_v19, %v348_v19  ;;  %v496_v19 = vpack.c.b16 %v489_v11, %v488_v10 }
 0x12e   :  { %v823_v44 = vpop.eup %612  ;;  %v310_v45 = vmul.f32 1.442695, %v303_v43  ;;  %v347_v43 = vld [vmem:[%s959_s2 + $0x58] sm:$0xff]  ;;  %s655_s2 = smov [#allocation2]  }
 0x12f   :  { %v825_v46 = vpop.eup %614  ;;  %v318_v47 = vsel %vm287_vm1, %v823_v44, 0.0  ;;  %v452_v37 = vunpack.c.l.b16 %v380_v27  ;;  %v379_v54 = vpack.c.bf16 %v347_v43, %v347_v43  ;;  %v392_v27 = vpack.c.bf16 %v360_v24, %v360_v24  ;;  %s587_s15 = sshll.u32 %s655_s2, 4  ;;  %s588_s15 = int_to_ptr.vmem [resolvable:$true] %s587_s15 }
 0x130   :  { %616 = vpow2.f32 %v310_v45  ;;  %319 = vadd.xlane.f32.xlu2 %v318_v47  ;;  %v315_v48 = vsel %vm287_vm1, %v825_v46, 0.0  ;;  %v416_v45 = vpack.c.b16 %v409_v34, %v408_v33  ;;  %v534_v47 = vunpack.c.l.b16 %v398_v35 }
 0x131   :  { %316 = vadd.xlane.f32.xlu1 %v315_v48  ;;  %v387_v48 = vpack.c.bf16 %v355_v36, %v355_v36  ;;  %v458_v51 = vpack.c.b16 %v453_v38, %v452_v37  ;;  %v451_v0 = vunpack.c.l.b16 %v379_v54  ;;  %v528_v29 = vunpack.c.l.b16 %v392_v27 }
 0x132   :  { %434 = vmatpush.bf16.msrb.mxu0 %v416_v45  ;;  %v539_v63 = vpack.c.b16 %v535_v52, %v534_v47  ;;  %v654_v33 = vmov 4.0  }
 0x133   :  { %v491_v58 = vunpack.c.l.b16 %v387_v48  ;;  %472 = vmatpush.bf16.msrb.mxu1 %v458_v51  ;;  %v536_v31 = vpack.c.b16 %v529_v30, %v528_v29  ;;  %618 = vrcp.f32 %v654_v33 }
 0x134   :  { %551 = vmatpush.bf16.msrb.mxu3 %v539_v63 }
 0x135   :  { %v497_v5 = vpack.c.b16 %v491_v58, %v490_v53 }
 0x136   :  { %v831_v49 = vpop.eup %616 }
 0x137   :  { %v321_v50 = vsel %vm287_vm1, %v831_v49, 0.0  ;;  %513 = vmatpush.bf16.msrb.mxu2 %v497_v5 }
 0x138   :  { %322 = vadd.xlane.f32.xlu2 %v321_v50  ;;  %v378_v50 = vpack.c.bf16 %v346_v42, %v346_v42  ;;  %552 = vmatpush.bf16.msrb.mxu3 %v538_v15 }
 0x139   :  { %v619_v34 = vpop.eup %618 }
 0x13a   :  { %v450_v59 = vunpack.c.l.b16 %v378_v50  ;;  %v572_v40 = vmul.f32 4.0, %v619_v34  ;;  %vm576_vm2 = vweird.f32 %v619_v34 }
 0x13b   :  { %514 = vmatpush.bf16.msrb.mxu2 %v496_v19 }
 0x13c   :  { %v457_v9 = vpack.c.b16 %v451_v0, %v450_v59  ;;  %553 = vmatpush.bf16.msrb.mxu3 %v537_v26  ;;  %v573_v42 = vsub.f32 1.0, %v572_v40 }
 0x13e   :  { %473 = vmatpush.bf16.msrb.mxu1 %v457_v9  ;;  %v574_v52 = vmul.f32 %v619_v34, %v573_v42 }
 0x140   :  { %554 = vmatpush.bf16.msrb.mxu3 %v536_v31  ;;  %v575_v56 = vadd.f32 %v619_v34, %v574_v52 }
 0x142   :  { %474 = vmatpush.bf16.msrb.mxu1 %v456_v23  ;;  %v577_v61 = vsel %vm576_vm2, %v619_v34, %v575_v56 }
 0x19c   :  { %v314_v32 = vpop.xlane.xlu0 %313 }
 0x19d   :  { %620 = vrcp.f32 %v314_v32 }
 0x1a3   :  { %v621_v35 = vpop.eup %620  ;;  %v320_v36 = vpop.xlane.xlu2 %319 }
 0x1a4   :  { %v328_v37 = vmul.f32 %v621_v35, %v819_v39  ;;  %622 = vrcp.f32 %v320_v36  ;;  %v317_v38 = vpop.xlane.xlu1 %316 }
 0x1a5   :  { %624 = vrcp.f32 %v317_v38 }
 0x1a6   :  { %v332_v41 = vpack.c.bf16 %v328_v37, %v328_v37  ;;  %v564_v54 = vsel %vm287_vm1, %v328_v37, 0.0 }
 0x1a8   :  { %604 = vmatmul.msk.bf16.vlgmr.msrb.gmra.mxu0 %vm287_vm1, %v332_v41 }
 0x1aa   :  { %v623_v43 = vpop.eup %622 }
 0x1ab   :  { %v625_v45 = vpop.eup %624  ;;  %v330_v47 = vmul.f32 %v623_v43, %v823_v44  ;;  %v323_v48 = vpop.xlane.xlu2 %322 }
 0x1ac   :  { %v329_v50 = vmul.f32 %v625_v45, %v825_v46  ;;  %626 = vrcp.f32 %v323_v48 }
 0x1ad   :  { %v334_v51 = vpack.c.bf16 %v330_v47, %v330_v47  ;;  %v567_v44 = vsel %vm287_vm1, %v330_v47, 0.0 }
 0x1ae   :  { %v565_v39 = vsel %vm287_vm1, %v329_v50, 0.0  ;;  %v333_v53 = vpack.c.bf16 %v329_v50, %v329_v50 }
 0x1af   :  { %606 = vmatmul.msk.bf16.vlgmr.msrb.gmra.mxu2 %vm287_vm1, %v334_v51  ;;  %v566_v55 = vadd.f32 %v565_v39, %v564_v54 }
 0x1b0   :  { %605 = vmatmul.msk.bf16.vlgmr.msrb.gmra.mxu1 %vm287_vm1, %v333_v53 }
 0x1b1   :  { %v568_v58 = vadd.f32 %v567_v44, %v566_v55 }
 0x1b2   :  { %v627_v57 = vpop.eup %626 }
 0x1b3   :  { %v331_v46 = vmul.f32 %v627_v57, %v831_v49 }
 0x1b5   :  { %v335_v59 = vpack.c.bf16 %v331_v46, %v331_v46  ;;  %v569_v60 = vsel %vm287_vm1, %v331_v46, 0.0 }
 0x1b6   :  { %v570_v62 = vadd.f32 %v569_v60, %v568_v58 }
 0x1b7   :  { %607 = vmatmul.msk.bf16.vlgmr.msrb.gmra.mxu3 %vm287_vm1, %v335_v59 }
 0x1b8   :  { %v578_v63 = vmul.f32 %v577_v61, %v570_v62 }
 0x1ba   :  { %579 = vst.msk [vmem:[#allocation2] sm:$0xff] %vm287_vm1, %v578_v63 }
 0x1bb   :  { %592 = dma.vmem_to_hbm [thread:$0]  %s588_s15, 128, %s590_s18, [#allocation3]  }
 0x225   :  { %v436_v49 = vpop.f32.mrf.mxu0 }
 0x226   :  { %560 = vst.msk [vmem:[%s960_s3] sm:$0xff] %vm110_vm0, %v436_v49 }
 0x22d   :  { %v438_v0 = vpop.f32.mrf.mxu0  ;;  %v476_v1 = vpop.f32.mrf.mxu1 }
 0x22e   :  { %561 = vst.msk [vmem:[%s960_s3 + $0x8] sm:$0xff] %vm110_vm0, %v476_v1 }
 0x232   :  { %v516_v2 = vpop.f32.mrf.mxu2 }
 0x233   :  { %562 = vst.msk [vmem:[%s960_s3 + $0x10] sm:$0xff] %vm110_vm0, %v516_v2 }
 0x235   :  { %v478_v3 = vpop.f32.mrf.mxu1 }
 0x23a   :  { %v518_v4 = vpop.f32.mrf.mxu2  ;;  %v556_v5 = vpop.f32.mrf.mxu3 }
 0x23b   :  { %563 = vst.msk [vmem:[%s960_s3 + $0x18] sm:$0xff] %vm110_vm0, %v556_v5 }
 0x242   :  { %v558_v6 = vpop.f32.mrf.mxu3 }
 0x243   :  { %652 = dma.done.wait [#allocation3], 128  }
 0x244   :  { %653 = vsyncadd [#allocation3], 4294967168 }
 0x245   :  { %599 = vsyncpa [#allocation3], 1 }

// kernel: forward.33
= control target key start
LH: loop header
LB: loop body
LE: loop exit
PB: predicated region body
PF: predicated region fallthrough
CT: control target
= control target key end

     0   :  { %s1140_s0 = inlined_call_operand.vmem [shape: f32[8,128], index: 0, kind: input, shape index: {}]   ;;  %s1141_s1 = inlined_call_operand.vmem [shape: f32[8,128], index: 1, kind: input, shape index: {}]   ;;  %s1142_s2 = inlined_call_operand.vmem [shape: f32[1,128], index: 2, kind: input, shape index: {}]   ;;  %s1143_s3 = inlined_call_operand.vmem [shape: f32[1,128], index: 3, kind: input, shape index: {}]   ;;  %s1144_s4 = inlined_call_operand.vmem [shape: f32[128,256], index: 4, kind: input, shape index: {}]   ;;  %s1145_s5 = inlined_call_operand.vmem [shape: f32[1,256], index: 5, kind: input, shape index: {}]   ;;  %s1146_s6 = inlined_call_operand.vmem [shape: f32[256,128], index: 6, kind: input, shape index: {}]   ;;  %s1147_s7 = inlined_call_operand.vmem [shape: f32[1,128], index: 7, kind: input, shape index: {}]   ;;  %s1148_s8 = inlined_call_operand.vmem [shape: f32[128,64], index: 8, kind: input, shape index: {}]   ;;  %s1149_s9 = inlined_call_operand.vmem [shape: f32[1,64], index: 9, kind: input, shape index: {}]   ;;  %s1150_s10 = inlined_call_operand.vmem [shape: f32[128,64], index: 10, kind: input, shape index: {}]   ;;  %s1151_s11 = inlined_call_operand.vmem [shape: f32[1,64], index: 11, kind: input, shape index: {}]   ;;  %s1152_s12 = inlined_call_operand.vmem [shape: f32[64,1], index: 12, kind: input, shape index: {}]   ;;  %s1153_s13 = inlined_call_operand.<no memory space> [shape: f32[1,1], index: 13, kind: input, shape index: {}]   ;;  %s1154_s14 = inlined_call_operand.hbm [shape: f32[8,64], index: 14, kind: output, shape index: {0}]   ;;  %s1155_s15 = inlined_call_operand.vmem [shape: f32[8,1], index: 15, kind: output, shape index: {1}]  }
   0x1   :  { %v21_v0 = vstv %s1153_s13 }
   0x2   :  { %22 = vst [vmem:[#allocation2] sm:$0x1] %v21_v0 }
   0x3   :  { %v53_v1 = vld [vmem:[%s1140_s0] sm:$0xff] }
   0x4   :  { %v54_v2 = vld [vmem:[%s1141_s1] sm:$0xff] }
   0x5   :  { %v55_v3 = vadd.f32 %v54_v2, %v53_v1 }
   0x6   :  { %23 = vsyncpa [#allocation4], 0  ;;  %v632_v4 = vmov 128.0   ;;  %v122_v5 = vld [vmem:[%s1144_s4 + $0xe8] sm:$0xff]  ;;  %v124_v6 = vld [vmem:[%s1144_s4 + $0xf8] sm:$0xff]  ;;  %s560_s1 = sshll.u32 %s1154_s14, 4  ;;  %s561_s1 = int_to_ptr.hbm [resolvable:$true] %s560_s1 }
   0x7   :  { %58 = vadd.xlane.f32.xlu0 %v55_v3  ;;  %582 = vrcp.f32 %v632_v4  ;;  %v118_v7 = vld [vmem:[%s1144_s4 + $0xc8] sm:$0xff]  ;;  %v141_v8 = vpack.c.bf16 %v124_v6, %v122_v5  ;;  %v120_v9 = vld [vmem:[%s1144_s4 + $0xd8] sm:$0xff]  ;;  %v121_v10 = vld [vmem:[%s1144_s4 + $0xe0] sm:$0xff] }
   0x8   :  { %v139_v11 = vpack.c.bf16 %v120_v9, %v118_v7  ;;  %v123_v12 = vld [vmem:[%s1144_s4 + $0xf0] sm:$0xff]  ;;  %v114_v14 = vld [vmem:[%s1144_s4 + $0xa8] sm:$0xff]  ;;  %v116_v15 = vld [vmem:[%s1144_s4 + $0xb8] sm:$0xff] }
   0x9   :  { %161 = vmatpush.bf16.msra.mxu1 %v141_v8  ;;  %v140_v16 = vpack.c.bf16 %v123_v12, %v121_v10  ;;  %v137_v18 = vpack.c.bf16 %v116_v15, %v114_v14  ;;  %v110_v19 = vld [vmem:[%s1144_s4 + $0x88] sm:$0xff]  ;;  %v112_v20 = vld [vmem:[%s1144_s4 + $0x98] sm:$0xff]  ;;  %v117_v33 = vld [vmem:[%s1144_s4 + $0xc0] sm:$0xff] }
   0xa   :  { %v135_v22 = vpack.c.bf16 %v112_v20, %v110_v19  ;;  %v106_v30 = vld [vmem:[%s1144_s4 + $0x68] sm:$0xff]  ;;  %v108_v31 = vld [vmem:[%s1144_s4 + $0x78] sm:$0xff]  ;;  %v119_v34 = vld [vmem:[%s1144_s4 + $0xd0] sm:$0xff] }
   0xb   :  { %148 = vmatpush.bf16.msra.mxu0 %v140_v16  ;;  %v133_v32 = vpack.c.bf16 %v108_v31, %v106_v30  ;;  %v138_v35 = vpack.c.bf16 %v119_v34, %v117_v33  ;;  %v102_v36 = vld [vmem:[%s1144_s4 + $0x48] sm:$0xff]  ;;  %v104_v37 = vld [vmem:[%s1144_s4 + $0x58] sm:$0xff]  ;;  %v113_v39 = vld [vmem:[%s1144_s4 + $0xa0] sm:$0xff] }
   0xc   :  { %v131_v38 = vpack.c.bf16 %v104_v37, %v102_v36  ;;  %v115_v40 = vld [vmem:[%s1144_s4 + $0xb0] sm:$0xff]  ;;  %v98_v42 = vld [vmem:[%s1144_s4 + $0x28] sm:$0xff]  ;;  %v100_v43 = vld [vmem:[%s1144_s4 + $0x38] sm:$0xff] }
   0xd   :  { %v583_v13 = vpop.eup %582  ;;  %162 = vmatpush.bf16.msra.mxu1 %v139_v11  ;;  %v136_v41 = vpack.c.bf16 %v115_v40, %v113_v39  ;;  %v129_v44 = vpack.c.bf16 %v100_v43, %v98_v42  ;;  %v109_v45 = vld [vmem:[%s1144_s4 + $0x80] sm:$0xff]  ;;  %v111_v46 = vld [vmem:[%s1144_s4 + $0x90] sm:$0xff]  ;;  %v94_v48 = vld [vmem:[%s1144_s4 + $0x8] sm:$0xff] }
   0xe   :  { %v61_v17 = vmul.f32 128.0, %v583_v13  ;;  %vm65_vm0 = vweird.f32 %v583_v13  ;;  %v134_v47 = vpack.c.bf16 %v111_v46, %v109_v45  ;;  %v96_v49 = vld [vmem:[%s1144_s4 + $0x18] sm:$0xff]  ;;  %v105_v51 = vld [vmem:[%s1144_s4 + $0x60] sm:$0xff]  ;;  %v107_v52 = vld [vmem:[%s1144_s4 + $0x70] sm:$0xff] }
   0xf   :  { %149 = vmatpush.bf16.msra.mxu0 %v138_v35  ;;  %v127_v50 = vpack.c.bf16 %v96_v49, %v94_v48  ;;  %v432_v53 = vld [vmem:[%s1150_s10 + $0x70] sm:$0xff]  ;;  %v132_v54 = vpack.c.bf16 %v107_v52, %v105_v51  ;;  %v433_v55 = vld [vmem:[%s1150_s10 + $0x78] sm:$0xff]  ;;  %v101_v57 = vld [vmem:[%s1144_s4 + $0x40] sm:$0xff] }
  0x10   :  { %v62_v21 = vsub.f32 1.0, %v61_v17  ;;  %v441_v56 = vpack.c.bf16 %v433_v55, %v432_v53  ;;  %v103_v58 = vld [vmem:[%s1144_s4 + $0x50] sm:$0xff]  ;;  %v430_v59 = vld [vmem:[%s1150_s10 + $0x60] sm:$0xff]  ;;  %v431_v61 = vld [vmem:[%s1150_s10 + $0x68] sm:$0xff] }
  0x11   :  { %163 = vmatpush.bf16.msra.mxu1 %v137_v18  ;;  %v130_v60 = vpack.c.bf16 %v103_v58, %v101_v57  ;;  %v440_v62 = vpack.c.bf16 %v431_v61, %v430_v59  ;;  %v97_v63 = vld [vmem:[%s1144_s4 + $0x20] sm:$0xff]  ;;  %v99_v0 = vld [vmem:[%s1144_s4 + $0x30] sm:$0xff]  ;;  %v427_v8 = vld [vmem:[%s1150_s10 + $0x48] sm:$0xff] }
  0x12   :  { %v63_v23 = vmul.f32 %v583_v13, %v62_v21  ;;  %v428_v1 = vld [vmem:[%s1150_s10 + $0x50] sm:$0xff]  ;;  %v128_v2 = vpack.c.bf16 %v99_v0, %v97_v63  ;;  %v93_v4 = vld [vmem:[%s1144_s4] sm:$0xff]  ;;  %v425_v12 = vld [vmem:[%s1150_s10 + $0x38] sm:$0xff] }
  0x13   :  { %150 = vmatpush.bf16.msra.mxu0 %v136_v41  ;;  %v95_v5 = vld [vmem:[%s1144_s4 + $0x10] sm:$0xff]  ;;  %v426_v7 = vld [vmem:[%s1150_s10 + $0x40] sm:$0xff]  ;;  %v423_v15 = vld [vmem:[%s1150_s10 + $0x28] sm:$0xff] }
  0x14   :  { %v64_v24 = vadd.f32 %v583_v13, %v63_v23  ;;  %v126_v9 = vpack.c.bf16 %v95_v5, %v93_v4  ;;  %v438_v10 = vpack.c.bf16 %v427_v8, %v426_v7  ;;  %v424_v11 = vld [vmem:[%s1150_s10 + $0x30] sm:$0xff]  ;;  %v422_v14 = vld [vmem:[%s1150_s10 + $0x20] sm:$0xff]  ;;  %v421_v20 = vld [vmem:[%s1150_s10 + $0x18] sm:$0xff] }
  0x15   :  { %164 = vmatpush.bf16.msra.mxu1 %v135_v22  ;;  %v436_v18 = vpack.c.bf16 %v423_v15, %v422_v14  ;;  %v420_v19 = vld [vmem:[%s1150_s10 + $0x10] sm:$0xff]  ;;  %v418_v23 = vld [vmem:[%s1150_s10] sm:$0xff]  ;;  %v267_v49 = vld [vmem:[%s1146_s6 + $0x68] sm:$0xff] }
  0x16   :  { %v753_v25 = vsel %vm65_vm0, %v583_v13, %v64_v24  ;;  %v437_v13 = vpack.c.bf16 %v425_v12, %v424_v11  ;;  %v435_v22 = vpack.c.bf16 %v421_v20, %v420_v19  ;;  %v419_v24 = vld [vmem:[%s1150_s10 + $0x8] sm:$0xff]  ;;  %v576_v33 = vld [vmem:[%s1142_s2] ss:$0 sm:$0xff]  ;;  %v268_v41 = vld [vmem:[%s1146_s6 + $0x70] sm:$0xff] }
  0x17   :  { %151 = vmatpush.bf16.msra.mxu0 %v134_v47  ;;  %v577_v36 = vld [vmem:[%s1143_s3] ss:$0 sm:$0xff]  ;;  %v284_v42 = vld [vmem:[%s1146_s6 + $0xf0] sm:$0xff]  ;;  %v283_v52 = vld [vmem:[%s1146_s6 + $0xe8] sm:$0xff] }
  0x18   :  { %v142_v40 = vld [vmem:[%s1145_s5] sm:$0x3]  ;;  %v264_v58 = vld [vmem:[%s1146_s6 + $0x50] sm:$0xff]  ;;  %v265_v59 = vld [vmem:[%s1146_s6 + $0x58] sm:$0xff] }
  0x19   :  { %165 = vmatpush.bf16.msra.mxu1 %v133_v32  ;;  %v144_v46 = vperm.slane %v142_v40, 0  ;;  %v145_v47 = vperm.slane %v142_v40, 1  ;;  %v266_v48 = vld [vmem:[%s1146_s6 + $0x60] sm:$0xff]  ;;  %v293_v63 = vpack.c.bf16 %v265_v59, %v264_v58  ;;  %v281_v0 = vld [vmem:[%s1146_s6 + $0xd8] sm:$0xff]  ;;  %v263_v5 = vld [vmem:[%s1146_s6 + $0x48] sm:$0xff] }
  0x1a   :  { %v294_v51 = vpack.c.bf16 %v267_v49, %v266_v48  ;;  %v262_v4 = vld [vmem:[%s1146_s6 + $0x40] sm:$0xff]  ;;  %v279_v12 = vld [vmem:[%s1146_s6 + $0xc8] sm:$0xff]  ;;  %v277_v19 = vld [vmem:[%s1146_s6 + $0xb8] sm:$0xff] }
  0x1b   :  { %152 = vmatpush.bf16.msra.mxu0 %v132_v54  ;;  %v278_v8 = vld [vmem:[%s1146_s6 + $0xc0] sm:$0xff]  ;;  %v292_v11 = vpack.c.bf16 %v263_v5, %v262_v4  ;;  %v255_v49 = vld [vmem:[%s1146_s6 + $0x8] sm:$0xff] }
  0x1c   :  { %v300_v15 = vpack.c.bf16 %v279_v12, %v278_v8  ;;  %v578_v20 = vld [vmem:[%s1151_s11] ss:$0 sm:$0xff] }
  0x1d   :  { %166 = vmatpush.bf16.msra.mxu1 %v131_v38  ;;  %v254_v48 = vld [vmem:[%s1146_s6] sm:$0xff] }
  0x1f   :  { %153 = vmatpush.bf16.msra.mxu0 %v130_v60 }
  0x21   :  { %167 = vmatpush.bf16.msra.mxu1 %v129_v44  ;;  %v285_v44 = vld [vmem:[%s1146_s6 + $0xf8] sm:$0xff] }
  0x22   :  { %v303_v45 = vpack.c.bf16 %v285_v44, %v284_v42 }
  0x23   :  { %154 = vmatpush.bf16.msra.mxu0 %v128_v2 }
  0x24   :  { %321 = vmatpush.bf16.msra.mxu3 %v303_v45 }
  0x25   :  { %168 = vmatpush.bf16.msra.mxu1 %v127_v50  ;;  %v282_v50 = vld [vmem:[%s1146_s6 + $0xe0] sm:$0xff] }
  0x26   :  { %v302_v55 = vpack.c.bf16 %v283_v52, %v282_v50  ;;  %v270_v50 = vld [vmem:[%s1146_s6 + $0x80] sm:$0xff] }
  0x27   :  { %155 = vmatpush.bf16.msra.mxu0 %v126_v9 }
  0x28   :  { %322 = vmatpush.bf16.msra.mxu3 %v302_v55 }
  0x29   :  { %446 = vmatpush.bf16.msrb.mxu1 %v441_v56 }
  0x2d   :  { %447 = vmatpush.bf16.msrb.mxu1 %v440_v62  ;;  %v280_v62 = vld [vmem:[%s1146_s6 + $0xd0] sm:$0xff] }
  0x7a   :  { %v59_v26 = vpop.xlane.xlu0 %58 }
  0x7b   :  { %v67_v27 = vmul.f32 %v753_v25, %v59_v26 }
  0x7d   :  { %v756_v28 = vsub.f32 %v55_v3, %v67_v27  ;;  %v429_v3 = vld [vmem:[%s1150_s10 + $0x58] sm:$0xff] }
  0x7e   :  { %v439_v6 = vpack.c.bf16 %v429_v3, %v428_v1  ;;  %v301_v3 = vpack.c.bf16 %v281_v0, %v280_v62 }
  0x7f   :  { %v69_v29 = vmul.f32 %v756_v28, %v756_v28 }
  0x80   :  { %448 = vmatpush.bf16.msrb.mxu1 %v439_v6  ;;  %323 = vmatpush.bf16.msra.mxu3 %v301_v3 }
  0x81   :  { %70 = vadd.xlane.f32.xlu0 %v69_v29 }
  0x84   :  { %449 = vmatpush.bf16.msrb.mxu1 %v438_v10  ;;  %324 = vmatpush.bf16.msra.mxu3 %v300_v15 }
  0x88   :  { %450 = vmatpush.bf16.msrb.mxu1 %v437_v13 }
  0x8c   :  { %451 = vmatpush.bf16.msrb.mxu1 %v436_v18  ;;  %v276_v18 = vld [vmem:[%s1146_s6 + $0xb0] sm:$0xff] }
  0x90   :  { %452 = vmatpush.bf16.msrb.mxu1 %v435_v22  ;;  %v299_v22 = vpack.c.bf16 %v277_v19, %v276_v18 }
  0x92   :  { %325 = vmatpush.bf16.msra.mxu3 %v299_v22 }
  0xf4   :  { %v71_v16 = vpop.xlane.xlu0 %70 }
  0xf5   :  { %v72_v17 = vmul.f32 %v71_v16, %v753_v25  ;;  %v434_v25 = vpack.c.bf16 %v419_v24, %v418_v23  ;;  %v260_v16 = vld [vmem:[%s1146_s6 + $0x30] sm:$0xff]  ;;  %v258_v23 = vld [vmem:[%s1146_s6 + $0x20] sm:$0xff]  ;;  %v259_v24 = vld [vmem:[%s1146_s6 + $0x28] sm:$0xff] }
  0xf7   :  { %v73_v21 = vadd.f32 1e-05, %v72_v17  ;;  %453 = vmatpush.bf16.msrb.mxu1 %v434_v25  ;;  %v261_v17 = vld [vmem:[%s1146_s6 + $0x38] sm:$0xff]  ;;  %v274_v25 = vld [vmem:[%s1146_s6 + $0xa0] sm:$0xff] }
  0xf9   :  { %584 = vrsqrt.f32 %v73_v21  ;;  %vm80_vm2 = vweird.f32 %v73_v21 }
  0xff   :  { %v585_v26 = vpop.eup %584 }
 0x100   :  { %v75_v27 = vmul.f32 %v585_v26, %v73_v21  ;;  %vm81_vm1 = vweird.f32 %v585_v26  ;;  %v291_v21 = vpack.c.bf16 %v261_v17, %v260_v16 }
 0x101   :  { %vm82_vm3 = vmor %vm80_vm2, %vm81_vm1 }
 0x102   :  { %v76_v29 = vmul.f32 %v585_v26, %v75_v27  ;;  %v275_v27 = vld [vmem:[%s1146_s6 + $0xa8] sm:$0xff] }
 0x104   :  { %v77_v30 = vmul.f32 0.5, %v76_v29 }
 0x106   :  { %v78_v31 = vsub.f32 1.5, %v77_v30  ;;  %v298_v30 = vpack.c.bf16 %v275_v27, %v274_v25 }
 0x108   :  { %v79_v32 = vmul.f32 %v585_v26, %v78_v31  ;;  %326 = vmatpush.bf16.msra.mxu3 %v298_v30 }
 0x10a   :  { %v83_v34 = vsel %vm82_vm3, %v585_v26, %v79_v32  ;;  %v290_v26 = vpack.c.bf16 %v259_v24, %v258_v23  ;;  %vm416_vm3 = vcmask 523264  }
 0x10b   :  { %v84_v35 = vmul.f32 %v83_v34, %v756_v28  ;;  %v269_v28 = vld [vmem:[%s1146_s6 + $0x78] sm:$0xff] }
 0x10c   :  { %v295_v43 = vpack.c.bf16 %v269_v28, %v268_v41  ;;  %v273_v41 = vld [vmem:[%s1146_s6 + $0x98] sm:$0xff] }
 0x10d   :  { %v88_v37 = vmul.f32 %v576_v33, %v84_v35  ;;  %v256_v35 = vld [vmem:[%s1146_s6 + $0x10] sm:$0xff] }
 0x10e   :  { %308 = vmatpush.bf16.msra.mxu2 %v295_v43 }
 0x10f   :  { %v92_v38 = vadd.f32 %v577_v36, %v88_v37  ;;  %v257_v36 = vld [vmem:[%s1146_s6 + $0x18] sm:$0xff]  ;;  %v272_v37 = vld [vmem:[%s1146_s6 + $0x90] sm:$0xff] }
 0x110   :  { %v289_v40 = vpack.c.bf16 %v257_v36, %v256_v35  ;;  %v297_v42 = vpack.c.bf16 %v273_v41, %v272_v37 }
 0x111   :  { %v125_v39 = vpack.c.bf16 %v92_v38, %v92_v38 }
 0x112   :  { %309 = vmatpush.bf16.msra.mxu2 %v294_v51  ;;  %327 = vmatpush.bf16.msra.mxu3 %v297_v42 }
 0x113   :  { %156 = vmatmul.bf16.vlgmr.msra.gmra.mxu0 %v125_v39  ;;  %169 = vmatmul.bf16.vlgmr.msra.gmra.mxu1 %v125_v39 }
 0x116   :  { %310 = vmatpush.bf16.msra.mxu2 %v293_v63 }
 0x11a   :  { %311 = vmatpush.bf16.msra.mxu2 %v292_v11  ;;  %v506_v11 = vld [vmem:[%s1152_s12 + $0x38] sm:$0xff] }
 0x11e   :  { %312 = vmatpush.bf16.msra.mxu2 %v291_v21  ;;  %v504_v21 = vld [vmem:[%s1152_s12 + $0x28] sm:$0xff] }
 0x122   :  { %313 = vmatpush.bf16.msra.mxu2 %v290_v26 }
 0x123   :  { %454 = vmatmul.bf16.vlgmr.msrb.gmra.mxu1 %v125_v39 }
 0x126   :  { %314 = vmatpush.bf16.msra.mxu2 %v289_v40 }
 0x190   :  { %v157_v53 = vpop.f32.mrf.mxu0  ;;  %v170_v54 = vpop.f32.mrf.mxu1 }
 0x191   :  { %v909_v56 = vadd.f32 %v157_v53, %v144_v46  ;;  %v911_v57 = vadd.f32 %v170_v54, %v145_v47  ;;  %v288_v53 = vpack.c.bf16 %v255_v49, %v254_v48  ;;  %v271_v54 = vld [vmem:[%s1146_s6 + $0x88] sm:$0xff] }
 0x192   :  { %v296_v59 = vpack.c.bf16 %v271_v54, %v270_v50 }
 0x193   :  { %v920_v60 = vmul.f32 0.70710677, %v909_v56  ;;  %v923_v61 = vmul.f32 0.70710677, %v911_v57  ;;  %315 = vmatpush.bf16.msra.mxu2 %v288_v53 }
 0x194   :  { %328 = vmatpush.bf16.msra.mxu3 %v296_v59 }
 0x195   :  { %v932_v1 = vand.u32 2147483647, %v920_v60  ;;  %v935_v2 = vand.u32 2147483647, %v923_v61  ;;  %vm244_vm0 = vcmp.ge.f32.partialorder %v920_v60, 0.0  ;;  %vm245_vm1 = vcmp.ge.f32.partialorder %v923_v61, 0.0 }
 0x197   :  { %v180_v6 = vmul.f32 0.3275911, %v932_v1  ;;  %v181_v7 = vmul.f32 0.3275911, %v935_v2  ;;  %v233_v12 = vsub.f32 0.0, %v935_v2 }
 0x198   :  { %v159_v9 = vpop.f32.mrf.mxu0  ;;  %v172_v10 = vpop.f32.mrf.mxu1 }
 0x199   :  { %v951_v13 = vadd.f32 1.0, %v180_v6  ;;  %v953_v14 = vadd.f32 1.0, %v181_v7  ;;  %v232_v6 = vsub.f32 0.0, %v932_v1  ;;  %v505_v10 = vld [vmem:[%s1152_s12 + $0x30] sm:$0xff]  ;;  %v235_v23 = vmul.f32 %v233_v12, %v935_v2 }
 0x19a   :  { %v511_v16 = vpack.c.bf16 %v506_v11, %v505_v10 }
 0x19b   :  { %586 = vrcp.f32 %v951_v13  ;;  %vm189_vm4 = vweird.f32 %v951_v13  ;;  %v195_v46 = vand.u32 2147483648, %v951_v13  ;;  %v210_v47 = vand.u32 2147483648, %v953_v14 }
 0x19c   :  { %588 = vrcp.f32 %v953_v14  ;;  %v193_v55 = vand.u32 2147483647, %v951_v13  ;;  %v208_v63 = vand.u32 2147483647, %v953_v14  ;;  %vm204_vm8 = vweird.f32 %v953_v14  ;;  %523 = vmatpush.bf16.msrb.mxu2 %v511_v16 }
 0x19d   :  { %v196_v5 = vor.u32 1.1754944e-38, %v195_v46  ;;  %v211_v7 = vor.u32 1.1754944e-38, %v210_v47  ;;  %v234_v17 = vmul.f32 %v232_v6, %v932_v1  ;;  %v238_v35 = vmul.f32 1.442695, %v235_v23  ;;  %v500_v46 = vld [vmem:[%s1152_s12 + $0x8] sm:$0xff] }
 0x19e   :  { %vm194_vm9 = vcmp.eq.f32.partialorder %v193_v55, 8.507059e+37  ;;  %vm209_vm11 = vcmp.eq.f32.partialorder %v208_v63, 8.507059e+37 }
 0x19f   :  { %v236_v1 = vmul.f32 1.442695, %v234_v17 }
 0x1a0   :  { %v455_v29 = vpop.f32.mrf.mxu1 }
 0x1a1   :  { %v587_v31 = vpop.eup %586  ;;  %v984_v32 = vadd.f32 %v578_v20, %v455_v29  ;;  %v503_v20 = vld [vmem:[%s1152_s12 + $0x20] sm:$0xff] }
 0x1a2   :  { %v589_v33 = vpop.eup %588  ;;  %v185_v34 = vmul.f32 %v587_v31, %v951_v13  ;;  %vm190_vm5 = vweird.f32 %v587_v31  ;;  %v510_v25 = vpack.c.bf16 %v504_v21, %v503_v20 }
 0x1a3   :  { %v200_v38 = vmul.f32 %v589_v33, %v953_v14  ;;  %v998_v39 = vmul.f32 0.70710677, %v984_v32  ;;  %vm205_vm6 = vweird.f32 %v589_v33  ;;  %vm191_vm7 = vmor %vm189_vm4, %vm190_vm5 }
 0x1a4   :  { %v186_v28 = vsub.f32 1.0, %v185_v34  ;;  %vm206_vm10 = vmor %vm204_vm8, %vm205_vm6  ;;  %524 = vmatpush.bf16.msrb.mxu2 %v510_v25  ;;  %v502_v34 = vld [vmem:[%s1152_s12 + $0x18] sm:$0xff] }
 0x1a5   :  { %v201_v43 = vsub.f32 1.0, %v200_v38  ;;  %v1005_v44 = vand.u32 2147483647, %v998_v39  ;;  %vm494_vm2 = vcmp.ge.f32.partialorder %v998_v39, 0.0  ;;  %v389_v39 = vld [vmem:[%s1148_s8 + $0x78] sm:$0xff] }
 0x1a6   :  { %v187_v45 = vmul.f32 %v587_v31, %v186_v28 }
 0x1a7   :  { %v202_v51 = vmul.f32 %v589_v33, %v201_v43  ;;  %v462_v52 = vmul.f32 0.3275911, %v1005_v44  ;;  %v488_v53 = vsub.f32 0.0, %v1005_v44 }
 0x1a8   :  { %v457_v58 = vpop.f32.mrf.mxu1  ;;  %v188_v62 = vadd.f32 %v587_v31, %v187_v45  ;;  %v499_v45 = vld [vmem:[%s1152_s12] sm:$0xff] }
 0x1a9   :  { %v1024_v0 = vadd.f32 1.0, %v462_v52  ;;  %v203_v3 = vadd.f32 %v589_v33, %v202_v51  ;;  %v508_v49 = vpack.c.bf16 %v500_v46, %v499_v45  ;;  %v385_v45 = vld [vmem:[%s1148_s8 + $0x58] sm:$0xff] }
 0x1aa   :  { %v192_v4 = vsel %vm191_vm7, %v587_v31, %v188_v62 }
 0x1ab   :  { %590 = vrcp.f32 %v1024_v0  ;;  %v197_v8 = vsel %vm194_vm9, %v196_v5, %v192_v4  ;;  %v207_v9 = vsel %vm206_vm10, %v589_v33, %v203_v3  ;;  %v501_v33 = vld [vmem:[%s1152_s12 + $0x10] sm:$0xff]  ;;  %v475_v2 = vand.u32 2147483648, %v1024_v0 }
 0x1ac   :  { %v214_v13 = vmul.f32 1.0614054, %v197_v8  ;;  %v212_v14 = vsel %vm209_vm11, %v211_v7, %v207_v9  ;;  %v509_v37 = vpack.c.bf16 %v502_v34, %v501_v33  ;;  %v473_v40 = vand.u32 2147483647, %v1024_v0  ;;  %v579_v34 = vld [vmem:[%s1147_s7] ss:$0 sm:$0xff] }
 0x1ad   :  { %v215_v15 = vmul.f32 1.0614054, %v212_v14  ;;  %592 = vpow2.f32 %v236_v1  ;;  %vm469_vm13 = vweird.f32 %v1024_v0  ;;  %v476_v47 = vor.u32 1.1754944e-38, %v475_v2  ;;  %s633_s7 = smov [#allocation3]  }
 0x1ae   :  { %v216_v18 = vadd.f32 -1.4531521, %v214_v13  ;;  %525 = vmatpush.bf16.msrb.mxu2 %v509_v37  ;;  %594 = vpow2.f32 %v238_v35  ;;  %vm474_vm15 = vcmp.eq.f32.partialorder %v473_v40, 8.507059e+37  ;;  %v489_v4 = vmul.f32 %v488_v53, %v1005_v44  ;;  %v388_v35 = vld [vmem:[%s1148_s8 + $0x70] sm:$0xff]  ;;  %v387_v40 = vld [vmem:[%s1148_s8 + $0x68] sm:$0xff]  ;;  %s558_s6 = sshll.u32 %s633_s7, 4  ;;  %s559_s6 = int_to_ptr.vmem [resolvable:$true] %s558_s6 }
 0x1af   :  { %v217_v19 = vadd.f32 -1.4531521, %v215_v15  ;;  %v398_v2 = vpack.c.bf16 %v389_v39, %v388_v35  ;;  %vm551_vm11 = vcmask 7168  }
 0x1b0   :  { %v218_v24 = vmul.f32 %v216_v18, %v197_v8  ;;  %v490_v12 = vmul.f32 1.442695, %v489_v4  ;;  %v379_v4 = vld [vmem:[%s1148_s8 + $0x28] sm:$0xff] }
 0x1b1   :  { %v591_v22 = vpop.eup %590  ;;  %v219_v27 = vmul.f32 %v217_v19, %v212_v14  ;;  %v175_v19 = vmul.f32 0.5, %v911_v57  ;;  %v459_v57 = vmul.f32 0.5, %v984_v32  ;;  %403 = vmatpush.bf16.msrb.mxu0 %v398_v2 }
 0x1b2   :  { %v465_v26 = vmul.f32 %v591_v22, %v1024_v0  ;;  %v220_v29 = vadd.f32 1.4214138, %v218_v24  ;;  %vm470_vm12 = vweird.f32 %v591_v22  ;;  %526 = vmatpush.bf16.msrb.mxu2 %v508_v49  ;;  %596 = vpow2.f32 %v490_v12 }
 0x1b3   :  { %v221_v31 = vadd.f32 1.4214138, %v219_v27  ;;  %vm471_vm14 = vmor %vm469_vm13, %vm470_vm12  ;;  %v593_v62 = vpop.eup %592 }
 0x1b4   :  { %v466_v30 = vsub.f32 1.0, %v465_v26  ;;  %v222_v36 = vmul.f32 %v220_v29, %v197_v8  ;;  %v595_v3 = vpop.eup %594 }
 0x1b5   :  { %v223_v41 = vmul.f32 %v221_v31, %v212_v14 }
 0x1b6   :  { %v467_v38 = vmul.f32 %v591_v22, %v466_v30  ;;  %v224_v28 = vadd.f32 -0.28449672, %v222_v36 }
 0x1b7   :  { %v225_v43 = vadd.f32 -0.28449672, %v223_v41 }
 0x1b8   :  { %v468_v42 = vadd.f32 %v591_v22, %v467_v38  ;;  %v226_v48 = vmul.f32 %v224_v28, %v197_v8  ;;  %v597_v27 = vpop.eup %596  ;;  %v386_v38 = vld [vmem:[%s1148_s8 + $0x60] sm:$0xff] }
 0x1b9   :  { %v227_v51 = vmul.f32 %v225_v43, %v212_v14  ;;  %v397_v41 = vpack.c.bf16 %v387_v40, %v386_v38  ;;  %v384_v43 = vld [vmem:[%s1148_s8 + $0x50] sm:$0xff] }
 0x1ba   :  { %v472_v50 = vsel %vm471_vm14, %v591_v22, %v468_v42  ;;  %v228_v54 = vadd.f32 0.2548296, %v226_v48  ;;  %v396_v46 = vpack.c.bf16 %v385_v45, %v384_v43 }
 0x1bb   :  { %v477_v52 = vsel %vm474_vm15, %v476_v47, %v472_v50  ;;  %v229_v58 = vadd.f32 0.2548296, %v227_v51  ;;  %404 = vmatpush.bf16.msrb.mxu0 %v397_v41  ;;  %v382_v51 = vld [vmem:[%s1148_s8 + $0x40] sm:$0xff] }
 0x1bc   :  { %v479_v55 = vmul.f32 1.0614054, %v477_v52  ;;  %v230_v59 = vmul.f32 %v228_v54, %v197_v8 }
 0x1bd   :  { %v231_v0 = vmul.f32 %v229_v58, %v212_v14  ;;  %v174_v14 = vmul.f32 0.5, %v909_v56  ;;  %v380_v58 = vld [vmem:[%s1148_s8 + $0x30] sm:$0xff] }
 0x1be   :  { %v480_v63 = vadd.f32 -1.4531521, %v479_v55  ;;  %v240_v5 = vmul.f32 %v593_v62, %v230_v59  ;;  %v580_v55 = vld [vmem:[#allocation2] ss:$0 sm:$0xff]  ;;  %v381_v59 = vld [vmem:[%s1148_s8 + $0x38] sm:$0xff] }
 0x1bf   :  { %v241_v7 = vmul.f32 %v595_v3, %v231_v0  ;;  %405 = vmatpush.bf16.msrb.mxu0 %v396_v46  ;;  %v394_v62 = vpack.c.bf16 %v381_v59, %v380_v58  ;;  %v378_v3 = vld [vmem:[%s1148_s8 + $0x20] sm:$0xff] }
 0x1c0   :  { %v481_v6 = vmul.f32 %v480_v63, %v477_v52  ;;  %v242_v9 = vsub.f32 1.0, %v240_v5  ;;  %v376_v5 = vld [vmem:[%s1148_s8 + $0x10] sm:$0xff] }
 0x1c1   :  { %v243_v11 = vsub.f32 1.0, %v241_v7  ;;  %v377_v7 = vld [vmem:[%s1148_s8 + $0x18] sm:$0xff] }
 0x1c2   :  { %v482_v10 = vadd.f32 1.4214138, %v481_v6  ;;  %v246_v13 = vsub.f32 0.0, %v242_v9  ;;  %v393_v6 = vpack.c.bf16 %v379_v4, %v378_v3  ;;  %v392_v12 = vpack.c.bf16 %v377_v7, %v376_v5 }
 0x1c3   :  { %v247_v16 = vsub.f32 0.0, %v243_v11 }
 0x1c4   :  { %v483_v15 = vmul.f32 %v482_v10, %v477_v52  ;;  %v248_v8 = vsel %vm244_vm0, %v242_v9, %v246_v13 }
 0x1c5   :  { %v250_v18 = vadd.f32 1.0, %v248_v8  ;;  %v249_v44 = vsel %vm245_vm1, %v243_v11, %v247_v16  ;;  %v375_v16 = vld [vmem:[%s1148_s8 + $0x8] sm:$0xff] }
 0x1c6   :  { %v484_v17 = vadd.f32 -0.28449672, %v483_v15  ;;  %v251_v20 = vadd.f32 1.0, %v249_v44  ;;  %v374_v15 = vld [vmem:[%s1148_s8] sm:$0xff] }
 0x1c7   :  { %v252_v22 = vmul.f32 %v250_v18, %v174_v14 }
 0x1c8   :  { %v485_v21 = vmul.f32 %v484_v17, %v477_v52  ;;  %v253_v23 = vmul.f32 %v251_v20, %v175_v19  ;;  %v391_v19 = vpack.c.bf16 %v375_v16, %v374_v15 }
 0x1c9   :  { %v286_v25 = vpack.c.bf16 %v252_v22, %v252_v22 }
 0x1ca   :  { %v486_v24 = vadd.f32 0.2548296, %v485_v21  ;;  %v287_v60 = vpack.c.bf16 %v253_v23, %v253_v23 }
 0x1cb   :  { %316 = vmatmul.bf16.vlgmr.msra.gmra.mxu2 %v286_v25 }
 0x1cc   :  { %v487_v26 = vmul.f32 %v486_v24, %v477_v52  ;;  %329 = vmatmul.bf16.vlgmr.msra.gmra.mxu3 %v287_v60  ;;  %v383_v52 = vld [vmem:[%s1148_s8 + $0x48] sm:$0xff] }
 0x1cd   :  { %v395_v53 = vpack.c.bf16 %v383_v52, %v382_v51 }
 0x1ce   :  { %v492_v61 = vmul.f32 %v597_v27, %v487_v26 }
 0x1cf   :  { %406 = vmatpush.bf16.msrb.mxu0 %v395_v53 }
 0x1d0   :  { %v493_v1 = vsub.f32 1.0, %v492_v61 }
 0x1d2   :  { %v495_v56 = vsub.f32 0.0, %v493_v1 }
 0x1d3   :  { %407 = vmatpush.bf16.msrb.mxu0 %v394_v62 }
 0x1d4   :  { %v496_v29 = vsel %vm494_vm2, %v493_v1, %v495_v56 }
 0x1d5   :  { %v497_v30 = vadd.f32 1.0, %v496_v29 }
 0x1d7   :  { %v498_v31 = vmul.f32 %v497_v30, %v459_v57  ;;  %408 = vmatpush.bf16.msrb.mxu0 %v393_v6 }
 0x1d9   :  { %v507_v33 = vpack.c.bf16 %v498_v31, %v498_v31 }
 0x1db   :  { %573 = vmatmul.msk.bf16.vlgmr.msrb.gmra.mxu2 %vm416_vm3, %v507_v33  ;;  %409 = vmatpush.bf16.msrb.mxu0 %v392_v12 }
 0x1df   :  { %410 = vmatpush.bf16.msrb.mxu0 %v391_v19 }
 0x24e   :  { %v317_v32 = vpop.f32.mrf.mxu2 }
 0x24f   :  { %v318_v36 = vadd.f32 %v579_v34, %v317_v32  ;;  %v330_v37 = vpop.f32.mrf.mxu3 }
 0x251   :  { %v1086_v28 = vadd.f32 %v330_v37, %v318_v36 }
 0x253   :  { %v1089_v42 = vmul.f32 0.70710677, %v1086_v28 }
 0x255   :  { %v336_v47 = vand.u32 2147483647, %v1089_v42  ;;  %vm369_vm13 = vcmp.ge.f32.partialorder %v1089_v42, 0.0 }
 0x256   :  { %v319_v48 = vpop.f32.mrf.mxu2 }
 0x257   :  { %v337_v49 = vmul.f32 0.3275911, %v336_v47  ;;  %v332_v50 = vpop.f32.mrf.mxu3  ;;  %v363_v25 = vsub.f32 0.0, %v336_v47 }
 0x258   :  { %v334_v50 = vmul.f32 0.5, %v1086_v28 }
 0x259   :  { %v338_v54 = vadd.f32 1.0, %v337_v49  ;;  %v364_v61 = vmul.f32 %v363_v25, %v336_v47 }
 0x25b   :  { %598 = vrcp.f32 %v338_v54  ;;  %v350_v14 = vand.u32 2147483648, %v338_v54  ;;  %v348_v18 = vand.u32 2147483647, %v338_v54  ;;  %vm344_vm5 = vweird.f32 %v338_v54 }
 0x25c   :  { %v365_v57 = vmul.f32 1.442695, %v364_v61 }
 0x25d   :  { %v351_v21 = vor.u32 1.1754944e-38, %v350_v14  ;;  %vm349_vm7 = vcmp.eq.f32.partialorder %v348_v18, 8.507059e+37 }
 0x25e   :  { %v528_v63 = vpop.f32.mrf.mxu2 }
 0x25f   :  { %v529_v0 = vadd.f32 %v580_v55, %v528_v63 }
 0x261   :  { %v599_v9 = vpop.eup %598  ;;  %v532_v10 = vsub.f32 0.0, %v529_v0 }
 0x262   :  { %v340_v11 = vmul.f32 %v599_v9, %v338_v54  ;;  %vm345_vm4 = vweird.f32 %v599_v9  ;;  %v581_v54 = vld [vmem:[%s1149_s9] ss:$0 sm:$0xff] }
 0x263   :  { %v533_v13 = vmul.f32 1.442695, %v532_v10  ;;  %vm346_vm6 = vmor %vm344_vm5, %vm345_vm4 }
 0x264   :  { %v341_v8 = vsub.f32 1.0, %v340_v11 }
 0x265   :  { %600 = vpow2.f32 %v533_v13 }
 0x266   :  { %v342_v17 = vmul.f32 %v599_v9, %v341_v8  ;;  %v530_v44 = vpop.f32.mrf.mxu2 }
 0x268   :  { %v343_v20 = vadd.f32 %v599_v9, %v342_v17 }
 0x26a   :  { %v347_v22 = vsel %vm346_vm6, %v599_v9, %v343_v20 }
 0x26b   :  { %v601_v23 = vpop.eup %600  ;;  %v352_v24 = vsel %vm349_vm7, %v351_v21, %v347_v22 }
 0x26c   :  { %v535_v60 = vadd.f32 1.0, %v601_v23  ;;  %v354_v26 = vmul.f32 1.0614054, %v352_v24 }
 0x26e   :  { %602 = vrcp.f32 %v535_v60  ;;  %v355_v27 = vadd.f32 -1.4531521, %v354_v26  ;;  %v547_v35 = vand.u32 2147483648, %v535_v60  ;;  %v545_v2 = vand.u32 2147483647, %v535_v60 }
 0x26f   :  { %604 = vpow2.f32 %v365_v57  ;;  %vm541_vm9 = vweird.f32 %v535_v60 }
 0x270   :  { %v356_v1 = vmul.f32 %v355_v27, %v352_v24  ;;  %v548_v38 = vor.u32 1.1754944e-38, %v547_v35  ;;  %vm546_vm12 = vcmp.eq.f32.partialorder %v545_v2, 8.507059e+37 }
 0x272   :  { %v357_v56 = vadd.f32 1.4214138, %v356_v1 }
 0x274   :  { %v603_v29 = vpop.eup %602  ;;  %v358_v31 = vmul.f32 %v357_v56, %v352_v24 }
 0x275   :  { %v537_v30 = vmul.f32 %v603_v29, %v535_v60  ;;  %vm542_vm8 = vweird.f32 %v603_v29  ;;  %v605_v43 = vpop.eup %604 }
 0x276   :  { %v359_v34 = vadd.f32 -0.28449672, %v358_v31  ;;  %vm543_vm10 = vmor %vm541_vm9, %vm542_vm8 }
 0x277   :  { %v538_v33 = vsub.f32 1.0, %v537_v30 }
 0x278   :  { %v360_v32 = vmul.f32 %v359_v34, %v352_v24 }
 0x279   :  { %v539_v39 = vmul.f32 %v603_v29, %v538_v33 }
 0x27a   :  { %v361_v37 = vadd.f32 0.2548296, %v360_v32 }
 0x27b   :  { %v540_v36 = vadd.f32 %v603_v29, %v539_v39 }
 0x27c   :  { %v362_v41 = vmul.f32 %v361_v37, %v352_v24 }
 0x27d   :  { %v544_v40 = vsel %vm543_vm10, %v603_v29, %v540_v36 }
 0x27e   :  { %v549_v45 = vsel %vm546_vm12, %v548_v38, %v544_v40  ;;  %v367_v46 = vmul.f32 %v605_v43, %v362_v41 }
 0x27f   :  { %552 = vst.msk [vmem:[%s1155_s15] sm:$0xff] %vm551_vm11, %v549_v45 }
 0x280   :  { %v368_v47 = vsub.f32 1.0, %v367_v46 }
 0x282   :  { %v370_v48 = vsub.f32 0.0, %v368_v47 }
 0x284   :  { %v371_v49 = vsel %vm369_vm13, %v368_v47, %v370_v48 }
 0x285   :  { %v372_v51 = vadd.f32 1.0, %v371_v49 }
 0x287   :  { %v373_v52 = vmul.f32 %v372_v51, %v334_v50 }
 0x289   :  { %v390_v53 = vpack.c.bf16 %v373_v52, %v373_v52 }
 0x28b   :  { %411 = vmatmul.bf16.vlgmr.msrb.gmra.mxu0 %v390_v53 }
 0x308   :  { %v412_v55 = vpop.f32.mrf.mxu0 }
 0x309   :  { %v413_v58 = vadd.f32 %v581_v54, %v412_v55 }
 0x30b   :  { %417 = vst.msk [vmem:[#allocation3] sm:$0xff] %vm416_vm3, %v413_v58 }
 0x30c   :  { %563 = dma.vmem_to_hbm [thread:$0]  %s559_s6, 128, %s561_s1, [#allocation4]  }
 0x310   :  { %v414_v28 = vpop.f32.mrf.mxu0 }
 0x311   :  { %630 = dma.done.wait [#allocation4], 128  }
 0x312   :  { %631 = vsyncadd [#allocation4], 4294967168 }
 0x313   :  { %572 = vsyncpa [#allocation4], 1 }

</bundles_post_ra>
